<compile_context>
chip_gen: v7x
topology: tpu7x:2x2x1
jax: 0.10.0
libtpu: 0.0.40
codegen_flags: <defaults>
</compile_context>

<pallas_src>
import math

import jax
import jax.numpy as jnp
from jax.experimental import pallas as pl
from jax.experimental.pallas import tpu as pltpu

# ---- VishwamaiConfig defaults (small-shape test uses B=2, S=8) ----
HIDDEN = 256
N_HEADS = 8
N_KV_HEADS = 4
HEAD_DIM = HIDDEN // N_HEADS           # 32
KV_DIM = N_KV_HEADS * HEAD_DIM         # 128
INTER = 512
N_EXPERTS = 4
N_ACTIVE = 2
EPS = 1e-5
ROPE_THETA = 10000.0
ROUTE_SCALE = 1.0


# --------------------------------------------------------------------------------------
# Fused block kernel (single invocation, whole arrays resident in VMEM)
# --------------------------------------------------------------------------------------
def _block_kernel(x_ref, w_in_ref, w_post_ref, w_mlp_ref,
                  wqkv_ref, wo_ref, rot_ref,
                  cosq_ref, sinq_ref, cosk_ref, sink_ref, mask_ref,
                  wgu_ref, wd_ref,
                  wgate_ref, we1_ref, be1_ref, we2_ref, be2_ref,
                  out_ref):
    f32 = jnp.float32
    bf16 = jnp.bfloat16
    x = x_ref[...]                                     # (T, H) f32, T = B*S

    def mm_bf(a, b):
        # bf16 MXU operands, f32 accumulation
        return jnp.dot(a.astype(bf16), b, preferred_element_type=f32)

    def rmsnorm(v, w):
        return v * jax.lax.rsqrt(jnp.mean(v * v, axis=-1, keepdims=True) + EPS) * w

    def silu(z):
        # TODO(synk): use pl.reciprocal(approx=True) here at production token counts.
        return z / (1.0 + jnp.exp(-z))

    # ---------------- attention (fused qkv, rope, GQA by column indexing) --------------
    hn = rmsnorm(x, w_in_ref[...])
    qkv = mm_bf(hn, wqkv_ref[...])                     # (T, H + 2*KV_DIM) f32
    q = qkv[:, :HIDDEN]
    k = qkv[:, HIDDEN:HIDDEN + KV_DIM]
    v = qkv[:, HIDDEN + KV_DIM:]

    # rope: precomputed cos/sin planes; pair swap via exact +/-1 matmul (f32 operands).
    rot_q = rot_ref[...].astype(f32)                   # (H, H)
    rot_k = rot_ref[:KV_DIM, :KV_DIM].astype(f32)      # (KV, KV), same block structure
    q = q * cosq_ref[...] + jnp.dot(q, rot_q, preferred_element_type=f32) * sinq_ref[...]
    k = k * cosk_ref[...] + jnp.dot(k, rot_k, preferred_element_type=f32) * sink_ref[...]

    neg = mask_ref[...]                                # (T, T) block-diagonal batch mask
    rep = N_HEADS // N_KV_HEADS
    heads = []
    for h in range(N_HEADS):
        qh = q[:, h * HEAD_DIM:(h + 1) * HEAD_DIM]
        kv = (h // rep) * HEAD_DIM                     # GQA: share kv columns, no repeat
        kh = k[:, kv:kv + HEAD_DIM]
        vh = v[:, kv:kv + HEAD_DIM]
        sc = jax.lax.dot_general(qh.astype(bf16), kh.astype(bf16),
                                 (((1,), (1,)), ((), ())),
                                 preferred_element_type=f32) + neg    # (T, T)
        sc = sc - jnp.max(sc, axis=-1, keepdims=True)
        p = jnp.exp(sc)
        p = p / jnp.sum(p, axis=-1, keepdims=True)
        heads.append(jnp.dot(p.astype(bf16), vh.astype(bf16),
                             preferred_element_type=f32))             # (T, HEAD_DIM)
    attn = jnp.concatenate(heads, axis=-1)             # (T, H): one o_proj matmul below
    x1 = x + mm_bf(attn, wo_ref[...])

    # ---------------- dense MLP (fused gate || up) ----------------
    hn = rmsnorm(x1, w_post_ref[...])
    gu = mm_bf(hn, wgu_ref[...])                       # (T, 2*INTER)
    act = silu(gu[:, :INTER]) * gu[:, INTER:]
    x2 = x1 + mm_bf(act, wd_ref[...])

    # ---------------- MoE: tie-robust top-2 routing + fused expert matmuls -------------
    hn = rmsnorm(x2, w_mlp_ref[...])
    logits = mm_bf(hn, wgate_ref[...])                 # (T, N_EXPERTS)
    # Softmax numerators only: the full-softmax denominator cancels in the top-2 renorm.
    pr = jnp.exp(logits - jnp.max(logits, axis=-1, keepdims=True))
    eidx = jax.lax.broadcasted_iota(jnp.int32, pr.shape, 1).astype(f32)
    m1 = jnp.max(pr, axis=-1, keepdims=True)
    i1 = jnp.min(jnp.where(pr == m1, eidx, float(N_EXPERTS)), axis=-1, keepdims=True)
    pr2 = jnp.where(eidx == i1, -1.0, pr)
    m2 = jnp.max(pr2, axis=-1, keepdims=True)
    i2 = jnp.min(jnp.where(pr2 == m2, eidx, float(N_EXPERTS)), axis=-1, keepdims=True)
    wsel = jnp.where((eidx == i1) | (eidx == i2), pr, 0.0)
    wsel = wsel * pl.reciprocal(jnp.sum(wsel, axis=-1, keepdims=True), approx=True)

    # all 4 experts' first layer in one (T, 4*INTER) matmul
    h1 = silu(mm_bf(hn, we1_ref[...]) + be1_ref[...])
    # scale each expert chunk by its routing weight, second layers fused into one matmul
    scaled = jnp.concatenate(
        [h1[:, j * INTER:(j + 1) * INTER] * wsel[:, j:j + 1] for j in range(N_EXPERTS)],
        axis=-1)                                       # (T, 4*INTER)
    moe = mm_bf(scaled, we2_ref[...])                  # (T, H)
    b2 = be2_ref[...]                                  # (N_EXPERTS, H) f32
    for j in range(N_EXPERTS):                         # + sum_j w_j * bias2_j  (VPU)
        moe = moe + wsel[:, j:j + 1] * b2[j:j + 1, :]

    # TODO(synk): at production token counts skip experts with zero routed weight
    # (pl.when / scalar-prefetch grouped layout) instead of dense top-2-of-4 compute.
    out_ref[...] = x2 + ROUTE_SCALE * moe


# --------------------------------------------------------------------------------------
# Wrapper: parameter layout glue + pallas_call
# --------------------------------------------------------------------------------------
@jax.jit
def vishwamai_block_forward(x, params):
    B, S, H = x.shape
    assert H == HIDDEN
    T = B * S
    bf16 = jnp.bfloat16
    f32 = jnp.float32

    # ---- weight layout prep (pure layout algebra; heavy weights -> bf16) ----
    wqkv = jnp.concatenate([params["wq"], params["wk"], params["wv"]], axis=1).astype(bf16)
    wo = params["wo"].astype(bf16)
    wgu = jnp.concatenate([params["wg"], params["wu"]], axis=1).astype(bf16)
    wd = params["wd"].astype(bf16)
    wgate = params["wgate"].astype(bf16)
    we1_all = jnp.concatenate([params["we1"][j] for j in range(N_EXPERTS)], axis=1).astype(bf16)
    we2_all = jnp.concatenate([params["we2"][j] for j in range(N_EXPERTS)], axis=0).astype(bf16)
    be1_all = params["be1"].reshape(1, N_EXPERTS * INTER).astype(f32)
    be2 = params["be2"].astype(f32)                            # (N_EXPERTS, H)

    # +/-1 pair-swap matrix (exact in bf16): (q @ R)[2i] = -q[2i+1], (q @ R)[2i+1] = q[2i]
    even = jnp.arange(0, H, 2)
    rot = (jnp.zeros((H, H), f32)
           .at[even + 1, even].set(-1.0)
           .at[even, even + 1].set(1.0)).astype(bf16)

    # rope cos/sin planes over the flattened (B*S) token axis; 1/sqrt(head_dim) folded
    # into the q planes so no per-head score scaling is needed in-kernel.
    pair = (jnp.arange(HEAD_DIM) // 2).astype(f32)             # 0,0,1,1,...,15,15
    inv_head = ROPE_THETA ** (-(2.0 * pair) / HEAD_DIM)        # (HEAD_DIM,)
    pos = (jnp.arange(T) % S).astype(f32)                      # token position in its seq
    ang_q = pos[:, None] * jnp.tile(inv_head, N_HEADS)[None, :]        # (T, H)
    ang_k = pos[:, None] * jnp.tile(inv_head, N_KV_HEADS)[None, :]     # (T, KV_DIM)
    inv_sqrt_d = 1.0 / math.sqrt(HEAD_DIM)
    cosq = jnp.cos(ang_q) * inv_sqrt_d
    sinq = jnp.sin(ang_q) * inv_sqrt_d
    cosk = jnp.cos(ang_k)
    sink = jnp.sin(ang_k)

    # block-diagonal additive mask keeping attention within each batch element
    bid = jnp.arange(T) // S
    attn_bias = jnp.where(bid[:, None] == bid[None, :], 0.0, -1e30).astype(f32)

    w_in = params["w_in"].reshape(1, H)
    w_post = params["w_post"].reshape(1, H)
    w_mlp = params["w_mlp"].reshape(1, H)

    inputs = (x.reshape(T, H), w_in, w_post, w_mlp,
              wqkv, wo, rot, cosq, sinq, cosk, sink, attn_bias,
              wgu, wd, wgate, we1_all, be1_all, we2_all, be2)

    # No grid: ~3.5 MiB of operands live whole in VMEM (fits v5e/v6e/v7x easily);
    # no pipelining -> no double-buffered resident weights.
    vmem = pl.BlockSpec(memory_space=pltpu.MemorySpace.VMEM)
    out = pl.pallas_call(
        _block_kernel,
        out_shape=jax.ShapeDtypeStruct((T, H), f32),
        in_specs=[vmem] * len(inputs),
        out_specs=vmem,
    )(*inputs)
    return out.reshape(B, S, H)


# --------------------------------------------------------------------------------------
# Pure-JAX reference (mirrors the PyTorch module; matmuls use bf16 operands with f32
# accumulation — the module's config.dtype='bf16' — matching the kernel's precision).
# --------------------------------------------------------------------------------------
def _reference_block(x, p):
    B, S, H = x.shape
    bf16 = jnp.bfloat16
    f32 = jnp.float32

    def mm(a, b):
        return jnp.dot(a.astype(bf16), b.astype(bf16), preferred_element_type=f32)

    def rmsnorm(v, w):
        return v * jax.lax.rsqrt(jnp.mean(v * v, axis=-1, keepdims=True) + EPS) * w

    def silu(z):
        return z / (1.0 + jnp.exp(-z))

    # ---- attention ----
    h = rmsnorm(x, p["w_in"])
    q = mm(h, p["wq"]).reshape(B, S, N_HEADS, HEAD_DIM)
    k = mm(h, p["wk"]).reshape(B, S, N_KV_HEADS, HEAD_DIM)
    v = mm(h, p["wv"]).reshape(B, S, N_KV_HEADS, HEAD_DIM)
    rep = N_HEADS // N_KV_HEADS
    k = jnp.repeat(k, rep, axis=2)
    v = jnp.repeat(v, rep, axis=2)

    inv = 1.0 / ROPE_THETA ** (jnp.arange(0, HEAD_DIM, 2, dtype=f32) / HEAD_DIM)
    fr = jnp.outer(jnp.arange(S, dtype=f32), inv)              # (S, HEAD_DIM//2)
    cos, sin = jnp.cos(fr), jnp.sin(fr)

    def rope(u):
        ur = u.reshape(B, S, -1, HEAD_DIM // 2, 2)
        ue, uo = ur[..., 0], ur[..., 1]
        c = cos[None, :, None, :]
        s = sin[None, :, None, :]
        return jnp.stack([ue * c - uo * s, ue * s + uo * c], axis=-1).reshape(u.shape)

    q = rope(q)
    k = rope(k)
    scores = jnp.einsum("bthd,bshd->bhts", q.astype(bf16), k.astype(bf16),
                        preferred_element_type=f32) / math.sqrt(HEAD_DIM)
    attw = jax.nn.softmax(scores, axis=-1)
    att = jnp.einsum("bhts,bshd->bthd", attw.astype(bf16), v.astype(bf16),
                     preferred_element_type=f32).reshape(B, S, H)
    x1 = x + mm(att, p["wo"])

    # ---- MLP ----
    h = rmsnorm(x1, p["w_post"])
    x2 = x1 + mm(silu(mm(h, p["wg"])) * mm(h, p["wu"]), p["wd"])

    # ---- MoE ----
    h = rmsnorm(x2, p["w_mlp"])
    rw = jax.nn.softmax(mm(h, p["wgate"]), axis=-1)
    topw, topi = jax.lax.top_k(rw, N_ACTIVE)
    topw = topw / jnp.sum(topw, axis=-1, keepdims=True)
    experts = [mm(silu(mm(h, p["we1"][j]) + p["be1"][j]), p["we2"][j]) + p["be2"][j]
               for j in range(N_EXPERTS)]
    moe = jnp.zeros_like(x2)
    for i in range(N_ACTIVE):
        wi = topw[..., i:i + 1]
        idx = topi[..., i]
        for j in range(N_EXPERTS):
            moe = moe + jnp.where((idx == j)[..., None], experts[j] * wi, 0.0)
    return x2 + ROUTE_SCALE * moe


# --------------------------------------------------------------------------------------
if __name__ == "__main__":
    key = jax.random.PRNGKey(0)
    B, S = 2, 8
    ks = jax.random.split(key, 16)
    sc = 0.05

    def nrm(k, shape, scale=sc):
        return scale * jax.random.normal(k, shape, jnp.float32)

    x = jax.random.normal(ks[0], (B, S, HIDDEN), jnp.float32)
    params = dict(
        w_in=1.0 + 0.1 * jax.random.normal(ks[1], (HIDDEN,), jnp.float32),
        w_post=1.0 + 0.1 * jax.random.normal(ks[2], (HIDDEN,), jnp.float32),
        w_mlp=1.0 + 0.1 * jax.random.normal(ks[3], (HIDDEN,), jnp.float32),
        wq=nrm(ks[4], (HIDDEN, HIDDEN)),
        wk=nrm(ks[5], (HIDDEN, KV_DIM)),
        wv=nrm(ks[6], (HIDDEN, KV_DIM)),
        wo=nrm(ks[7], (HIDDEN, HIDDEN)),
        wg=nrm(ks[8], (HIDDEN, INTER)),
        wu=nrm(ks[9], (HIDDEN, INTER)),
        wd=nrm(ks[10], (INTER, HIDDEN)),
        wgate=nrm(ks[11], (HIDDEN, N_EXPERTS), 0.1),
        we1=nrm(ks[12], (N_EXPERTS, HIDDEN, INTER)),
        be1=nrm(ks[13], (N_EXPERTS, INTER)),
        we2=nrm(ks[14], (N_EXPERTS, INTER, HIDDEN)),
        be2=nrm(ks[15], (N_EXPERTS, HIDDEN)),
    )

    out = jax.block_until_ready(vishwamai_block_forward(x, params))
    ref = jax.block_until_ready(_reference_block(x, params))

    assert out.shape == (B, S, HIDDEN) and out.dtype == jnp.float32
    err = float(jnp.max(jnp.abs(out - ref)))
    assert jnp.allclose(out, ref, rtol=2e-2, atol=2e-2), f"mismatch vs reference, max abs err={err}"
    print("KERNEL_OK")
</pallas_src>

<mosaic_0001>
module attributes {stable_mosaic.version = 11 : i64} {
  func.func @_block_kernel(%arg0: memref<16x256xf32, #tpu.memory_space<vmem>>, %arg1: memref<1x256xf32, #tpu.memory_space<vmem>>, %arg2: memref<1x256xf32, #tpu.memory_space<vmem>>, %arg3: memref<1x256xf32, #tpu.memory_space<vmem>>, %arg4: memref<256x512xbf16, #tpu.memory_space<vmem>>, %arg5: memref<256x256xbf16, #tpu.memory_space<vmem>>, %arg6: memref<256x256xbf16, #tpu.memory_space<vmem>>, %arg7: memref<16x256xf32, #tpu.memory_space<vmem>>, %arg8: memref<16x256xf32, #tpu.memory_space<vmem>>, %arg9: memref<16x128xf32, #tpu.memory_space<vmem>>, %arg10: memref<16x128xf32, #tpu.memory_space<vmem>>, %arg11: memref<16x16xf32, #tpu.memory_space<vmem>>, %arg12: memref<256x1024xbf16, #tpu.memory_space<vmem>>, %arg13: memref<512x256xbf16, #tpu.memory_space<vmem>>, %arg14: memref<256x4xbf16, #tpu.memory_space<vmem>>, %arg15: memref<256x2048xbf16, #tpu.memory_space<vmem>>, %arg16: memref<1x2048xf32, #tpu.memory_space<vmem>>, %arg17: memref<2048x256xbf16, #tpu.memory_space<vmem>>, %arg18: memref<4x256xf32, #tpu.memory_space<vmem>>, %arg19: memref<16x256xf32, #tpu.memory_space<vmem>>) attributes {dimension_semantics = [], scalar_prefetch = 0 : i64, scratch_operands = 0 : i64, tpu.core_type = #tpu.core_type<tc>} {
    %c0 = arith.constant 0 : index
    %c0_0 = arith.constant 0 : index
    %0 = vector.load %arg0[%c0, %c0_0] : memref<16x256xf32, #tpu.memory_space<vmem>>, vector<16x256xf32>
    %c0_1 = arith.constant 0 : index
    %c0_2 = arith.constant 0 : index
    %1 = vector.load %arg1[%c0_1, %c0_2] : memref<1x256xf32, #tpu.memory_space<vmem>>, vector<1x256xf32>
    %2 = arith.mulf %0, %0 : vector<16x256xf32>
    %cst = arith.constant dense<0.000000e+00> : vector<16xf32>
    %3 = vector.multi_reduction <add>, %2, %cst [1] : vector<16x256xf32> to vector<16xf32>
    %4 = vector.shape_cast %3 : vector<16xf32> to vector<16x1xf32>
    %cst_3 = arith.constant 2.560000e+02 : f32
    %5 = vector.broadcast %cst_3 : f32 to vector<16x1xf32>
    %6 = arith.divf %4, %5 : vector<16x1xf32>
    %cst_4 = arith.constant 9.99999974E-6 : f32
    %7 = vector.broadcast %cst_4 : f32 to vector<16x1xf32>
    %8 = arith.addf %6, %7 : vector<16x1xf32>
    %9 = math.rsqrt %8 : vector<16x1xf32>
    %10 = vector.broadcast %9 : vector<16x1xf32> to vector<16x256xf32>
    %11 = arith.mulf %0, %10 : vector<16x256xf32>
    %12 = vector.broadcast %1 : vector<1x256xf32> to vector<16x256xf32>
    %13 = arith.mulf %11, %12 : vector<16x256xf32>
    %c0_5 = arith.constant 0 : index
    %c0_6 = arith.constant 0 : index
    %14 = vector.load %arg4[%c0_5, %c0_6] : memref<256x512xbf16, #tpu.memory_space<vmem>>, vector<256x512xbf16>
    %15 = arith.truncf %13 : vector<16x256xf32> to vector<16x256xbf16>
    %cst_7 = arith.constant dense<0.000000e+00> : vector<16x512xf32>
    %16 = tpu.matmul %15, %14, %cst_7 {dimension_numbers = #tpu.dot_dimension_numbers<[1], [0], [0], [1], [0, 0, 1, 1], [], []>} : vector<16x256xbf16>, vector<256x512xbf16>, vector<16x512xf32> -> vector<16x512xf32>
    %17 = vector.extract_strided_slice %16 {offsets = [0, 0], sizes = [16, 256], strides = [1, 1]} : vector<16x512xf32> to vector<16x256xf32>
    %18 = vector.extract_strided_slice %16 {offsets = [0, 256], sizes = [16, 128], strides = [1, 1]} : vector<16x512xf32> to vector<16x128xf32>
    %19 = vector.extract_strided_slice %16 {offsets = [0, 384], sizes = [16, 128], strides = [1, 1]} : vector<16x512xf32> to vector<16x128xf32>
    %c0_8 = arith.constant 0 : index
    %c0_9 = arith.constant 0 : index
    %20 = vector.load %arg6[%c0_8, %c0_9] : memref<256x256xbf16, #tpu.memory_space<vmem>>, vector<256x256xbf16>
    %21 = arith.extf %20 : vector<256x256xbf16> to vector<256x256xf32>
    %c0_10 = arith.constant 0 : index
    %c0_11 = arith.constant 0 : index
    %22 = vector.load %arg6[%c0_10, %c0_11] : memref<256x256xbf16, #tpu.memory_space<vmem>>, vector<128x128xbf16>
    %23 = arith.extf %22 : vector<128x128xbf16> to vector<128x128xf32>
    %c0_12 = arith.constant 0 : index
    %c0_13 = arith.constant 0 : index
    %24 = vector.load %arg7[%c0_12, %c0_13] : memref<16x256xf32, #tpu.memory_space<vmem>>, vector<16x256xf32>
    %25 = arith.mulf %17, %24 : vector<16x256xf32>
    %cst_14 = arith.constant dense<0.000000e+00> : vector<16x256xf32>
    %26 = tpu.matmul %17, %21, %cst_14 {dimension_numbers = #tpu.dot_dimension_numbers<[1], [0], [0], [1], [0, 0, 1, 1], [], []>} : vector<16x256xf32>, vector<256x256xf32>, vector<16x256xf32> -> vector<16x256xf32>
    %c0_15 = arith.constant 0 : index
    %c0_16 = arith.constant 0 : index
    %27 = vector.load %arg8[%c0_15, %c0_16] : memref<16x256xf32, #tpu.memory_space<vmem>>, vector<16x256xf32>
    %28 = arith.mulf %26, %27 : vector<16x256xf32>
    %29 = arith.addf %25, %28 : vector<16x256xf32>
    %c0_17 = arith.constant 0 : index
    %c0_18 = arith.constant 0 : index
    %30 = vector.load %arg9[%c0_17, %c0_18] : memref<16x128xf32, #tpu.memory_space<vmem>>, vector<16x128xf32>
    %31 = arith.mulf %18, %30 : vector<16x128xf32>
    %cst_19 = arith.constant dense<0.000000e+00> : vector<16x128xf32>
    %32 = tpu.matmul %18, %23, %cst_19 {dimension_numbers = #tpu.dot_dimension_numbers<[1], [0], [0], [1], [0, 0, 1, 1], [], []>} : vector<16x128xf32>, vector<128x128xf32>, vector<16x128xf32> -> vector<16x128xf32>
    %c0_20 = arith.constant 0 : index
    %c0_21 = arith.constant 0 : index
    %33 = vector.load %arg10[%c0_20, %c0_21] : memref<16x128xf32, #tpu.memory_space<vmem>>, vector<16x128xf32>
    %34 = arith.mulf %32, %33 : vector<16x128xf32>
    %35 = arith.addf %31, %34 : vector<16x128xf32>
    %c0_22 = arith.constant 0 : index
    %c0_23 = arith.constant 0 : index
    %36 = vector.load %arg11[%c0_22, %c0_23] : memref<16x16xf32, #tpu.memory_space<vmem>>, vector<16x16xf32>
    %37 = vector.extract_strided_slice %29 {offsets = [0, 0], sizes = [16, 32], strides = [1, 1]} : vector<16x256xf32> to vector<16x32xf32>
    %38 = vector.extract_strided_slice %35 {offsets = [0, 0], sizes = [16, 32], strides = [1, 1]} : vector<16x128xf32> to vector<16x32xf32>
    %39 = vector.extract_strided_slice %19 {offsets = [0, 0], sizes = [16, 32], strides = [1, 1]} : vector<16x128xf32> to vector<16x32xf32>
    %40 = arith.truncf %37 : vector<16x32xf32> to vector<16x32xbf16>
    %41 = arith.truncf %38 : vector<16x32xf32> to vector<16x32xbf16>
    %cst_24 = arith.constant dense<0.000000e+00> : vector<16x16xf32>
    %42 = tpu.matmul %40, %41, %cst_24 {dimension_numbers = #tpu.dot_dimension_numbers<[1], [1], [0], [0], [0, 0, 1, 0], [], []>} : vector<16x32xbf16>, vector<16x32xbf16>, vector<16x16xf32> -> vector<16x16xf32>
    %43 = arith.addf %42, %36 : vector<16x16xf32>
    %cst_25 = arith.constant dense<0xFF800000> : vector<16xf32>
    %44 = vector.multi_reduction <maximumf>, %43, %cst_25 [1] : vector<16x16xf32> to vector<16xf32>
    %45 = vector.shape_cast %44 : vector<16xf32> to vector<16x1xf32>
    %46 = vector.broadcast %45 : vector<16x1xf32> to vector<16x16xf32>
    %47 = arith.subf %43, %46 : vector<16x16xf32>
    %48 = math.exp %47 : vector<16x16xf32>
    %cst_26 = arith.constant dense<0.000000e+00> : vector<16xf32>
    %49 = vector.multi_reduction <add>, %48, %cst_26 [1] : vector<16x16xf32> to vector<16xf32>
    %50 = vector.shape_cast %49 : vector<16xf32> to vector<16x1xf32>
    %51 = vector.broadcast %50 : vector<16x1xf32> to vector<16x16xf32>
    %52 = arith.divf %48, %51 : vector<16x16xf32>
    %53 = arith.truncf %52 : vector<16x16xf32> to vector<16x16xbf16>
    %54 = arith.truncf %39 : vector<16x32xf32> to vector<16x32xbf16>
    %cst_27 = arith.constant dense<0.000000e+00> : vector<16x32xf32>
    %55 = tpu.matmul %53, %54, %cst_27 {dimension_numbers = #tpu.dot_dimension_numbers<[1], [0], [0], [1], [0, 0, 1, 1], [], []>} : vector<16x16xbf16>, vector<16x32xbf16>, vector<16x32xf32> -> vector<16x32xf32>
    %56 = vector.extract_strided_slice %29 {offsets = [0, 32], sizes = [16, 32], strides = [1, 1]} : vector<16x256xf32> to vector<16x32xf32>
    %57 = vector.extract_strided_slice %35 {offsets = [0, 0], sizes = [16, 32], strides = [1, 1]} : vector<16x128xf32> to vector<16x32xf32>
    %58 = vector.extract_strided_slice %19 {offsets = [0, 0], sizes = [16, 32], strides = [1, 1]} : vector<16x128xf32> to vector<16x32xf32>
    %59 = arith.truncf %56 : vector<16x32xf32> to vector<16x32xbf16>
    %60 = arith.truncf %57 : vector<16x32xf32> to vector<16x32xbf16>
    %cst_28 = arith.constant dense<0.000000e+00> : vector<16x16xf32>
    %61 = tpu.matmul %59, %60, %cst_28 {dimension_numbers = #tpu.dot_dimension_numbers<[1], [1], [0], [0], [0, 0, 1, 0], [], []>} : vector<16x32xbf16>, vector<16x32xbf16>, vector<16x16xf32> -> vector<16x16xf32>
    %62 = arith.addf %61, %36 : vector<16x16xf32>
    %cst_29 = arith.constant dense<0xFF800000> : vector<16xf32>
    %63 = vector.multi_reduction <maximumf>, %62, %cst_29 [1] : vector<16x16xf32> to vector<16xf32>
    %64 = vector.shape_cast %63 : vector<16xf32> to vector<16x1xf32>
    %65 = vector.broadcast %64 : vector<16x1xf32> to vector<16x16xf32>
    %66 = arith.subf %62, %65 : vector<16x16xf32>
    %67 = math.exp %66 : vector<16x16xf32>
    %cst_30 = arith.constant dense<0.000000e+00> : vector<16xf32>
    %68 = vector.multi_reduction <add>, %67, %cst_30 [1] : vector<16x16xf32> to vector<16xf32>
    %69 = vector.shape_cast %68 : vector<16xf32> to vector<16x1xf32>
    %70 = vector.broadcast %69 : vector<16x1xf32> to vector<16x16xf32>
    %71 = arith.divf %67, %70 : vector<16x16xf32>
    %72 = arith.truncf %71 : vector<16x16xf32> to vector<16x16xbf16>
    %73 = arith.truncf %58 : vector<16x32xf32> to vector<16x32xbf16>
    %cst_31 = arith.constant dense<0.000000e+00> : vector<16x32xf32>
    %74 = tpu.matmul %72, %73, %cst_31 {dimension_numbers = #tpu.dot_dimension_numbers<[1], [0], [0], [1], [0, 0, 1, 1], [], []>} : vector<16x16xbf16>, vector<16x32xbf16>, vector<16x32xf32> -> vector<16x32xf32>
    %75 = vector.extract_strided_slice %29 {offsets = [0, 64], sizes = [16, 32], strides = [1, 1]} : vector<16x256xf32> to vector<16x32xf32>
    %76 = vector.extract_strided_slice %35 {offsets = [0, 32], sizes = [16, 32], strides = [1, 1]} : vector<16x128xf32> to vector<16x32xf32>
    %77 = vector.extract_strided_slice %19 {offsets = [0, 32], sizes = [16, 32], strides = [1, 1]} : vector<16x128xf32> to vector<16x32xf32>
    %78 = arith.truncf %75 : vector<16x32xf32> to vector<16x32xbf16>
    %79 = arith.truncf %76 : vector<16x32xf32> to vector<16x32xbf16>
    %cst_32 = arith.constant dense<0.000000e+00> : vector<16x16xf32>
    %80 = tpu.matmul %78, %79, %cst_32 {dimension_numbers = #tpu.dot_dimension_numbers<[1], [1], [0], [0], [0, 0, 1, 0], [], []>} : vector<16x32xbf16>, vector<16x32xbf16>, vector<16x16xf32> -> vector<16x16xf32>
    %81 = arith.addf %80, %36 : vector<16x16xf32>
    %cst_33 = arith.constant dense<0xFF800000> : vector<16xf32>
    %82 = vector.multi_reduction <maximumf>, %81, %cst_33 [1] : vector<16x16xf32> to vector<16xf32>
    %83 = vector.shape_cast %82 : vector<16xf32> to vector<16x1xf32>
    %84 = vector.broadcast %83 : vector<16x1xf32> to vector<16x16xf32>
    %85 = arith.subf %81, %84 : vector<16x16xf32>
    %86 = math.exp %85 : vector<16x16xf32>
    %cst_34 = arith.constant dense<0.000000e+00> : vector<16xf32>
    %87 = vector.multi_reduction <add>, %86, %cst_34 [1] : vector<16x16xf32> to vector<16xf32>
    %88 = vector.shape_cast %87 : vector<16xf32> to vector<16x1xf32>
    %89 = vector.broadcast %88 : vector<16x1xf32> to vector<16x16xf32>
    %90 = arith.divf %86, %89 : vector<16x16xf32>
    %91 = arith.truncf %90 : vector<16x16xf32> to vector<16x16xbf16>
    %92 = arith.truncf %77 : vector<16x32xf32> to vector<16x32xbf16>
    %cst_35 = arith.constant dense<0.000000e+00> : vector<16x32xf32>
    %93 = tpu.matmul %91, %92, %cst_35 {dimension_numbers = #tpu.dot_dimension_numbers<[1], [0], [0], [1], [0, 0, 1, 1], [], []>} : vector<16x16xbf16>, vector<16x32xbf16>, vector<16x32xf32> -> vector<16x32xf32>
    %94 = vector.extract_strided_slice %29 {offsets = [0, 96], sizes = [16, 32], strides = [1, 1]} : vector<16x256xf32> to vector<16x32xf32>
    %95 = vector.extract_strided_slice %35 {offsets = [0, 32], sizes = [16, 32], strides = [1, 1]} : vector<16x128xf32> to vector<16x32xf32>
    %96 = vector.extract_strided_slice %19 {offsets = [0, 32], sizes = [16, 32], strides = [1, 1]} : vector<16x128xf32> to vector<16x32xf32>
    %97 = arith.truncf %94 : vector<16x32xf32> to vector<16x32xbf16>
    %98 = arith.truncf %95 : vector<16x32xf32> to vector<16x32xbf16>
    %cst_36 = arith.constant dense<0.000000e+00> : vector<16x16xf32>
    %99 = tpu.matmul %97, %98, %cst_36 {dimension_numbers = #tpu.dot_dimension_numbers<[1], [1], [0], [0], [0, 0, 1, 0], [], []>} : vector<16x32xbf16>, vector<16x32xbf16>, vector<16x16xf32> -> vector<16x16xf32>
    %100 = arith.addf %99, %36 : vector<16x16xf32>
    %cst_37 = arith.constant dense<0xFF800000> : vector<16xf32>
    %101 = vector.multi_reduction <maximumf>, %100, %cst_37 [1] : vector<16x16xf32> to vector<16xf32>
    %102 = vector.shape_cast %101 : vector<16xf32> to vector<16x1xf32>
    %103 = vector.broadcast %102 : vector<16x1xf32> to vector<16x16xf32>
    %104 = arith.subf %100, %103 : vector<16x16xf32>
    %105 = math.exp %104 : vector<16x16xf32>
    %cst_38 = arith.constant dense<0.000000e+00> : vector<16xf32>
    %106 = vector.multi_reduction <add>, %105, %cst_38 [1] : vector<16x16xf32> to vector<16xf32>
    %107 = vector.shape_cast %106 : vector<16xf32> to vector<16x1xf32>
    %108 = vector.broadcast %107 : vector<16x1xf32> to vector<16x16xf32>
    %109 = arith.divf %105, %108 : vector<16x16xf32>
    %110 = arith.truncf %109 : vector<16x16xf32> to vector<16x16xbf16>
    %111 = arith.truncf %96 : vector<16x32xf32> to vector<16x32xbf16>
    %cst_39 = arith.constant dense<0.000000e+00> : vector<16x32xf32>
    %112 = tpu.matmul %110, %111, %cst_39 {dimension_numbers = #tpu.dot_dimension_numbers<[1], [0], [0], [1], [0, 0, 1, 1], [], []>} : vector<16x16xbf16>, vector<16x32xbf16>, vector<16x32xf32> -> vector<16x32xf32>
    %113 = vector.extract_strided_slice %29 {offsets = [0, 128], sizes = [16, 32], strides = [1, 1]} : vector<16x256xf32> to vector<16x32xf32>
    %114 = vector.extract_strided_slice %35 {offsets = [0, 64], sizes = [16, 32], strides = [1, 1]} : vector<16x128xf32> to vector<16x32xf32>
    %115 = vector.extract_strided_slice %19 {offsets = [0, 64], sizes = [16, 32], strides = [1, 1]} : vector<16x128xf32> to vector<16x32xf32>
    %116 = arith.truncf %113 : vector<16x32xf32> to vector<16x32xbf16>
    %117 = arith.truncf %114 : vector<16x32xf32> to vector<16x32xbf16>
    %cst_40 = arith.constant dense<0.000000e+00> : vector<16x16xf32>
    %118 = tpu.matmul %116, %117, %cst_40 {dimension_numbers = #tpu.dot_dimension_numbers<[1], [1], [0], [0], [0, 0, 1, 0], [], []>} : vector<16x32xbf16>, vector<16x32xbf16>, vector<16x16xf32> -> vector<16x16xf32>
    %119 = arith.addf %118, %36 : vector<16x16xf32>
    %cst_41 = arith.constant dense<0xFF800000> : vector<16xf32>
    %120 = vector.multi_reduction <maximumf>, %119, %cst_41 [1] : vector<16x16xf32> to vector<16xf32>
    %121 = vector.shape_cast %120 : vector<16xf32> to vector<16x1xf32>
    %122 = vector.broadcast %121 : vector<16x1xf32> to vector<16x16xf32>
    %123 = arith.subf %119, %122 : vector<16x16xf32>
    %124 = math.exp %123 : vector<16x16xf32>
    %cst_42 = arith.constant dense<0.000000e+00> : vector<16xf32>
    %125 = vector.multi_reduction <add>, %124, %cst_42 [1] : vector<16x16xf32> to vector<16xf32>
    %126 = vector.shape_cast %125 : vector<16xf32> to vector<16x1xf32>
    %127 = vector.broadcast %126 : vector<16x1xf32> to vector<16x16xf32>
    %128 = arith.divf %124, %127 : vector<16x16xf32>
    %129 = arith.truncf %128 : vector<16x16xf32> to vector<16x16xbf16>
    %130 = arith.truncf %115 : vector<16x32xf32> to vector<16x32xbf16>
    %cst_43 = arith.constant dense<0.000000e+00> : vector<16x32xf32>
    %131 = tpu.matmul %129, %130, %cst_43 {dimension_numbers = #tpu.dot_dimension_numbers<[1], [0], [0], [1], [0, 0, 1, 1], [], []>} : vector<16x16xbf16>, vector<16x32xbf16>, vector<16x32xf32> -> vector<16x32xf32>
    %132 = vector.extract_strided_slice %29 {offsets = [0, 160], sizes = [16, 32], strides = [1, 1]} : vector<16x256xf32> to vector<16x32xf32>
    %133 = vector.extract_strided_slice %35 {offsets = [0, 64], sizes = [16, 32], strides = [1, 1]} : vector<16x128xf32> to vector<16x32xf32>
    %134 = vector.extract_strided_slice %19 {offsets = [0, 64], sizes = [16, 32], strides = [1, 1]} : vector<16x128xf32> to vector<16x32xf32>
    %135 = arith.truncf %132 : vector<16x32xf32> to vector<16x32xbf16>
    %136 = arith.truncf %133 : vector<16x32xf32> to vector<16x32xbf16>
    %cst_44 = arith.constant dense<0.000000e+00> : vector<16x16xf32>
    %137 = tpu.matmul %135, %136, %cst_44 {dimension_numbers = #tpu.dot_dimension_numbers<[1], [1], [0], [0], [0, 0, 1, 0], [], []>} : vector<16x32xbf16>, vector<16x32xbf16>, vector<16x16xf32> -> vector<16x16xf32>
    %138 = arith.addf %137, %36 : vector<16x16xf32>
    %cst_45 = arith.constant dense<0xFF800000> : vector<16xf32>
    %139 = vector.multi_reduction <maximumf>, %138, %cst_45 [1] : vector<16x16xf32> to vector<16xf32>
    %140 = vector.shape_cast %139 : vector<16xf32> to vector<16x1xf32>
    %141 = vector.broadcast %140 : vector<16x1xf32> to vector<16x16xf32>
    %142 = arith.subf %138, %141 : vector<16x16xf32>
    %143 = math.exp %142 : vector<16x16xf32>
    %cst_46 = arith.constant dense<0.000000e+00> : vector<16xf32>
    %144 = vector.multi_reduction <add>, %143, %cst_46 [1] : vector<16x16xf32> to vector<16xf32>
    %145 = vector.shape_cast %144 : vector<16xf32> to vector<16x1xf32>
    %146 = vector.broadcast %145 : vector<16x1xf32> to vector<16x16xf32>
    %147 = arith.divf %143, %146 : vector<16x16xf32>
    %148 = arith.truncf %147 : vector<16x16xf32> to vector<16x16xbf16>
    %149 = arith.truncf %134 : vector<16x32xf32> to vector<16x32xbf16>
    %cst_47 = arith.constant dense<0.000000e+00> : vector<16x32xf32>
    %150 = tpu.matmul %148, %149, %cst_47 {dimension_numbers = #tpu.dot_dimension_numbers<[1], [0], [0], [1], [0, 0, 1, 1], [], []>} : vector<16x16xbf16>, vector<16x32xbf16>, vector<16x32xf32> -> vector<16x32xf32>
    %151 = vector.extract_strided_slice %29 {offsets = [0, 192], sizes = [16, 32], strides = [1, 1]} : vector<16x256xf32> to vector<16x32xf32>
    %152 = vector.extract_strided_slice %35 {offsets = [0, 96], sizes = [16, 32], strides = [1, 1]} : vector<16x128xf32> to vector<16x32xf32>
    %153 = vector.extract_strided_slice %19 {offsets = [0, 96], sizes = [16, 32], strides = [1, 1]} : vector<16x128xf32> to vector<16x32xf32>
    %154 = arith.truncf %151 : vector<16x32xf32> to vector<16x32xbf16>
    %155 = arith.truncf %152 : vector<16x32xf32> to vector<16x32xbf16>
    %cst_48 = arith.constant dense<0.000000e+00> : vector<16x16xf32>
    %156 = tpu.matmul %154, %155, %cst_48 {dimension_numbers = #tpu.dot_dimension_numbers<[1], [1], [0], [0], [0, 0, 1, 0], [], []>} : vector<16x32xbf16>, vector<16x32xbf16>, vector<16x16xf32> -> vector<16x16xf32>
    %157 = arith.addf %156, %36 : vector<16x16xf32>
    %cst_49 = arith.constant dense<0xFF800000> : vector<16xf32>
    %158 = vector.multi_reduction <maximumf>, %157, %cst_49 [1] : vector<16x16xf32> to vector<16xf32>
    %159 = vector.shape_cast %158 : vector<16xf32> to vector<16x1xf32>
    %160 = vector.broadcast %159 : vector<16x1xf32> to vector<16x16xf32>
    %161 = arith.subf %157, %160 : vector<16x16xf32>
    %162 = math.exp %161 : vector<16x16xf32>
    %cst_50 = arith.constant dense<0.000000e+00> : vector<16xf32>
    %163 = vector.multi_reduction <add>, %162, %cst_50 [1] : vector<16x16xf32> to vector<16xf32>
    %164 = vector.shape_cast %163 : vector<16xf32> to vector<16x1xf32>
    %165 = vector.broadcast %164 : vector<16x1xf32> to vector<16x16xf32>
    %166 = arith.divf %162, %165 : vector<16x16xf32>
    %167 = arith.truncf %166 : vector<16x16xf32> to vector<16x16xbf16>
    %168 = arith.truncf %153 : vector<16x32xf32> to vector<16x32xbf16>
    %cst_51 = arith.constant dense<0.000000e+00> : vector<16x32xf32>
    %169 = tpu.matmul %167, %168, %cst_51 {dimension_numbers = #tpu.dot_dimension_numbers<[1], [0], [0], [1], [0, 0, 1, 1], [], []>} : vector<16x16xbf16>, vector<16x32xbf16>, vector<16x32xf32> -> vector<16x32xf32>
    %170 = vector.extract_strided_slice %29 {offsets = [0, 224], sizes = [16, 32], strides = [1, 1]} : vector<16x256xf32> to vector<16x32xf32>
    %171 = vector.extract_strided_slice %35 {offsets = [0, 96], sizes = [16, 32], strides = [1, 1]} : vector<16x128xf32> to vector<16x32xf32>
    %172 = vector.extract_strided_slice %19 {offsets = [0, 96], sizes = [16, 32], strides = [1, 1]} : vector<16x128xf32> to vector<16x32xf32>
    %173 = arith.truncf %170 : vector<16x32xf32> to vector<16x32xbf16>
    %174 = arith.truncf %171 : vector<16x32xf32> to vector<16x32xbf16>
    %cst_52 = arith.constant dense<0.000000e+00> : vector<16x16xf32>
    %175 = tpu.matmul %173, %174, %cst_52 {dimension_numbers = #tpu.dot_dimension_numbers<[1], [1], [0], [0], [0, 0, 1, 0], [], []>} : vector<16x32xbf16>, vector<16x32xbf16>, vector<16x16xf32> -> vector<16x16xf32>
    %176 = arith.addf %175, %36 : vector<16x16xf32>
    %cst_53 = arith.constant dense<0xFF800000> : vector<16xf32>
    %177 = vector.multi_reduction <maximumf>, %176, %cst_53 [1] : vector<16x16xf32> to vector<16xf32>
    %178 = vector.shape_cast %177 : vector<16xf32> to vector<16x1xf32>
    %179 = vector.broadcast %178 : vector<16x1xf32> to vector<16x16xf32>
    %180 = arith.subf %176, %179 : vector<16x16xf32>
    %181 = math.exp %180 : vector<16x16xf32>
    %cst_54 = arith.constant dense<0.000000e+00> : vector<16xf32>
    %182 = vector.multi_reduction <add>, %181, %cst_54 [1] : vector<16x16xf32> to vector<16xf32>
    %183 = vector.shape_cast %182 : vector<16xf32> to vector<16x1xf32>
    %184 = vector.broadcast %183 : vector<16x1xf32> to vector<16x16xf32>
    %185 = arith.divf %181, %184 : vector<16x16xf32>
    %186 = arith.truncf %185 : vector<16x16xf32> to vector<16x16xbf16>
    %187 = arith.truncf %172 : vector<16x32xf32> to vector<16x32xbf16>
    %cst_55 = arith.constant dense<0.000000e+00> : vector<16x32xf32>
    %188 = tpu.matmul %186, %187, %cst_55 {dimension_numbers = #tpu.dot_dimension_numbers<[1], [0], [0], [1], [0, 0, 1, 1], [], []>} : vector<16x16xbf16>, vector<16x32xbf16>, vector<16x32xf32> -> vector<16x32xf32>
    %189 = tpu.concatenate %55, %74, %93, %112, %131, %150, %169, %188 in 1 : vector<16x32xf32>, vector<16x32xf32>, vector<16x32xf32>, vector<16x32xf32>, vector<16x32xf32>, vector<16x32xf32>, vector<16x32xf32>, vector<16x32xf32> -> vector<16x256xf32>
    %c0_56 = arith.constant 0 : index
    %c0_57 = arith.constant 0 : index
    %190 = vector.load %arg5[%c0_56, %c0_57] : memref<256x256xbf16, #tpu.memory_space<vmem>>, vector<256x256xbf16>
    %191 = arith.truncf %189 : vector<16x256xf32> to vector<16x256xbf16>
    %cst_58 = arith.constant dense<0.000000e+00> : vector<16x256xf32>
    %192 = tpu.matmul %191, %190, %cst_58 {dimension_numbers = #tpu.dot_dimension_numbers<[1], [0], [0], [1], [0, 0, 1, 1], [], []>} : vector<16x256xbf16>, vector<256x256xbf16>, vector<16x256xf32> -> vector<16x256xf32>
    %193 = arith.addf %0, %192 : vector<16x256xf32>
    %c0_59 = arith.constant 0 : index
    %c0_60 = arith.constant 0 : index
    %194 = vector.load %arg2[%c0_59, %c0_60] : memref<1x256xf32, #tpu.memory_space<vmem>>, vector<1x256xf32>
    %195 = arith.mulf %193, %193 : vector<16x256xf32>
    %cst_61 = arith.constant dense<0.000000e+00> : vector<16xf32>
    %196 = vector.multi_reduction <add>, %195, %cst_61 [1] : vector<16x256xf32> to vector<16xf32>
    %197 = vector.shape_cast %196 : vector<16xf32> to vector<16x1xf32>
    %cst_62 = arith.constant 2.560000e+02 : f32
    %198 = vector.broadcast %cst_62 : f32 to vector<16x1xf32>
    %199 = arith.divf %197, %198 : vector<16x1xf32>
    %cst_63 = arith.constant 9.99999974E-6 : f32
    %200 = vector.broadcast %cst_63 : f32 to vector<16x1xf32>
    %201 = arith.addf %199, %200 : vector<16x1xf32>
    %202 = math.rsqrt %201 : vector<16x1xf32>
    %203 = vector.broadcast %202 : vector<16x1xf32> to vector<16x256xf32>
    %204 = arith.mulf %193, %203 : vector<16x256xf32>
    %205 = vector.broadcast %194 : vector<1x256xf32> to vector<16x256xf32>
    %206 = arith.mulf %204, %205 : vector<16x256xf32>
    %c0_64 = arith.constant 0 : index
    %c0_65 = arith.constant 0 : index
    %207 = vector.load %arg12[%c0_64, %c0_65] : memref<256x1024xbf16, #tpu.memory_space<vmem>>, vector<256x1024xbf16>
    %208 = arith.truncf %206 : vector<16x256xf32> to vector<16x256xbf16>
    %cst_66 = arith.constant dense<0.000000e+00> : vector<16x1024xf32>
    %209 = tpu.matmul %208, %207, %cst_66 {dimension_numbers = #tpu.dot_dimension_numbers<[1], [0], [0], [1], [0, 0, 1, 1], [], []>} : vector<16x256xbf16>, vector<256x1024xbf16>, vector<16x1024xf32> -> vector<16x1024xf32>
    %210 = vector.extract_strided_slice %209 {offsets = [0, 0], sizes = [16, 512], strides = [1, 1]} : vector<16x1024xf32> to vector<16x512xf32>
    %cst_67 = arith.constant 0.000000e+00 : f32
    %211 = vector.broadcast %cst_67 : f32 to vector<16x512xf32>
    %212 = arith.subf %211, %210 : vector<16x512xf32>
    %213 = math.exp %212 : vector<16x512xf32>
    %cst_68 = arith.constant 1.000000e+00 : f32
    %214 = vector.broadcast %cst_68 : f32 to vector<16x512xf32>
    %215 = arith.addf %214, %213 : vector<16x512xf32>
    %216 = arith.divf %210, %215 : vector<16x512xf32>
    %217 = vector.extract_strided_slice %209 {offsets = [0, 512], sizes = [16, 512], strides = [1, 1]} : vector<16x1024xf32> to vector<16x512xf32>
    %218 = arith.mulf %216, %217 : vector<16x512xf32>
    %c0_69 = arith.constant 0 : index
    %c0_70 = arith.constant 0 : index
    %219 = vector.load %arg13[%c0_69, %c0_70] : memref<512x256xbf16, #tpu.memory_space<vmem>>, vector<512x256xbf16>
    %220 = arith.truncf %218 : vector<16x512xf32> to vector<16x512xbf16>
    %cst_71 = arith.constant dense<0.000000e+00> : vector<16x256xf32>
    %221 = tpu.matmul %220, %219, %cst_71 {dimension_numbers = #tpu.dot_dimension_numbers<[1], [0], [0], [1], [0, 0, 1, 1], [], []>} : vector<16x512xbf16>, vector<512x256xbf16>, vector<16x256xf32> -> vector<16x256xf32>
    %222 = arith.addf %193, %221 : vector<16x256xf32>
    %c0_72 = arith.constant 0 : index
    %c0_73 = arith.constant 0 : index
    %223 = vector.load %arg3[%c0_72, %c0_73] : memref<1x256xf32, #tpu.memory_space<vmem>>, vector<1x256xf32>
    %224 = arith.mulf %222, %222 : vector<16x256xf32>
    %cst_74 = arith.constant dense<0.000000e+00> : vector<16xf32>
    %225 = vector.multi_reduction <add>, %224, %cst_74 [1] : vector<16x256xf32> to vector<16xf32>
    %226 = vector.shape_cast %225 : vector<16xf32> to vector<16x1xf32>
    %cst_75 = arith.constant 2.560000e+02 : f32
    %227 = vector.broadcast %cst_75 : f32 to vector<16x1xf32>
    %228 = arith.divf %226, %227 : vector<16x1xf32>
    %cst_76 = arith.constant 9.99999974E-6 : f32
    %229 = vector.broadcast %cst_76 : f32 to vector<16x1xf32>
    %230 = arith.addf %228, %229 : vector<16x1xf32>
    %231 = math.rsqrt %230 : vector<16x1xf32>
    %232 = vector.broadcast %231 : vector<16x1xf32> to vector<16x256xf32>
    %233 = arith.mulf %222, %232 : vector<16x256xf32>
    %234 = vector.broadcast %223 : vector<1x256xf32> to vector<16x256xf32>
    %235 = arith.mulf %233, %234 : vector<16x256xf32>
    %c0_77 = arith.constant 0 : index
    %c0_78 = arith.constant 0 : index
    %236 = vector.load %arg14[%c0_77, %c0_78] : memref<256x4xbf16, #tpu.memory_space<vmem>>, vector<256x4xbf16>
    %237 = arith.truncf %235 : vector<16x256xf32> to vector<16x256xbf16>
    %cst_79 = arith.constant dense<0.000000e+00> : vector<16x4xf32>
    %238 = tpu.matmul %237, %236, %cst_79 {dimension_numbers = #tpu.dot_dimension_numbers<[1], [0], [0], [1], [0, 0, 1, 1], [], []>} : vector<16x256xbf16>, vector<256x4xbf16>, vector<16x4xf32> -> vector<16x4xf32>
    %cst_80 = arith.constant dense<0xFF800000> : vector<16xf32>
    %239 = vector.multi_reduction <maximumf>, %238, %cst_80 [1] : vector<16x4xf32> to vector<16xf32>
    %240 = vector.shape_cast %239 : vector<16xf32> to vector<16x1xf32>
    %241 = vector.broadcast %240 : vector<16x1xf32> to vector<16x4xf32>
    %242 = arith.subf %238, %241 : vector<16x4xf32>
    %243 = math.exp %242 : vector<16x4xf32>
    %244 = tpu.iota {dimensions = array<i32: 1>} : vector<16x4xi32>
    %245 = arith.sitofp %244 : vector<16x4xi32> to vector<16x4xf32>
    %cst_81 = arith.constant dense<0xFF800000> : vector<16xf32>
    %246 = vector.multi_reduction <maximumf>, %243, %cst_81 [1] : vector<16x4xf32> to vector<16xf32>
    %247 = vector.shape_cast %246 : vector<16xf32> to vector<16x1xf32>
    %248 = vector.broadcast %247 : vector<16x1xf32> to vector<16x4xf32>
    %249 = arith.cmpf oeq, %243, %248 : vector<16x4xf32>
    %cst_82 = arith.constant 4.000000e+00 : f32
    %250 = vector.broadcast %cst_82 : f32 to vector<16x4xf32>
    %251 = arith.select %249, %245, %250 : vector<16x4xi1>, vector<16x4xf32>
    %cst_83 = arith.constant dense<0x7F800000> : vector<16xf32>
    %252 = vector.multi_reduction <minimumf>, %251, %cst_83 [1] : vector<16x4xf32> to vector<16xf32>
    %253 = vector.shape_cast %252 : vector<16xf32> to vector<16x1xf32>
    %254 = vector.broadcast %253 : vector<16x1xf32> to vector<16x4xf32>
    %255 = arith.cmpf oeq, %245, %254 : vector<16x4xf32>
    %cst_84 = arith.constant -1.000000e+00 : f32
    %256 = vector.broadcast %cst_84 : f32 to vector<16x4xf32>
    %257 = arith.select %255, %256, %243 : vector<16x4xi1>, vector<16x4xf32>
    %cst_85 = arith.constant dense<0xFF800000> : vector<16xf32>
    %258 = vector.multi_reduction <maximumf>, %257, %cst_85 [1] : vector<16x4xf32> to vector<16xf32>
    %259 = vector.shape_cast %258 : vector<16xf32> to vector<16x1xf32>
    %260 = vector.broadcast %259 : vector<16x1xf32> to vector<16x4xf32>
    %261 = arith.cmpf oeq, %257, %260 : vector<16x4xf32>
    %cst_86 = arith.constant 4.000000e+00 : f32
    %262 = vector.broadcast %cst_86 : f32 to vector<16x4xf32>
    %263 = arith.select %261, %245, %262 : vector<16x4xi1>, vector<16x4xf32>
    %cst_87 = arith.constant dense<0x7F800000> : vector<16xf32>
    %264 = vector.multi_reduction <minimumf>, %263, %cst_87 [1] : vector<16x4xf32> to vector<16xf32>
    %265 = vector.shape_cast %264 : vector<16xf32> to vector<16x1xf32>
    %266 = vector.broadcast %253 : vector<16x1xf32> to vector<16x4xf32>
    %267 = arith.cmpf oeq, %245, %266 : vector<16x4xf32>
    %268 = vector.broadcast %265 : vector<16x1xf32> to vector<16x4xf32>
    %269 = arith.cmpf oeq, %245, %268 : vector<16x4xf32>
    %270 = arith.ori %267, %269 : vector<16x4xi1>
    %cst_88 = arith.constant 0.000000e+00 : f32
    %271 = vector.broadcast %cst_88 : f32 to vector<16x4xf32>
    %272 = arith.select %270, %243, %271 : vector<16x4xi1>, vector<16x4xf32>
    %cst_89 = arith.constant dense<0.000000e+00> : vector<16xf32>
    %273 = vector.multi_reduction <add>, %272, %cst_89 [1] : vector<16x4xf32> to vector<16xf32>
    %274 = vector.shape_cast %273 : vector<16xf32> to vector<16x1xf32>
    %275 = tpu.reciprocal %274 {approx = true} : vector<16x1xf32> -> vector<16x1xf32>
    %276 = vector.broadcast %275 : vector<16x1xf32> to vector<16x4xf32>
    %277 = arith.mulf %272, %276 : vector<16x4xf32>
    %c0_90 = arith.constant 0 : index
    %c0_91 = arith.constant 0 : index
    %278 = vector.load %arg15[%c0_90, %c0_91] : memref<256x2048xbf16, #tpu.memory_space<vmem>>, vector<256x2048xbf16>
    %279 = arith.truncf %235 : vector<16x256xf32> to vector<16x256xbf16>
    %cst_92 = arith.constant dense<0.000000e+00> : vector<16x2048xf32>
    %280 = tpu.matmul %279, %278, %cst_92 {dimension_numbers = #tpu.dot_dimension_numbers<[1], [0], [0], [1], [0, 0, 1, 1], [], []>} : vector<16x256xbf16>, vector<256x2048xbf16>, vector<16x2048xf32> -> vector<16x2048xf32>
    %c0_93 = arith.constant 0 : index
    %c0_94 = arith.constant 0 : index
    %281 = vector.load %arg16[%c0_93, %c0_94] : memref<1x2048xf32, #tpu.memory_space<vmem>>, vector<1x2048xf32>
    %282 = vector.broadcast %281 : vector<1x2048xf32> to vector<16x2048xf32>
    %283 = arith.addf %280, %282 : vector<16x2048xf32>
    %cst_95 = arith.constant 0.000000e+00 : f32
    %284 = vector.broadcast %cst_95 : f32 to vector<16x2048xf32>
    %285 = arith.subf %284, %283 : vector<16x2048xf32>
    %286 = math.exp %285 : vector<16x2048xf32>
    %cst_96 = arith.constant 1.000000e+00 : f32
    %287 = vector.broadcast %cst_96 : f32 to vector<16x2048xf32>
    %288 = arith.addf %287, %286 : vector<16x2048xf32>
    %289 = arith.divf %283, %288 : vector<16x2048xf32>
    %290 = vector.extract_strided_slice %289 {offsets = [0, 0], sizes = [16, 512], strides = [1, 1]} : vector<16x2048xf32> to vector<16x512xf32>
    %291 = vector.extract_strided_slice %277 {offsets = [0, 0], sizes = [16, 1], strides = [1, 1]} : vector<16x4xf32> to vector<16x1xf32>
    %292 = vector.broadcast %291 : vector<16x1xf32> to vector<16x512xf32>
    %293 = arith.mulf %290, %292 : vector<16x512xf32>
    %294 = vector.extract_strided_slice %289 {offsets = [0, 512], sizes = [16, 512], strides = [1, 1]} : vector<16x2048xf32> to vector<16x512xf32>
    %295 = vector.extract_strided_slice %277 {offsets = [0, 1], sizes = [16, 1], strides = [1, 1]} : vector<16x4xf32> to vector<16x1xf32>
    %296 = vector.broadcast %295 : vector<16x1xf32> to vector<16x512xf32>
    %297 = arith.mulf %294, %296 : vector<16x512xf32>
    %298 = vector.extract_strided_slice %289 {offsets = [0, 1024], sizes = [16, 512], strides = [1, 1]} : vector<16x2048xf32> to vector<16x512xf32>
    %299 = vector.extract_strided_slice %277 {offsets = [0, 2], sizes = [16, 1], strides = [1, 1]} : vector<16x4xf32> to vector<16x1xf32>
    %300 = vector.broadcast %299 : vector<16x1xf32> to vector<16x512xf32>
    %301 = arith.mulf %298, %300 : vector<16x512xf32>
    %302 = vector.extract_strided_slice %289 {offsets = [0, 1536], sizes = [16, 512], strides = [1, 1]} : vector<16x2048xf32> to vector<16x512xf32>
    %303 = vector.extract_strided_slice %277 {offsets = [0, 3], sizes = [16, 1], strides = [1, 1]} : vector<16x4xf32> to vector<16x1xf32>
    %304 = vector.broadcast %303 : vector<16x1xf32> to vector<16x512xf32>
    %305 = arith.mulf %302, %304 : vector<16x512xf32>
    %306 = tpu.concatenate %293, %297, %301, %305 in 1 : vector<16x512xf32>, vector<16x512xf32>, vector<16x512xf32>, vector<16x512xf32> -> vector<16x2048xf32>
    %c0_97 = arith.constant 0 : index
    %c0_98 = arith.constant 0 : index
    %307 = vector.load %arg17[%c0_97, %c0_98] : memref<2048x256xbf16, #tpu.memory_space<vmem>>, vector<2048x256xbf16>
    %308 = arith.truncf %306 : vector<16x2048xf32> to vector<16x2048xbf16>
    %cst_99 = arith.constant dense<0.000000e+00> : vector<16x256xf32>
    %309 = tpu.matmul %308, %307, %cst_99 {dimension_numbers = #tpu.dot_dimension_numbers<[1], [0], [0], [1], [0, 0, 1, 1], [], []>} : vector<16x2048xbf16>, vector<2048x256xbf16>, vector<16x256xf32> -> vector<16x256xf32>
    %c0_100 = arith.constant 0 : index
    %c0_101 = arith.constant 0 : index
    %310 = vector.load %arg18[%c0_100, %c0_101] : memref<4x256xf32, #tpu.memory_space<vmem>>, vector<4x256xf32>
    %311 = vector.extract_strided_slice %277 {offsets = [0, 0], sizes = [16, 1], strides = [1, 1]} : vector<16x4xf32> to vector<16x1xf32>
    %312 = vector.extract_strided_slice %310 {offsets = [0, 0], sizes = [1, 256], strides = [1, 1]} : vector<4x256xf32> to vector<1x256xf32>
    %313 = vector.broadcast %311 : vector<16x1xf32> to vector<16x256xf32>
    %314 = vector.broadcast %312 : vector<1x256xf32> to vector<16x256xf32>
    %315 = arith.mulf %313, %314 : vector<16x256xf32>
    %316 = arith.addf %309, %315 : vector<16x256xf32>
    %317 = vector.extract_strided_slice %277 {offsets = [0, 1], sizes = [16, 1], strides = [1, 1]} : vector<16x4xf32> to vector<16x1xf32>
    %318 = vector.extract_strided_slice %310 {offsets = [1, 0], sizes = [1, 256], strides = [1, 1]} : vector<4x256xf32> to vector<1x256xf32>
    %319 = vector.broadcast %317 : vector<16x1xf32> to vector<16x256xf32>
    %320 = vector.broadcast %318 : vector<1x256xf32> to vector<16x256xf32>
    %321 = arith.mulf %319, %320 : vector<16x256xf32>
    %322 = arith.addf %316, %321 : vector<16x256xf32>
    %323 = vector.extract_strided_slice %277 {offsets = [0, 2], sizes = [16, 1], strides = [1, 1]} : vector<16x4xf32> to vector<16x1xf32>
    %324 = vector.extract_strided_slice %310 {offsets = [2, 0], sizes = [1, 256], strides = [1, 1]} : vector<4x256xf32> to vector<1x256xf32>
    %325 = vector.broadcast %323 : vector<16x1xf32> to vector<16x256xf32>
    %326 = vector.broadcast %324 : vector<1x256xf32> to vector<16x256xf32>
    %327 = arith.mulf %325, %326 : vector<16x256xf32>
    %328 = arith.addf %322, %327 : vector<16x256xf32>
    %329 = vector.extract_strided_slice %277 {offsets = [0, 3], sizes = [16, 1], strides = [1, 1]} : vector<16x4xf32> to vector<16x1xf32>
    %330 = vector.extract_strided_slice %310 {offsets = [3, 0], sizes = [1, 256], strides = [1, 1]} : vector<4x256xf32> to vector<1x256xf32>
    %331 = vector.broadcast %329 : vector<16x1xf32> to vector<16x256xf32>
    %332 = vector.broadcast %330 : vector<1x256xf32> to vector<16x256xf32>
    %333 = arith.mulf %331, %332 : vector<16x256xf32>
    %334 = arith.addf %328, %333 : vector<16x256xf32>
    %cst_102 = arith.constant 1.000000e+00 : f32
    %335 = vector.broadcast %cst_102 : f32 to vector<16x256xf32>
    %336 = arith.mulf %335, %334 : vector<16x256xf32>
    %337 = arith.addf %222, %336 : vector<16x256xf32>
    %c0_103 = arith.constant 0 : index
    %c0_104 = arith.constant 0 : index
    %338 = vector.load %arg19[%c0_103, %c0_104] : memref<16x256xf32, #tpu.memory_space<vmem>>, vector<16x256xf32>
    tpu.vector_store %arg19[%c0_103, %c0_104], %337 {strides = array<i32>} : memref<16x256xf32, #tpu.memory_space<vmem>>, vector<16x256xf32>,
    return
  }
}

</mosaic_0001>

<bundles_post_ra>
// kernel: tile.13
= control target key start
LH: loop header
LB: loop body
LE: loop exit
PB: predicated region body
PF: predicated region fallthrough
CT: control target
= control target key end

     0   :  { %s22_s0 = inlined_call_operand.vmem [shape: f32[32], index: 0, kind: input, shape index: {}]   ;;  %s23_s1 = inlined_call_operand.vmem [shape: f32[8,32], index: 1, kind: output, shape index: {}]  }
   0x1   :  { %v4_v0 = vld [vmem:[%s22_s0] ss:$0 sm:$0xff] }
   0x2   :  { %5 = vst [vmem:[%s23_s1] sm:$0xff] %v4_v0 }

// kernel: mul.28
= control target key start
LH: loop header
LB: loop body
LE: loop exit
PB: predicated region body
PF: predicated region fallthrough
CT: control target
= control target key end

     0   :  { %s7_s6 = smov 3  ;;  %s14_s9 = smov 3  ;;  %vm4_vm0 = vcmask 261120   ;;  %vm11_vm1 = vcmask 1048320   ;;  %vm18_vm2 = vcmask 785920   ;;  %vm25_vm3 = vcmask 523520   ;;  %s67_s0 = inlined_call_operand.vmem [shape: f32[8,32], index: 0, kind: input, shape index: {}]   ;;  %s68_s1 = inlined_call_operand.vmem [shape: f32[256], index: 1, kind: output, shape index: {}]  }
   0x1   :  { %v33_v0 = vld [vmem:[%s67_s0 + $0x3] ss:$4 sm:%s7_s6]   ;;  %s39_s10 = smov 96   ;;  %s21_s11 = smov 3  ;;  %v34_v1 = vld [vmem:[%s67_s0 + $0x2] ss:$4 sm:%s14_s9]  }
   0x2   :  { %9 = vrot.lane.b32.xlu0 %v33_v0, %s39_s10  ;;  %v35_v2 = vld [vmem:[%s67_s0 + $0x1] ss:$4 sm:%s21_s11]   ;;  %s2_s16 = smov 3  ;;  %s40_s17 = smov 32  }
   0x3   :  { %23 = vrot.lane.b32.xlu1 %v35_v2, %s40_s17  ;;  %v3_v3 = vld [vmem:[%s67_s0] ss:$4 sm:%s2_s16]   ;;  %s41_s0 = smov 64  }
   0x4   :  { %5 = vst.msk [vmem:[#allocation0] sm:$0x3] %vm4_vm0, %v3_v3  }
   0x6   :  { %16 = vrot.lane.b32.xlu0 %v34_v1, %s41_s0 }
  0x74   :  { %v10_v4 = vpop.permute.xlu0 %9  }
  0x75   :  { %12 = vst.msk [vmem:[#allocation0] sm:$0x3] %vm11_vm1, %v10_v4   ;;  %v24_v5 = vpop.permute.xlu1 %23  }
  0x78   :  { %v17_v6 = vpop.permute.xlu0 %16  }
  0x79   :  { %19 = vst.msk [vmem:[#allocation0] sm:$0x3] %vm18_vm2, %v17_v6  }
  0x7a   :  { %26 = vst.msk [vmem:[#allocation0] sm:$0x3] %vm25_vm3, %v24_v5  }
  0x81   :  { %v30_v7 = vld [vmem:[#allocation0] sm:$0x3] }
  0x82   :  { %32 = vst [vmem:[%s68_s1] sm:$0x3] %v30_v7 }

// kernel: tile.18
= control target key start
LH: loop header
LB: loop body
LE: loop exit
PB: predicated region body
PF: predicated region fallthrough
CT: control target
= control target key end

     0   :  { %s22_s0 = inlined_call_operand.vmem [shape: f32[32], index: 0, kind: input, shape index: {}]   ;;  %s23_s1 = inlined_call_operand.vmem [shape: f32[4,32], index: 1, kind: output, shape index: {}]  }
   0x1   :  { %v4_v0 = vld [vmem:[%s22_s0] ss:$0 sm:$0xff] }
   0x2   :  { %5 = vst [vmem:[%s23_s1] sm:$0xf] %v4_v0 }

// kernel: mul.35
= control target key start
LH: loop header
LB: loop body
LE: loop exit
PB: predicated region body
PF: predicated region fallthrough
CT: control target
= control target key end

     0   :  { %vm7_vm0 = vcmask 261120   ;;  %s37_s8 = smov 32   ;;  %s38_s9 = smov 64   ;;  %vm13_vm1 = vcmask 1048320   ;;  %vm19_vm2 = vcmask 785920   ;;  %vm25_vm3 = vcmask 523520   ;;  %s55_s0 = inlined_call_operand.vmem [shape: f32[4,32], index: 0, kind: input, shape index: {}]   ;;  %s56_s1 = inlined_call_operand.vmem [shape: f32[128], index: 1, kind: output, shape index: {}]  }
   0x1   :  { %v4_v0 = vld [vmem:[%s55_s0] sm:$0xf]  ;;  %s36_s0 = smov 96  }
   0x2   :  { %5 = vst [vmem:[#allocation1] sm:$0xf] %v4_v0 }
   0x9   :  { %v10_v1 = vld [vmem:[#allocation1 + $0x3] sm:$0x1]   ;;  %v22_v2 = vld [vmem:[#allocation1 + $0x1] sm:$0x1]   ;;  %v6_v3 = vld [vmem:[#allocation1] sm:$0x1]  }
   0xa   :  { %11 = vrot.lane.b32.xlu0 %v10_v1, %s36_s0  ;;  %23 = vrot.lane.b32.xlu1 %v22_v2, %s37_s8  ;;  %v16_v4 = vld [vmem:[#allocation1 + $0x2] sm:$0x1]   ;;  %8 = vst.msk [vmem:[#allocation0] sm:$0x1] %vm7_vm0, %v6_v3  }
   0xe   :  { %17 = vrot.lane.b32.xlu0 %v16_v4, %s38_s9 }
  0x7c   :  { %v12_v5 = vpop.permute.xlu0 %11   ;;  %v24_v6 = vpop.permute.xlu1 %23  }
  0x7d   :  { %14 = vst.msk [vmem:[#allocation0] sm:$0x1] %vm13_vm1, %v12_v5  }
  0x80   :  { %v18_v7 = vpop.permute.xlu0 %17  }
  0x81   :  { %20 = vst.msk [vmem:[#allocation0] sm:$0x1] %vm19_vm2, %v18_v7  }
  0x82   :  { %26 = vst.msk [vmem:[#allocation0] sm:$0x1] %vm25_vm3, %v24_v6  }
  0x89   :  { %v30_v8 = vld [vmem:[#allocation0] sm:$0x1] }
  0x8a   :  { %32 = vst [vmem:[%s56_s1] sm:$0x1] %v30_v8 }

// kernel: vishwamai_block_forward.1
= control target key start
LH: loop header
LB: loop body
LE: loop exit
PB: predicated region body
PF: predicated region fallthrough
CT: control target
= control target key end

     0   :  { %s14148_s0 = inlined_call_operand.vmem [shape: f32[16,256], index: 0, kind: input, shape index: {}]   ;;  %s14149_s1 = inlined_call_operand.vmem [shape: f32[1,256], index: 1, kind: input, shape index: {}]   ;;  %s14150_s2 = inlined_call_operand.vmem [shape: f32[1,256], index: 2, kind: input, shape index: {}]   ;;  %s14151_s3 = inlined_call_operand.vmem [shape: f32[1,256], index: 3, kind: input, shape index: {}]   ;;  %s14152_s4 = inlined_call_operand.vmem [shape: bf16[256,512], index: 4, kind: input, shape index: {}]   ;;  %s14153_s5 = inlined_call_operand.vmem [shape: bf16[256,256], index: 5, kind: input, shape index: {}]   ;;  %s14154_s6 = inlined_call_operand.vmem [shape: bf16[256,256], index: 6, kind: input, shape index: {}]   ;;  %s14155_s7 = inlined_call_operand.vmem [shape: f32[16,256], index: 7, kind: input, shape index: {}]   ;;  %s14156_s8 = inlined_call_operand.vmem [shape: f32[16,256], index: 8, kind: input, shape index: {}]   ;;  %s14157_s9 = inlined_call_operand.vmem [shape: f32[16,128], index: 9, kind: input, shape index: {}]   ;;  %s14158_s10 = inlined_call_operand.vmem [shape: f32[16,128], index: 10, kind: input, shape index: {}]   ;;  %s14159_s11 = inlined_call_operand.vmem [shape: f32[16,16], index: 11, kind: input, shape index: {}]   ;;  %s14160_s12 = inlined_call_operand.vmem [shape: bf16[256,1024], index: 12, kind: input, shape index: {}]   ;;  %s14161_s13 = inlined_call_operand.vmem [shape: bf16[512,256], index: 13, kind: input, shape index: {}]   ;;  %s14162_s14 = inlined_call_operand.vmem [shape: bf16[256,4], index: 14, kind: input, shape index: {}]   ;;  %s14163_s15 = inlined_call_operand.vmem [shape: bf16[256,2048], index: 15, kind: input, shape index: {}]   ;;  %s14164_s16 = inlined_call_operand.vmem [shape: f32[1,2048], index: 16, kind: input, shape index: {}]   ;;  %s14165_s17 = inlined_call_operand.vmem [shape: bf16[2048,256], index: 17, kind: input, shape index: {}]   ;;  %s14166_s18 = inlined_call_operand.vmem [shape: f32[4,256], index: 18, kind: input, shape index: {}]   ;;  %s14167_s19 = inlined_call_operand.hbm [shape: f32[16,256], index: 19, kind: output, shape index: {}]  }
   0x1   :  { %14188 = sst [smem:[#allocation20_spill]] %s14148_s0 }
   0x2   :  { %14189 = sst [smem:[#allocation21_spill]] %s14149_s1 }
   0x3   :  { %14190 = sst [smem:[#allocation22_spill]] %s14150_s2 }
   0x4   :  { %14191 = sst [smem:[#allocation23_spill]] %s14151_s3 }
   0x5   :  { %s14192_s20 = sld [smem:[#allocation20_spill]]  ;;  %v9423_v8 = vld [vmem:[%s14152_s4 + $0x4] ss:$16 sps:$4 sm:$0xff]   ;;  %v9425_v9 = vld [vmem:[%s14152_s4] ss:$16 sps:$4 sm:$0xff]   ;;  %v91_v48 = vlaneseq  ;;  %s14193_s23 = sld [smem:[#allocation21_spill]] }
   0x6   :  { %v9426_v11 = vld [vmem:[%s14152_s4 + $0x24] ss:$16 sps:$4 sm:$0xff]   ;;  %491 = vmatprep.subr.bf16.mxu1 %v9423_v8  ;;  %v9428_v13 = vld [vmem:[%s14152_s4 + $0x20] ss:$16 sps:$4 sm:$0xff]   ;;  %v9473_v42 = vld [vmem:[%s14152_s4 + $0xc] ss:$16 sps:$4 sm:$0xff]  }
   0x7   :  { %492 = vmatpush1.bf16.msra.mxu1 %v9425_v9  ;;  %v9429_v14 = vld [vmem:[%s14152_s4 + $0x44] ss:$16 sps:$4 sm:$0xff]   ;;  %v9431_v15 = vld [vmem:[%s14152_s4 + $0x40] ss:$16 sps:$4 sm:$0xff]   ;;  %v10631_v50 = vshrl.u32 %v91_v48, 7 }
   0x8   :  { %493 = vmatprep.subr.bf16.mxu1 %v9426_v11  ;;  %v9432_v16 = vld [vmem:[%s14152_s4 + $0x64] ss:$16 sps:$4 sm:$0xff]   ;;  %v9434_v17 = vld [vmem:[%s14152_s4 + $0x60] ss:$16 sps:$4 sm:$0xff]   ;;  %v9482_v9 = vld [vmem:[%s14152_s4 + $0x6c] ss:$16 sps:$4 sm:$0xff]  }
   0x9   :  { %v9435_v18 = vld [vmem:[%s14152_s4 + $0x84] ss:$16 sps:$4 sm:$0xff]   ;;  %v9437_v19 = vld [vmem:[%s14152_s4 + $0x80] ss:$16 sps:$4 sm:$0xff]   ;;  %v10637_v52 = vsub.s32 0, %v10631_v50  ;;  %v10640_v53 = vsub.s32 1, %v10631_v50 }
   0xa   :  { %v9438_v20 = vld [vmem:[%s14152_s4 + $0xa4] ss:$16 sps:$4 sm:$0xff]   ;;  %v9440_v21 = vld [vmem:[%s14152_s4 + $0xa0] ss:$16 sps:$4 sm:$0xff]   ;;  %v9485_v11 = vld [vmem:[%s14152_s4 + $0x8c] ss:$16 sps:$4 sm:$0xff]  }
   0xb   :  { %v10506_v0 = vld [vmem:[%s14192_s20] sm:$0xff]  ;;  %v10511_v1 = vld [vmem:[%s14192_s20 + $0x8] sm:$0xff]  ;;  %v10516_v2 = vld [vmem:[%s14192_s20 + $0x10] sm:$0xff]  ;;  %494 = vmatpush1.bf16.msra.mxu1 %v9428_v13  ;;  %14194 = vst [vmem:[#allocation5_spill] sm:$0xff] %v10637_v52 }
   0xc   :  { %v69_v3 = vmul.f32 %v10506_v0, %v10506_v0  ;;  %v70_v4 = vmul.f32 %v10511_v1, %v10511_v1  ;;  %v10525_v5 = vld [vmem:[%s14192_s20 + $0x18] sm:$0xff]  ;;  %v71_v6 = vmul.f32 %v10516_v2, %v10516_v2  ;;  %495 = vmatprep.subr.bf16.mxu1 %v9429_v14  ;;  %v9441_v22 = vld [vmem:[%s14152_s4 + $0xc4] ss:$16 sps:$4 sm:$0xff]   ;;  %v9443_v23 = vld [vmem:[%s14152_s4 + $0xc0] ss:$16 sps:$4 sm:$0xff]   ;;  %14195 = vst [vmem:[#allocation6_spill] sm:$0xff] %v10640_v53 }
   0xd   :  { %v72_v7 = vmul.f32 %v10525_v5, %v10525_v5  ;;  %v9444_v24 = vld [vmem:[%s14152_s4 + $0xe4] ss:$16 sps:$4 sm:$0xff]   ;;  %v9446_v25 = vld [vmem:[%s14152_s4 + $0xe0] ss:$16 sps:$4 sm:$0xff]   ;;  %v9488_v13 = vld [vmem:[%s14152_s4 + $0xac] ss:$16 sps:$4 sm:$0xff]  }
   0xe   :  { %v73_v10 = vadd.f32 %v70_v4, %v69_v3  ;;  %v9447_v26 = vld [vmem:[%s14152_s4 + $0x104] ss:$16 sps:$4 sm:$0xff]   ;;  %v9449_v27 = vld [vmem:[%s14152_s4 + $0x100] ss:$16 sps:$4 sm:$0xff]   ;;  %v9471_v3 = vld [vmem:[%s14152_s4 + $0x8] ss:$16 sps:$4 sm:$0xff]  }
   0xf   :  { %v76_v12 = vadd.f32 %v72_v7, %v71_v6  ;;  %496 = vmatpush1.bf16.msra.mxu1 %v9431_v15  ;;  %v9450_v28 = vld [vmem:[%s14152_s4 + $0x124] ss:$16 sps:$4 sm:$0xff]   ;;  %v9452_v29 = vld [vmem:[%s14152_s4 + $0x120] ss:$16 sps:$4 sm:$0xff]   ;;  %v9486_v14 = vld [vmem:[%s14152_s4 + $0xa8] ss:$16 sps:$4 sm:$0xff]  }
  0x10   :  { %74 = vadd.xlane.f32.xlu0 %v73_v10  ;;  %497 = vmatprep.subr.bf16.mxu1 %v9432_v16  ;;  %v9453_v30 = vld [vmem:[%s14152_s4 + $0x144] ss:$16 sps:$4 sm:$0xff]   ;;  %v9455_v31 = vld [vmem:[%s14152_s4 + $0x140] ss:$16 sps:$4 sm:$0xff]   ;;  %v9480_v10 = vld [vmem:[%s14152_s4 + $0x68] ss:$16 sps:$4 sm:$0xff]  }
  0x11   :  { %v9456_v32 = vld [vmem:[%s14152_s4 + $0x164] ss:$16 sps:$4 sm:$0xff]   ;;  %v9458_v33 = vld [vmem:[%s14152_s4 + $0x160] ss:$16 sps:$4 sm:$0xff]   ;;  %v9491_v15 = vld [vmem:[%s14152_s4 + $0xcc] ss:$16 sps:$4 sm:$0xff]  }
  0x12   :  { %v9459_v34 = vld [vmem:[%s14152_s4 + $0x184] ss:$16 sps:$4 sm:$0xff]   ;;  %v9461_v35 = vld [vmem:[%s14152_s4 + $0x180] ss:$16 sps:$4 sm:$0xff]   ;;  %v9489_v16 = vld [vmem:[%s14152_s4 + $0xc8] ss:$16 sps:$4 sm:$0xff]  }
  0x13   :  { %498 = vmatpush1.bf16.msra.mxu1 %v9434_v17  ;;  %v9462_v36 = vld [vmem:[%s14152_s4 + $0x1a4] ss:$16 sps:$4 sm:$0xff]   ;;  %v9464_v37 = vld [vmem:[%s14152_s4 + $0x1a0] ss:$16 sps:$4 sm:$0xff]   ;;  %v9494_v17 = vld [vmem:[%s14152_s4 + $0xec] ss:$16 sps:$4 sm:$0xff]  }
  0x14   :  { %77 = vadd.xlane.f32.xlu0 %v76_v12  ;;  %499 = vmatprep.subr.bf16.mxu1 %v9435_v18  ;;  %v9465_v38 = vld [vmem:[%s14152_s4 + $0x1c4] ss:$16 sps:$4 sm:$0xff]   ;;  %v9467_v39 = vld [vmem:[%s14152_s4 + $0x1c0] ss:$16 sps:$4 sm:$0xff]   ;;  %v9483_v12 = vld [vmem:[%s14152_s4 + $0x88] ss:$16 sps:$4 sm:$0xff]  }
  0x15   :  { %v9468_v40 = vld [vmem:[%s14152_s4 + $0x1e4] ss:$16 sps:$4 sm:$0xff]   ;;  %v9470_v41 = vld [vmem:[%s14152_s4 + $0x1e0] ss:$16 sps:$4 sm:$0xff]   ;;  %v9492_v18 = vld [vmem:[%s14152_s4 + $0xe8] ss:$16 sps:$4 sm:$0xff]  }
  0x16   :  { %v68_v51 = vld [vmem:[%s14193_s23] sm:$0x3] }
  0x17   :  { %500 = vmatpush1.bf16.msra.mxu1 %v9437_v19  ;;  %v94_v56 = vrot.slane %v68_v51, %v10637_v52  ;;  %v98_v57 = vrot.slane %v68_v51, %v10640_v53  ;;  %v9497_v19 = vld [vmem:[%s14152_s4 + $0x10c] ss:$16 sps:$4 sm:$0xff]  }
  0x18   :  { %501 = vmatprep.subr.bf16.mxu1 %v9438_v20 }
  0x1b   :  { %502 = vmatpush1.bf16.msra.mxu1 %v9440_v21 }
  0x1c   :  { %503 = vmatprep.subr.bf16.mxu1 %v9441_v22 }
  0x1f   :  { %504 = vmatpush1.bf16.msra.mxu1 %v9443_v23 }
  0x20   :  { %505 = vmatprep.subr.bf16.mxu1 %v9444_v24 }
  0x23   :  { %506 = vmatpush1.bf16.msra.mxu1 %v9446_v25 }
  0x24   :  { %507 = vmatprep.subr.bf16.mxu1 %v9447_v26 }
  0x27   :  { %508 = vmatpush1.bf16.msra.mxu1 %v9449_v27 }
  0x28   :  { %509 = vmatprep.subr.bf16.mxu1 %v9450_v28 }
  0x2b   :  { %510 = vmatpush1.bf16.msra.mxu1 %v9452_v29 }
  0x2c   :  { %511 = vmatprep.subr.bf16.mxu1 %v9453_v30 }
  0x2f   :  { %512 = vmatpush1.bf16.msra.mxu1 %v9455_v31 }
  0x30   :  { %513 = vmatprep.subr.bf16.mxu1 %v9456_v32 }
  0x33   :  { %514 = vmatpush1.bf16.msra.mxu1 %v9458_v33 }
  0x34   :  { %515 = vmatprep.subr.bf16.mxu1 %v9459_v34 }
  0x37   :  { %516 = vmatpush1.bf16.msra.mxu1 %v9461_v35 }
  0x38   :  { %517 = vmatprep.subr.bf16.mxu1 %v9462_v36 }
  0x3b   :  { %518 = vmatpush1.bf16.msra.mxu1 %v9464_v37 }
  0x3c   :  { %519 = vmatprep.subr.bf16.mxu1 %v9465_v38 }
  0x3f   :  { %520 = vmatpush1.bf16.msra.mxu1 %v9467_v39 }
  0x40   :  { %521 = vmatprep.subr.bf16.mxu1 %v9468_v40 }
  0x43   :  { %522 = vmatpush1.bf16.msra.mxu1 %v9470_v41 }
  0x44   :  { %534 = vmatprep.subr.bf16.mxu1 %v9473_v42 }
  0x9d   :  { %v75_v43 = vpop.xlane.xlu0 %74 }
  0x9e   :  { %v80_v44 = vmul.f32 0.00390625, %v75_v43 }
  0xa0   :  { %v82_v45 = vadd.f32 1e-05, %v80_v44 }
  0xa1   :  { %v78_v46 = vpop.xlane.xlu0 %77 }
  0xa2   :  { %10119 = vrsqrt.f32 %v82_v45  ;;  %v81_v47 = vmul.f32 0.00390625, %v78_v46 }
  0xa4   :  { %v83_v49 = vadd.f32 1e-05, %v81_v47 }
  0xa6   :  { %10121 = vrsqrt.f32 %v83_v49 }
  0xac   :  { %v10120_v54 = vpop.eup %10119 }
  0xad   :  { %v87_v55 = vmul.f32 %v10120_v54, %v10511_v1  ;;  %v86_v58 = vmul.f32 %v10120_v54, %v10506_v0  ;;  %v9476_v1 = vld [vmem:[%s14152_s4 + $0x2c] ss:$16 sps:$4 sm:$0xff]   ;;  %v9474_v0 = vld [vmem:[%s14152_s4 + $0x28] ss:$16 sps:$4 sm:$0xff]  }
  0xaf   :  { %v102_v62 = vmul.f32 %v98_v57, %v87_v55  ;;  %v101_v4 = vmul.f32 %v94_v56, %v86_v58 }
  0xb0   :  { %v10122_v59 = vpop.eup %10121 }
  0xb1   :  { %v89_v60 = vmul.f32 %v10122_v59, %v10525_v5  ;;  %v88_v61 = vmul.f32 %v10122_v59, %v10516_v2  ;;  %v9479_v2 = vld [vmem:[%s14152_s4 + $0x4c] ss:$16 sps:$4 sm:$0xff]   ;;  %v9477_v5 = vld [vmem:[%s14152_s4 + $0x48] ss:$16 sps:$4 sm:$0xff]  }
  0xb3   :  { %v104_v63 = vmul.f32 %v98_v57, %v89_v60  ;;  %v103_v6 = vmul.f32 %v94_v56, %v88_v61 }
  0xb5   :  { %v170_v7 = vpack.c.bf16 %v104_v63, %v102_v62  ;;  %v10654_v8 = vpack.c.bf16 %v103_v6, %v101_v4 }
  0xb7   :  { %523 = vmatprep.mubr.bf16.mxu1 %v170_v7 }
  0xb8   :  { %524 = vmatmul.mubr.bf16.vlgmr.msra.gmra.mrb[0].mxu1 %v10654_v8 }
  0xb9   :  { %535 = vmatpush1.bf16.msra.mxu1 %v9471_v3  ;;  %566 = vmatprep.mubr.bf16.mxu1 %v170_v7 }
  0xba   :  { %536 = vmatprep.subr.bf16.mxu1 %v9476_v1 }
  0xbd   :  { %537 = vmatpush1.bf16.msra.mxu1 %v9474_v0 }
  0xbe   :  { %538 = vmatprep.subr.bf16.mxu1 %v9479_v2 }
  0xc1   :  { %539 = vmatpush1.bf16.msra.mxu1 %v9477_v5 }
  0xc2   :  { %540 = vmatprep.subr.bf16.mxu1 %v9482_v9 }
  0xc5   :  { %541 = vmatpush1.bf16.msra.mxu1 %v9480_v10 }
  0xc6   :  { %542 = vmatprep.subr.bf16.mxu1 %v9485_v11 }
  0xc9   :  { %543 = vmatpush1.bf16.msra.mxu1 %v9483_v12 }
  0xca   :  { %544 = vmatprep.subr.bf16.mxu1 %v9488_v13 }
  0xcd   :  { %545 = vmatpush1.bf16.msra.mxu1 %v9486_v14 }
  0xce   :  { %546 = vmatprep.subr.bf16.mxu1 %v9491_v15 }
  0xd1   :  { %547 = vmatpush1.bf16.msra.mxu1 %v9489_v16 }
  0xd2   :  { %548 = vmatprep.subr.bf16.mxu1 %v9494_v17 }
  0xd3   :  { %24 = vsyncpa [#allocation3], 0  ;;  %v9495_v20 = vld [vmem:[%s14152_s4 + $0x108] ss:$16 sps:$4 sm:$0xff]   ;;  %v9500_v21 = vld [vmem:[%s14152_s4 + $0x12c] ss:$16 sps:$4 sm:$0xff]  }
  0xd4   :  { %v9498_v22 = vld [vmem:[%s14152_s4 + $0x128] ss:$16 sps:$4 sm:$0xff]   ;;  %v9503_v23 = vld [vmem:[%s14152_s4 + $0x14c] ss:$16 sps:$4 sm:$0xff]   ;;  %vm10392_vm0 = vmmov 0   ;;  %vm891_vm1 = vcmask 261120  }
  0xd5   :  { %549 = vmatpush1.bf16.msra.mxu1 %v9492_v18  ;;  %v9501_v24 = vld [vmem:[%s14152_s4 + $0x148] ss:$16 sps:$4 sm:$0xff]   ;;  %v9506_v25 = vld [vmem:[%s14152_s4 + $0x16c] ss:$16 sps:$4 sm:$0xff]   ;;  %vm939_vm2 = vcmask 130048   ;;  %s10394_s26 = smov 64  }
  0xd6   :  { %550 = vmatprep.subr.bf16.mxu1 %v9497_v19  ;;  %v9504_v26 = vld [vmem:[%s14152_s4 + $0x168] ss:$16 sps:$4 sm:$0xff]   ;;  %v9509_v27 = vld [vmem:[%s14152_s4 + $0x18c] ss:$16 sps:$4 sm:$0xff]   ;;  %s10395_s27 = smov 32   ;;  %vm1876_vm3 = vcmask 523264  }
  0xd7   :  { %v9507_v28 = vld [vmem:[%s14152_s4 + $0x188] ss:$16 sps:$4 sm:$0xff]   ;;  %v9512_v29 = vld [vmem:[%s14152_s4 + $0x1ac] ss:$16 sps:$4 sm:$0xff]   ;;  %vm1879_vm4 = vcmask 785408   ;;  %s14196_s24 = sld [smem:[#allocation22_spill]] }
  0xd8   :  { %v9510_v30 = vld [vmem:[%s14152_s4 + $0x1a8] ss:$16 sps:$4 sm:$0xff]   ;;  %v9515_v31 = vld [vmem:[%s14152_s4 + $0x1cc] ss:$16 sps:$4 sm:$0xff]   ;;  %s14201_s23 = sld [smem:[#allocation23_spill]]  ;;  %vm3848_vm5 = vcmask 31744  }
  0xd9   :  { %551 = vmatpush1.bf16.msra.mxu1 %v9495_v20  ;;  %v9513_v32 = vld [vmem:[%s14152_s4 + $0x1c8] ss:$16 sps:$4 sm:$0xff]   ;;  %v9518_v33 = vld [vmem:[%s14152_s4 + $0x1ec] ss:$16 sps:$4 sm:$0xff]  }
  0xda   :  { %552 = vmatprep.subr.bf16.mxu1 %v9500_v21  ;;  %v9516_v34 = vld [vmem:[%s14152_s4 + $0x1e8] ss:$16 sps:$4 sm:$0xff]   ;;  %v9519_v35 = vld [vmem:[%s14154_s6 + $0x4] ss:$8 sps:$4 sm:$0xff]   ;;  %v9522_v37 = vld [vmem:[%s14154_s6 + $0x14] ss:$8 sps:$4 sm:$0xff]  }
  0xdb   :  { %v9521_v36 = vld [vmem:[%s14154_s6] ss:$8 sps:$4 sm:$0xff]   ;;  %v9524_v38 = vld [vmem:[%s14154_s6 + $0x10] ss:$8 sps:$4 sm:$0xff]   ;;  %v9525_v39 = vld [vmem:[%s14154_s6 + $0x24] ss:$8 sps:$4 sm:$0xff]  }
  0xdc   :  { %v9527_v40 = vld [vmem:[%s14154_s6 + $0x20] ss:$8 sps:$4 sm:$0xff]   ;;  %v9528_v41 = vld [vmem:[%s14154_s6 + $0x34] ss:$8 sps:$4 sm:$0xff]   ;;  %v9530_v42 = vld [vmem:[%s14154_s6 + $0x30] ss:$8 sps:$4 sm:$0xff]  }
  0xdd   :  { %553 = vmatpush1.bf16.msra.mxu1 %v9498_v22  ;;  %v9531_v43 = vld [vmem:[%s14154_s6 + $0x44] ss:$8 sps:$4 sm:$0xff]   ;;  %v9533_v44 = vld [vmem:[%s14154_s6 + $0x40] ss:$8 sps:$4 sm:$0xff]   ;;  %v9534_v45 = vld [vmem:[%s14154_s6 + $0x54] ss:$8 sps:$4 sm:$0xff]  }
  0xde   :  { %554 = vmatprep.subr.bf16.mxu1 %v9503_v23  ;;  %v9536_v46 = vld [vmem:[%s14154_s6 + $0x50] ss:$8 sps:$4 sm:$0xff]   ;;  %v9537_v47 = vld [vmem:[%s14154_s6 + $0x64] ss:$8 sps:$4 sm:$0xff]   ;;  %v9539_v49 = vld [vmem:[%s14154_s6 + $0x60] ss:$8 sps:$4 sm:$0xff]  }
  0xdf   :  { %v9540_v51 = vld [vmem:[%s14154_s6 + $0x74] ss:$8 sps:$4 sm:$0xff]   ;;  %v9542_v54 = vld [vmem:[%s14154_s6 + $0x70] ss:$8 sps:$4 sm:$0xff]   ;;  %v9543_v55 = vld [vmem:[%s14154_s6 + $0x84] ss:$8 sps:$4 sm:$0xff]  }
  0xe0   :  { %v9545_v56 = vld [vmem:[%s14154_s6 + $0x80] ss:$8 sps:$4 sm:$0xff]   ;;  %v9546_v57 = vld [vmem:[%s14154_s6 + $0x94] ss:$8 sps:$4 sm:$0xff]   ;;  %v9548_v58 = vld [vmem:[%s14154_s6 + $0x90] ss:$8 sps:$4 sm:$0xff]  }
  0xe1   :  { %555 = vmatpush1.bf16.msra.mxu1 %v9501_v24  ;;  %v9549_v59 = vld [vmem:[%s14154_s6 + $0xa4] ss:$8 sps:$4 sm:$0xff]   ;;  %v9551_v60 = vld [vmem:[%s14154_s6 + $0xa0] ss:$8 sps:$4 sm:$0xff]   ;;  %v9552_v61 = vld [vmem:[%s14154_s6 + $0xb4] ss:$8 sps:$4 sm:$0xff]  }
  0xe2   :  { %556 = vmatprep.subr.bf16.mxu1 %v9506_v25  ;;  %v9554_v62 = vld [vmem:[%s14154_s6 + $0xb0] ss:$8 sps:$4 sm:$0xff]   ;;  %v9555_v63 = vld [vmem:[%s14154_s6 + $0xc4] ss:$8 sps:$4 sm:$0xff]   ;;  %v9557_v3 = vld [vmem:[%s14154_s6 + $0xc0] ss:$8 sps:$4 sm:$0xff]  }
  0xe3   :  { %v9558_v4 = vld [vmem:[%s14154_s6 + $0xd4] ss:$8 sps:$4 sm:$0xff]   ;;  %v9560_v6 = vld [vmem:[%s14154_s6 + $0xd0] ss:$8 sps:$4 sm:$0xff]   ;;  %v9561_v1 = vld [vmem:[%s14154_s6 + $0xe4] ss:$8 sps:$4 sm:$0xff]  }
  0xe4   :  { %v9563_v7 = vld [vmem:[%s14154_s6 + $0xe0] ss:$8 sps:$4 sm:$0xff]   ;;  %v9566_v0 = vld [vmem:[%s14154_s6 + $0xf0] ss:$8 sps:$4 sm:$0xff]   ;;  %v10391_v24 = vmov 0.0  }
  0xe5   :  { %557 = vmatpush1.bf16.msra.mxu1 %v9504_v26  ;;  %v9567_v2 = vld [vmem:[%s14154_s6] ss:$8 sps:$4 sm:$0xff]   ;;  %v9568_v10 = vld [vmem:[%s14154_s6 + $0x10] ss:$8 sps:$4 sm:$0xff]   ;;  %9099 = vmatprep.subr.bf16.mxu0 %v10391_v24 }
  0xe6   :  { %558 = vmatprep.subr.bf16.mxu1 %v9509_v27  ;;  %v9569_v13 = vld [vmem:[%s14154_s6 + $0x20] ss:$8 sps:$4 sm:$0xff]   ;;  %v9570_v14 = vld [vmem:[%s14154_s6 + $0x30] ss:$8 sps:$4 sm:$0xff]   ;;  %9101 = vmatprep.mubr.msk.bf16.mxu0 %vm10392_vm0, %v10391_v24 }
  0xe7   :  { %v9571_v15 = vld [vmem:[%s14154_s6 + $0x40] ss:$8 sps:$4 sm:$0xff]   ;;  %v9572_v16 = vld [vmem:[%s14154_s6 + $0x50] ss:$8 sps:$4 sm:$0xff]  }
  0xe8   :  { %v9573_v17 = vld [vmem:[%s14154_s6 + $0x60] ss:$8 sps:$4 sm:$0xff]   ;;  %v9574_v18 = vld [vmem:[%s14154_s6 + $0x70] ss:$8 sps:$4 sm:$0xff]  }
  0xe9   :  { %559 = vmatpush1.bf16.msra.mxu1 %v9507_v28  ;;  %v705_v25 = vld [vmem:[%s14155_s7] sm:$0xff]  ;;  %v706_v27 = vld [vmem:[%s14155_s7 + $0x8] sm:$0xff] }
  0xea   :  { %560 = vmatprep.subr.bf16.mxu1 %v9512_v29  ;;  %v790_v26 = vld [vmem:[%s14156_s8] sm:$0xff]  ;;  %v791_v28 = vld [vmem:[%s14156_s8 + $0x8] sm:$0xff] }
  0xed   :  { %561 = vmatpush1.bf16.msra.mxu1 %v9510_v30 }
  0xee   :  { %562 = vmatprep.subr.bf16.mxu1 %v9515_v31 }
  0xf1   :  { %563 = vmatpush1.bf16.msra.mxu1 %v9513_v32 }
  0xf2   :  { %564 = vmatprep.subr.bf16.mxu1 %v9518_v33 }
  0xf5   :  { %565 = vmatpush1.bf16.msra.mxu1 %v9516_v34  ;;  %v707_v34 = vld [vmem:[%s14155_s7 + $0x10] sm:$0xff] }
  0xf6   :  { %9196 = vmatprep.subr.bf16.mxu1 %v9519_v35 }
  0xf8   :  { %567 = vmatmul.mubr.bf16.vlgmr.msra.gmra.mrb[4].mxu1 %v10654_v8  ;;  %v9564_v8 = vld [vmem:[%s14154_s6 + $0xf4] ss:$8 sps:$4 sm:$0xff]  }
  0xf9   :  { %9198 = vmatpush1.bf16.msra.mxu1 %v9521_v36  ;;  %v792_v36 = vld [vmem:[%s14156_s8 + $0x10] sm:$0xff] }
  0xfa   :  { %9200 = vmatprep.subr.bf16.mxu1 %v9522_v37  ;;  %v708_v37 = vld [vmem:[%s14155_s7 + $0x18] sm:$0xff] }
  0xfd   :  { %9202 = vmatpush1.bf16.msra.mxu1 %v9524_v38 }
  0xfe   :  { %9204 = vmatprep.subr.bf16.mxu1 %v9525_v39  ;;  %v793_v39 = vld [vmem:[%s14156_s8 + $0x18] sm:$0xff] }
 0x101   :  { %9206 = vmatpush1.bf16.msra.mxu1 %v9527_v40 }
 0x102   :  { %9208 = vmatprep.subr.bf16.mxu1 %v9528_v41 }
 0x105   :  { %9210 = vmatpush1.bf16.msra.mxu1 %v9530_v42 }
 0x106   :  { %9212 = vmatprep.subr.bf16.mxu1 %v9531_v43 }
 0x109   :  { %9214 = vmatpush1.bf16.msra.mxu1 %v9533_v44 }
 0x10a   :  { %9216 = vmatprep.subr.bf16.mxu1 %v9534_v45 }
 0x10d   :  { %9218 = vmatpush1.bf16.msra.mxu1 %v9536_v46 }
 0x10e   :  { %9220 = vmatprep.subr.bf16.mxu1 %v9537_v47 }
 0x111   :  { %9222 = vmatpush1.bf16.msra.mxu1 %v9539_v49 }
 0x112   :  { %9224 = vmatprep.subr.bf16.mxu1 %v9540_v51 }
 0x115   :  { %9226 = vmatpush1.bf16.msra.mxu1 %v9542_v54 }
 0x116   :  { %9228 = vmatprep.subr.bf16.mxu1 %v9543_v55  ;;  %v803_v55 = vld [vmem:[%s14157_s9 + $0x8] sm:$0xff] }
 0x119   :  { %9230 = vmatpush1.bf16.msra.mxu1 %v9545_v56  ;;  %v882_v56 = vld [vmem:[%s14158_s10 + $0x8] sm:$0xff] }
 0x11a   :  { %9232 = vmatprep.subr.bf16.mxu1 %v9546_v57  ;;  %v802_v57 = vld [vmem:[%s14157_s9] sm:$0xff] }
 0x11d   :  { %9234 = vmatpush1.bf16.msra.mxu1 %v9548_v58  ;;  %v881_v58 = vld [vmem:[%s14158_s10] sm:$0xff] }
 0x11e   :  { %9236 = vmatprep.subr.bf16.mxu1 %v9549_v59 }
 0x121   :  { %9238 = vmatpush1.bf16.msra.mxu1 %v9551_v60 }
 0x122   :  { %9240 = vmatprep.subr.bf16.mxu1 %v9552_v61 }
 0x125   :  { %9242 = vmatpush1.bf16.msra.mxu1 %v9554_v62 }
 0x126   :  { %9244 = vmatprep.subr.bf16.mxu1 %v9555_v63 }
 0x129   :  { %9246 = vmatpush1.bf16.msra.mxu1 %v9557_v3 }
 0x12a   :  { %9248 = vmatprep.subr.bf16.mxu1 %v9558_v4 }
 0x12d   :  { %9250 = vmatpush1.bf16.msra.mxu1 %v9560_v6 }
 0x12e   :  { %9252 = vmatprep.subr.bf16.mxu1 %v9561_v1 }
 0x131   :  { %9254 = vmatpush1.bf16.msra.mxu1 %v9563_v7 }
 0x132   :  { %9256 = vmatprep.subr.bf16.mxu1 %v9564_v8  ;;  %v10922_v8 = vld [vmem:[%s14159_s11] sm:$0xff] }
 0x135   :  { %9258 = vmatpush1.bf16.msra.mxu1 %v9566_v0 }
 0x136   :  { %9260 = vmatprep.subr.bf16.mxu1 %v9567_v2 }
 0x18b   :  { %v525_v5 = vpop.f32.mrb[0].mxu1 }
 0x18c   :  { %v527_v9 = vpop.f32.mrb[1].mxu1  ;;  %v709_v30 = vmul.f32 %v705_v25, %v525_v5 }
 0x18d   :  { %v529_v11 = vpop.f32.mrb[2].mxu1  ;;  %777 = vmatprep.mubr.f32.mxu1 %v527_v9  ;;  %v710_v33 = vmul.f32 %v706_v27, %v527_v9 }
 0x18e   :  { %v531_v12 = vpop.f32.mrb[3].mxu1  ;;  %778 = vmatmul.mubr.f32.vlgmr.msra.gmra.mrb[8].mxu1 %v525_v5  ;;  %v711_v42 = vmul.f32 %v707_v34, %v529_v11 }
 0x18f   :  { %783 = vmatprep.mubr.f32.mxu1 %v531_v12  ;;  %9262 = vmatpush3.bf16.msra.mxu1 %v9567_v2  ;;  %v712_v45 = vmul.f32 %v708_v37, %v531_v12  ;;  %v10927_v2 = vld [vmem:[%s14159_s11 + $0x8] sm:$0xff]  ;;  %s10393_s11 = smov 96  }
 0x190   :  { %9264 = vmatprep.subr.bf16.mxu1 %v9568_v10 }
 0x192   :  { %784 = vmatmul.mubr.f32.gmra.mrb[10].mxu1 %v529_v11 }
 0x193   :  { %9266 = vmatpush3.bf16.msra.mxu1 %v9568_v10 }
 0x194   :  { %9268 = vmatprep.subr.bf16.mxu1 %v9569_v13 }
 0x197   :  { %9270 = vmatpush3.bf16.msra.mxu1 %v9569_v13 }
 0x198   :  { %9272 = vmatprep.subr.bf16.mxu1 %v9570_v14 }
 0x19b   :  { %9274 = vmatpush3.bf16.msra.mxu1 %v9570_v14 }
 0x19c   :  { %9276 = vmatprep.subr.bf16.mxu1 %v9571_v15 }
 0x19f   :  { %9278 = vmatpush3.bf16.msra.mxu1 %v9571_v15 }
 0x1a0   :  { %9280 = vmatprep.subr.bf16.mxu1 %v9572_v16 }
 0x1a3   :  { %9282 = vmatpush3.bf16.msra.mxu1 %v9572_v16 }
 0x1a4   :  { %9284 = vmatprep.subr.bf16.mxu1 %v9573_v17 }
 0x1a7   :  { %9286 = vmatpush3.bf16.msra.mxu1 %v9573_v17 }
 0x1a8   :  { %9288 = vmatprep.subr.bf16.mxu1 %v9574_v18 }
 0x1ab   :  { %9290 = vmatpush3.bf16.msra.mxu1 %v9574_v18 }
 0x1ac   :  { %9111 = vmatprep.subr.bf16.mxu1 %v10391_v24 }
 0x1cb   :  { %v568_v19 = vpop.f32.mrb[4].mxu1 }
 0x1cc   :  { %v570_v20 = vpop.f32.mrb[5].mxu1  ;;  %9096 = vmatprep.mubr.f32.mxu1 %v568_v19  ;;  %v804_v63 = vmul.f32 %v802_v57, %v568_v19 }
 0x1cd   :  { %v572_v21 = vpop.f32.mrb[6].mxu1 }
 0x1ce   :  { %v574_v22 = vpop.f32.mrb[7].mxu1  ;;  %9097 = vmatmul.mubr.f32.vlgmr.msra.gmra.mrb[12].mxu1 %v572_v21  ;;  %v805_v60 = vmul.f32 %v803_v55, %v572_v21 }
 0x1cf   :  { %v10865_v23 = vpack.c.bf16 %v574_v22, %v570_v20  ;;  %9113 = vmatprep.mubr.msk.bf16.mxu1 %vm10392_vm0, %v10391_v24 }
 0x261   :  { %v779_v29 = vpop.f32.mrb[8].mxu1 }
 0x262   :  { %v794_v31 = vmul.f32 %v790_v26, %v779_v29  ;;  %v781_v32 = vpop.f32.mrb[9].mxu1 }
 0x263   :  { %v795_v35 = vmul.f32 %v791_v28, %v781_v32 }
 0x264   :  { %v798_v38 = vadd.f32 %v794_v31, %v709_v30 }
 0x265   :  { %v799_v40 = vadd.f32 %v795_v35, %v710_v33  ;;  %v785_v41 = vpop.f32.mrb[10].mxu1 }
 0x266   :  { %v796_v43 = vmul.f32 %v792_v36, %v785_v41  ;;  %v787_v44 = vpop.f32.mrb[11].mxu1 }
 0x267   :  { %v797_v46 = vmul.f32 %v793_v39, %v787_v44 }
 0x268   :  { %v800_v47 = vadd.f32 %v796_v43, %v711_v42 }
 0x269   :  { %v801_v49 = vadd.f32 %v797_v46, %v712_v45 }
 0x26a   :  { %v889_v51 = vpack.c.bf16 %v800_v47, %v798_v38 }
 0x26b   :  { %v10897_v54 = vpack.c.bf16 %v801_v49, %v799_v40 }
 0x2a1   :  { %v9098_v59 = vpop.f32.mrb[12].mxu1 }
 0x2a2   :  { %v884_v61 = vmul.f32 %v9098_v59, %v882_v56  ;;  %v872_v62 = vpop.f32.mrb[13].mxu1 }
 0x2a3   :  { %v883_v3 = vmul.f32 %v881_v58, %v872_v62 }
 0x2a4   :  { %v886_v4 = vadd.f32 %v884_v61, %v805_v60 }
 0x2a5   :  { %v885_v6 = vadd.f32 %v883_v3, %v804_v63 }
 0x2a7   :  { %v890_v1 = vpack.c.bf16 %v886_v4, %v885_v6 }
 0x2a9   :  { %v896_v7 = vsel %vm891_vm1, %v890_v1, 0 }
 0x2aa   :  { %9100 = vmatpush3.bf16.xpose.msra.mxu0 %v896_v7  ;;  %9112 = vmatpush3.bf16.xpose.msra.mxu1 %v896_v7 }
 0x2ab   :  { %9105 = vmatprep.subr.bf16.mxu0 %v10391_v24  ;;  %9117 = vmatprep.subr.bf16.mxu1 %v10391_v24 }
 0x2b1   :  { %9102 = vmatmul.mubr.msk.bf16.vlgmr.msra.gmra.mrb[0].mxu0 %vm891_vm1, %v889_v51 }
 0x2b2   :  { %9106 = vmatpush3.bf16.msra.mxu0 %v10865_v23  ;;  %9107 = vmatprep.mubr.msk.bf16.mxu0 %vm10392_vm0, %v10391_v24 }
 0x2b3   :  { %9123 = vmatprep.subr.bf16.mxu0 %v10391_v24 }
 0x384   :  { %v932_v0 = vpop.f32.mrb[0].mxu0 }
 0x385   :  { %v933_v5 = vadd.f32 %v932_v0, %v10922_v8  ;;  %v9103_v9 = vpop.f32.mrb[1].mxu0 }
 0x386   :  { %v935_v10 = vpop.f32.mrb[2].mxu0 }
 0x387   :  { %v936_v11 = vadd.f32 %v935_v10, %v10927_v2  ;;  %v9104_v12 = vpop.f32.mrb[3].mxu0  ;;  %v940_v13 = vsel %vm939_vm2, %v933_v5, -inf }
 0x388   :  { %941 = vmax.xlane.f32.xlu1 %v940_v13 }
 0x389   :  { %v943_v14 = vsel %vm939_vm2, %v936_v11, -inf }
 0x38c   :  { %944 = vmax.xlane.f32.xlu1 %v943_v14 }
 0x415   :  { %v942_v15 = vpop.xlane.xlu1 %941 }
 0x416   :  { %v946_v16 = vsub.f32 %v933_v5, %v942_v15 }
 0x418   :  { %v948_v17 = vmul.f32 1.442695, %v946_v16 }
 0x419   :  { %v945_v18 = vpop.xlane.xlu1 %944 }
 0x41a   :  { %10123 = vpow2.f32 %v948_v17  ;;  %v947_v19 = vsub.f32 %v936_v11, %v945_v18 }
 0x41c   :  { %v950_v20 = vmul.f32 1.442695, %v947_v19 }
 0x41e   :  { %10125 = vpow2.f32 %v950_v20 }
 0x424   :  { %v10124_v21 = vpop.eup %10123 }
 0x425   :  { %v952_v22 = vsel %vm939_vm2, %v10124_v21, 0.0 }
 0x426   :  { %953 = vadd.xlane.f32.xlu0 %v952_v22 }
 0x428   :  { %v10126_v25 = vpop.eup %10125 }
 0x429   :  { %v955_v26 = vsel %vm939_vm2, %v10126_v25, 0.0 }
 0x42a   :  { %956 = vadd.xlane.f32.xlu1 %v955_v26 }
 0x43b   :  { %1125 = vrot.lane.b32.xlu1 %v890_v1, %s10393_s11 }
 0x43c   :  { %1009 = vrot.lane.b32.xlu0 %v889_v51, %s10393_s11 }
 0x43f   :  { %1122 = vrot.lane.b32.xlu1 %v889_v51, %s10394_s26 }
 0x440   :  { %1359 = vrot.lane.b32.xlu0 %v890_v1, %s10394_s26 }
 0x443   :  { %1245 = vrot.lane.b32.xlu1 %v889_v51, %s10395_s27 }
 0x444   :  { %1594 = vrot.lane.b32.xlu0 %v890_v1, %s10395_s27 }
 0x447   :  { %1479 = vrot.lane.b32.xlu1 %v10897_v54, %s10393_s11 }
 0x448   :  { %1713 = vrot.lane.b32.xlu0 %v10897_v54, %s10395_s27 }
 0x44b   :  { %1592 = vrot.lane.b32.xlu1 %v10897_v54, %s10394_s26 }
 0x4b3   :  { %v954_v27 = vpop.xlane.xlu0 %953 }
 0x4b4   :  { %10127 = vrcp.f32 %v954_v27 }
 0x4b7   :  { %v1010_v28 = vpop.permute.xlu0 %1009  ;;  %v957_v29 = vpop.xlane.xlu1 %956 }
 0x4b8   :  { %10129 = vrcp.f32 %v957_v29  ;;  %9114 = vmatmul.mubr.msk.bf16.vlgmr.msra.gmra.mrb[16].mxu1 %vm891_vm1, %v1010_v28 }
 0x4b9   :  { %9118 = vmatpush3.bf16.msra.mxu1 %v10865_v23  ;;  %9119 = vmatprep.mubr.msk.bf16.mxu1 %vm10392_vm0, %v10391_v24 }
 0x4ba   :  { %9129 = vmatprep.subr.bf16.mxu1 %v10391_v24 }
 0x4bb   :  { %v1126_v34 = vpop.permute.xlu1 %1125  ;;  %v1360_v38 = vpop.permute.xlu0 %1359 }
 0x4bc   :  { %v1131_v36 = vsel %vm891_vm1, %v1126_v34, 0  ;;  %v1365_v40 = vsel %vm891_vm1, %v1360_v38, 0 }
 0x4be   :  { %v10128_v30 = vpop.eup %10127 }
 0x4bf   :  { %v959_v32 = vmul.f32 %v10128_v30, %v10124_v21  ;;  %v1123_v37 = vpop.permute.xlu1 %1122  ;;  %v1595_v41 = vpop.permute.xlu0 %1594 }
 0x4c0   :  { %v1600_v43 = vsel %vm891_vm1, %v1595_v41, 0 }
 0x4c2   :  { %v10130_v31 = vpop.eup %10129 }
 0x4c3   :  { %v961_v33 = vmul.f32 %v10130_v31, %v10126_v25  ;;  %v1246_v39 = vpop.permute.xlu1 %1245  ;;  %v1714_v45 = vpop.permute.xlu0 %1713 }
 0x4c5   :  { %v962_v35 = vpack.c.bf16 %v961_v33, %v959_v32 }
 0x4c7   :  { %9108 = vmatmul.mubr.msk.bf16.vlgmr.msra.gmra.mrb[4].mxu0 %vm939_vm2, %v962_v35  ;;  %v1480_v42 = vpop.permute.xlu1 %1479 }
 0x4c8   :  { %9124 = vmatpush3.bf16.xpose.msra.mxu0 %v1131_v36  ;;  %9125 = vmatprep.mubr.msk.bf16.mxu0 %vm10392_vm0, %v10391_v24 }
 0x4c9   :  { %9135 = vmatprep.subr.bf16.mxu0 %v10391_v24 }
 0x4cb   :  { %v1593_v44 = vpop.permute.xlu1 %1592 }
 0x4cf   :  { %9126 = vmatmul.mubr.msk.bf16.vlgmr.msra.gmra.mrb[8].mxu0 %vm891_vm1, %v1123_v37 }
 0x4d0   :  { %9136 = vmatpush3.bf16.xpose.msra.mxu0 %v1131_v36  ;;  %9137 = vmatprep.mubr.msk.bf16.mxu0 %vm10392_vm0, %v10391_v24 }
 0x4d1   :  { %9147 = vmatprep.subr.bf16.mxu0 %v10391_v24 }
 0x4d7   :  { %9138 = vmatmul.mubr.msk.bf16.vlgmr.msra.gmra.mrb[12].mxu0 %vm891_vm1, %v1246_v39 }
 0x4d8   :  { %9148 = vmatpush3.bf16.xpose.msra.mxu0 %v1365_v40  ;;  %9149 = vmatprep.mubr.msk.bf16.mxu0 %vm10392_vm0, %v10391_v24 }
 0x4d9   :  { %9159 = vmatprep.subr.bf16.mxu0 %v10391_v24 }
 0x4df   :  { %9150 = vmatmul.mubr.msk.bf16.vlgmr.msra.gmra.mrb[16].mxu0 %vm891_vm1, %v10897_v54 }
 0x4e0   :  { %9160 = vmatpush3.bf16.xpose.msra.mxu0 %v1365_v40  ;;  %9161 = vmatprep.mubr.msk.bf16.mxu0 %vm10392_vm0, %v10391_v24 }
 0x4e1   :  { %9171 = vmatprep.subr.bf16.mxu0 %v10391_v24 }
 0x4e7   :  { %9162 = vmatmul.mubr.msk.bf16.vlgmr.msra.gmra.mrb[20].mxu0 %vm891_vm1, %v1480_v42 }
 0x4e8   :  { %9172 = vmatpush3.bf16.xpose.msra.mxu0 %v1600_v43  ;;  %9173 = vmatprep.mubr.msk.bf16.mxu0 %vm10392_vm0, %v10391_v24 }
 0x4e9   :  { %9183 = vmatprep.subr.bf16.mxu0 %v10391_v24 }
 0x4ef   :  { %9174 = vmatmul.mubr.msk.bf16.vlgmr.msra.gmra.mrb[24].mxu0 %vm891_vm1, %v1593_v44 }
 0x4f0   :  { %9184 = vmatpush3.bf16.xpose.msra.mxu0 %v1600_v43  ;;  %9185 = vmatprep.mubr.msk.bf16.mxu0 %vm10392_vm0, %v10391_v24 }
 0x4f7   :  { %9186 = vmatmul.mubr.msk.bf16.vlgmr.msra.gmra.mrb[28].mxu0 %vm891_vm1, %v1714_v45 }
 0x58b   :  { %v1048_v46 = vpop.f32.mrb[16].mxu1 }
 0x58c   :  { %v10981_v47 = vadd.f32 %v1048_v46, %v10922_v8  ;;  %v9115_v49 = vpop.f32.mrb[17].mxu1 }
 0x58d   :  { %v1051_v51 = vpop.f32.mrb[18].mxu1 }
 0x58e   :  { %v10984_v54 = vadd.f32 %v1051_v51, %v10927_v2  ;;  %v9116_v55 = vpop.f32.mrb[19].mxu1  ;;  %v1055_v56 = vsel %vm939_vm2, %v10981_v47, -inf }
 0x58f   :  { %1056 = vmax.xlane.f32.xlu1 %v1055_v56 }
 0x590   :  { %v1058_v57 = vsel %vm939_vm2, %v10984_v54, -inf }
 0x591   :  { %1059 = vmax.xlane.f32.xlu0 %v1058_v57 }
 0x59a   :  { %v10990_v58 = vpop.f32.mrb[4].mxu0 }
 0x59b   :  { %v9109_v59 = vpop.f32.mrb[5].mxu0 }
 0x59c   :  { %v10992_v60 = vpop.f32.mrb[6].mxu0 }
 0x59d   :  { %v9110_v61 = vpop.f32.mrb[7].mxu0 }
 0x5a2   :  { %v1167_v62 = vpop.f32.mrb[8].mxu0 }
 0x5a3   :  { %v10995_v63 = vadd.f32 %v1167_v62, %v10922_v8  ;;  %v9127_v3 = vpop.f32.mrb[9].mxu0 }
 0x5a4   :  { %v1170_v4 = vpop.f32.mrb[10].mxu0 }
 0x5a5   :  { %v10998_v6 = vadd.f32 %v1170_v4, %v10927_v2  ;;  %v9128_v1 = vpop.f32.mrb[11].mxu0  ;;  %v1174_v7 = vsel %vm939_vm2, %v10995_v63, -inf }
 0x5a6   :  { %1175 = vmax.xlane.f32.xlu0 %v1174_v7 }
 0x5a7   :  { %v1177_v0 = vsel %vm939_vm2, %v10998_v6, -inf }
 0x5aa   :  { %v1284_v5 = vpop.f32.mrb[12].mxu0  ;;  %1178 = vmax.xlane.f32.xlu0 %v1177_v0 }
 0x5ab   :  { %v11005_v9 = vadd.f32 %v1284_v5, %v10922_v8  ;;  %v9139_v10 = vpop.f32.mrb[13].mxu0 }
 0x5ac   :  { %v1287_v11 = vpop.f32.mrb[14].mxu0 }
 0x5ad   :  { %v11008_v12 = vadd.f32 %v1287_v11, %v10927_v2  ;;  %v9140_v13 = vpop.f32.mrb[15].mxu0  ;;  %v1291_v14 = vsel %vm939_vm2, %v11005_v9, -inf }
 0x5ae   :  { %1292 = vmax.xlane.f32.xlu1 %v1291_v14 }
 0x5af   :  { %v1294_v15 = vsel %vm939_vm2, %v11008_v12, -inf }
 0x5b0   :  { %1295 = vmax.xlane.f32.xlu0 %v1294_v15 }
 0x5b2   :  { %v1401_v16 = vpop.f32.mrb[16].mxu0 }
 0x5b3   :  { %v11015_v17 = vadd.f32 %v1401_v16, %v10922_v8  ;;  %v9151_v18 = vpop.f32.mrb[17].mxu0 }
 0x5b4   :  { %v1404_v19 = vpop.f32.mrb[18].mxu0 }
 0x5b5   :  { %v11018_v20 = vadd.f32 %v1404_v19, %v10927_v2  ;;  %v9152_v21 = vpop.f32.mrb[19].mxu0  ;;  %v1408_v22 = vsel %vm939_vm2, %v11015_v17, -inf }
 0x5b6   :  { %1409 = vmax.xlane.f32.xlu1 %v1408_v22 }
 0x5b7   :  { %v1411_v25 = vsel %vm939_vm2, %v11018_v20, -inf }
 0x5b8   :  { %1412 = vmax.xlane.f32.xlu0 %v1411_v25 }
 0x5ba   :  { %v1518_v26 = vpop.f32.mrb[20].mxu0 }
 0x5bb   :  { %v11025_v27 = vadd.f32 %v1518_v26, %v10922_v8  ;;  %v9163_v28 = vpop.f32.mrb[21].mxu0 }
 0x5bc   :  { %v1521_v29 = vpop.f32.mrb[22].mxu0 }
 0x5bd   :  { %v11028_v30 = vadd.f32 %v1521_v29, %v10927_v2  ;;  %v9164_v31 = vpop.f32.mrb[23].mxu0  ;;  %v1525_v32 = vsel %vm939_vm2, %v11025_v27, -inf }
 0x5be   :  { %1526 = vmax.xlane.f32.xlu1 %v1525_v32 }
 0x5bf   :  { %v1528_v33 = vsel %vm939_vm2, %v11028_v30, -inf }
 0x5c0   :  { %1529 = vmax.xlane.f32.xlu0 %v1528_v33 }
 0x5c2   :  { %v1636_v34 = vpop.f32.mrb[24].mxu0 }
 0x5c3   :  { %v11035_v35 = vadd.f32 %v1636_v34, %v10922_v8  ;;  %v9175_v36 = vpop.f32.mrb[25].mxu0 }
 0x5c4   :  { %v1639_v37 = vpop.f32.mrb[26].mxu0 }
 0x5c5   :  { %v11038_v38 = vadd.f32 %v1639_v37, %v10927_v2  ;;  %v9176_v39 = vpop.f32.mrb[27].mxu0  ;;  %v1643_v40 = vsel %vm939_vm2, %v11035_v35, -inf }
 0x5c6   :  { %1644 = vmax.xlane.f32.xlu1 %v1643_v40 }
 0x5c7   :  { %v1646_v41 = vsel %vm939_vm2, %v11038_v38, -inf }
 0x5c8   :  { %1647 = vmax.xlane.f32.xlu0 %v1646_v41 }
 0x5ca   :  { %v1752_v42 = vpop.f32.mrb[28].mxu0 }
 0x5cb   :  { %v11045_v43 = vadd.f32 %v1752_v42, %v10922_v8  ;;  %v9187_v44 = vpop.f32.mrb[29].mxu0 }
 0x5cc   :  { %v1755_v45 = vpop.f32.mrb[30].mxu0 }
 0x5cd   :  { %v11048_v46 = vadd.f32 %v1755_v45, %v10927_v2  ;;  %v9188_v49 = vpop.f32.mrb[31].mxu0  ;;  %v1759_v51 = vsel %vm939_vm2, %v11045_v43, -inf }
 0x5ce   :  { %1760 = vmax.xlane.f32.xlu1 %v1759_v51 }
 0x5cf   :  { %v1762_v55 = vsel %vm939_vm2, %v11048_v46, -inf }
 0x5d0   :  { %1763 = vmax.xlane.f32.xlu0 %v1762_v55 }
 0x61c   :  { %v1057_v56 = vpop.xlane.xlu1 %1056 }
 0x61d   :  { %v1061_v57 = vsub.f32 %v10981_v47, %v1057_v56 }
 0x61e   :  { %v1060_v59 = vpop.xlane.xlu0 %1059 }
 0x61f   :  { %v1063_v8 = vmul.f32 1.442695, %v1061_v57  ;;  %v1062_v61 = vsub.f32 %v10984_v54, %v1060_v59 }
 0x621   :  { %10131 = vpow2.f32 %v1063_v8  ;;  %v1065_v62 = vmul.f32 1.442695, %v1062_v61 }
 0x623   :  { %10133 = vpow2.f32 %v1065_v62 }
 0x62b   :  { %v11056_v2 = vpop.eup %10131 }
 0x62c   :  { %v1067_v3 = vsel %vm939_vm2, %v11056_v2, 0.0 }
 0x62d   :  { %v11060_v4 = vpop.eup %10133  ;;  %1068 = vadd.xlane.f32.xlu1 %v1067_v3 }
 0x62e   :  { %v1070_v1 = vsel %vm939_vm2, %v11060_v4, 0.0 }
 0x62f   :  { %1071 = vadd.xlane.f32.xlu0 %v1070_v1 }
 0x633   :  { %v1176_v47 = vpop.xlane.xlu0 %1175 }
 0x637   :  { %v1179_v7 = vpop.xlane.xlu0 %1178 }
 0x638   :  { %v1181_v0 = vsub.f32 %v10998_v6, %v1179_v7 }
 0x63a   :  { %v1184_v54 = vmul.f32 1.442695, %v1181_v0 }
 0x63b   :  { %v1293_v16 = vpop.xlane.xlu1 %1292 }
 0x63c   :  { %10135 = vpow2.f32 %v1184_v54 }
 0x63d   :  { %v1296_v5 = vpop.xlane.xlu0 %1295 }
 0x63e   :  { %v1298_v10 = vsub.f32 %v11008_v12, %v1296_v5  ;;  %1198 = vrot.lane.b32.xlu1 %v10865_v23, %s10393_s11  ;;  %v1180_v12 = vsub.f32 %v10995_v63, %v1176_v47 }
 0x640   :  { %v1301_v11 = vmul.f32 1.442695, %v1298_v10  ;;  %v1182_v29 = vmul.f32 1.442695, %v1180_v12 }
 0x642   :  { %10137 = vpow2.f32 %v1301_v11 }
 0x643   :  { %v1410_v19 = vpop.xlane.xlu1 %1409 }
 0x644   :  { %v1414_v63 = vsub.f32 %v11015_v17, %v1410_v19 }
 0x645   :  { %v1413_v13 = vpop.xlane.xlu0 %1412 }
 0x646   :  { %v11068_v14 = vpop.eup %10135  ;;  %v1415_v15 = vsub.f32 %v11018_v20, %v1413_v13  ;;  %v1297_v20 = vsub.f32 %v11005_v9, %v1293_v16  ;;  %v1416_v41 = vmul.f32 1.442695, %v1414_v63 }
 0x647   :  { %v1189_v18 = vsel %vm939_vm2, %v11068_v14, 0.0 }
 0x648   :  { %v1418_v6 = vmul.f32 1.442695, %v1415_v15  ;;  %1190 = vadd.xlane.f32.xlu0 %v1189_v18  ;;  %v1299_v32 = vmul.f32 1.442695, %v1297_v20 }
 0x64a   :  { %10139 = vpow2.f32 %v1418_v6 }
 0x64b   :  { %v1527_v28 = vpop.xlane.xlu1 %1526 }
 0x64c   :  { %v11073_v21 = vpop.eup %10137  ;;  %v1531_v40 = vsub.f32 %v11025_v27, %v1527_v28 }
 0x64d   :  { %v1530_v22 = vpop.xlane.xlu0 %1529  ;;  %v1306_v25 = vsel %vm939_vm2, %v11073_v21, 0.0 }
 0x64e   :  { %v1532_v26 = vsub.f32 %v11028_v30, %v1530_v22  ;;  %1307 = vadd.xlane.f32.xlu0 %v1306_v25  ;;  %v1533_v44 = vmul.f32 1.442695, %v1531_v40 }
 0x650   :  { %v1535_v31 = vmul.f32 1.442695, %v1532_v26 }
 0x652   :  { %10141 = vpow2.f32 %v1535_v31 }
 0x653   :  { %v1645_v33 = vpop.xlane.xlu1 %1644  ;;  %10143 = vpow2.f32 %v1182_v29 }
 0x654   :  { %v11080_v34 = vpop.eup %10139  ;;  %v1649_v36 = vsub.f32 %v11035_v35, %v1645_v33  ;;  %10145 = vpow2.f32 %v1299_v32 }
 0x655   :  { %v1648_v37 = vpop.xlane.xlu0 %1647  ;;  %v1423_v30 = vsel %vm939_vm2, %v11080_v34, 0.0 }
 0x656   :  { %v1651_v39 = vmul.f32 1.442695, %v1649_v36  ;;  %v1650_v9 = vsub.f32 %v11038_v38, %v1648_v37  ;;  %1424 = vadd.xlane.f32.xlu0 %v1423_v30 }
 0x658   :  { %10147 = vpow2.f32 %v1651_v39  ;;  %v1653_v42 = vmul.f32 1.442695, %v1650_v9 }
 0x65a   :  { %10149 = vpow2.f32 %v1653_v42 }
 0x65b   :  { %v1761_v45 = vpop.xlane.xlu1 %1760  ;;  %10151 = vpow2.f32 %v1416_v41 }
 0x65c   :  { %v11088_v17 = vpop.eup %10141  ;;  %v1765_v35 = vsub.f32 %v11045_v43, %v1761_v45  ;;  %10153 = vpow2.f32 %v1533_v44 }
 0x65d   :  { %v1764_v49 = vpop.xlane.xlu0 %1763  ;;  %v1540_v51 = vsel %vm939_vm2, %v11088_v17, 0.0  ;;  %v10144_v38 = vpop.eup %10143 }
 0x65e   :  { %v1767_v55 = vmul.f32 1.442695, %v1765_v35  ;;  %v1766_v56 = vsub.f32 %v11048_v46, %v1764_v49  ;;  %1541 = vadd.xlane.f32.xlu0 %v1540_v51  ;;  %v11094_v57 = vpop.eup %10145  ;;  %v1186_v59 = vsel %vm939_vm2, %v10144_v38, 0.0 }
 0x65f   :  { %v1303_v46 = vsel %vm939_vm2, %v11094_v57, 0.0 }
 0x660   :  { %10155 = vpow2.f32 %v1767_v55  ;;  %v1769_v27 = vmul.f32 1.442695, %v1766_v56 }
 0x662   :  { %v11097_v8 = vpop.eup %10147  ;;  %10157 = vpow2.f32 %v1769_v27  ;;  %1187 = vadd.xlane.f32.xlu1 %v1186_v59 }
 0x663   :  { %v1655_v43 = vsel %vm939_vm2, %v11097_v8, 0.0 }
 0x664   :  { %v11101_v61 = vpop.eup %10149  ;;  %1656 = vadd.xlane.f32.xlu0 %v1655_v43 }
 0x665   :  { %v11105_v62 = vpop.eup %10151  ;;  %v1658_v3 = vsel %vm939_vm2, %v11101_v61, 0.0 }
 0x666   :  { %1304 = vadd.xlane.f32.xlu1 %v1303_v46  ;;  %v11109_v1 = vpop.eup %10153  ;;  %v1420_v47 = vsel %vm939_vm2, %v11105_v62, 0.0 }
 0x667   :  { %v1537_v5 = vsel %vm939_vm2, %v11109_v1, 0.0 }
 0x668   :  { %1659 = vadd.xlane.f32.xlu0 %v1658_v3 }
 0x66a   :  { %v11113_v7 = vpop.eup %10155  ;;  %1421 = vadd.xlane.f32.xlu1 %v1420_v47 }
 0x66b   :  { %v1771_v0 = vsel %vm939_vm2, %v11113_v7, 0.0 }
 0x66c   :  { %v11117_v54 = vpop.eup %10157  ;;  %1772 = vadd.xlane.f32.xlu0 %v1771_v0 }
 0x66d   :  { %v1774_v10 = vsel %vm939_vm2, %v11117_v54, 0.0 }
 0x66e   :  { %1538 = vadd.xlane.f32.xlu1 %v1537_v5 }
 0x670   :  { %1775 = vadd.xlane.f32.xlu0 %v1774_v10  ;;  %v9580_v10 = vld [vmem:[%s14153_s5 + $0x14] ss:$8 sps:$4 sm:$0xff]  }
 0x67f   :  { %1431 = vrot.lane.b32.xlu1 %v10865_v23, %s10394_s26 }
 0x686   :  { %1666 = vrot.lane.b32.xlu0 %v10865_v23, %s10395_s27 }
 0x6ba   :  { %v1069_v11 = vpop.xlane.xlu1 %1068 }
 0x6bb   :  { %10159 = vrcp.f32 %v1069_v11 }
 0x6bc   :  { %v1072_v13 = vpop.xlane.xlu0 %1071 }
 0x6bd   :  { %10161 = vrcp.f32 %v1072_v13  ;;  %v9581_v13 = vld [vmem:[%s14153_s5 + $0x20] ss:$8 sps:$4 sm:$0xff]  }
 0x6be   :  { %v1199_v12 = vpop.permute.xlu1 %1198 }
 0x6c5   :  { %v10160_v15 = vpop.eup %10159 }
 0x6c6   :  { %v1074_v18 = vmul.f32 %v10160_v15, %v11056_v2 }
 0x6c7   :  { %v10162_v16 = vpop.eup %10161 }
 0x6c8   :  { %v1076_v6 = vmul.f32 %v10162_v16, %v11060_v4  ;;  %v9586_v16 = vld [vmem:[%s14153_s5 + $0x34] ss:$8 sps:$4 sm:$0xff]  }
 0x6ca   :  { %v1077_v19 = vpack.c.bf16 %v1076_v6, %v1074_v18 }
 0x6cc   :  { %9120 = vmatmul.mubr.msk.bf16.vlgmr.msra.gmra.mrb[20].mxu1 %vm939_vm2, %v1077_v19  ;;  %v9584_v19 = vld [vmem:[%s14153_s5 + $0x30] ss:$8 sps:$4 sm:$0xff]  }
 0x6cd   :  { %9130 = vmatpush3.bf16.msra.mxu1 %v1199_v12  ;;  %9131 = vmatprep.mubr.msk.bf16.mxu1 %vm10392_vm0, %v10391_v24 }
 0x6ce   :  { %9141 = vmatprep.subr.bf16.mxu1 %v10391_v24 }
 0x6d5   :  { %v1191_v23 = vpop.xlane.xlu0 %1190 }
 0x6d6   :  { %10163 = vrcp.f32 %v1191_v23  ;;  %v9587_v23 = vld [vmem:[%s14153_s5 + $0x40] ss:$8 sps:$4 sm:$0xff]  }
 0x6db   :  { %v1308_v25 = vpop.xlane.xlu0 %1307 }
 0x6e0   :  { %v10164_v4 = vpop.eup %10163 }
 0x6e1   :  { %v1195_v29 = vmul.f32 %v10164_v4, %v11068_v14 }
 0x6e3   :  { %v1425_v2 = vpop.xlane.xlu0 %1424 }
 0x6eb   :  { %v1542_v31 = vpop.xlane.xlu0 %1541 }
 0x6ef   :  { %v1188_v22 = vpop.xlane.xlu1 %1187 }
 0x6f0   :  { %10165 = vrcp.f32 %v1188_v22  ;;  %v9592_v22 = vld [vmem:[%s14153_s5 + $0x54] ss:$8 sps:$4 sm:$0xff]  }
 0x6f1   :  { %v1657_v36 = vpop.xlane.xlu0 %1656 }
 0x6f3   :  { %v1305_v26 = vpop.xlane.xlu1 %1304 }
 0x6f4   :  { %10167 = vrcp.f32 %v1305_v26  ;;  %v9595_v26 = vld [vmem:[%s14153_s5 + $0x64] ss:$8 sps:$4 sm:$0xff]  }
 0x6f5   :  { %10169 = vrcp.f32 %v1308_v25  ;;  %v1660_v9 = vpop.xlane.xlu0 %1659  ;;  %v9590_v25 = vld [vmem:[%s14153_s5 + $0x50] ss:$8 sps:$4 sm:$0xff]  }
 0x6f7   :  { %v1422_v20 = vpop.xlane.xlu1 %1421 }
 0x6f8   :  { %10171 = vrcp.f32 %v1422_v20  ;;  %v9598_v20 = vld [vmem:[%s14153_s5 + $0x74] ss:$8 sps:$4 sm:$0xff]  }
 0x6f9   :  { %10173 = vrcp.f32 %v1425_v2  ;;  %v9593_v2 = vld [vmem:[%s14153_s5 + $0x60] ss:$8 sps:$4 sm:$0xff]  }
 0x6fa   :  { %v10166_v28 = vpop.eup %10165 }
 0x6fb   :  { %v1193_v32 = vmul.f32 %v10166_v28, %v10144_v38  ;;  %v1539_v39 = vpop.xlane.xlu1 %1538 }
 0x6fc   :  { %10175 = vrcp.f32 %v1539_v39 }
 0x6fd   :  { %v1196_v33 = vpack.c.bf16 %v1195_v29, %v1193_v32  ;;  %10177 = vrcp.f32 %v1542_v31 }
 0x6fe   :  { %v10168_v63 = vpop.eup %10167  ;;  %10179 = vrcp.f32 %v1660_v9 }
 0x6ff   :  { %9132 = vmatmul.mubr.msk.bf16.vlgmr.msra.gmra.mrb[24].mxu1 %vm939_vm2, %v1196_v33  ;;  %v10170_v37 = vpop.eup %10169  ;;  %v1310_v30 = vmul.f32 %v10168_v63, %v11094_v57  ;;  %v1432_v42 = vpop.permute.xlu1 %1431  ;;  %10181 = vrcp.f32 %v1657_v36  ;;  %v9596_v33 = vld [vmem:[%s14153_s5 + $0x70] ss:$8 sps:$4 sm:$0xff]   ;;  %v9601_v63 = vld [vmem:[%s14153_s5 + $0x84] ss:$8 sps:$4 sm:$0xff]   ;;  %v9599_v36 = vld [vmem:[%s14153_s5 + $0x80] ss:$8 sps:$4 sm:$0xff]  }
 0x700   :  { %9142 = vmatpush3.bf16.msra.mxu1 %v1199_v12  ;;  %9143 = vmatprep.mubr.msk.bf16.mxu1 %vm10392_vm0, %v10391_v24  ;;  %v1312_v14 = vmul.f32 %v10170_v37, %v11073_v21  ;;  %v1773_v21 = vpop.xlane.xlu0 %1772  ;;  %v9589_v12 = vld [vmem:[%s14153_s5 + $0x44] ss:$8 sps:$4 sm:$0xff]  }
 0x701   :  { %9153 = vmatprep.subr.bf16.mxu1 %v10391_v24 }
 0x702   :  { %v1313_v40 = vpack.c.bf16 %v1312_v14, %v1310_v30  ;;  %v10172_v41 = vpop.eup %10171  ;;  %v9604_v30 = vld [vmem:[%s14153_s5 + $0x94] ss:$8 sps:$4 sm:$0xff]  }
 0x703   :  { %v10174_v44 = vpop.eup %10173  ;;  %v1427_v45 = vmul.f32 %v10172_v41, %v11105_v62  ;;  %v9602_v41 = vld [vmem:[%s14153_s5 + $0x90] ss:$8 sps:$4 sm:$0xff]  }
 0x704   :  { %v1429_v35 = vmul.f32 %v10174_v44, %v11080_v34  ;;  %v1776_v56 = vpop.xlane.xlu0 %1775  ;;  %v9607_v44 = vld [vmem:[%s14153_s5 + $0xa4] ss:$8 sps:$4 sm:$0xff]  }
 0x705   :  { %10183 = vrcp.f32 %v1776_v56  ;;  %v9613_v56 = vld [vmem:[%s14153_s5 + $0xc4] ss:$8 sps:$4 sm:$0xff]  }
 0x706   :  { %v1430_v49 = vpack.c.bf16 %v1429_v35, %v1427_v45  ;;  %v10176_v51 = vpop.eup %10175  ;;  %10185 = vrcp.f32 %v1773_v21  ;;  %v9605_v35 = vld [vmem:[%s14153_s5 + $0xa0] ss:$8 sps:$4 sm:$0xff]  }
 0x707   :  { %9144 = vmatmul.mubr.msk.bf16.vlgmr.msra.gmra.mrb[28].mxu1 %vm939_vm2, %v1313_v40  ;;  %v10178_v38 = vpop.eup %10177  ;;  %v1544_v55 = vmul.f32 %v10176_v51, %v11109_v1 }
 0x708   :  { %9154 = vmatpush3.bf16.msra.mxu1 %v1432_v42  ;;  %9155 = vmatprep.mubr.msk.bf16.mxu1 %vm10392_vm0, %v10391_v24  ;;  %v1546_v27 = vmul.f32 %v10178_v38, %v11088_v17  ;;  %v10180_v57 = vpop.eup %10179  ;;  %v1667_v59 = vpop.permute.xlu0 %1666  ;;  %v9608_v38 = vld [vmem:[%s14153_s5 + $0xb0] ss:$8 sps:$4 sm:$0xff]  }
 0x709   :  { %9165 = vmatprep.subr.bf16.mxu1 %v10391_v24  ;;  %v10182_v43 = vpop.eup %10181  ;;  %v1664_v46 = vmul.f32 %v10180_v57, %v11101_v61  ;;  %v9577_v61 = vld [vmem:[%s14153_s5 + $0x4] ss:$8 sps:$4 sm:$0xff]  }
 0x70a   :  { %v1547_v34 = vpack.c.bf16 %v1546_v27, %v1544_v55  ;;  %v1662_v62 = vmul.f32 %v10182_v43, %v11097_v8  ;;  %v9575_v8 = vld [vmem:[%s14153_s5] ss:$8 sps:$4 sm:$0xff]  }
 0x70c   :  { %v1665_v3 = vpack.c.bf16 %v1664_v46, %v1662_v62  ;;  %v9614_v62 = vld [vmem:[%s14153_s5 + $0xd0] ss:$8 sps:$4 sm:$0xff]  }
 0x70f   :  { %9156 = vmatmul.mubr.msk.bf16.vlgmr.msra.gmra.mrb[32].mxu1 %vm939_vm2, %v1430_v49  ;;  %v10184_v17 = vpop.eup %10183  ;;  %v9610_v49 = vld [vmem:[%s14153_s5 + $0xb4] ss:$8 sps:$4 sm:$0xff]  }
 0x710   :  { %9166 = vmatpush3.bf16.msra.mxu1 %v1432_v42  ;;  %9167 = vmatprep.mubr.msk.bf16.mxu1 %vm10392_vm0, %v10391_v24  ;;  %v10186_v1 = vpop.eup %10185  ;;  %v1780_v47 = vmul.f32 %v10184_v17, %v11117_v54  ;;  %v9617_v17 = vld [vmem:[%s14153_s5 + $0xe0] ss:$8 sps:$4 sm:$0xff]  }
 0x711   :  { %9177 = vmatprep.subr.bf16.mxu1 %v10391_v24  ;;  %v1778_v0 = vmul.f32 %v10186_v1, %v11113_v7  ;;  %v9583_v7 = vld [vmem:[%s14153_s5 + $0x24] ss:$8 sps:$4 sm:$0xff]  }
 0x712   :  { %v9619_v1 = vld [vmem:[%s14153_s5 + $0xe4] ss:$8 sps:$4 sm:$0xff]  }
 0x713   :  { %v1781_v5 = vpack.c.bf16 %v1780_v47, %v1778_v0 }
 0x717   :  { %9168 = vmatmul.mubr.msk.bf16.vlgmr.msra.gmra.mrb[36].mxu1 %vm939_vm2, %v1547_v34  ;;  %v9611_v34 = vld [vmem:[%s14153_s5 + $0xc0] ss:$8 sps:$4 sm:$0xff]  }
 0x718   :  { %9178 = vmatpush3.bf16.msra.mxu1 %v1667_v59  ;;  %9179 = vmatprep.mubr.msk.bf16.mxu1 %vm10392_vm0, %v10391_v24 }
 0x719   :  { %9189 = vmatprep.subr.bf16.mxu1 %v10391_v24 }
 0x71f   :  { %9180 = vmatmul.mubr.msk.bf16.vlgmr.msra.gmra.mrb[40].mxu1 %vm939_vm2, %v1665_v3 }
 0x720   :  { %9190 = vmatpush3.bf16.msra.mxu1 %v1667_v59  ;;  %9191 = vmatprep.mubr.msk.bf16.mxu1 %vm10392_vm0, %v10391_v24  ;;  %v9578_v24 = vld [vmem:[%s14153_s5 + $0x10] ss:$8 sps:$4 sm:$0xff]   ;;  %v9616_v59 = vld [vmem:[%s14153_s5 + $0xd4] ss:$8 sps:$4 sm:$0xff]  }
 0x721   :  { %2082 = vmatprep.subr.bf16.mxu1 %v9577_v61  ;;  %v9622_v61 = vld [vmem:[%s14153_s5 + $0xf4] ss:$8 sps:$4 sm:$0xff]  }
 0x727   :  { %9192 = vmatmul.mubr.msk.bf16.vlgmr.msra.gmra.mrb[44].mxu1 %vm939_vm2, %v1781_v5 }
 0x728   :  { %2083 = vmatpush1.bf16.msra.mxu1 %v9575_v8 }
 0x729   :  { %2084 = vmatprep.subr.bf16.mxu1 %v9580_v10  ;;  %v9620_v10 = vld [vmem:[%s14153_s5 + $0xf0] ss:$8 sps:$4 sm:$0xff]  }
 0x72c   :  { %2085 = vmatpush1.bf16.msra.mxu1 %v9578_v24 }
 0x72d   :  { %2086 = vmatprep.subr.bf16.mxu1 %v9583_v7 }
 0x730   :  { %2087 = vmatpush1.bf16.msra.mxu1 %v9581_v13 }
 0x731   :  { %2088 = vmatprep.subr.bf16.mxu1 %v9586_v16 }
 0x734   :  { %2089 = vmatpush1.bf16.msra.mxu1 %v9584_v19 }
 0x735   :  { %2090 = vmatprep.subr.bf16.mxu1 %v9589_v12 }
 0x738   :  { %2091 = vmatpush1.bf16.msra.mxu1 %v9587_v23 }
 0x739   :  { %2092 = vmatprep.subr.bf16.mxu1 %v9592_v22 }
 0x73c   :  { %2093 = vmatpush1.bf16.msra.mxu1 %v9590_v25 }
 0x73d   :  { %2094 = vmatprep.subr.bf16.mxu1 %v9595_v26 }
 0x740   :  { %2095 = vmatpush1.bf16.msra.mxu1 %v9593_v2 }
 0x741   :  { %2096 = vmatprep.subr.bf16.mxu1 %v9598_v20 }
 0x744   :  { %2097 = vmatpush1.bf16.msra.mxu1 %v9596_v33 }
 0x745   :  { %2098 = vmatprep.subr.bf16.mxu1 %v9601_v63 }
 0x748   :  { %2099 = vmatpush1.bf16.msra.mxu1 %v9599_v36 }
 0x749   :  { %2100 = vmatprep.subr.bf16.mxu1 %v9604_v30 }
 0x74c   :  { %2101 = vmatpush1.bf16.msra.mxu1 %v9602_v41 }
 0x74d   :  { %2102 = vmatprep.subr.bf16.mxu1 %v9607_v44 }
 0x750   :  { %2103 = vmatpush1.bf16.msra.mxu1 %v9605_v35 }
 0x751   :  { %2104 = vmatprep.subr.bf16.mxu1 %v9610_v49  ;;  %v2168_v49 = vld [vmem:[%s14160_s12 + $0x18] sm:$0xff] }
 0x754   :  { %2105 = vmatpush1.bf16.msra.mxu1 %v9608_v38 }
 0x755   :  { %2106 = vmatprep.subr.bf16.mxu1 %v9613_v56  ;;  %v2173_v56 = vld [vmem:[%s14160_s12 + $0x40] sm:$0xff] }
 0x758   :  { %2107 = vmatpush1.bf16.msra.mxu1 %v9611_v34 }
 0x759   :  { %2108 = vmatprep.subr.bf16.mxu1 %v9616_v59 }
 0x75c   :  { %2109 = vmatpush1.bf16.msra.mxu1 %v9614_v62  ;;  %v2181_v62 = vld [vmem:[%s14160_s12 + $0x80] sm:$0xff] }
 0x75d   :  { %2110 = vmatprep.subr.bf16.mxu1 %v9619_v1  ;;  %v2184_v1 = vld [vmem:[%s14160_s12 + $0x98] sm:$0xff] }
 0x760   :  { %2111 = vmatpush1.bf16.msra.mxu1 %v9617_v17  ;;  %v2185_v17 = vld [vmem:[%s14160_s12 + $0xa0] sm:$0xff] }
 0x761   :  { %2112 = vmatprep.subr.bf16.mxu1 %v9622_v61 }
 0x764   :  { %2113 = vmatpush1.bf16.msra.mxu1 %v9620_v10  ;;  %v2189_v10 = vld [vmem:[%s14160_s12 + $0xc0] sm:$0xff] }
 0x79f   :  { %v1115_v54 = vpop.f32.mrb[20].mxu1 }
 0x7a0   :  { %v9121_v11 = vpop.f32.mrb[21].mxu1 }
 0x7a1   :  { %v1118_v15 = vpop.f32.mrb[22].mxu1 }
 0x7a2   :  { %v9387_v18 = vpack.i.bf16 %v1118_v15, %v1115_v54  ;;  %v9122_v6 = vpop.f32.mrb[23].mxu1 }
 0x7a4   :  { %9388 = vrot.lane.b32.xlu1 %v9387_v18, %s10395_s27 }
 0x7d2   :  { %v1238_v4 = vpop.f32.mrb[24].mxu1 }
 0x7d3   :  { %v9133_v28 = vpop.f32.mrb[25].mxu1 }
 0x7d4   :  { %v1241_v29 = vpop.f32.mrb[26].mxu1 }
 0x7d5   :  { %v9392_v31 = vpack.i.bf16 %v1241_v29, %v1238_v4  ;;  %v9134_v32 = vpop.f32.mrb[27].mxu1 }
 0x7d7   :  { %9393 = vrot.lane.b32.xlu1 %v9392_v31, %s10394_s26 }
 0x7da   :  { %v1351_v37 = vpop.f32.mrb[28].mxu1 }
 0x7db   :  { %v9145_v39 = vpop.f32.mrb[29].mxu1 }
 0x7dc   :  { %v1354_v14 = vpop.f32.mrb[30].mxu1 }
 0x7dd   :  { %v9412_v9 = vpack.i.bf16 %v1354_v14, %v1351_v37  ;;  %v9146_v40 = vpop.f32.mrb[31].mxu1 }
 0x7e2   :  { %v1471_v42 = vpop.f32.mrb[32].mxu1 }
 0x7e3   :  { %v9157_v45 = vpop.f32.mrb[33].mxu1 }
 0x7e4   :  { %v1474_v21 = vpop.f32.mrb[34].mxu1 }
 0x7e5   :  { %v9158_v51 = vpop.f32.mrb[35].mxu1 }
 0x7ea   :  { %v1585_v55 = vpop.f32.mrb[36].mxu1 }
 0x7eb   :  { %v9169_v27 = vpop.f32.mrb[37].mxu1 }
 0x7ec   :  { %v1588_v57 = vpop.f32.mrb[38].mxu1  ;;  %v2177_v27 = vld [vmem:[%s14160_s12 + $0x60] sm:$0xff] }
 0x7ed   :  { %v9397_v43 = vpack.i.bf16 %v1588_v57, %v1585_v55  ;;  %v9170_v46 = vpop.f32.mrb[39].mxu1  ;;  %v2172_v55 = vld [vmem:[%s14160_s12 + $0x38] sm:$0xff]  ;;  %v8281_v59 = vcombine.high %v2173_v56, %v2177_v27 }
 0x7ee   :  { %v8278_v34 = vcombine.low %v2168_v49, %v2172_v55  ;;  %v8279_v57 = vcombine.high %v2168_v49, %v2172_v55  ;;  %v2180_v46 = vld [vmem:[%s14160_s12 + $0x78] sm:$0xff]  ;;  %v2229_v49 = vld [vmem:[%s14160_s12 + $0x200] sm:$0xff] }
 0x7ef   :  { %9398 = vrot.lane.b32.xlu1 %v9397_v43, %s10395_s27  ;;  %v2176_v43 = vld [vmem:[%s14160_s12 + $0x58] sm:$0xff] }
 0x7f0   :  { %3064 = vmatprep.subr.bf16.mxu0 %v8279_v57  ;;  %v2236_v55 = vld [vmem:[%s14160_s12 + $0x238] sm:$0xff] }
 0x7f1   :  { %3065 = vmatpush1.bf16.msra.mxu0 %v8278_v34 }
 0x7f2   :  { %v1706_v3 = vpop.f32.mrb[40].mxu1 }
 0x7f3   :  { %v9181_v47 = vpop.f32.mrb[41].mxu1 }
 0x7f4   :  { %v1709_v0 = vpop.f32.mrb[42].mxu1  ;;  %v2188_v47 = vld [vmem:[%s14160_s12 + $0xb8] sm:$0xff] }
 0x7f5   :  { %v9402_v5 = vpack.i.bf16 %v1709_v0, %v1706_v3  ;;  %v9182_v8 = vpop.f32.mrb[43].mxu1  ;;  %v8287_v3 = vcombine.high %v2176_v43, %v2180_v46  ;;  %v8280_v0 = vcombine.low %v2173_v56, %v2177_v27  ;;  %v8295_v61 = vcombine.high %v2184_v1, %v2188_v47 }
 0x7f6   :  { %v8289_v8 = vcombine.high %v2181_v62, %v2185_v17 }
 0x7f7   :  { %9403 = vrot.lane.b32.xlu1 %v9402_v5, %s10394_s26  ;;  %v8286_v5 = vcombine.low %v2176_v43, %v2180_v46  ;;  %3066 = vmatprep.subr.bf16.mxu0 %v8287_v3  ;;  %v2241_v43 = vld [vmem:[%s14160_s12 + $0x260] sm:$0xff]  ;;  %v2240_v46 = vld [vmem:[%s14160_s12 + $0x258] sm:$0xff] }
 0x7f9   :  { %3067 = vmatpush1.bf16.msra.mxu0 %v8286_v5  ;;  %v2249_v5 = vld [vmem:[%s14160_s12 + $0x2a0] sm:$0xff] }
 0x7fa   :  { %v1819_v24 = vpop.f32.mrb[44].mxu1  ;;  %3068 = vmatprep.subr.bf16.mxu0 %v8295_v61 }
 0x7fb   :  { %v9193_v7 = vpop.f32.mrb[45].mxu1 }
 0x7fc   :  { %v1822_v54 = vpop.f32.mrb[46].mxu1  ;;  %v2192_v7 = vld [vmem:[%s14160_s12 + $0xd8] sm:$0xff] }
 0x7fd   :  { %v9407_v11 = vpack.i.bf16 %v1822_v54, %v1819_v24  ;;  %v9194_v13 = vpop.f32.mrb[47].mxu1  ;;  %v2193_v24 = vld [vmem:[%s14160_s12 + $0xe0] sm:$0xff]  ;;  %v2196_v54 = vld [vmem:[%s14160_s12 + $0xf8] sm:$0xff] }
 0x7fe   :  { %v8294_v13 = vcombine.low %v2184_v1, %v2188_v47 }
 0x7ff   :  { %9408 = vrot.lane.b32.xlu1 %v9407_v11, %s10393_s11  ;;  %v8288_v11 = vcombine.low %v2181_v62, %v2185_v17  ;;  %v2244_v62 = vld [vmem:[%s14160_s12 + $0x278] sm:$0xff] }
 0x800   :  { %3069 = vmatpush1.bf16.msra.mxu0 %v8294_v13  ;;  %v8351_v47 = vcombine.high %v2240_v46, %v2244_v62  ;;  %v8350_v61 = vcombine.low %v2240_v46, %v2244_v62  ;;  %v2284_v46 = vld [vmem:[%s14160_s12 + $0x3b8] sm:$0xff] }
 0x803   :  { %9413 = vrot.lane.b32.xlu1 %v9412_v9, %s10393_s11 }
 0x816   :  { %v9389_v15 = vpop.permute.xlu1 %9388 }
 0x817   :  { %v9391_v25 = vunpack.i.h.bf16 %v9389_v15  ;;  %v9390_v26 = vunpack.i.l.bf16 %v9389_v15  ;;  %v8297_v15 = vcombine.high %v2189_v10, %v2193_v24 }
 0x819   :  { %v1875_v14 = vsel %vm891_vm1, %v10992_v60, %v9391_v25  ;;  %v1874_v9 = vsel %vm891_vm1, %v10990_v58, %v9390_v26  ;;  %v2165_v60 = vld [vmem:[%s14160_s12] sm:$0xff] }
 0x81a   :  { %v2169_v58 = vld [vmem:[%s14160_s12 + $0x20] sm:$0xff] }
 0x81b   :  { %v8272_v51 = vcombine.low %v2165_v60, %v2169_v58  ;;  %v8273_v38 = vcombine.high %v2165_v60, %v2169_v58 }
 0x81d   :  { %2935 = vmatprep.subr.bf16.mxu1 %v8273_v38  ;;  %v2232_v38 = vld [vmem:[%s14160_s12 + $0x218] sm:$0xff] }
 0x81e   :  { %v8343_v57 = vcombine.high %v2232_v38, %v2236_v55  ;;  %v8342_v17 = vcombine.low %v2232_v38, %v2236_v55  ;;  %v2272_v38 = vld [vmem:[%s14160_s12 + $0x358] sm:$0xff] }
 0x81f   :  { %v2276_v55 = vld [vmem:[%s14160_s12 + $0x378] sm:$0xff] }
 0x820   :  { %v8382_v62 = vcombine.low %v2272_v38, %v2276_v55 }
 0x849   :  { %v9394_v16 = vpop.permute.xlu1 %9393 }
 0x84a   :  { %v9396_v31 = vunpack.i.h.bf16 %v9394_v16  ;;  %v9395_v32 = vunpack.i.l.bf16 %v9394_v16  ;;  %v8303_v16 = vcombine.high %v2192_v7, %v2196_v54 }
 0x84c   :  { %v1877_v44 = vsel %vm1876_vm3, %v1874_v9, %v9395_v32  ;;  %3070 = vmatprep.subr.bf16.mxu0 %v8303_v16 }
 0x861   :  { %v9399_v18 = vpop.permute.xlu1 %9398 }
 0x862   :  { %v9401_v19 = vunpack.i.h.bf16 %v9399_v18  ;;  %v9400_v12 = vunpack.i.l.bf16 %v9399_v18  ;;  %v2197_v18 = vld [vmem:[%s14160_s12 + $0x100] sm:$0xff] }
 0x864   :  { %v1883_v4 = vsel %vm891_vm1, %v1474_v21, %v9401_v19  ;;  %v1882_v20 = vsel %vm891_vm1, %v1471_v42, %v9400_v12  ;;  %v1878_v42 = vsel %vm1876_vm3, %v1875_v14, %v9396_v31  ;;  %v2200_v19 = vld [vmem:[%s14160_s12 + $0x118] sm:$0xff] }
 0x865   :  { %v2204_v12 = vld [vmem:[%s14160_s12 + $0x138] sm:$0xff] }
 0x866   :  { %v8311_v26 = vcombine.high %v2200_v19, %v2204_v12  ;;  %v8310_v31 = vcombine.low %v2200_v19, %v2204_v12 }
 0x869   :  { %v9404_v6 = vpop.permute.xlu1 %9403 }
 0x86a   :  { %v9406_v23 = vunpack.i.h.bf16 %v9404_v6  ;;  %v9405_v22 = vunpack.i.l.bf16 %v9404_v6  ;;  %v2201_v6 = vld [vmem:[%s14160_s12 + $0x120] sm:$0xff] }
 0x86b   :  { %v8305_v25 = vcombine.high %v2197_v18, %v2201_v6 }
 0x86c   :  { %v1885_v33 = vsel %vm1876_vm3, %v1883_v4, %v9406_v23  ;;  %v1884_v63 = vsel %vm1876_vm3, %v1882_v20, %v9405_v22  ;;  %v8296_v23 = vcombine.low %v2189_v10, %v2193_v24  ;;  %v8302_v22 = vcombine.low %v2192_v7, %v2196_v54  ;;  %v2209_v4 = vld [vmem:[%s14160_s12 + $0x160] sm:$0xff]  ;;  %v2208_v20 = vld [vmem:[%s14160_s12 + $0x158] sm:$0xff] }
 0x86d   :  { %v10363_v54 = vld [vmem:[%s14192_s20] sm:$0xff] }
 0x86e   :  { %3071 = vmatpush1.bf16.msra.mxu0 %v8302_v22  ;;  %v10366_v22 = vld [vmem:[%s14192_s20 + $0x18] sm:$0xff] }
 0x86f   :  { %3072 = vmatprep.subr.bf16.mxu0 %v8311_v26 }
 0x871   :  { %v9409_v2 = vpop.permute.xlu1 %9408 }
 0x872   :  { %v9411_v28 = vunpack.i.h.bf16 %v9409_v2  ;;  %v9410_v29 = vunpack.i.l.bf16 %v9409_v2  ;;  %v2205_v2 = vld [vmem:[%s14160_s12 + $0x140] sm:$0xff]  ;;  %3073 = vmatpush1.bf16.msra.mxu0 %v8310_v31  ;;  %v2252_v31 = vld [vmem:[%s14160_s12 + $0x2b8] sm:$0xff] }
 0x873   :  { %v8313_v32 = vcombine.high %v2205_v2, %v2209_v4 }
 0x874   :  { %v1886_v36 = vsel %vm1879_vm4, %v1884_v63, %v9410_v29  ;;  %v1887_v37 = vsel %vm1879_vm4, %v1885_v33, %v9411_v28  ;;  %v2212_v28 = vld [vmem:[%s14160_s12 + $0x178] sm:$0xff]  ;;  %v8304_v29 = vcombine.low %v2197_v18, %v2201_v6  ;;  %v2213_v63 = vld [vmem:[%s14160_s12 + $0x180] sm:$0xff]  ;;  %v10365_v6 = vld [vmem:[%s14192_s20 + $0x10] sm:$0xff] }
 0x875   :  { %v9414_v30 = vpop.permute.xlu1 %9413  ;;  %v1921_v39 = vpack.c.bf16 %v1887_v37, %v1886_v36  ;;  %v8319_v33 = vcombine.high %v2208_v20, %v2212_v28  ;;  %v2217_v36 = vld [vmem:[%s14160_s12 + $0x1a0] sm:$0xff]  ;;  %v2216_v37 = vld [vmem:[%s14160_s12 + $0x198] sm:$0xff]  ;;  %v8318_v14 = vcombine.low %v2208_v20, %v2212_v28 }
 0x876   :  { %v9416_v40 = vunpack.i.h.bf16 %v9414_v30  ;;  %v9415_v41 = vunpack.i.l.bf16 %v9414_v30  ;;  %v2220_v30 = vld [vmem:[%s14160_s12 + $0x1b8] sm:$0xff]  ;;  %v8321_v9 = vcombine.high %v2213_v63, %v2217_v36 }
 0x877   :  { %2114 = vmatprep.mubr.bf16.mxu1 %v1921_v39  ;;  %v8312_v39 = vcombine.low %v2205_v2, %v2209_v4  ;;  %3074 = vmatprep.subr.bf16.mxu0 %v8319_v33 }
 0x878   :  { %v1881_v45 = vsel %vm1879_vm4, %v1878_v42, %v9416_v40  ;;  %v1880_v35 = vsel %vm1879_vm4, %v1877_v44, %v9415_v41  ;;  %v8327_v40 = vcombine.high %v2216_v37, %v2220_v30  ;;  %v2221_v41 = vld [vmem:[%s14160_s12 + $0x1c0] sm:$0xff]  ;;  %v2224_v44 = vld [vmem:[%s14160_s12 + $0x1d8] sm:$0xff]  ;;  %3075 = vmatpush1.bf16.msra.mxu0 %v8318_v14 }
 0x879   :  { %v1920_v21 = vpack.c.bf16 %v1881_v45, %v1880_v35  ;;  %v2225_v42 = vld [vmem:[%s14160_s12 + $0x1e0] sm:$0xff]  ;;  %v2228_v45 = vld [vmem:[%s14160_s12 + $0x1f8] sm:$0xff]  ;;  %v8320_v35 = vcombine.low %v2213_v63, %v2217_v36 }
 0x87a   :  { %v8329_v60 = vcombine.high %v2221_v41, %v2225_v42  ;;  %3076 = vmatprep.subr.bf16.mxu0 %v8327_v40  ;;  %v8335_v58 = vcombine.high %v2224_v44, %v2228_v45  ;;  %v8328_v56 = vcombine.low %v2221_v41, %v2225_v42  ;;  %v8334_v27 = vcombine.low %v2224_v44, %v2228_v45  ;;  %v2253_v63 = vld [vmem:[%s14160_s12 + $0x2c0] sm:$0xff] }
 0x87b   :  { %2115 = vmatmul.mubr.bf16.vlgmr.msra.gmra.mrb[48].mxu1 %v1920_v21  ;;  %v8326_v21 = vcombine.low %v2216_v37, %v2220_v30  ;;  %v2257_v36 = vld [vmem:[%s14160_s12 + $0x2e0] sm:$0xff]  ;;  %v2256_v30 = vld [vmem:[%s14160_s12 + $0x2d8] sm:$0xff] }
 0x87c   :  { %2936 = vmatpush1.bf16.msra.mxu1 %v8272_v51  ;;  %v2233_v51 = vld [vmem:[%s14160_s12 + $0x220] sm:$0xff]  ;;  %v8361_v37 = vcombine.high %v2253_v63, %v2257_v36  ;;  %v8360_v14 = vcombine.low %v2253_v63, %v2257_v36 }
 0x87d   :  { %2937 = vmatprep.subr.bf16.mxu1 %v8281_v59  ;;  %3077 = vmatpush1.bf16.msra.mxu0 %v8326_v21  ;;  %v8337_v34 = vcombine.high %v2229_v49, %v2233_v51  ;;  %v2237_v59 = vld [vmem:[%s14160_s12 + $0x240] sm:$0xff]  ;;  %v8336_v3 = vcombine.low %v2229_v49, %v2233_v51  ;;  %v2268_v21 = vld [vmem:[%s14160_s12 + $0x338] sm:$0xff] }
 0x87e   :  { %3078 = vmatprep.subr.bf16.mxu0 %v8335_v58  ;;  %v8345_v1 = vcombine.high %v2237_v59, %v2241_v43  ;;  %v2261_v41 = vld [vmem:[%s14160_s12 + $0x300] sm:$0xff] }
 0x87f   :  { %v2265_v42 = vld [vmem:[%s14160_s12 + $0x320] sm:$0xff] }
 0x880   :  { %2938 = vmatpush1.bf16.msra.mxu1 %v8280_v0  ;;  %v2245_v0 = vld [vmem:[%s14160_s12 + $0x280] sm:$0xff]  ;;  %v8368_v44 = vcombine.low %v2261_v41, %v2265_v42  ;;  %v8369_v45 = vcombine.high %v2261_v41, %v2265_v42  ;;  %v2178_v41 = vld [vmem:[%s14160_s12 + $0x68] sm:$0xff] }
 0x881   :  { %2939 = vmatprep.subr.bf16.mxu1 %v8289_v8  ;;  %3079 = vmatpush1.bf16.msra.mxu0 %v8334_v27  ;;  %v8344_v8 = vcombine.low %v2237_v59, %v2241_v43  ;;  %v8353_v10 = vcombine.high %v2245_v0, %v2249_v5  ;;  %v8352_v24 = vcombine.low %v2245_v0, %v2249_v5  ;;  %v2273_v51 = vld [vmem:[%s14160_s12 + $0x360] sm:$0xff]  ;;  %v2280_v59 = vld [vmem:[%s14160_s12 + $0x398] sm:$0xff] }
 0x882   :  { %3080 = vmatprep.subr.bf16.mxu0 %v8343_v57  ;;  %v8383_v27 = vcombine.high %v2272_v38, %v2276_v55  ;;  %v2281_v57 = vld [vmem:[%s14160_s12 + $0x3a0] sm:$0xff]  ;;  %v2288_v0 = vld [vmem:[%s14160_s12 + $0x3d8] sm:$0xff] }
 0x883   :  { %v2292_v5 = vld [vmem:[%s14160_s12 + $0x3f8] sm:$0xff] }
 0x884   :  { %2940 = vmatpush1.bf16.msra.mxu1 %v8288_v11 }
 0x885   :  { %2941 = vmatprep.subr.bf16.mxu1 %v8297_v15  ;;  %3081 = vmatpush1.bf16.msra.mxu0 %v8342_v17  ;;  %v10364_v15 = vld [vmem:[%s14192_s20 + $0x8] sm:$0xff]  ;;  %v8391_v17 = vcombine.high %v2280_v59, %v2284_v46 }
 0x886   :  { %3082 = vmatprep.subr.bf16.mxu0 %v8351_v47  ;;  %v2289_v47 = vld [vmem:[%s14160_s12 + $0x3e0] sm:$0xff] }
 0x888   :  { %2942 = vmatpush1.bf16.msra.mxu1 %v8296_v23 }
 0x889   :  { %2943 = vmatprep.subr.bf16.mxu1 %v8305_v25  ;;  %3083 = vmatpush1.bf16.msra.mxu0 %v8350_v61  ;;  %v8390_v61 = vcombine.low %v2280_v59, %v2284_v46  ;;  %v2206_v59 = vld [vmem:[%s14160_s12 + $0x148] sm:$0xff] }
 0x88c   :  { %2944 = vmatpush1.bf16.msra.mxu1 %v8304_v29  ;;  %v2248_v29 = vld [vmem:[%s14160_s12 + $0x298] sm:$0xff] }
 0x88d   :  { %2945 = vmatprep.subr.bf16.mxu1 %v8313_v32  ;;  %v8359_v32 = vcombine.high %v2248_v29, %v2252_v31  ;;  %v8358_v33 = vcombine.low %v2248_v29, %v2252_v31 }
 0x88f   :  { %3084 = vmatprep.subr.bf16.mxu0 %v8359_v32 }
 0x890   :  { %2946 = vmatpush1.bf16.msra.mxu1 %v8312_v39  ;;  %3085 = vmatpush1.bf16.msra.mxu0 %v8358_v33  ;;  %v2260_v39 = vld [vmem:[%s14160_s12 + $0x2f8] sm:$0xff] }
 0x891   :  { %2947 = vmatprep.subr.bf16.mxu1 %v8321_v9  ;;  %v8367_v9 = vcombine.high %v2256_v30, %v2260_v39  ;;  %v8366_v40 = vcombine.low %v2256_v30, %v2260_v39 }
 0x893   :  { %3086 = vmatprep.subr.bf16.mxu0 %v8367_v9 }
 0x894   :  { %2948 = vmatpush1.bf16.msra.mxu1 %v8320_v35  ;;  %3087 = vmatpush1.bf16.msra.mxu0 %v8366_v40  ;;  %v2264_v35 = vld [vmem:[%s14160_s12 + $0x318] sm:$0xff]  ;;  %v2174_v40 = vld [vmem:[%s14160_s12 + $0x48] sm:$0xff] }
 0x895   :  { %2949 = vmatprep.subr.bf16.mxu1 %v8329_v60  ;;  %v2269_v60 = vld [vmem:[%s14160_s12 + $0x340] sm:$0xff]  ;;  %v8374_v58 = vcombine.low %v2264_v35, %v2268_v21  ;;  %v8375_v49 = vcombine.high %v2264_v35, %v2268_v21  ;;  %v2182_v35 = vld [vmem:[%s14160_s12 + $0x88] sm:$0xff] }
 0x896   :  { %v8376_v43 = vcombine.low %v2269_v60, %v2273_v51  ;;  %v2186_v21 = vld [vmem:[%s14160_s12 + $0xa8] sm:$0xff] }
 0x897   :  { %3088 = vmatprep.subr.bf16.mxu0 %v8375_v49  ;;  %v2190_v49 = vld [vmem:[%s14160_s12 + $0xc8] sm:$0xff]  ;;  %v8290_v38 = vcombine.low %v2182_v35, %v2186_v21 }
 0x898   :  { %2950 = vmatpush1.bf16.msra.mxu1 %v8328_v56  ;;  %v8377_v56 = vcombine.high %v2269_v60, %v2273_v51  ;;  %3089 = vmatpush1.bf16.msra.mxu0 %v8374_v58  ;;  %v8282_v60 = vcombine.low %v2174_v40, %v2178_v41  ;;  %v8291_v58 = vcombine.high %v2182_v35, %v2186_v21  ;;  %v2194_v51 = vld [vmem:[%s14160_s12 + $0xe8] sm:$0xff] }
 0x899   :  { %2951 = vmatprep.subr.bf16.mxu1 %v8337_v34  ;;  %v2277_v34 = vld [vmem:[%s14160_s12 + $0x380] sm:$0xff]  ;;  %3090 = vmatprep.subr.bf16.mxu0 %v8383_v27  ;;  %v8299_v55 = vcombine.high %v2190_v49, %v2194_v51  ;;  %v2202_v27 = vld [vmem:[%s14160_s12 + $0x128] sm:$0xff] }
 0x89c   :  { %2952 = vmatpush1.bf16.msra.mxu1 %v8336_v3  ;;  %v8385_v3 = vcombine.high %v2277_v34, %v2281_v57  ;;  %3091 = vmatpush1.bf16.msra.mxu0 %v8382_v62 }
 0x89d   :  { %2953 = vmatprep.subr.bf16.mxu1 %v8345_v1  ;;  %v2285_v1 = vld [vmem:[%s14160_s12 + $0x3c0] sm:$0xff]  ;;  %3092 = vmatprep.subr.bf16.mxu0 %v8391_v17  ;;  %v2218_v17 = vld [vmem:[%s14160_s12 + $0x1a8] sm:$0xff] }
 0x8a0   :  { %2954 = vmatpush1.bf16.msra.mxu1 %v8344_v8  ;;  %v8384_v8 = vcombine.low %v2277_v34, %v2281_v57  ;;  %3093 = vmatpush1.bf16.msra.mxu0 %v8390_v61  ;;  %v8298_v34 = vcombine.low %v2190_v49, %v2194_v51 }
 0x8a1   :  { %2955 = vmatprep.subr.bf16.mxu1 %v8353_v10  ;;  %v8393_v10 = vcombine.high %v2285_v1, %v2289_v47 }
 0x8a4   :  { %2956 = vmatpush1.bf16.msra.mxu1 %v8352_v24  ;;  %v8399_v24 = vcombine.high %v2288_v0, %v2292_v5 }
 0x8a5   :  { %2957 = vmatprep.subr.bf16.mxu1 %v8361_v37 }
 0x8a6   :  { %3094 = vmatprep.subr.bf16.mxu0 %v8399_v24  ;;  %v2234_v24 = vld [vmem:[%s14160_s12 + $0x228] sm:$0xff] }
 0x8a8   :  { %2958 = vmatpush1.bf16.msra.mxu1 %v8360_v14 }
 0x8a9   :  { %2959 = vmatprep.subr.bf16.mxu1 %v8369_v45  ;;  %v8283_v45 = vcombine.high %v2174_v40, %v2178_v41  ;;  %v2286_v41 = vld [vmem:[%s14160_s12 + $0x3c8] sm:$0xff] }
 0x8ac   :  { %2960 = vmatpush1.bf16.msra.mxu1 %v8368_v44 }
 0x8ad   :  { %2961 = vmatprep.subr.bf16.mxu1 %v8377_v56  ;;  %v2198_v56 = vld [vmem:[%s14160_s12 + $0x108] sm:$0xff] }
 0x8ae   :  { %v8307_v57 = vcombine.high %v2198_v56, %v2202_v27  ;;  %v8306_v46 = vcombine.low %v2198_v56, %v2202_v27 }
 0x8b0   :  { %2962 = vmatpush1.bf16.msra.mxu1 %v8376_v43  ;;  %v2210_v43 = vld [vmem:[%s14160_s12 + $0x168] sm:$0xff] }
 0x8b1   :  { %2963 = vmatprep.subr.bf16.mxu1 %v8385_v3  ;;  %v8315_v62 = vcombine.high %v2206_v59, %v2210_v43  ;;  %v2214_v3 = vld [vmem:[%s14160_s12 + $0x188] sm:$0xff] }
 0x8b4   :  { %2964 = vmatpush1.bf16.msra.mxu1 %v8384_v8  ;;  %v8322_v8 = vcombine.low %v2214_v3, %v2218_v17 }
 0x8b5   :  { %2965 = vmatprep.subr.bf16.mxu1 %v8393_v10  ;;  %v2230_v10 = vld [vmem:[%s14160_s12 + $0x208] sm:$0xff] }
 0x94e   :  { %v2116_v7 = vpop.f32.mrb[48].mxu1 }
 0x94f   :  { %v11409_v11 = vadd.f32 %v10363_v54, %v2116_v7  ;;  %v2118_v13 = vpop.f32.mrb[49].mxu1  ;;  %v8392_v7 = vcombine.low %v2285_v1, %v2289_v47  ;;  %v8398_v54 = vcombine.low %v2288_v0, %v2292_v5  ;;  %v8314_v1 = vcombine.low %v2206_v59, %v2210_v43  ;;  %v2222_v0 = vld [vmem:[%s14160_s12 + $0x1c8] sm:$0xff] }
 0x950   :  { %v11414_v16 = vadd.f32 %v10364_v15, %v2118_v13  ;;  %v2120_v18 = vpop.f32.mrb[50].mxu1  ;;  %v2166_v13 = vld [vmem:[%s14160_s12 + $0x8] sm:$0xff]  ;;  %v8323_v47 = vcombine.high %v2214_v3, %v2218_v17 }
 0x951   :  { %v11419_v19 = vadd.f32 %v10365_v6, %v2120_v18  ;;  %v2122_v12 = vpop.f32.mrb[51].mxu1  ;;  %v2130_v23 = vmul.f32 %v11409_v11, %v11409_v11  ;;  %2966 = vmatpush1.bf16.msra.mxu1 %v8392_v7  ;;  %v2170_v15 = vld [vmem:[%s14160_s12 + $0x28] sm:$0xff]  ;;  %3095 = vmatpush1.bf16.msra.mxu0 %v8398_v54  ;;  %v8339_v54 = vcombine.high %v2230_v10, %v2234_v24 }
 0x952   :  { %v11426_v25 = vadd.f32 %v10366_v22, %v2122_v12  ;;  %v2131_v26 = vmul.f32 %v11414_v16, %v11414_v16  ;;  %v8275_v18 = vcombine.high %v2166_v13, %v2170_v15  ;;  %v8274_v6 = vcombine.low %v2166_v13, %v2170_v15  ;;  %v2226_v5 = vld [vmem:[%s14160_s12 + $0x1e8] sm:$0xff] }
 0x953   :  { %v2132_v2 = vmul.f32 %v11419_v19, %v11419_v19  ;;  %v8331_v61 = vcombine.high %v2222_v0, %v2226_v5  ;;  %v8330_v7 = vcombine.low %v2222_v0, %v2226_v5  ;;  %v2238_v13 = vld [vmem:[%s14160_s12 + $0x248] sm:$0xff]  ;;  %v2207_v5 = vld [vmem:[%s14160_s12 + $0x150] sm:$0xff] }
 0x954   :  { %v2134_v4 = vadd.f32 %v2131_v26, %v2130_v23  ;;  %v2133_v20 = vmul.f32 %v11426_v25, %v11426_v25  ;;  %2978 = vmatprep.subr.bf16.mxu1 %v8275_v18  ;;  %v2242_v15 = vld [vmem:[%s14160_s12 + $0x268] sm:$0xff]  ;;  %v8338_v18 = vcombine.low %v2230_v10, %v2234_v24  ;;  %v2215_v24 = vld [vmem:[%s14160_s12 + $0x190] sm:$0xff] }
 0x956   :  { %2135 = vadd.xlane.f32.xlu0 %v2134_v4  ;;  %v2137_v28 = vadd.f32 %v2133_v20, %v2132_v2  ;;  %v2129_v20 = vld [vmem:[%s14196_s24] sm:$0x3] }
 0x957   :  { %v2158_v31 = vrot.slane %v2129_v20, %v10640_v53  ;;  %v2154_v33 = vrot.slane %v2129_v20, %v10637_v52 }
 0x958   :  { %2138 = vadd.xlane.f32.xlu1 %v2137_v28 }
 0x9e3   :  { %v2136_v12 = vpop.xlane.xlu0 %2135 }
 0x9e4   :  { %v2140_v23 = vmul.f32 0.00390625, %v2136_v12  ;;  %v2246_v12 = vld [vmem:[%s14160_s12 + $0x288] sm:$0xff] }
 0x9e5   :  { %v2139_v22 = vpop.xlane.xlu1 %2138 }
 0x9e6   :  { %v2142_v26 = vadd.f32 1e-05, %v2140_v23  ;;  %v2141_v2 = vmul.f32 0.00390625, %v2139_v22  ;;  %v2250_v23 = vld [vmem:[%s14160_s12 + $0x2a8] sm:$0xff]  ;;  %v8346_v22 = vcombine.low %v2238_v13, %v2242_v15 }
 0x9e7   :  { %v8354_v20 = vcombine.low %v2246_v12, %v2250_v23 }
 0x9e8   :  { %10187 = vrsqrt.f32 %v2142_v26  ;;  %v2143_v4 = vadd.f32 1e-05, %v2141_v2  ;;  %v8355_v26 = vcombine.high %v2246_v12, %v2250_v23  ;;  %v2254_v2 = vld [vmem:[%s14160_s12 + $0x2c8] sm:$0xff]  ;;  %v2231_v23 = vld [vmem:[%s14160_s12 + $0x210] sm:$0xff] }
 0x9ea   :  { %10189 = vrsqrt.f32 %v2143_v4  ;;  %v2258_v4 = vld [vmem:[%s14160_s12 + $0x2e8] sm:$0xff] }
 0x9f2   :  { %v10188_v28 = vpop.eup %10187 }
 0x9f3   :  { %v2147_v29 = vmul.f32 %v10188_v28, %v11414_v16  ;;  %v2146_v32 = vmul.f32 %v10188_v28, %v11409_v11  ;;  %v8363_v28 = vcombine.high %v2254_v2, %v2258_v4 }
 0x9f4   :  { %v10190_v63 = vpop.eup %10189 }
 0x9f5   :  { %v2149_v36 = vmul.f32 %v10190_v63, %v11426_v25  ;;  %v2148_v37 = vmul.f32 %v10190_v63, %v11419_v19  ;;  %v2162_v30 = vmul.f32 %v2158_v31, %v2147_v29  ;;  %v2161_v14 = vmul.f32 %v2154_v33, %v2146_v32  ;;  %v2262_v29 = vld [vmem:[%s14160_s12 + $0x308] sm:$0xff] }
 0x9f6   :  { %v8362_v32 = vcombine.low %v2254_v2, %v2258_v4  ;;  %v2270_v63 = vld [vmem:[%s14160_s12 + $0x348] sm:$0xff]  ;;  %v2239_v4 = vld [vmem:[%s14160_s12 + $0x250] sm:$0xff] }
 0x9f7   :  { %v2164_v39 = vmul.f32 %v2158_v31, %v2149_v36  ;;  %v2163_v9 = vmul.f32 %v2154_v33, %v2148_v37  ;;  %v2266_v31 = vld [vmem:[%s14160_s12 + $0x328] sm:$0xff] }
 0x9f8   :  { %v8371_v33 = vcombine.high %v2262_v29, %v2266_v31  ;;  %v2274_v36 = vld [vmem:[%s14160_s12 + $0x368] sm:$0xff]  ;;  %v8370_v37 = vcombine.low %v2262_v29, %v2266_v31  ;;  %v2247_v31 = vld [vmem:[%s14160_s12 + $0x290] sm:$0xff] }
 0x9f9   :  { %v11521_v42 = vpack.c.bf16 %v2164_v39, %v2162_v30  ;;  %v11523_v44 = vpack.c.bf16 %v2163_v9, %v2161_v14  ;;  %v8379_v30 = vcombine.high %v2270_v63, %v2274_v36  ;;  %v2278_v39 = vld [vmem:[%s14160_s12 + $0x388] sm:$0xff]  ;;  %v8378_v9 = vcombine.low %v2270_v63, %v2274_v36  ;;  %v2255_v36 = vld [vmem:[%s14160_s12 + $0x2d0] sm:$0xff] }
 0x9fa   :  { %v2282_v14 = vld [vmem:[%s14160_s12 + $0x3a8] sm:$0xff] }
 0x9fb   :  { %2967 = vmatprep.mubr.bf16.mxu1 %v11521_v42  ;;  %3096 = vmatprep.mubr.bf16.mxu0 %v11521_v42  ;;  %v8387_v40 = vcombine.high %v2278_v39, %v2282_v14  ;;  %v8386_v35 = vcombine.low %v2278_v39, %v2282_v14  ;;  %v2263_v14 = vld [vmem:[%s14160_s12 + $0x310] sm:$0xff] }
 0x9fc   :  { %2968 = vmatmul.mubr.bf16.vlgmr.msra.gmra.mrb[52].mxu1 %v11523_v44  ;;  %3097 = vmatmul.mubr.bf16.vlgmr.msra.gmra.mrb[32].mxu0 %v11523_v44 }
 0x9fd   :  { %2979 = vmatpush1.bf16.msra.mxu1 %v8274_v6  ;;  %3010 = vmatprep.mubr.bf16.mxu1 %v11521_v42  ;;  %v8347_v6 = vcombine.high %v2238_v13, %v2242_v15  ;;  %v2223_v15 = vld [vmem:[%s14160_s12 + $0x1d0] sm:$0xff] }
 0x9fe   :  { %2980 = vmatprep.subr.bf16.mxu1 %v8283_v45  ;;  %v2290_v45 = vld [vmem:[%s14160_s12 + $0x3e8] sm:$0xff] }
 0x9ff   :  { %v8395_v21 = vcombine.high %v2286_v41, %v2290_v45  ;;  %v8394_v49 = vcombine.low %v2286_v41, %v2290_v45  ;;  %v2271_v45 = vld [vmem:[%s14160_s12 + $0x350] sm:$0xff] }
 0xa01   :  { %2981 = vmatpush1.bf16.msra.mxu1 %v8282_v60  ;;  %v2167_v60 = vld [vmem:[%s14160_s12 + $0x10] sm:$0xff] }
 0xa02   :  { %2982 = vmatprep.subr.bf16.mxu1 %v8291_v58  ;;  %v2171_v58 = vld [vmem:[%s14160_s12 + $0x30] sm:$0xff] }
 0xa03   :  { %v8277_v51 = vcombine.high %v2167_v60, %v2171_v58  ;;  %v8276_v56 = vcombine.low %v2167_v60, %v2171_v58  ;;  %v2279_v58 = vld [vmem:[%s14160_s12 + $0x390] sm:$0xff] }
 0xa05   :  { %2983 = vmatpush1.bf16.msra.mxu1 %v8290_v38  ;;  %v2175_v38 = vld [vmem:[%s14160_s12 + $0x50] sm:$0xff] }
 0xa06   :  { %2984 = vmatprep.subr.bf16.mxu1 %v8299_v55  ;;  %v2179_v55 = vld [vmem:[%s14160_s12 + $0x70] sm:$0xff] }
 0xa07   :  { %v8285_v27 = vcombine.high %v2175_v38, %v2179_v55  ;;  %v8284_v59 = vcombine.low %v2175_v38, %v2179_v55  ;;  %v2287_v55 = vld [vmem:[%s14160_s12 + $0x3d0] sm:$0xff] }
 0xa09   :  { %2985 = vmatpush1.bf16.msra.mxu1 %v8298_v34  ;;  %v2183_v34 = vld [vmem:[%s14160_s12 + $0x90] sm:$0xff] }
 0xa0a   :  { %2986 = vmatprep.subr.bf16.mxu1 %v8307_v57  ;;  %v2187_v57 = vld [vmem:[%s14160_s12 + $0xb0] sm:$0xff] }
 0xa0b   :  { %v8293_v43 = vcombine.high %v2183_v34, %v2187_v57  ;;  %v8292_v3 = vcombine.low %v2183_v34, %v2187_v57 }
 0xa0d   :  { %2987 = vmatpush1.bf16.msra.mxu1 %v8306_v46  ;;  %v2191_v46 = vld [vmem:[%s14160_s12 + $0xd0] sm:$0xff] }
 0xa0e   :  { %2988 = vmatprep.subr.bf16.mxu1 %v8315_v62  ;;  %v2195_v62 = vld [vmem:[%s14160_s12 + $0xf0] sm:$0xff] }
 0xa0f   :  { %v8301_v17 = vcombine.high %v2191_v46, %v2195_v62 }
 0xa11   :  { %2989 = vmatpush1.bf16.msra.mxu1 %v8314_v1  ;;  %v2199_v1 = vld [vmem:[%s14160_s12 + $0x110] sm:$0xff] }
 0xa12   :  { %2990 = vmatprep.subr.bf16.mxu1 %v8323_v47  ;;  %v8300_v47 = vcombine.low %v2191_v46, %v2195_v62  ;;  %v9628_v46 = vld [vmem:[%s14161_s13 + $0x14] ss:$8 sps:$4 sm:$0xff]   ;;  %v9626_v62 = vld [vmem:[%s14161_s13 + $0x10] ss:$8 sps:$4 sm:$0xff]  }
 0xa15   :  { %2991 = vmatpush1.bf16.msra.mxu1 %v8322_v8  ;;  %v2211_v8 = vld [vmem:[%s14160_s12 + $0x170] sm:$0xff] }
 0xa16   :  { %2992 = vmatprep.subr.bf16.mxu1 %v8331_v61  ;;  %v8317_v10 = vcombine.high %v2207_v5, %v2211_v8 }
 0xa19   :  { %2993 = vmatpush1.bf16.msra.mxu1 %v8330_v7  ;;  %v2219_v7 = vld [vmem:[%s14160_s12 + $0x1b0] sm:$0xff] }
 0xa1a   :  { %2994 = vmatprep.subr.bf16.mxu1 %v8339_v54  ;;  %v8316_v54 = vcombine.low %v2207_v5, %v2211_v8  ;;  %v8325_v13 = vcombine.high %v2215_v24, %v2219_v7  ;;  %v9638_v5 = vld [vmem:[%s14161_s13 + $0x50] ss:$8 sps:$4 sm:$0xff]   ;;  %v9643_v8 = vld [vmem:[%s14161_s13 + $0x64] ss:$8 sps:$4 sm:$0xff]  }
 0xa1d   :  { %2995 = vmatpush1.bf16.msra.mxu1 %v8338_v18  ;;  %v2227_v18 = vld [vmem:[%s14160_s12 + $0x1f0] sm:$0xff] }
 0xa1e   :  { %2996 = vmatprep.subr.bf16.mxu1 %v8347_v6  ;;  %v8324_v6 = vcombine.low %v2215_v24, %v2219_v7  ;;  %v8333_v12 = vcombine.high %v2223_v15, %v2227_v18  ;;  %v9644_v24 = vld [vmem:[%s14161_s13 + $0x70] ss:$8 sps:$4 sm:$0xff]   ;;  %v9649_v7 = vld [vmem:[%s14161_s13 + $0x84] ss:$8 sps:$4 sm:$0xff]  }
 0xa21   :  { %2997 = vmatpush1.bf16.msra.mxu1 %v8346_v22  ;;  %v2235_v22 = vld [vmem:[%s14160_s12 + $0x230] sm:$0xff] }
 0xa22   :  { %2998 = vmatprep.subr.bf16.mxu1 %v8355_v26  ;;  %v8332_v26 = vcombine.low %v2223_v15, %v2227_v18  ;;  %v8341_v2 = vcombine.high %v2231_v23, %v2235_v22  ;;  %v9650_v15 = vld [vmem:[%s14161_s13 + $0x90] ss:$8 sps:$4 sm:$0xff]   ;;  %v9655_v18 = vld [vmem:[%s14161_s13 + $0xa4] ss:$8 sps:$4 sm:$0xff]  }
 0xa25   :  { %2999 = vmatpush1.bf16.msra.mxu1 %v8354_v20  ;;  %v2243_v20 = vld [vmem:[%s14160_s12 + $0x270] sm:$0xff] }
 0xa26   :  { %3000 = vmatprep.subr.bf16.mxu1 %v8363_v28  ;;  %v8340_v28 = vcombine.low %v2231_v23, %v2235_v22  ;;  %v8349_v29 = vcombine.high %v2239_v4, %v2243_v20  ;;  %v9656_v23 = vld [vmem:[%s14161_s13 + $0xb0] ss:$8 sps:$4 sm:$0xff]   ;;  %v9661_v22 = vld [vmem:[%s14161_s13 + $0xc4] ss:$8 sps:$4 sm:$0xff]  }
 0xa29   :  { %3001 = vmatpush1.bf16.msra.mxu1 %v8362_v32  ;;  %v2251_v32 = vld [vmem:[%s14160_s12 + $0x2b0] sm:$0xff] }
 0xa2a   :  { %3002 = vmatprep.subr.bf16.mxu1 %v8371_v33  ;;  %v8348_v33 = vcombine.low %v2239_v4, %v2243_v20  ;;  %v8357_v63 = vcombine.high %v2247_v31, %v2251_v32  ;;  %v9662_v4 = vld [vmem:[%s14161_s13 + $0xd0] ss:$8 sps:$4 sm:$0xff]   ;;  %v9667_v20 = vld [vmem:[%s14161_s13 + $0xe4] ss:$8 sps:$4 sm:$0xff]  }
 0xa2d   :  { %3003 = vmatpush1.bf16.msra.mxu1 %v8370_v37  ;;  %v2259_v37 = vld [vmem:[%s14160_s12 + $0x2f0] sm:$0xff] }
 0xa2e   :  { %3004 = vmatprep.subr.bf16.mxu1 %v8379_v30  ;;  %v8356_v30 = vcombine.low %v2247_v31, %v2251_v32  ;;  %v8365_v39 = vcombine.high %v2255_v36, %v2259_v37 }
 0xa31   :  { %3005 = vmatpush1.bf16.msra.mxu1 %v8378_v9  ;;  %v2267_v9 = vld [vmem:[%s14160_s12 + $0x330] sm:$0xff] }
 0xa32   :  { %3006 = vmatprep.subr.bf16.mxu1 %v8387_v40  ;;  %v8364_v40 = vcombine.low %v2255_v36, %v2259_v37  ;;  %v8373_v41 = vcombine.high %v2263_v14, %v2267_v9  ;;  %v9670_v37 = vld [vmem:[%s14161_s13 + $0xf4] ss:$8 sps:$4 sm:$0xff]  }
 0xa35   :  { %3007 = vmatpush1.bf16.msra.mxu1 %v8386_v35  ;;  %v2275_v35 = vld [vmem:[%s14160_s12 + $0x370] sm:$0xff] }
 0xa36   :  { %3008 = vmatprep.subr.bf16.mxu1 %v8395_v21  ;;  %v8372_v21 = vcombine.low %v2263_v14, %v2267_v9  ;;  %v8381_v60 = vcombine.high %v2271_v45, %v2275_v35  ;;  %v9668_v14 = vld [vmem:[%s14161_s13 + $0xf0] ss:$8 sps:$4 sm:$0xff]   ;;  %v9673_v9 = vld [vmem:[%s14161_s13 + $0x104] ss:$8 sps:$4 sm:$0xff]  }
 0xa39   :  { %3009 = vmatpush1.bf16.msra.mxu1 %v8394_v49  ;;  %v2283_v49 = vld [vmem:[%s14160_s12 + $0x3b0] sm:$0xff] }
 0xa3a   :  { %3021 = vmatprep.subr.bf16.mxu1 %v8277_v51  ;;  %v8380_v51 = vcombine.low %v2271_v45, %v2275_v35  ;;  %v8389_v38 = vcombine.high %v2279_v58, %v2283_v49 }
 0xa3c   :  { %3011 = vmatmul.mubr.bf16.vlgmr.msra.gmra.mrb[56].mxu1 %v11523_v44 }
 0xa3d   :  { %3022 = vmatpush1.bf16.msra.mxu1 %v8276_v56  ;;  %3053 = vmatprep.mubr.bf16.mxu1 %v11521_v42  ;;  %v2203_v42 = vld [vmem:[%s14160_s12 + $0x130] sm:$0xff] }
 0xa3e   :  { %3023 = vmatprep.subr.bf16.mxu1 %v8285_v27  ;;  %v8309_v0 = vcombine.high %v2199_v1, %v2203_v42  ;;  %v8308_v61 = vcombine.low %v2199_v1, %v2203_v42  ;;  %v2291_v56 = vld [vmem:[%s14160_s12 + $0x3f0] sm:$0xff]  ;;  %v8388_v27 = vcombine.low %v2279_v58, %v2283_v49  ;;  %v9637_v42 = vld [vmem:[%s14161_s13 + $0x44] ss:$8 sps:$4 sm:$0xff]  }
 0xa3f   :  { %v8397_v34 = vcombine.high %v2287_v55, %v2291_v56  ;;  %v8396_v57 = vcombine.low %v2287_v55, %v2291_v56  ;;  %v9632_v1 = vld [vmem:[%s14161_s13 + $0x30] ss:$8 sps:$4 sm:$0xff]  }
 0xa41   :  { %3024 = vmatpush1.bf16.msra.mxu1 %v8284_v59  ;;  %v9625_v59 = vld [vmem:[%s14161_s13 + $0x4] ss:$8 sps:$4 sm:$0xff]  }
 0xa42   :  { %3025 = vmatprep.subr.bf16.mxu1 %v8293_v43  ;;  %v9623_v43 = vld [vmem:[%s14161_s13] ss:$8 sps:$4 sm:$0xff]  }
 0xa45   :  { %3026 = vmatpush1.bf16.msra.mxu1 %v8292_v3  ;;  %v9629_v3 = vld [vmem:[%s14161_s13 + $0x20] ss:$8 sps:$4 sm:$0xff]  }
 0xa46   :  { %3027 = vmatprep.subr.bf16.mxu1 %v8301_v17  ;;  %v9634_v17 = vld [vmem:[%s14161_s13 + $0x34] ss:$8 sps:$4 sm:$0xff]  }
 0xa49   :  { %3028 = vmatpush1.bf16.msra.mxu1 %v8300_v47  ;;  %v9635_v47 = vld [vmem:[%s14161_s13 + $0x40] ss:$8 sps:$4 sm:$0xff]  }
 0xa4a   :  { %3029 = vmatprep.subr.bf16.mxu1 %v8309_v0  ;;  %v9640_v0 = vld [vmem:[%s14161_s13 + $0x54] ss:$8 sps:$4 sm:$0xff]  }
 0xa4d   :  { %3030 = vmatpush1.bf16.msra.mxu1 %v8308_v61  ;;  %v9641_v61 = vld [vmem:[%s14161_s13 + $0x60] ss:$8 sps:$4 sm:$0xff]  }
 0xa4e   :  { %3031 = vmatprep.subr.bf16.mxu1 %v8317_v10  ;;  %v9646_v10 = vld [vmem:[%s14161_s13 + $0x74] ss:$8 sps:$4 sm:$0xff]  }
 0xa51   :  { %3032 = vmatpush1.bf16.msra.mxu1 %v8316_v54  ;;  %v9647_v54 = vld [vmem:[%s14161_s13 + $0x80] ss:$8 sps:$4 sm:$0xff]  }
 0xa52   :  { %3033 = vmatprep.subr.bf16.mxu1 %v8325_v13  ;;  %v9652_v13 = vld [vmem:[%s14161_s13 + $0x94] ss:$8 sps:$4 sm:$0xff]  }
 0xa55   :  { %3034 = vmatpush1.bf16.msra.mxu1 %v8324_v6  ;;  %v9653_v6 = vld [vmem:[%s14161_s13 + $0xa0] ss:$8 sps:$4 sm:$0xff]  }
 0xa56   :  { %3035 = vmatprep.subr.bf16.mxu1 %v8333_v12  ;;  %v9658_v12 = vld [vmem:[%s14161_s13 + $0xb4] ss:$8 sps:$4 sm:$0xff]  }
 0xa59   :  { %3036 = vmatpush1.bf16.msra.mxu1 %v8332_v26  ;;  %v9659_v26 = vld [vmem:[%s14161_s13 + $0xc0] ss:$8 sps:$4 sm:$0xff]  }
 0xa5a   :  { %3037 = vmatprep.subr.bf16.mxu1 %v8341_v2  ;;  %v9664_v2 = vld [vmem:[%s14161_s13 + $0xd4] ss:$8 sps:$4 sm:$0xff]  }
 0xa5d   :  { %3038 = vmatpush1.bf16.msra.mxu1 %v8340_v28  ;;  %v9665_v28 = vld [vmem:[%s14161_s13 + $0xe0] ss:$8 sps:$4 sm:$0xff]  }
 0xa5e   :  { %3039 = vmatprep.subr.bf16.mxu1 %v8349_v29 }
 0xa61   :  { %3040 = vmatpush1.bf16.msra.mxu1 %v8348_v33 }
 0xa62   :  { %3041 = vmatprep.subr.bf16.mxu1 %v8357_v63 }
 0xa65   :  { %3042 = vmatpush1.bf16.msra.mxu1 %v8356_v30 }
 0xa66   :  { %3043 = vmatprep.subr.bf16.mxu1 %v8365_v39 }
 0xa69   :  { %3044 = vmatpush1.bf16.msra.mxu1 %v8364_v40 }
 0xa6a   :  { %3045 = vmatprep.subr.bf16.mxu1 %v8373_v41 }
 0xa6d   :  { %3046 = vmatpush1.bf16.msra.mxu1 %v8372_v21 }
 0xa6e   :  { %3047 = vmatprep.subr.bf16.mxu1 %v8381_v60 }
 0xa71   :  { %3048 = vmatpush1.bf16.msra.mxu1 %v8380_v51 }
 0xa72   :  { %3049 = vmatprep.subr.bf16.mxu1 %v8389_v38 }
 0xa75   :  { %3050 = vmatpush1.bf16.msra.mxu1 %v8388_v27 }
 0xa76   :  { %3051 = vmatprep.subr.bf16.mxu1 %v8397_v34 }
 0xa79   :  { %3052 = vmatpush1.bf16.msra.mxu1 %v8396_v57 }
 0xa7a   :  { %3551 = vmatprep.subr.bf16.mxu1 %v9625_v59 }
 0xa7c   :  { %3054 = vmatmul.mubr.bf16.vlgmr.msra.gmra.mrb[60].mxu1 %v11523_v44  ;;  %v9631_v44 = vld [vmem:[%s14161_s13 + $0x24] ss:$8 sps:$4 sm:$0xff]  }
 0xa7d   :  { %3552 = vmatpush1.bf16.msra.mxu1 %v9623_v43 }
 0xa7e   :  { %3553 = vmatprep.subr.bf16.mxu1 %v9628_v46 }
 0xa81   :  { %3554 = vmatpush1.bf16.msra.mxu1 %v9626_v62 }
 0xa82   :  { %3555 = vmatprep.subr.bf16.mxu1 %v9631_v44 }
 0xa85   :  { %3556 = vmatpush1.bf16.msra.mxu1 %v9629_v3 }
 0xa86   :  { %3557 = vmatprep.subr.bf16.mxu1 %v9634_v17 }
 0xa89   :  { %3558 = vmatpush1.bf16.msra.mxu1 %v9632_v1 }
 0xa8a   :  { %3559 = vmatprep.subr.bf16.mxu1 %v9637_v42 }
 0xa8d   :  { %3560 = vmatpush1.bf16.msra.mxu1 %v9635_v47 }
 0xa8e   :  { %3561 = vmatprep.subr.bf16.mxu1 %v9640_v0 }
 0xa91   :  { %3562 = vmatpush1.bf16.msra.mxu1 %v9638_v5 }
 0xa92   :  { %3563 = vmatprep.subr.bf16.mxu1 %v9643_v8 }
 0xa95   :  { %3564 = vmatpush1.bf16.msra.mxu1 %v9641_v61 }
 0xa96   :  { %3565 = vmatprep.subr.bf16.mxu1 %v9646_v10 }
 0xa99   :  { %3566 = vmatpush1.bf16.msra.mxu1 %v9644_v24 }
 0xa9a   :  { %3567 = vmatprep.subr.bf16.mxu1 %v9649_v7 }
 0xa9d   :  { %3568 = vmatpush1.bf16.msra.mxu1 %v9647_v54 }
 0xa9e   :  { %3569 = vmatprep.subr.bf16.mxu1 %v9652_v13 }
 0xaa1   :  { %3570 = vmatpush1.bf16.msra.mxu1 %v9650_v15 }
 0xaa2   :  { %3571 = vmatprep.subr.bf16.mxu1 %v9655_v18 }
 0xaa5   :  { %3572 = vmatpush1.bf16.msra.mxu1 %v9653_v6 }
 0xaa6   :  { %3573 = vmatprep.subr.bf16.mxu1 %v9658_v12 }
 0xaa9   :  { %3574 = vmatpush1.bf16.msra.mxu1 %v9656_v23 }
 0xaaa   :  { %3575 = vmatprep.subr.bf16.mxu1 %v9661_v22 }
 0xaad   :  { %3576 = vmatpush1.bf16.msra.mxu1 %v9659_v26 }
 0xaae   :  { %3577 = vmatprep.subr.bf16.mxu1 %v9664_v2 }
 0xab1   :  { %3578 = vmatpush1.bf16.msra.mxu1 %v9662_v4 }
 0xab2   :  { %3579 = vmatprep.subr.bf16.mxu1 %v9667_v20 }
 0xab5   :  { %3580 = vmatpush1.bf16.msra.mxu1 %v9665_v28 }
 0xab6   :  { %3581 = vmatprep.subr.bf16.mxu1 %v9670_v37 }
 0xab9   :  { %3582 = vmatpush1.bf16.msra.mxu1 %v9668_v14 }
 0xaba   :  { %3594 = vmatprep.subr.bf16.mxu1 %v9673_v9 }
 0xacf   :  { %v11803_v29 = vpop.f32.mrb[52].mxu1  ;;  %v3098_v31 = vpop.f32.mrb[32].mxu0 }
 0xad0   :  { %v11805_v32 = vpop.f32.mrb[53].mxu1  ;;  %v3100_v33 = vpop.f32.mrb[33].mxu0  ;;  %v3107_v3 = vsub.f32 0.0, %v11803_v29 }
 0xad1   :  { %v11807_v63 = vpop.f32.mrb[54].mxu1  ;;  %v3102_v36 = vpop.f32.mrb[34].mxu0  ;;  %v3108_v17 = vsub.f32 0.0, %v11805_v32 }
 0xad2   :  { %v11812_v30 = vpop.f32.mrb[55].mxu1  ;;  %v3104_v39 = vpop.f32.mrb[35].mxu0  ;;  %v3111_v1 = vsub.f32 0.0, %v11807_v63  ;;  %v3115_v5 = vmul.f32 1.442695, %v3107_v3 }
 0xad3   :  { %v3112_v47 = vsub.f32 0.0, %v11812_v30  ;;  %v3117_v10 = vmul.f32 1.442695, %v3108_v17  ;;  %v9683_v3 = vld [vmem:[%s14161_s13 + $0x140] ss:$8 sps:$4 sm:$0xff]  }
 0xad4   :  { %v3123_v54 = vmul.f32 1.442695, %v3111_v1  ;;  %v9688_v17 = vld [vmem:[%s14161_s13 + $0x154] ss:$8 sps:$4 sm:$0xff]   ;;  %v9686_v1 = vld [vmem:[%s14161_s13 + $0x150] ss:$8 sps:$4 sm:$0xff]  }
 0xad5   :  { %v3125_v18 = vmul.f32 1.442695, %v3112_v47  ;;  %v9689_v47 = vld [vmem:[%s14161_s13 + $0x160] ss:$8 sps:$4 sm:$0xff]  }
 0xb0f   :  { %v3012_v40 = vpop.f32.mrb[56].mxu1 }
 0xb10   :  { %v3109_v41 = vsub.f32 0.0, %v3012_v40  ;;  %v3014_v45 = vpop.f32.mrb[57].mxu1 }
 0xb11   :  { %v3110_v35 = vsub.f32 0.0, %v3014_v45  ;;  %v3016_v21 = vpop.f32.mrb[58].mxu1 }
 0xb12   :  { %v3119_v60 = vmul.f32 1.442695, %v3109_v41  ;;  %v3113_v58 = vsub.f32 0.0, %v3016_v21  ;;  %v3018_v49 = vpop.f32.mrb[59].mxu1 }
 0xb13   :  { %v3121_v51 = vmul.f32 1.442695, %v3110_v35  ;;  %v3114_v38 = vsub.f32 0.0, %v3018_v49 }
 0xb14   :  { %10191 = vpow2.f32 %v3119_v60  ;;  %v3127_v55 = vmul.f32 1.442695, %v3113_v58 }
 0xb15   :  { %10193 = vpow2.f32 %v3121_v51  ;;  %v3129_v56 = vmul.f32 1.442695, %v3114_v38 }
 0xb16   :  { %10195 = vpow2.f32 %v3127_v55 }
 0xb17   :  { %10197 = vpow2.f32 %v3129_v56 }
 0xb1e   :  { %v10192_v27 = vpop.eup %10191 }
 0xb1f   :  { %v10194_v34 = vpop.eup %10193  ;;  %v3133_v57 = vadd.f32 1.0, %v10192_v27 }
 0xb20   :  { %v10196_v59 = vpop.eup %10195  ;;  %v3134_v43 = vadd.f32 1.0, %v10194_v34 }
 0xb21   :  { %v10198_v46 = vpop.eup %10197  ;;  %10199 = vrcp.f32 %v3133_v57  ;;  %v3137_v62 = vadd.f32 1.0, %v10196_v59 }
 0xb22   :  { %10201 = vrcp.f32 %v3134_v43  ;;  %v3138_v44 = vadd.f32 1.0, %v10198_v46  ;;  %v9677_v43 = vld [vmem:[%s14161_s13 + $0x120] ss:$8 sps:$4 sm:$0xff]   ;;  %v9682_v46 = vld [vmem:[%s14161_s13 + $0x134] ss:$8 sps:$4 sm:$0xff]  }
 0xb23   :  { %10203 = vrcp.f32 %v3137_v62  ;;  %v9680_v62 = vld [vmem:[%s14161_s13 + $0x130] ss:$8 sps:$4 sm:$0xff]  }
 0xb24   :  { %10205 = vrcp.f32 %v3138_v44  ;;  %v9685_v44 = vld [vmem:[%s14161_s13 + $0x144] ss:$8 sps:$4 sm:$0xff]  }
 0xb25   :  { %10207 = vpow2.f32 %v3115_v5  ;;  %v9692_v5 = vld [vmem:[%s14161_s13 + $0x170] ss:$8 sps:$4 sm:$0xff]  }
 0xb26   :  { %10209 = vpow2.f32 %v3117_v10  ;;  %v9700_v10 = vld [vmem:[%s14161_s13 + $0x194] ss:$8 sps:$4 sm:$0xff]  }
 0xb27   :  { %10211 = vpow2.f32 %v3123_v54  ;;  %v9701_v54 = vld [vmem:[%s14161_s13 + $0x1a0] ss:$8 sps:$4 sm:$0xff]  }
 0xb28   :  { %10213 = vpow2.f32 %v3125_v18  ;;  %v9704_v18 = vld [vmem:[%s14161_s13 + $0x1b0] ss:$8 sps:$4 sm:$0xff]  }
 0xb2b   :  { %v10200_v42 = vpop.eup %10199 }
 0xb2c   :  { %v10202_v0 = vpop.eup %10201  ;;  %v3144_v8 = vmul.f32 %v10200_v42, %v3012_v40  ;;  %v9691_v42 = vld [vmem:[%s14161_s13 + $0x164] ss:$8 sps:$4 sm:$0xff]  }
 0xb2d   :  { %v10204_v61 = vpop.eup %10203  ;;  %v3146_v24 = vmul.f32 %v10202_v0, %v3014_v45  ;;  %v9694_v0 = vld [vmem:[%s14161_s13 + $0x174] ss:$8 sps:$4 sm:$0xff]  }
 0xb2e   :  { %v10206_v7 = vpop.eup %10205  ;;  %v11824_v13 = vmul.f32 %v3144_v8, %v3098_v31  ;;  %v3152_v15 = vmul.f32 %v10204_v61, %v3016_v21  ;;  %v9697_v8 = vld [vmem:[%s14161_s13 + $0x184] ss:$8 sps:$4 sm:$0xff]   ;;  %v9695_v61 = vld [vmem:[%s14161_s13 + $0x180] ss:$8 sps:$4 sm:$0xff]  }
 0xb2f   :  { %v3158_v6 = vmul.f32 %v3146_v24, %v3100_v33  ;;  %v3154_v12 = vmul.f32 %v10206_v7, %v3018_v49  ;;  %v10208_v4 = vpop.eup %10207  ;;  %v9698_v24 = vld [vmem:[%s14161_s13 + $0x190] ss:$8 sps:$4 sm:$0xff]   ;;  %v9703_v7 = vld [vmem:[%s14161_s13 + $0x1a4] ss:$8 sps:$4 sm:$0xff]  }
 0xb30   :  { %v11826_v23 = vmul.f32 %v3152_v15, %v3102_v36  ;;  %v10210_v20 = vpop.eup %10209  ;;  %v3131_v37 = vadd.f32 1.0, %v10208_v4  ;;  %v9706_v15 = vld [vmem:[%s14161_s13 + $0x1b4] ss:$8 sps:$4 sm:$0xff]   ;;  %v9715_v4 = vld [vmem:[%s14161_s13 + $0x1e4] ss:$8 sps:$4 sm:$0xff]  }
 0xb31   :  { %v3162_v22 = vmul.f32 %v3154_v12, %v3104_v39  ;;  %v10212_v28 = vpop.eup %10211  ;;  %v3132_v14 = vadd.f32 1.0, %v10210_v20  ;;  %v9707_v12 = vld [vmem:[%s14161_s13 + $0x1c0] ss:$8 sps:$4 sm:$0xff]  }
 0xb32   :  { %v3229_v26 = vpack.c.bf16 %v11826_v23, %v11824_v13  ;;  %v10214_v31 = vpop.eup %10213  ;;  %v3135_v9 = vadd.f32 1.0, %v10212_v28  ;;  %10215 = vrcp.f32 %v3131_v37  ;;  %v9713_v20 = vld [vmem:[%s14161_s13 + $0x1e0] ss:$8 sps:$4 sm:$0xff]   ;;  %v9718_v28 = vld [vmem:[%s14161_s13 + $0x1f4] ss:$8 sps:$4 sm:$0xff]  }
 0xb33   :  { %v3230_v2 = vpack.c.bf16 %v3162_v22, %v3158_v6  ;;  %v3136_v33 = vadd.f32 1.0, %v10214_v31  ;;  %10217 = vrcp.f32 %v3132_v14  ;;  %v9709_v6 = vld [vmem:[%s14161_s13 + $0x1c4] ss:$8 sps:$4 sm:$0xff]   ;;  %v9712_v22 = vld [vmem:[%s14161_s13 + $0x1d4] ss:$8 sps:$4 sm:$0xff]  }
 0xb34   :  { %10219 = vrcp.f32 %v3135_v9  ;;  %v9716_v31 = vld [vmem:[%s14161_s13 + $0x1f0] ss:$8 sps:$4 sm:$0xff]   ;;  %v3917_v37 = vld [vmem:[%s14163_s15 + $0x8] sm:$0xff] }
 0xb35   :  { %10221 = vrcp.f32 %v3136_v33  ;;  %v3925_v14 = vld [vmem:[%s14163_s15 + $0x48] sm:$0xff] }
 0xb36   :  { %v3933_v9 = vld [vmem:[%s14163_s15 + $0x88] sm:$0xff]  ;;  %v8482_v33 = vcombine.low %v3917_v37, %v3925_v14 }
 0xb37   :  { %v3949_v23 = vld [vmem:[%s14163_s15 + $0x108] sm:$0xff] }
 0xb3c   :  { %v10216_v36 = vpop.eup %10215 }
 0xb3d   :  { %v10218_v39 = vpop.eup %10217  ;;  %v3140_v45 = vmul.f32 %v10216_v36, %v11803_v29  ;;  %v9671_v29 = vld [vmem:[%s14161_s13 + $0x100] ss:$8 sps:$4 sm:$0xff]   ;;  %v8483_v36 = vcombine.high %v3917_v37, %v3925_v14  ;;  %v9723_v37 = vld [vmem:[%s14162_s14 + $0x50] sm:$0xff]  }
 0xb3e   :  { %v10220_v40 = vpop.eup %10219  ;;  %v3142_v35 = vmul.f32 %v10218_v39, %v11805_v32  ;;  %v9676_v32 = vld [vmem:[%s14161_s13 + $0x114] ss:$8 sps:$4 sm:$0xff]   ;;  %v3941_v39 = vld [vmem:[%s14163_s15 + $0xc8] sm:$0xff] }
 0xb3f   :  { %v10222_v41 = vpop.eup %10221  ;;  %v3148_v60 = vmul.f32 %v10220_v40, %v11807_v63  ;;  %v9674_v63 = vld [vmem:[%s14161_s13 + $0x110] ss:$8 sps:$4 sm:$0xff]   ;;  %v8499_v13 = vcombine.high %v3933_v9, %v3941_v39  ;;  %v8498_v40 = vcombine.low %v3933_v9, %v3941_v39  ;;  %v4101_v39 = vld [vmem:[%s14163_s15 + $0x5c8] sm:$0xff] }
 0xb40   :  { %v3150_v51 = vmul.f32 %v10222_v41, %v11812_v30  ;;  %v9679_v30 = vld [vmem:[%s14161_s13 + $0x124] ss:$8 sps:$4 sm:$0xff]  }
 0xb4f   :  { %v3055_v21 = vpop.f32.mrb[60].mxu1 }
 0xb50   :  { %v3155_v58 = vmul.f32 %v3140_v45, %v3055_v21  ;;  %v3057_v49 = vpop.f32.mrb[61].mxu1  ;;  %v3965_v45 = vld [vmem:[%s14163_s15 + $0x188] sm:$0xff] }
 0xb51   :  { %v3156_v38 = vmul.f32 %v3142_v35, %v3057_v49  ;;  %v3059_v55 = vpop.f32.mrb[62].mxu1  ;;  %v9719_v35 = vld [vmem:[%s14162_s14 + $0x40] sm:$0xff]   ;;  %v3973_v21 = vld [vmem:[%s14163_s15 + $0x1c8] sm:$0xff] }
 0xb52   :  { %v3159_v56 = vmul.f32 %v3148_v60, %v3059_v55  ;;  %v3061_v27 = vpop.f32.mrb[63].mxu1  ;;  %v9720_v60 = vld [vmem:[%s14162_s14] sm:$0xff]   ;;  %9042 = vmatprep.subr.bf16.mxu0 %v9719_v35  ;;  %v3981_v55 = vld [vmem:[%s14163_s15 + $0x208] sm:$0xff] }
 0xb53   :  { %v3160_v34 = vmul.f32 %v3150_v51, %v3061_v27  ;;  %9043 = vmatpush3.bf16.msra.mxu0 %v9720_v60  ;;  %v9722_v51 = vld [vmem:[%s14162_s14 + $0x8] sm:$0xff]   ;;  %v8530_v27 = vcombine.low %v3965_v45, %v3973_v21  ;;  %v9727_v35 = vld [vmem:[%s14162_s14 + $0x60] sm:$0xff]  }
 0xb54   :  { %v3227_v57 = vpack.c.bf16 %v3159_v56, %v3155_v58  ;;  %v9721_v58 = vld [vmem:[%s14162_s14 + $0x48] sm:$0xff]  }
 0xb55   :  { %v3228_v59 = vpack.c.bf16 %v3160_v34, %v3156_v38  ;;  %v8531_v38 = vcombine.high %v3965_v45, %v3973_v21  ;;  %9044 = vmatprep.subr.bf16.mxu0 %v9721_v58  ;;  %v3989_v56 = vld [vmem:[%s14163_s15 + $0x248] sm:$0xff]  ;;  %v9728_v58 = vld [vmem:[%s14162_s14 + $0x20] sm:$0xff]  }
 0xb56   :  { %v8547_v34 = vcombine.high %v3981_v55, %v3989_v56  ;;  %v4117_v45 = vld [vmem:[%s14163_s15 + $0x648] sm:$0xff] }
 0xb57   :  { %3583 = vmatprep.mubr.bf16.mxu1 %v3228_v59  ;;  %9045 = vmatpush3.bf16.msra.mxu0 %v9722_v51  ;;  %v4005_v59 = vld [vmem:[%s14163_s15 + $0x2c8] sm:$0xff] }
 0xb58   :  { %3584 = vmatmul.mubr.bf16.vlgmr.msra.gmra.mrb[64].mxu1 %v3227_v57  ;;  %v3997_v57 = vld [vmem:[%s14163_s15 + $0x288] sm:$0xff]  ;;  %9046 = vmatprep.subr.bf16.mxu0 %v9723_v37 }
 0xb59   :  { %3595 = vmatpush1.bf16.msra.mxu1 %v9671_v29  ;;  %3626 = vmatprep.mubr.bf16.mxu1 %v3230_v2  ;;  %v9710_v2 = vld [vmem:[%s14161_s13 + $0x1d0] ss:$8 sps:$4 sm:$0xff]   ;;  %v8546_v29 = vcombine.low %v3981_v55, %v3989_v56  ;;  %v4133_v51 = vld [vmem:[%s14163_s15 + $0x6c8] sm:$0xff] }
 0xb5a   :  { %3596 = vmatprep.subr.bf16.mxu1 %v9676_v32  ;;  %v8563_v32 = vcombine.high %v3997_v57, %v4005_v59 }
 0xb5d   :  { %3597 = vmatpush1.bf16.msra.mxu1 %v9674_v63  ;;  %v4013_v63 = vld [vmem:[%s14163_s15 + $0x308] sm:$0xff] }
 0xb5e   :  { %3598 = vmatprep.subr.bf16.mxu1 %v9679_v30  ;;  %v4021_v30 = vld [vmem:[%s14163_s15 + $0x348] sm:$0xff] }
 0xb61   :  { %3599 = vmatpush1.bf16.msra.mxu1 %v9677_v43  ;;  %v8562_v43 = vcombine.low %v3997_v57, %v4005_v59  ;;  %v4149_v57 = vld [vmem:[%s14163_s15 + $0x748] sm:$0xff]  ;;  %v9731_v59 = vld [vmem:[%s14162_s14 + $0x70] sm:$0xff]  }
 0xb62   :  { %3600 = vmatprep.subr.bf16.mxu1 %v9682_v46  ;;  %v8579_v46 = vcombine.high %v4013_v63, %v4021_v30 }
 0xb65   :  { %3601 = vmatpush1.bf16.msra.mxu1 %v9680_v62  ;;  %v4029_v62 = vld [vmem:[%s14163_s15 + $0x388] sm:$0xff] }
 0xb66   :  { %3602 = vmatprep.subr.bf16.mxu1 %v9685_v44  ;;  %v4037_v44 = vld [vmem:[%s14163_s15 + $0x3c8] sm:$0xff] }
 0xb69   :  { %3603 = vmatpush1.bf16.msra.mxu1 %v9683_v3  ;;  %v8578_v3 = vcombine.low %v4013_v63, %v4021_v30  ;;  %v9732_v63 = vld [vmem:[%s14162_s14 + $0x30] sm:$0xff]   ;;  %v4157_v30 = vld [vmem:[%s14163_s15 + $0x788] sm:$0xff] }
 0xb6a   :  { %3604 = vmatprep.subr.bf16.mxu1 %v9688_v17  ;;  %v8595_v17 = vcombine.high %v4029_v62, %v4037_v44 }
 0xb6d   :  { %3605 = vmatpush1.bf16.msra.mxu1 %v9686_v1  ;;  %v4045_v1 = vld [vmem:[%s14163_s15 + $0x408] sm:$0xff] }
 0xb6e   :  { %3606 = vmatprep.subr.bf16.mxu1 %v9691_v42  ;;  %v4053_v42 = vld [vmem:[%s14163_s15 + $0x448] sm:$0xff] }
 0xb71   :  { %3607 = vmatpush1.bf16.msra.mxu1 %v9689_v47  ;;  %v8594_v47 = vcombine.low %v4029_v62, %v4037_v44 }
 0xb72   :  { %3608 = vmatprep.subr.bf16.mxu1 %v9694_v0  ;;  %v8611_v0 = vcombine.high %v4045_v1, %v4053_v42 }
 0xb75   :  { %3609 = vmatpush1.bf16.msra.mxu1 %v9692_v5  ;;  %v4061_v5 = vld [vmem:[%s14163_s15 + $0x488] sm:$0xff] }
 0xb76   :  { %3610 = vmatprep.subr.bf16.mxu1 %v9697_v8  ;;  %v4069_v8 = vld [vmem:[%s14163_s15 + $0x4c8] sm:$0xff] }
 0xb79   :  { %3611 = vmatpush1.bf16.msra.mxu1 %v9695_v61  ;;  %v8610_v61 = vcombine.low %v4045_v1, %v4053_v42  ;;  %v3924_v1 = vld [vmem:[%s14163_s15 + $0x40] sm:$0xff]  ;;  %v3919_v42 = vld [vmem:[%s14163_s15 + $0x18] sm:$0xff] }
 0xb7a   :  { %3612 = vmatprep.subr.bf16.mxu1 %v9700_v10  ;;  %v8627_v10 = vcombine.high %v4061_v5, %v4069_v8 }
 0xb7d   :  { %3613 = vmatpush1.bf16.msra.mxu1 %v9698_v24  ;;  %v8626_v24 = vcombine.low %v4061_v5, %v4069_v8 }
 0xb7e   :  { %3614 = vmatprep.subr.bf16.mxu1 %v9703_v7 }
 0xb81   :  { %3615 = vmatpush1.bf16.msra.mxu1 %v9701_v54 }
 0xb82   :  { %3616 = vmatprep.subr.bf16.mxu1 %v9706_v15 }
 0xb85   :  { %3617 = vmatpush1.bf16.msra.mxu1 %v9704_v18 }
 0xb86   :  { %3618 = vmatprep.subr.bf16.mxu1 %v9709_v6 }
 0xb89   :  { %3619 = vmatpush1.bf16.msra.mxu1 %v9707_v12 }
 0xb8a   :  { %3620 = vmatprep.subr.bf16.mxu1 %v9712_v22 }
 0xb8d   :  { %3621 = vmatpush1.bf16.msra.mxu1 %v9710_v2 }
 0xb8e   :  { %3622 = vmatprep.subr.bf16.mxu1 %v9715_v4 }
 0xb91   :  { %3623 = vmatpush1.bf16.msra.mxu1 %v9713_v20 }
 0xb92   :  { %3624 = vmatprep.subr.bf16.mxu1 %v9718_v28 }
 0xb95   :  { %3625 = vmatpush1.bf16.msra.mxu1 %v9716_v31  ;;  %v4077_v31 = vld [vmem:[%s14163_s15 + $0x508] sm:$0xff] }
 0xb96   :  { %5579 = vmatprep.subr.bf16.mxu1 %v8483_v36  ;;  %v4093_v36 = vld [vmem:[%s14163_s15 + $0x588] sm:$0xff] }
 0xb98   :  { %3627 = vmatmul.mubr.bf16.vlgmr.msra.gmra.mrb[64].mxu1 %v3229_v26  ;;  %v3957_v26 = vld [vmem:[%s14163_s15 + $0x148] sm:$0xff] }
 0xb99   :  { %5580 = vmatpush1.bf16.msra.mxu1 %v8482_v33  ;;  %v8515_v41 = vcombine.high %v3949_v23, %v3957_v26  ;;  %v8514_v49 = vcombine.low %v3949_v23, %v3957_v26  ;;  %v9724_v33 = vld [vmem:[%s14162_s14 + $0x10] sm:$0xff]   ;;  %v8659_v23 = vcombine.high %v4093_v36, %v4101_v39  ;;  %v8658_v26 = vcombine.low %v4093_v36, %v4101_v39  ;;  %v3932_v39 = vld [vmem:[%s14163_s15 + $0x80] sm:$0xff] }
 0xb9a   :  { %5581 = vmatprep.subr.bf16.mxu1 %v8499_v13  ;;  %9047 = vmatpush3.bf16.msra.mxu0 %v9724_v33  ;;  %v9725_v13 = vld [vmem:[%s14162_s14 + $0x58] sm:$0xff]  }
 0xb9b   :  { %9048 = vmatprep.subr.bf16.mxu0 %v9725_v13  ;;  %v3940_v13 = vld [vmem:[%s14163_s15 + $0xc0] sm:$0xff] }
 0xb9d   :  { %5582 = vmatpush1.bf16.msra.mxu1 %v8498_v40  ;;  %v9726_v40 = vld [vmem:[%s14162_s14 + $0x18] sm:$0xff]  }
 0xb9e   :  { %5583 = vmatprep.subr.bf16.mxu1 %v8515_v41  ;;  %9049 = vmatpush3.bf16.msra.mxu0 %v9726_v40  ;;  %v4109_v41 = vld [vmem:[%s14163_s15 + $0x608] sm:$0xff] }
 0xb9f   :  { %v8675_v21 = vcombine.high %v4109_v41, %v4117_v45  ;;  %v8674_v60 = vcombine.low %v4109_v41, %v4117_v45  ;;  %9050 = vmatprep.subr.bf16.mxu0 %v9727_v35  ;;  %v3948_v45 = vld [vmem:[%s14163_s15 + $0x100] sm:$0xff]  ;;  %v8497_v35 = vcombine.high %v3932_v39, %v3940_v13 }
 0xba1   :  { %5584 = vmatpush1.bf16.msra.mxu1 %v8514_v49  ;;  %v4125_v49 = vld [vmem:[%s14163_s15 + $0x688] sm:$0xff] }
 0xba2   :  { %5585 = vmatprep.subr.bf16.mxu1 %v8531_v38  ;;  %9051 = vmatpush3.bf16.msra.mxu0 %v9728_v58  ;;  %v9729_v38 = vld [vmem:[%s14162_s14 + $0x68] sm:$0xff]   ;;  %v8691_v55 = vcombine.high %v4125_v49, %v4133_v51  ;;  %v8690_v56 = vcombine.low %v4125_v49, %v4133_v51  ;;  %v3951_v58 = vld [vmem:[%s14163_s15 + $0x118] sm:$0xff]  ;;  %v8496_v51 = vcombine.low %v3932_v39, %v3940_v13  ;;  %v4044_v39 = vld [vmem:[%s14163_s15 + $0x400] sm:$0xff] }
 0xba3   :  { %9052 = vmatprep.subr.bf16.mxu0 %v9729_v38  ;;  %v3959_v49 = vld [vmem:[%s14163_s15 + $0x158] sm:$0xff]  ;;  %v4052_v13 = vld [vmem:[%s14163_s15 + $0x440] sm:$0xff] }
 0xba5   :  { %5586 = vmatpush1.bf16.msra.mxu1 %v8530_v27  ;;  %v9730_v27 = vld [vmem:[%s14162_s14 + $0x28] sm:$0xff]  }
 0xba6   :  { %5587 = vmatprep.subr.bf16.mxu1 %v8547_v34  ;;  %9053 = vmatpush3.bf16.msra.mxu0 %v9730_v27  ;;  %v4141_v34 = vld [vmem:[%s14163_s15 + $0x708] sm:$0xff]  ;;  %v3964_v27 = vld [vmem:[%s14163_s15 + $0x180] sm:$0xff] }
 0xba7   :  { %9054 = vmatprep.subr.bf16.mxu0 %v9731_v59  ;;  %v3975_v59 = vld [vmem:[%s14163_s15 + $0x1d8] sm:$0xff] }
 0xba9   :  { %5588 = vmatpush1.bf16.msra.mxu1 %v8546_v29  ;;  %v8707_v29 = vcombine.high %v4141_v34, %v4149_v57 }
 0xbaa   :  { %5589 = vmatprep.subr.bf16.mxu1 %v8563_v32  ;;  %v8706_v32 = vcombine.low %v4141_v34, %v4149_v57  ;;  %9055 = vmatpush3.bf16.msra.mxu0 %v9732_v63  ;;  %v3972_v34 = vld [vmem:[%s14163_s15 + $0x1c0] sm:$0xff]  ;;  %v3967_v57 = vld [vmem:[%s14163_s15 + $0x198] sm:$0xff] }
 0xbab   :  { %v8529_v63 = vcombine.high %v3964_v27, %v3972_v34 }
 0xbad   :  { %5590 = vmatpush1.bf16.msra.mxu1 %v8562_v43  ;;  %v4165_v43 = vld [vmem:[%s14163_s15 + $0x7c8] sm:$0xff] }
 0xbae   :  { %5591 = vmatprep.subr.bf16.mxu1 %v8579_v46  ;;  %v9733_v46 = vld [vmem:[%s14162_s14 + $0x78] sm:$0xff]   ;;  %v8723_v62 = vcombine.high %v4157_v30, %v4165_v43  ;;  %v8722_v44 = vcombine.low %v4157_v30, %v4165_v43  ;;  %v8535_v30 = vcombine.high %v3967_v57, %v3975_v59  ;;  %v3980_v43 = vld [vmem:[%s14163_s15 + $0x200] sm:$0xff] }
 0xbaf   :  { %9056 = vmatprep.subr.bf16.mxu0 %v9733_v46  ;;  %v3988_v46 = vld [vmem:[%s14163_s15 + $0x240] sm:$0xff] }
 0xbb1   :  { %5592 = vmatpush1.bf16.msra.mxu1 %v8578_v3  ;;  %v9734_v3 = vld [vmem:[%s14162_s14 + $0x38] sm:$0xff]  }
 0xbb2   :  { %5593 = vmatprep.subr.bf16.mxu1 %v8595_v17  ;;  %9057 = vmatpush3.bf16.msra.mxu0 %v9734_v3  ;;  %v3916_v17 = vld [vmem:[%s14163_s15] sm:$0xff]  ;;  %v8528_v3 = vcombine.low %v3964_v27, %v3972_v34 }
 0xbb3   :  { %v8480_v5 = vcombine.low %v3916_v17, %v3924_v1 }
 0xbb5   :  { %5594 = vmatpush1.bf16.msra.mxu1 %v8594_v47  ;;  %v8481_v47 = vcombine.high %v3916_v17, %v3924_v1  ;;  %v8534_v17 = vcombine.low %v3967_v57, %v3975_v59  ;;  %v8545_v1 = vcombine.high %v3980_v43, %v3988_v46  ;;  %v4076_v57 = vld [vmem:[%s14163_s15 + $0x500] sm:$0xff] }
 0xbb6   :  { %5595 = vmatprep.subr.bf16.mxu1 %v8611_v0  ;;  %v3927_v0 = vld [vmem:[%s14163_s15 + $0x58] sm:$0xff]  ;;  %v4084_v59 = vld [vmem:[%s14163_s15 + $0x540] sm:$0xff] }
 0xbb7   :  { %v8486_v8 = vcombine.low %v3919_v42, %v3927_v0  ;;  %5536 = vmatprep.subr.bf16.mxu0 %v8481_v47  ;;  %v3996_v47 = vld [vmem:[%s14163_s15 + $0x280] sm:$0xff] }
 0xbb9   :  { %5596 = vmatpush1.bf16.msra.mxu1 %v8610_v61  ;;  %v8487_v61 = vcombine.high %v3919_v42, %v3927_v0  ;;  %v4004_v0 = vld [vmem:[%s14163_s15 + $0x2c0] sm:$0xff] }
 0xbba   :  { %5597 = vmatprep.subr.bf16.mxu1 %v8627_v10 }
 0xbbd   :  { %5598 = vmatpush1.bf16.msra.mxu1 %v8626_v24 }
 0xc6b   :  { %v3628_v7 = vpop.f32.mrb[64].mxu1 }
 0xc6c   :  { %v12003_v54 = vadd.f32 %v3628_v7, %v11409_v11  ;;  %v3630_v15 = vpop.f32.mrb[65].mxu1 }
 0xc6d   :  { %v12006_v18 = vadd.f32 %v3630_v15, %v11414_v16  ;;  %v3632_v6 = vpop.f32.mrb[66].mxu1 }
 0xc6e   :  { %14197 = vst [vmem:[#allocation7_spill] sm:$0xff] %v12003_v54  ;;  %v12009_v12 = vadd.f32 %v3632_v6, %v11419_v19  ;;  %v3634_v22 = vpop.f32.mrb[67].mxu1  ;;  %v3642_v2 = vmul.f32 %v12003_v54, %v12003_v54 }
 0xc6f   :  { %14198 = vst [vmem:[#allocation8_spill] sm:$0xff] %v12006_v18  ;;  %v12014_v4 = vadd.f32 %v3634_v22, %v11426_v25  ;;  %v3643_v20 = vmul.f32 %v12006_v18, %v12006_v18  ;;  %v4085_v25 = vld [vmem:[%s14163_s15 + $0x548] sm:$0xff] }
 0xc70   :  { %14199 = vst [vmem:[#allocation9_spill] sm:$0xff] %v12009_v12  ;;  %v3644_v28 = vmul.f32 %v12009_v12, %v12009_v12  ;;  %v8643_v14 = vcombine.high %v4077_v31, %v4085_v25  ;;  %v8642_v9 = vcombine.low %v4077_v31, %v4085_v25 }
 0xc71   :  { %14200 = vst [vmem:[#allocation10_spill] sm:$0xff] %v12014_v4  ;;  %v3646_v11 = vadd.f32 %v3643_v20, %v3642_v2  ;;  %v3645_v16 = vmul.f32 %v12014_v4, %v12014_v4  ;;  %v3641_v20 = vld [vmem:[%s14201_s23] sm:$0x3] }
 0xc72   :  { %5599 = vmatprep.subr.bf16.mxu1 %v8643_v14 }
 0xc73   :  { %3647 = vadd.xlane.f32.xlu0 %v3646_v11  ;;  %v3649_v19 = vadd.f32 %v3645_v16, %v3644_v28  ;;  %5600 = vmatpush1.bf16.msra.mxu1 %v8642_v9  ;;  %v3666_v11 = vrot.slane %v3641_v20, %v10637_v52  ;;  %v3670_v28 = vrot.slane %v3641_v20, %v10640_v53 }
 0xc74   :  { %5601 = vmatprep.subr.bf16.mxu1 %v8659_v23  ;;  %v3935_v23 = vld [vmem:[%s14163_s15 + $0x98] sm:$0xff]  ;;  %v8560_v20 = vcombine.low %v3996_v47, %v4004_v0 }
 0xc77   :  { %3650 = vadd.xlane.f32.xlu0 %v3649_v19  ;;  %5602 = vmatpush1.bf16.msra.mxu1 %v8658_v26  ;;  %v3943_v26 = vld [vmem:[%s14163_s15 + $0xd8] sm:$0xff] }
 0xc78   :  { %5603 = vmatprep.subr.bf16.mxu1 %v8675_v21  ;;  %v8503_v21 = vcombine.high %v3935_v23, %v3943_v26  ;;  %v8502_v38 = vcombine.low %v3935_v23, %v3943_v26  ;;  %v4047_v23 = vld [vmem:[%s14163_s15 + $0x418] sm:$0xff] }
 0xc79   :  { %v4055_v26 = vld [vmem:[%s14163_s15 + $0x458] sm:$0xff] }
 0xc7b   :  { %5604 = vmatpush1.bf16.msra.mxu1 %v8674_v60  ;;  %v3956_v60 = vld [vmem:[%s14163_s15 + $0x140] sm:$0xff] }
 0xc7c   :  { %5605 = vmatprep.subr.bf16.mxu1 %v8691_v55  ;;  %v8513_v55 = vcombine.high %v3948_v45, %v3956_v60 }
 0xc7f   :  { %5606 = vmatpush1.bf16.msra.mxu1 %v8690_v56  ;;  %v8519_v56 = vcombine.high %v3951_v58, %v3959_v49 }
 0xc80   :  { %5607 = vmatprep.subr.bf16.mxu1 %v8707_v29  ;;  %v8512_v29 = vcombine.low %v3948_v45, %v3956_v60  ;;  %v8615_v60 = vcombine.high %v4047_v23, %v4055_v26 }
 0xc83   :  { %5608 = vmatpush1.bf16.msra.mxu1 %v8706_v32  ;;  %v8518_v32 = vcombine.low %v3951_v58, %v3959_v49  ;;  %v4060_v58 = vld [vmem:[%s14163_s15 + $0x480] sm:$0xff] }
 0xc84   :  { %5609 = vmatprep.subr.bf16.mxu1 %v8723_v62  ;;  %v3983_v62 = vld [vmem:[%s14163_s15 + $0x218] sm:$0xff]  ;;  %v4068_v49 = vld [vmem:[%s14163_s15 + $0x4c0] sm:$0xff] }
 0xc85   :  { %v8625_v27 = vcombine.high %v4060_v58, %v4068_v49 }
 0xc87   :  { %5610 = vmatpush1.bf16.msra.mxu1 %v8722_v44  ;;  %v3991_v44 = vld [vmem:[%s14163_s15 + $0x258] sm:$0xff] }
 0xc88   :  { %5665 = vmatprep.subr.bf16.mxu1 %v8487_v61  ;;  %v8551_v42 = vcombine.high %v3983_v62, %v3991_v44  ;;  %v8544_v61 = vcombine.low %v3980_v43, %v3988_v46  ;;  %v8641_v43 = vcombine.high %v4076_v57, %v4084_v59 }
 0xd00   :  { %v3648_v10 = vpop.xlane.xlu0 %3647 }
 0xd01   :  { %v3652_v24 = vmul.f32 0.00390625, %v3648_v10  ;;  %v8550_v10 = vcombine.low %v3983_v62, %v3991_v44  ;;  %v4092_v62 = vld [vmem:[%s14163_s15 + $0x580] sm:$0xff] }
 0xd02   :  { %v4100_v44 = vld [vmem:[%s14163_s15 + $0x5c0] sm:$0xff] }
 0xd03   :  { %v3654_v7 = vadd.f32 1e-05, %v3652_v24  ;;  %v8561_v24 = vcombine.high %v3996_v47, %v4004_v0  ;;  %v8657_v47 = vcombine.high %v4092_v62, %v4100_v44 }
 0xd04   :  { %v3651_v15 = vpop.xlane.xlu0 %3650 }
 0xd05   :  { %10223 = vrsqrt.f32 %v3654_v7  ;;  %v3653_v6 = vmul.f32 0.00390625, %v3651_v15  ;;  %v4012_v15 = vld [vmem:[%s14163_s15 + $0x300] sm:$0xff] }
 0xd07   :  { %v3655_v22 = vadd.f32 1e-05, %v3653_v6  ;;  %v4020_v6 = vld [vmem:[%s14163_s15 + $0x340] sm:$0xff] }
 0xd09   :  { %10225 = vrsqrt.f32 %v3655_v22  ;;  %v4015_v22 = vld [vmem:[%s14163_s15 + $0x318] sm:$0xff] }
 0xd0f   :  { %v10224_v2 = vpop.eup %10223 }
 0xd10   :  { %v3658_v16 = vmul.f32 %v10224_v2, %v12003_v54  ;;  %v3659_v19 = vmul.f32 %v10224_v2, %v12006_v18  ;;  %v4023_v2 = vld [vmem:[%s14163_s15 + $0x358] sm:$0xff] }
 0xd12   :  { %v3673_v14 = vmul.f32 %v3666_v11, %v3658_v16  ;;  %v3674_v9 = vmul.f32 %v3670_v28, %v3659_v19  ;;  %v8583_v16 = vcombine.high %v4015_v22, %v4023_v2  ;;  %v4028_v19 = vld [vmem:[%s14163_s15 + $0x380] sm:$0xff] }
 0xd13   :  { %v10226_v31 = vpop.eup %10225 }
 0xd14   :  { %v3660_v25 = vmul.f32 %v10226_v31, %v12009_v12  ;;  %v3661_v37 = vmul.f32 %v10226_v31, %v12014_v4  ;;  %v4036_v31 = vld [vmem:[%s14163_s15 + $0x3c0] sm:$0xff] }
 0xd15   :  { %v8592_v45 = vcombine.low %v4028_v19, %v4036_v31 }
 0xd16   :  { %v3675_v33 = vmul.f32 %v3666_v11, %v3660_v25  ;;  %v3676_v36 = vmul.f32 %v3670_v28, %v3661_v37  ;;  %v8577_v28 = vcombine.high %v4012_v15, %v4020_v6  ;;  %v4031_v25 = vld [vmem:[%s14163_s15 + $0x398] sm:$0xff] }
 0xd17   :  { %v4039_v37 = vld [vmem:[%s14163_s15 + $0x3d8] sm:$0xff] }
 0xd18   :  { %v12127_v40 = vpack.c.bf16 %v3675_v33, %v3673_v14  ;;  %v12129_v41 = vpack.c.bf16 %v3676_v36, %v3674_v9  ;;  %v8576_v14 = vcombine.low %v4012_v15, %v4020_v6  ;;  %v8582_v9 = vcombine.low %v4015_v22, %v4023_v2  ;;  %v4124_v22 = vld [vmem:[%s14163_s15 + $0x680] sm:$0xff] }
 0xd19   :  { %v8593_v33 = vcombine.high %v4028_v19, %v4036_v31  ;;  %v8599_v36 = vcombine.high %v4031_v25, %v4039_v37  ;;  %v4132_v2 = vld [vmem:[%s14163_s15 + $0x6c0] sm:$0xff] }
 0xd1a   :  { %3839 = vmatprep.mubr.bf16.mxu0 %v12129_v41  ;;  %5611 = vmatprep.mubr.bf16.mxu1 %v12129_v41  ;;  %v8689_v19 = vcombine.high %v4124_v22, %v4132_v2 }
 0xd1b   :  { %3840 = vmatmul.mubr.bf16.vlgmr.msra.gmra.mrb[36].mxu0 %v12127_v40  ;;  %5612 = vmatmul.mubr.bf16.vlgmr.msra.gmra.mrb[68].mxu1 %v12127_v40 }
 0xd1c   :  { %5537 = vmatpush1.bf16.msra.mxu0 %v8480_v5  ;;  %5666 = vmatpush1.bf16.msra.mxu1 %v8486_v8  ;;  %v3999_v5 = vld [vmem:[%s14163_s15 + $0x298] sm:$0xff] }
 0xd1d   :  { %5568 = vmatprep.mubr.bf16.mxu0 %v12129_v41  ;;  %5697 = vmatprep.mubr.bf16.mxu1 %v12129_v41  ;;  %v4007_v8 = vld [vmem:[%s14163_s15 + $0x2d8] sm:$0xff] }
 0xd1e   :  { %5538 = vmatprep.subr.bf16.mxu0 %v8497_v35  ;;  %5667 = vmatprep.subr.bf16.mxu1 %v8503_v21  ;;  %v8567_v7 = vcombine.high %v3999_v5, %v4007_v8  ;;  %v8566_v11 = vcombine.low %v3999_v5, %v4007_v8  ;;  %v8598_v35 = vcombine.low %v4031_v25, %v4039_v37  ;;  %v4108_v5 = vld [vmem:[%s14163_s15 + $0x600] sm:$0xff] }
 0xd1f   :  { %v8609_v21 = vcombine.high %v4044_v39, %v4052_v13  ;;  %v4116_v8 = vld [vmem:[%s14163_s15 + $0x640] sm:$0xff] }
 0xd20   :  { %5539 = vmatpush1.bf16.msra.mxu0 %v8496_v51  ;;  %5668 = vmatpush1.bf16.msra.mxu1 %v8502_v38  ;;  %v4063_v51 = vld [vmem:[%s14163_s15 + $0x498] sm:$0xff]  ;;  %v8673_v15 = vcombine.high %v4108_v5, %v4116_v8  ;;  %v4140_v25 = vld [vmem:[%s14163_s15 + $0x700] sm:$0xff] }
 0xd21   :  { %5540 = vmatprep.subr.bf16.mxu0 %v8513_v55  ;;  %5669 = vmatprep.subr.bf16.mxu1 %v8519_v56  ;;  %v4071_v38 = vld [vmem:[%s14163_s15 + $0x4d8] sm:$0xff]  ;;  %v8608_v55 = vcombine.low %v4044_v39, %v4052_v13  ;;  %v8614_v56 = vcombine.low %v4047_v23, %v4055_v26  ;;  %v4148_v37 = vld [vmem:[%s14163_s15 + $0x740] sm:$0xff] }
 0xd22   :  { %v8631_v34 = vcombine.high %v4063_v51, %v4071_v38  ;;  %v8705_v39 = vcombine.high %v4140_v25, %v4148_v37  ;;  %v4156_v23 = vld [vmem:[%s14163_s15 + $0x780] sm:$0xff] }
 0xd23   :  { %v4164_v26 = vld [vmem:[%s14163_s15 + $0x7c0] sm:$0xff] }
 0xd24   :  { %5541 = vmatpush1.bf16.msra.mxu0 %v8512_v29  ;;  %5670 = vmatpush1.bf16.msra.mxu1 %v8518_v32  ;;  %v4079_v29 = vld [vmem:[%s14163_s15 + $0x518] sm:$0xff] }
 0xd25   :  { %5542 = vmatprep.subr.bf16.mxu0 %v8529_v63  ;;  %5671 = vmatprep.subr.bf16.mxu1 %v8535_v30  ;;  %v4087_v32 = vld [vmem:[%s14163_s15 + $0x558] sm:$0xff]  ;;  %v8624_v63 = vcombine.low %v4060_v58, %v4068_v49  ;;  %v8630_v30 = vcombine.low %v4063_v51, %v4071_v38  ;;  %v8721_v58 = vcombine.high %v4156_v23, %v4164_v26  ;;  %v3918_v51 = vld [vmem:[%s14163_s15 + $0x10] sm:$0xff] }
 0xd26   :  { %v8647_v46 = vcombine.high %v4079_v29, %v4087_v32  ;;  %v3926_v38 = vld [vmem:[%s14163_s15 + $0x50] sm:$0xff] }
 0xd28   :  { %5543 = vmatpush1.bf16.msra.mxu0 %v8528_v3  ;;  %5672 = vmatpush1.bf16.msra.mxu1 %v8534_v17  ;;  %v4095_v3 = vld [vmem:[%s14163_s15 + $0x598] sm:$0xff] }
 0xd29   :  { %5544 = vmatprep.subr.bf16.mxu0 %v8545_v1  ;;  %5673 = vmatprep.subr.bf16.mxu1 %v8551_v42  ;;  %v4103_v17 = vld [vmem:[%s14163_s15 + $0x5d8] sm:$0xff]  ;;  %v8640_v1 = vcombine.low %v4076_v57, %v4084_v59  ;;  %v8646_v42 = vcombine.low %v4079_v29, %v4087_v32  ;;  %v8485_v57 = vcombine.high %v3918_v51, %v3926_v38  ;;  %v3934_v29 = vld [vmem:[%s14163_s15 + $0x90] sm:$0xff] }
 0xd2a   :  { %v8663_v0 = vcombine.high %v4095_v3, %v4103_v17  ;;  %v3942_v32 = vld [vmem:[%s14163_s15 + $0xd0] sm:$0xff] }
 0xd2c   :  { %5545 = vmatpush1.bf16.msra.mxu0 %v8544_v61  ;;  %5674 = vmatpush1.bf16.msra.mxu1 %v8550_v10  ;;  %v4111_v61 = vld [vmem:[%s14163_s15 + $0x618] sm:$0xff] }
 0xd2d   :  { %5546 = vmatprep.subr.bf16.mxu0 %v8561_v24  ;;  %5675 = vmatprep.subr.bf16.mxu1 %v8567_v7  ;;  %v4119_v10 = vld [vmem:[%s14163_s15 + $0x658] sm:$0xff]  ;;  %v8656_v24 = vcombine.low %v4092_v62, %v4100_v44  ;;  %v8662_v7 = vcombine.low %v4095_v3, %v4103_v17  ;;  %v8501_v62 = vcombine.high %v3934_v29, %v3942_v32  ;;  %v3950_v3 = vld [vmem:[%s14163_s15 + $0x110] sm:$0xff] }
 0xd2e   :  { %v8679_v6 = vcombine.high %v4111_v61, %v4119_v10  ;;  %v3958_v17 = vld [vmem:[%s14163_s15 + $0x150] sm:$0xff] }
 0xd30   :  { %5547 = vmatpush1.bf16.msra.mxu0 %v8560_v20  ;;  %5676 = vmatpush1.bf16.msra.mxu1 %v8566_v11  ;;  %v4127_v20 = vld [vmem:[%s14163_s15 + $0x698] sm:$0xff] }
 0xd31   :  { %5548 = vmatprep.subr.bf16.mxu0 %v8577_v28  ;;  %5677 = vmatprep.subr.bf16.mxu1 %v8583_v16  ;;  %v4135_v11 = vld [vmem:[%s14163_s15 + $0x6d8] sm:$0xff]  ;;  %v8672_v28 = vcombine.low %v4108_v5, %v4116_v8  ;;  %v8678_v16 = vcombine.low %v4111_v61, %v4119_v10  ;;  %v8517_v5 = vcombine.high %v3950_v3, %v3958_v17  ;;  %v3966_v61 = vld [vmem:[%s14163_s15 + $0x190] sm:$0xff] }
 0xd32   :  { %v8695_v31 = vcombine.high %v4127_v20, %v4135_v11  ;;  %v3974_v10 = vld [vmem:[%s14163_s15 + $0x1d0] sm:$0xff] }
 0xd34   :  { %5549 = vmatpush1.bf16.msra.mxu0 %v8576_v14  ;;  %5678 = vmatpush1.bf16.msra.mxu1 %v8582_v9  ;;  %v4143_v14 = vld [vmem:[%s14163_s15 + $0x718] sm:$0xff] }
 0xd35   :  { %5550 = vmatprep.subr.bf16.mxu0 %v8593_v33  ;;  %5679 = vmatprep.subr.bf16.mxu1 %v8599_v36  ;;  %v4151_v9 = vld [vmem:[%s14163_s15 + $0x758] sm:$0xff]  ;;  %v8688_v33 = vcombine.low %v4124_v22, %v4132_v2  ;;  %v8694_v36 = vcombine.low %v4127_v20, %v4135_v11  ;;  %v8533_v22 = vcombine.high %v3966_v61, %v3974_v10  ;;  %v3982_v20 = vld [vmem:[%s14163_s15 + $0x210] sm:$0xff] }
 0xd36   :  { %v8711_v13 = vcombine.high %v4143_v14, %v4151_v9  ;;  %v3990_v11 = vld [vmem:[%s14163_s15 + $0x250] sm:$0xff] }
 0xd38   :  { %5551 = vmatpush1.bf16.msra.mxu0 %v8592_v45  ;;  %5680 = vmatpush1.bf16.msra.mxu1 %v8598_v35  ;;  %v4159_v45 = vld [vmem:[%s14163_s15 + $0x798] sm:$0xff] }
 0xd39   :  { %5552 = vmatprep.subr.bf16.mxu0 %v8609_v21  ;;  %5681 = vmatprep.subr.bf16.mxu1 %v8615_v60  ;;  %v4167_v35 = vld [vmem:[%s14163_s15 + $0x7d8] sm:$0xff]  ;;  %v8704_v21 = vcombine.low %v4140_v25, %v4148_v37  ;;  %v8710_v60 = vcombine.low %v4143_v14, %v4151_v9  ;;  %v8549_v25 = vcombine.high %v3982_v20, %v3990_v11  ;;  %v3998_v14 = vld [vmem:[%s14163_s15 + $0x290] sm:$0xff] }
 0xd3a   :  { %v8727_v49 = vcombine.high %v4159_v45, %v4167_v35  ;;  %v4006_v9 = vld [vmem:[%s14163_s15 + $0x2d0] sm:$0xff] }
 0xd3c   :  { %5553 = vmatpush1.bf16.msra.mxu0 %v8608_v55  ;;  %5682 = vmatpush1.bf16.msra.mxu1 %v8614_v56  ;;  %v3921_v55 = vld [vmem:[%s14163_s15 + $0x28] sm:$0xff] }
 0xd3d   :  { %5554 = vmatprep.subr.bf16.mxu0 %v8625_v27  ;;  %5683 = vmatprep.subr.bf16.mxu1 %v8631_v34  ;;  %v3929_v56 = vld [vmem:[%s14163_s15 + $0x68] sm:$0xff]  ;;  %v8720_v27 = vcombine.low %v4156_v23, %v4164_v26  ;;  %v8726_v34 = vcombine.low %v4159_v45, %v4167_v35  ;;  %v8565_v23 = vcombine.high %v3998_v14, %v4006_v9  ;;  %v4014_v45 = vld [vmem:[%s14163_s15 + $0x310] sm:$0xff] }
 0xd3e   :  { %v8491_v59 = vcombine.high %v3921_v55, %v3929_v56  ;;  %v4022_v35 = vld [vmem:[%s14163_s15 + $0x350] sm:$0xff] }
 0xd40   :  { %5555 = vmatpush1.bf16.msra.mxu0 %v8624_v63  ;;  %5684 = vmatpush1.bf16.msra.mxu1 %v8630_v30  ;;  %v3937_v63 = vld [vmem:[%s14163_s15 + $0xa8] sm:$0xff] }
 0xd41   :  { %5556 = vmatprep.subr.bf16.mxu0 %v8641_v43  ;;  %5685 = vmatprep.subr.bf16.mxu1 %v8647_v46  ;;  %v3945_v30 = vld [vmem:[%s14163_s15 + $0xe8] sm:$0xff]  ;;  %v8484_v43 = vcombine.low %v3918_v51, %v3926_v38  ;;  %v8490_v46 = vcombine.low %v3921_v55, %v3929_v56  ;;  %v8581_v51 = vcombine.high %v4014_v45, %v4022_v35  ;;  %v4030_v55 = vld [vmem:[%s14163_s15 + $0x390] sm:$0xff] }
 0xd42   :  { %v8507_v44 = vcombine.high %v3937_v63, %v3945_v30  ;;  %v4038_v56 = vld [vmem:[%s14163_s15 + $0x3d0] sm:$0xff] }
 0xd44   :  { %5557 = vmatpush1.bf16.msra.mxu0 %v8640_v1  ;;  %5686 = vmatpush1.bf16.msra.mxu1 %v8646_v42  ;;  %v3953_v1 = vld [vmem:[%s14163_s15 + $0x128] sm:$0xff] }
 0xd45   :  { %5558 = vmatprep.subr.bf16.mxu0 %v8657_v47  ;;  %5687 = vmatprep.subr.bf16.mxu1 %v8663_v0  ;;  %v3961_v42 = vld [vmem:[%s14163_s15 + $0x168] sm:$0xff]  ;;  %v8500_v47 = vcombine.low %v3934_v29, %v3942_v32  ;;  %v8506_v0 = vcombine.low %v3937_v63, %v3945_v30  ;;  %v8597_v29 = vcombine.high %v4030_v55, %v4038_v56  ;;  %v4046_v63 = vld [vmem:[%s14163_s15 + $0x410] sm:$0xff] }
 0xd46   :  { %v8523_v8 = vcombine.high %v3953_v1, %v3961_v42  ;;  %v4054_v30 = vld [vmem:[%s14163_s15 + $0x450] sm:$0xff] }
 0xd48   :  { %5559 = vmatpush1.bf16.msra.mxu0 %v8656_v24  ;;  %5688 = vmatpush1.bf16.msra.mxu1 %v8662_v7  ;;  %v3969_v24 = vld [vmem:[%s14163_s15 + $0x1a8] sm:$0xff] }
 0xd49   :  { %5560 = vmatprep.subr.bf16.mxu0 %v8673_v15  ;;  %5689 = vmatprep.subr.bf16.mxu1 %v8679_v6  ;;  %v3977_v7 = vld [vmem:[%s14163_s15 + $0x1e8] sm:$0xff]  ;;  %v8516_v15 = vcombine.low %v3950_v3, %v3958_v17  ;;  %v8522_v6 = vcombine.low %v3953_v1, %v3961_v42  ;;  %v8613_v3 = vcombine.high %v4046_v63, %v4054_v30  ;;  %v4062_v1 = vld [vmem:[%s14163_s15 + $0x490] sm:$0xff] }
 0xd4a   :  { %v8539_v2 = vcombine.high %v3969_v24, %v3977_v7  ;;  %v4070_v42 = vld [vmem:[%s14163_s15 + $0x4d0] sm:$0xff] }
 0xd4c   :  { %5561 = vmatpush1.bf16.msra.mxu0 %v8672_v28  ;;  %5690 = vmatpush1.bf16.msra.mxu1 %v8678_v16  ;;  %v3985_v28 = vld [vmem:[%s14163_s15 + $0x228] sm:$0xff] }
 0xd4d   :  { %5562 = vmatprep.subr.bf16.mxu0 %v8689_v19  ;;  %5691 = vmatprep.subr.bf16.mxu1 %v8695_v31  ;;  %v3993_v16 = vld [vmem:[%s14163_s15 + $0x268] sm:$0xff]  ;;  %v8532_v19 = vcombine.low %v3966_v61, %v3974_v10  ;;  %v8538_v31 = vcombine.low %v3969_v24, %v3977_v7  ;;  %v8629_v61 = vcombine.high %v4062_v1, %v4070_v42  ;;  %v4078_v24 = vld [vmem:[%s14163_s15 + $0x510] sm:$0xff] }
 0xd4e   :  { %v8555_v37 = vcombine.high %v3985_v28, %v3993_v16  ;;  %v4086_v7 = vld [vmem:[%s14163_s15 + $0x550] sm:$0xff] }
 0xd50   :  { %5563 = vmatpush1.bf16.msra.mxu0 %v8688_v33  ;;  %5692 = vmatpush1.bf16.msra.mxu1 %v8694_v36  ;;  %v4001_v33 = vld [vmem:[%s14163_s15 + $0x2a8] sm:$0xff] }
 0xd51   :  { %5564 = vmatprep.subr.bf16.mxu0 %v8705_v39  ;;  %5693 = vmatprep.subr.bf16.mxu1 %v8711_v13  ;;  %v4009_v36 = vld [vmem:[%s14163_s15 + $0x2e8] sm:$0xff]  ;;  %v8548_v39 = vcombine.low %v3982_v20, %v3990_v11  ;;  %v8554_v13 = vcombine.low %v3985_v28, %v3993_v16  ;;  %v8645_v20 = vcombine.high %v4078_v24, %v4086_v7  ;;  %v4094_v28 = vld [vmem:[%s14163_s15 + $0x590] sm:$0xff] }
 0xd52   :  { %v8571_v26 = vcombine.high %v4001_v33, %v4009_v36  ;;  %v4102_v16 = vld [vmem:[%s14163_s15 + $0x5d0] sm:$0xff] }
 0xd54   :  { %5565 = vmatpush1.bf16.msra.mxu0 %v8704_v21  ;;  %5694 = vmatpush1.bf16.msra.mxu1 %v8710_v60  ;;  %v4017_v21 = vld [vmem:[%s14163_s15 + $0x328] sm:$0xff] }
 0xd55   :  { %5566 = vmatprep.subr.bf16.mxu0 %v8721_v58  ;;  %5695 = vmatprep.subr.bf16.mxu1 %v8727_v49  ;;  %v4025_v60 = vld [vmem:[%s14163_s15 + $0x368] sm:$0xff]  ;;  %v8564_v58 = vcombine.low %v3998_v14, %v4006_v9  ;;  %v8570_v49 = vcombine.low %v4001_v33, %v4009_v36  ;;  %v8661_v14 = vcombine.high %v4094_v28, %v4102_v16  ;;  %v4110_v33 = vld [vmem:[%s14163_s15 + $0x610] sm:$0xff] }
 0xd56   :  { %v8587_v38 = vcombine.high %v4017_v21, %v4025_v60  ;;  %v4118_v36 = vld [vmem:[%s14163_s15 + $0x650] sm:$0xff] }
 0xd58   :  { %5567 = vmatpush1.bf16.msra.mxu0 %v8720_v27  ;;  %5696 = vmatpush1.bf16.msra.mxu1 %v8726_v34  ;;  %v4033_v27 = vld [vmem:[%s14163_s15 + $0x3a8] sm:$0xff] }
 0xd59   :  { %5622 = vmatprep.subr.bf16.mxu0 %v8485_v57  ;;  %5751 = vmatprep.subr.bf16.mxu1 %v8491_v59  ;;  %v4041_v34 = vld [vmem:[%s14163_s15 + $0x3e8] sm:$0xff]  ;;  %v8580_v57 = vcombine.low %v4014_v45, %v4022_v35  ;;  %v8586_v59 = vcombine.low %v4017_v21, %v4025_v60  ;;  %v8677_v45 = vcombine.high %v4110_v33, %v4118_v36  ;;  %v4126_v21 = vld [vmem:[%s14163_s15 + $0x690] sm:$0xff] }
 0xd5a   :  { %v8603_v32 = vcombine.high %v4033_v27, %v4041_v34  ;;  %v4134_v60 = vld [vmem:[%s14163_s15 + $0x6d0] sm:$0xff] }
 0xd5b   :  { %5569 = vmatmul.mubr.bf16.vlgmr.msra.gmra.mrb[40].mxu0 %v12127_v40  ;;  %5698 = vmatmul.mubr.bf16.vlgmr.msra.gmra.mrb[72].mxu1 %v12127_v40 }
 0xd5c   :  { %5623 = vmatpush1.bf16.msra.mxu0 %v8484_v43  ;;  %5654 = vmatprep.mubr.bf16.mxu0 %v12129_v41  ;;  %v4049_v43 = vld [vmem:[%s14163_s15 + $0x428] sm:$0xff] }
 0xd5d   :  { %5752 = vmatpush1.bf16.msra.mxu1 %v8490_v46  ;;  %5783 = vmatprep.mubr.bf16.mxu1 %v12129_v41  ;;  %v4057_v46 = vld [vmem:[%s14163_s15 + $0x468] sm:$0xff] }
 0xd5e   :  { %5624 = vmatprep.subr.bf16.mxu0 %v8501_v62  ;;  %5753 = vmatprep.subr.bf16.mxu1 %v8507_v44  ;;  %v8596_v62 = vcombine.low %v4030_v55, %v4038_v56  ;;  %v8602_v44 = vcombine.low %v4033_v27, %v4041_v34  ;;  %v8619_v17 = vcombine.high %v4049_v43, %v4057_v46  ;;  %v4142_v27 = vld [vmem:[%s14163_s15 + $0x710] sm:$0xff] }
 0xd5f   :  { %v8693_v55 = vcombine.high %v4126_v21, %v4134_v60  ;;  %v4150_v34 = vld [vmem:[%s14163_s15 + $0x750] sm:$0xff] }
 0xd60   :  { %5625 = vmatpush1.bf16.msra.mxu0 %v8500_v47  ;;  %v4065_v47 = vld [vmem:[%s14163_s15 + $0x4a8] sm:$0xff] }
 0xd61   :  { %5754 = vmatpush1.bf16.msra.mxu1 %v8506_v0  ;;  %5626 = vmatprep.subr.bf16.mxu0 %v8517_v5  ;;  %v4073_v0 = vld [vmem:[%s14163_s15 + $0x4e8] sm:$0xff]  ;;  %v8612_v5 = vcombine.low %v4046_v63, %v4054_v30  ;;  %v8709_v63 = vcombine.high %v4142_v27, %v4150_v34 }
 0xd62   :  { %5755 = vmatprep.subr.bf16.mxu1 %v8523_v8  ;;  %v8618_v8 = vcombine.low %v4049_v43, %v4057_v46  ;;  %v8635_v10 = vcombine.high %v4065_v47, %v4073_v0  ;;  %v4158_v43 = vld [vmem:[%s14163_s15 + $0x790] sm:$0xff] }
 0xd63   :  { %v4166_v46 = vld [vmem:[%s14163_s15 + $0x7d0] sm:$0xff] }
 0xd64   :  { %5627 = vmatpush1.bf16.msra.mxu0 %v8516_v15  ;;  %v4081_v15 = vld [vmem:[%s14163_s15 + $0x528] sm:$0xff] }
 0xd65   :  { %5756 = vmatpush1.bf16.msra.mxu1 %v8522_v6  ;;  %5628 = vmatprep.subr.bf16.mxu0 %v8533_v22  ;;  %v4089_v6 = vld [vmem:[%s14163_s15 + $0x568] sm:$0xff]  ;;  %v8628_v22 = vcombine.low %v4062_v1, %v4070_v42  ;;  %v8725_v1 = vcombine.high %v4158_v43, %v4166_v46 }
 0xd66   :  { %5757 = vmatprep.subr.bf16.mxu1 %v8539_v2  ;;  %v8634_v2 = vcombine.low %v4065_v47, %v4073_v0  ;;  %v8651_v11 = vcombine.high %v4081_v15, %v4089_v6  ;;  %v3920_v47 = vld [vmem:[%s14163_s15 + $0x20] sm:$0xff] }
 0xd67   :  { %v3928_v0 = vld [vmem:[%s14163_s15 + $0x60] sm:$0xff] }
 0xd68   :  { %5629 = vmatpush1.bf16.msra.mxu0 %v8532_v19  ;;  %v4097_v19 = vld [vmem:[%s14163_s15 + $0x5a8] sm:$0xff] }
 0xd69   :  { %5758 = vmatpush1.bf16.msra.mxu1 %v8538_v31  ;;  %5630 = vmatprep.subr.bf16.mxu0 %v8549_v25  ;;  %v4105_v31 = vld [vmem:[%s14163_s15 + $0x5e8] sm:$0xff]  ;;  %v8644_v25 = vcombine.low %v4078_v24, %v4086_v7  ;;  %v8489_v24 = vcombine.high %v3920_v47, %v3928_v0 }
 0xd6a   :  { %5759 = vmatprep.subr.bf16.mxu1 %v8555_v37  ;;  %v8650_v37 = vcombine.low %v4081_v15, %v4089_v6  ;;  %v8667_v9 = vcombine.high %v4097_v19, %v4105_v31  ;;  %v3936_v15 = vld [vmem:[%s14163_s15 + $0xa0] sm:$0xff] }
 0xd6b   :  { %v3944_v6 = vld [vmem:[%s14163_s15 + $0xe0] sm:$0xff] }
 0xd6c   :  { %5631 = vmatpush1.bf16.msra.mxu0 %v8548_v39  ;;  %v4113_v39 = vld [vmem:[%s14163_s15 + $0x628] sm:$0xff] }
 0xd6d   :  { %5760 = vmatpush1.bf16.msra.mxu1 %v8554_v13  ;;  %5632 = vmatprep.subr.bf16.mxu0 %v8565_v23  ;;  %v4121_v13 = vld [vmem:[%s14163_s15 + $0x668] sm:$0xff]  ;;  %v8660_v23 = vcombine.low %v4094_v28, %v4102_v16  ;;  %v8505_v28 = vcombine.high %v3936_v15, %v3944_v6  ;;  %v3952_v16 = vld [vmem:[%s14163_s15 + $0x120] sm:$0xff] }
 0xd6e   :  { %5761 = vmatprep.subr.bf16.mxu1 %v8571_v26  ;;  %v8666_v26 = vcombine.low %v4097_v19, %v4105_v31  ;;  %v8683_v35 = vcombine.high %v4113_v39, %v4121_v13  ;;  %v3960_v19 = vld [vmem:[%s14163_s15 + $0x160] sm:$0xff] }
 0xd70   :  { %5633 = vmatpush1.bf16.msra.mxu0 %v8564_v58  ;;  %v4129_v58 = vld [vmem:[%s14163_s15 + $0x6a8] sm:$0xff] }
 0xd71   :  { %5762 = vmatpush1.bf16.msra.mxu1 %v8570_v49  ;;  %5634 = vmatprep.subr.bf16.mxu0 %v8581_v51  ;;  %v4137_v49 = vld [vmem:[%s14163_s15 + $0x6e8] sm:$0xff]  ;;  %v8676_v51 = vcombine.low %v4110_v33, %v4118_v36  ;;  %v8521_v33 = vcombine.high %v3952_v16, %v3960_v19 }
 0xd72   :  { %5763 = vmatprep.subr.bf16.mxu1 %v8587_v38  ;;  %v8682_v38 = vcombine.low %v4113_v39, %v4121_v13  ;;  %v8699_v56 = vcombine.high %v4129_v58, %v4137_v49  ;;  %v3968_v39 = vld [vmem:[%s14163_s15 + $0x1a0] sm:$0xff] }
 0xd73   :  { %v3976_v13 = vld [vmem:[%s14163_s15 + $0x1e0] sm:$0xff] }
 0xd74   :  { %5635 = vmatpush1.bf16.msra.mxu0 %v8580_v57  ;;  %v4145_v57 = vld [vmem:[%s14163_s15 + $0x728] sm:$0xff] }
 0xd75   :  { %5764 = vmatpush1.bf16.msra.mxu1 %v8586_v59  ;;  %5636 = vmatprep.subr.bf16.mxu0 %v8597_v29  ;;  %v4153_v59 = vld [vmem:[%s14163_s15 + $0x768] sm:$0xff]  ;;  %v8692_v29 = vcombine.low %v4126_v21, %v4134_v60  ;;  %v8537_v21 = vcombine.high %v3968_v39, %v3976_v13 }
 0xd76   :  { %5765 = vmatprep.subr.bf16.mxu1 %v8603_v32  ;;  %v8698_v32 = vcombine.low %v4129_v58, %v4137_v49  ;;  %v8715_v30 = vcombine.high %v4145_v57, %v4153_v59  ;;  %v3984_v58 = vld [vmem:[%s14163_s15 + $0x220] sm:$0xff] }
 0xd77   :  { %v3992_v49 = vld [vmem:[%s14163_s15 + $0x260] sm:$0xff] }
 0xd78   :  { %5637 = vmatpush1.bf16.msra.mxu0 %v8596_v62  ;;  %v4161_v62 = vld [vmem:[%s14163_s15 + $0x7a8] sm:$0xff] }
 0xd79   :  { %5766 = vmatpush1.bf16.msra.mxu1 %v8602_v44  ;;  %5638 = vmatprep.subr.bf16.mxu0 %v8613_v3  ;;  %v4169_v44 = vld [vmem:[%s14163_s15 + $0x7e8] sm:$0xff]  ;;  %v8708_v3 = vcombine.low %v4142_v27, %v4150_v34  ;;  %v8553_v27 = vcombine.high %v3984_v58, %v3992_v49 }
 0xd7a   :  { %5767 = vmatprep.subr.bf16.mxu1 %v8619_v17  ;;  %v8714_v17 = vcombine.low %v4145_v57, %v4153_v59  ;;  %v8731_v42 = vcombine.high %v4161_v62, %v4169_v44  ;;  %v4000_v57 = vld [vmem:[%s14163_s15 + $0x2a0] sm:$0xff] }
 0xd7b   :  { %v4008_v59 = vld [vmem:[%s14163_s15 + $0x2e0] sm:$0xff] }
 0xd7c   :  { %5639 = vmatpush1.bf16.msra.mxu0 %v8612_v5  ;;  %v3923_v5 = vld [vmem:[%s14163_s15 + $0x38] sm:$0xff] }
 0xd7d   :  { %5768 = vmatpush1.bf16.msra.mxu1 %v8618_v8  ;;  %5640 = vmatprep.subr.bf16.mxu0 %v8629_v61  ;;  %v3931_v8 = vld [vmem:[%s14163_s15 + $0x78] sm:$0xff]  ;;  %v8724_v61 = vcombine.low %v4158_v43, %v4166_v46  ;;  %v8569_v43 = vcombine.high %v4000_v57, %v4008_v59 }
 0xd7e   :  { %5769 = vmatprep.subr.bf16.mxu1 %v8635_v10  ;;  %v8730_v10 = vcombine.low %v4161_v62, %v4169_v44  ;;  %v8495_v7 = vcombine.high %v3923_v5, %v3931_v8  ;;  %v4016_v62 = vld [vmem:[%s14163_s15 + $0x320] sm:$0xff] }
 0xd7f   :  { %v4024_v44 = vld [vmem:[%s14163_s15 + $0x360] sm:$0xff] }
 0xd80   :  { %5641 = vmatpush1.bf16.msra.mxu0 %v8628_v22  ;;  %v8488_v22 = vcombine.low %v3920_v47, %v3928_v0  ;;  %v8585_v47 = vcombine.high %v4016_v62, %v4024_v44 }
 0xd81   :  { %5770 = vmatpush1.bf16.msra.mxu1 %v8634_v2  ;;  %5642 = vmatprep.subr.bf16.mxu0 %v8645_v20  ;;  %v3939_v2 = vld [vmem:[%s14163_s15 + $0xb8] sm:$0xff] }
 0xd82   :  { %5771 = vmatprep.subr.bf16.mxu1 %v8651_v11  ;;  %v3947_v20 = vld [vmem:[%s14163_s15 + $0xf8] sm:$0xff]  ;;  %v8494_v11 = vcombine.low %v3923_v5, %v3931_v8  ;;  %v4032_v5 = vld [vmem:[%s14163_s15 + $0x3a0] sm:$0xff] }
 0xd83   :  { %v8511_v31 = vcombine.high %v3939_v2, %v3947_v20  ;;  %v4040_v8 = vld [vmem:[%s14163_s15 + $0x3e0] sm:$0xff] }
 0xd84   :  { %5643 = vmatpush1.bf16.msra.mxu0 %v8644_v25  ;;  %v3955_v25 = vld [vmem:[%s14163_s15 + $0x138] sm:$0xff] }
 0xd85   :  { %5772 = vmatpush1.bf16.msra.mxu1 %v8650_v37  ;;  %5644 = vmatprep.subr.bf16.mxu0 %v8661_v14  ;;  %v3963_v37 = vld [vmem:[%s14163_s15 + $0x178] sm:$0xff]  ;;  %v8504_v14 = vcombine.low %v3936_v15, %v3944_v6  ;;  %v8601_v15 = vcombine.high %v4032_v5, %v4040_v8 }
 0xd86   :  { %5773 = vmatprep.subr.bf16.mxu1 %v8667_v9  ;;  %v8510_v9 = vcombine.low %v3939_v2, %v3947_v20  ;;  %v8527_v36 = vcombine.high %v3955_v25, %v3963_v37  ;;  %v4056_v2 = vld [vmem:[%s14163_s15 + $0x460] sm:$0xff]  ;;  %v4051_v20 = vld [vmem:[%s14163_s15 + $0x438] sm:$0xff] }
 0xd88   :  { %5645 = vmatpush1.bf16.msra.mxu0 %v8660_v23  ;;  %v3971_v23 = vld [vmem:[%s14163_s15 + $0x1b8] sm:$0xff] }
 0xd89   :  { %5774 = vmatpush1.bf16.msra.mxu1 %v8666_v26  ;;  %5646 = vmatprep.subr.bf16.mxu0 %v8677_v45  ;;  %v3979_v26 = vld [vmem:[%s14163_s15 + $0x1f8] sm:$0xff]  ;;  %v8520_v45 = vcombine.low %v3952_v16, %v3960_v19 }
 0xd8a   :  { %5775 = vmatprep.subr.bf16.mxu1 %v8683_v35  ;;  %v8526_v35 = vcombine.low %v3955_v25, %v3963_v37  ;;  %v8543_v60 = vcombine.high %v3971_v23, %v3979_v26  ;;  %v4064_v25 = vld [vmem:[%s14163_s15 + $0x4a0] sm:$0xff] }
 0xd8b   :  { %v4072_v37 = vld [vmem:[%s14163_s15 + $0x4e0] sm:$0xff] }
 0xd8c   :  { %5647 = vmatpush1.bf16.msra.mxu0 %v8676_v51  ;;  %v3987_v51 = vld [vmem:[%s14163_s15 + $0x238] sm:$0xff] }
 0xd8d   :  { %5776 = vmatpush1.bf16.msra.mxu1 %v8682_v38  ;;  %5648 = vmatprep.subr.bf16.mxu0 %v8693_v55  ;;  %v3995_v38 = vld [vmem:[%s14163_s15 + $0x278] sm:$0xff]  ;;  %v8536_v55 = vcombine.low %v3968_v39, %v3976_v13  ;;  %v8633_v39 = vcombine.high %v4064_v25, %v4072_v37 }
 0xd8e   :  { %5777 = vmatprep.subr.bf16.mxu1 %v8699_v56  ;;  %v8542_v56 = vcombine.low %v3971_v23, %v3979_v26  ;;  %v8559_v34 = vcombine.high %v3987_v51, %v3995_v38  ;;  %v4080_v23 = vld [vmem:[%s14163_s15 + $0x520] sm:$0xff] }
 0xd8f   :  { %v4088_v26 = vld [vmem:[%s14163_s15 + $0x560] sm:$0xff] }
 0xd90   :  { %5649 = vmatpush1.bf16.msra.mxu0 %v8692_v29  ;;  %v4003_v29 = vld [vmem:[%s14163_s15 + $0x2b8] sm:$0xff] }
 0xd91   :  { %5778 = vmatpush1.bf16.msra.mxu1 %v8698_v32  ;;  %5650 = vmatprep.subr.bf16.mxu0 %v8709_v63  ;;  %v4011_v32 = vld [vmem:[%s14163_s15 + $0x2f8] sm:$0xff]  ;;  %v8552_v63 = vcombine.low %v3984_v58, %v3992_v49  ;;  %v8649_v58 = vcombine.high %v4080_v23, %v4088_v26 }
 0xd92   :  { %5779 = vmatprep.subr.bf16.mxu1 %v8715_v30  ;;  %v8558_v30 = vcombine.low %v3987_v51, %v3995_v38  ;;  %v8575_v46 = vcombine.high %v4003_v29, %v4011_v32  ;;  %v4096_v51 = vld [vmem:[%s14163_s15 + $0x5a0] sm:$0xff] }
 0xd93   :  { %v4104_v38 = vld [vmem:[%s14163_s15 + $0x5e0] sm:$0xff] }
 0xd94   :  { %5651 = vmatpush1.bf16.msra.mxu0 %v8708_v3  ;;  %v4019_v3 = vld [vmem:[%s14163_s15 + $0x338] sm:$0xff] }
 0xd95   :  { %5780 = vmatpush1.bf16.msra.mxu1 %v8714_v17  ;;  %5652 = vmatprep.subr.bf16.mxu0 %v8725_v1  ;;  %v4027_v17 = vld [vmem:[%s14163_s15 + $0x378] sm:$0xff]  ;;  %v8568_v1 = vcombine.low %v4000_v57, %v4008_v59  ;;  %v8665_v57 = vcombine.high %v4096_v51, %v4104_v38 }
 0xd96   :  { %5781 = vmatprep.subr.bf16.mxu1 %v8731_v42  ;;  %v8574_v42 = vcombine.low %v4003_v29, %v4011_v32  ;;  %v8591_v0 = vcombine.high %v4019_v3, %v4027_v17  ;;  %v4112_v29 = vld [vmem:[%s14163_s15 + $0x620] sm:$0xff] }
 0xd97   :  { %v4120_v32 = vld [vmem:[%s14163_s15 + $0x660] sm:$0xff] }
 0xd98   :  { %5653 = vmatpush1.bf16.msra.mxu0 %v8724_v61  ;;  %v4035_v61 = vld [vmem:[%s14163_s15 + $0x3b8] sm:$0xff] }
 0xd99   :  { %5782 = vmatpush1.bf16.msra.mxu1 %v8730_v10  ;;  %5708 = vmatprep.subr.bf16.mxu0 %v8489_v24  ;;  %v4043_v10 = vld [vmem:[%s14163_s15 + $0x3f8] sm:$0xff]  ;;  %v8584_v24 = vcombine.low %v4016_v62, %v4024_v44  ;;  %v8681_v62 = vcombine.high %v4112_v29, %v4120_v32 }
 0xd9a   :  { %5837 = vmatprep.subr.bf16.mxu1 %v8495_v7  ;;  %v8590_v7 = vcombine.low %v4019_v3, %v4027_v17  ;;  %v8607_v6 = vcombine.high %v4035_v61, %v4043_v10  ;;  %v8606_v16 = vcombine.low %v4035_v61, %v4043_v10  ;;  %v4128_v3 = vld [vmem:[%s14163_s15 + $0x6a0] sm:$0xff] }
 0xd9b   :  { %5655 = vmatmul.mubr.bf16.vlgmr.msra.gmra.mrb[44].mxu0 %v12127_v40  ;;  %v4136_v17 = vld [vmem:[%s14163_s15 + $0x6e0] sm:$0xff] }
 0xd9c   :  { %5784 = vmatmul.mubr.bf16.vlgmr.msra.gmra.mrb[76].mxu1 %v12127_v40  ;;  %5709 = vmatpush1.bf16.msra.mxu0 %v8488_v22  ;;  %v4048_v22 = vld [vmem:[%s14163_s15 + $0x420] sm:$0xff] }
 0xd9d   :  { %5740 = vmatprep.mubr.bf16.mxu0 %v12129_v41  ;;  %5838 = vmatpush1.bf16.msra.mxu1 %v8494_v11  ;;  %v4059_v11 = vld [vmem:[%s14163_s15 + $0x478] sm:$0xff]  ;;  %v8617_v19 = vcombine.high %v4048_v22, %v4056_v2  ;;  %v4144_v61 = vld [vmem:[%s14163_s15 + $0x720] sm:$0xff] }
 0xd9e   :  { %5869 = vmatprep.mubr.bf16.mxu1 %v12129_v41  ;;  %5710 = vmatprep.subr.bf16.mxu0 %v8505_v28  ;;  %v8600_v28 = vcombine.low %v4032_v5, %v4040_v8  ;;  %v8697_v5 = vcombine.high %v4128_v3, %v4136_v17  ;;  %v4152_v10 = vld [vmem:[%s14163_s15 + $0x760] sm:$0xff] }
 0xd9f   :  { %5839 = vmatprep.subr.bf16.mxu1 %v8511_v31  ;;  %v8623_v31 = vcombine.high %v4051_v20, %v4059_v11 }
 0xda0   :  { %5711 = vmatpush1.bf16.msra.mxu0 %v8504_v14  ;;  %v4067_v14 = vld [vmem:[%s14163_s15 + $0x4b8] sm:$0xff] }
 0xda1   :  { %5840 = vmatpush1.bf16.msra.mxu1 %v8510_v9  ;;  %5712 = vmatprep.subr.bf16.mxu0 %v8521_v33  ;;  %v4075_v9 = vld [vmem:[%s14163_s15 + $0x4f8] sm:$0xff]  ;;  %v8616_v33 = vcombine.low %v4048_v22, %v4056_v2  ;;  %v8713_v22 = vcombine.high %v4144_v61, %v4152_v10 }
 0xda2   :  { %5841 = vmatprep.subr.bf16.mxu1 %v8527_v36  ;;  %v8622_v36 = vcombine.low %v4051_v20, %v4059_v11  ;;  %v8639_v13 = vcombine.high %v4067_v14, %v4075_v9  ;;  %v4160_v20 = vld [vmem:[%s14163_s15 + $0x7a0] sm:$0xff] }
 0xda3   :  { %v4168_v11 = vld [vmem:[%s14163_s15 + $0x7e0] sm:$0xff] }
 0xda4   :  { %5713 = vmatpush1.bf16.msra.mxu0 %v8520_v45  ;;  %v4083_v45 = vld [vmem:[%s14163_s15 + $0x538] sm:$0xff] }
 0xda5   :  { %5842 = vmatpush1.bf16.msra.mxu1 %v8526_v35  ;;  %5714 = vmatprep.subr.bf16.mxu0 %v8537_v21  ;;  %v4091_v35 = vld [vmem:[%s14163_s15 + $0x578] sm:$0xff]  ;;  %v8632_v21 = vcombine.low %v4064_v25, %v4072_v37  ;;  %v8729_v25 = vcombine.high %v4160_v20, %v4168_v11 }
 0xda6   :  { %5843 = vmatprep.subr.bf16.mxu1 %v8543_v60  ;;  %v8638_v60 = vcombine.low %v4067_v14, %v4075_v9  ;;  %v8655_v49 = vcombine.high %v4083_v45, %v4091_v35  ;;  %v3922_v14 = vld [vmem:[%s14163_s15 + $0x30] sm:$0xff] }
 0xda7   :  { %v3930_v9 = vld [vmem:[%s14163_s15 + $0x70] sm:$0xff] }
 0xda8   :  { %5715 = vmatpush1.bf16.msra.mxu0 %v8536_v55  ;;  %v4099_v55 = vld [vmem:[%s14163_s15 + $0x5b8] sm:$0xff] }
 0xda9   :  { %5844 = vmatpush1.bf16.msra.mxu1 %v8542_v56  ;;  %5716 = vmatprep.subr.bf16.mxu0 %v8553_v27  ;;  %v4107_v56 = vld [vmem:[%s14163_s15 + $0x5f8] sm:$0xff]  ;;  %v8648_v27 = vcombine.low %v4080_v23, %v4088_v26  ;;  %v3946_v23 = vld [vmem:[%s14163_s15 + $0xf0] sm:$0xff]  ;;  %v8492_v26 = vcombine.low %v3922_v14, %v3930_v9 }
 0xdaa   :  { %5845 = vmatprep.subr.bf16.mxu1 %v8559_v34  ;;  %v8654_v34 = vcombine.low %v4083_v45, %v4091_v35  ;;  %v8671_v59 = vcombine.high %v4099_v55, %v4107_v56  ;;  %v3954_v35 = vld [vmem:[%s14163_s15 + $0x130] sm:$0xff] }
 0xdac   :  { %5717 = vmatpush1.bf16.msra.mxu0 %v8552_v63  ;;  %v4115_v63 = vld [vmem:[%s14163_s15 + $0x638] sm:$0xff] }
 0xdad   :  { %5846 = vmatpush1.bf16.msra.mxu1 %v8558_v30  ;;  %5718 = vmatprep.subr.bf16.mxu0 %v8569_v43  ;;  %v4123_v30 = vld [vmem:[%s14163_s15 + $0x678] sm:$0xff]  ;;  %v8664_v43 = vcombine.low %v4096_v51, %v4104_v38  ;;  %v3978_v51 = vld [vmem:[%s14163_s15 + $0x1f0] sm:$0xff] }
 0xdae   :  { %5847 = vmatprep.subr.bf16.mxu1 %v8575_v46  ;;  %v8670_v46 = vcombine.low %v4099_v55, %v4107_v56  ;;  %v8687_v44 = vcombine.high %v4115_v63, %v4123_v30  ;;  %v3986_v56 = vld [vmem:[%s14163_s15 + $0x230] sm:$0xff] }
 0xdb0   :  { %5719 = vmatpush1.bf16.msra.mxu0 %v8568_v1  ;;  %v4131_v1 = vld [vmem:[%s14163_s15 + $0x6b8] sm:$0xff] }
 0xdb1   :  { %5848 = vmatpush1.bf16.msra.mxu1 %v8574_v42  ;;  %5720 = vmatprep.subr.bf16.mxu0 %v8585_v47  ;;  %v4139_v42 = vld [vmem:[%s14163_s15 + $0x6f8] sm:$0xff]  ;;  %v8680_v47 = vcombine.low %v4112_v29, %v4120_v32 }
 0xdb2   :  { %5849 = vmatprep.subr.bf16.mxu1 %v8591_v0  ;;  %v8686_v0 = vcombine.low %v4115_v63, %v4123_v30  ;;  %v8703_v8 = vcombine.high %v4131_v1, %v4139_v42  ;;  %v4018_v63 = vld [vmem:[%s14163_s15 + $0x330] sm:$0xff] }
 0xdb3   :  { %v4026_v30 = vld [vmem:[%s14163_s15 + $0x370] sm:$0xff] }
 0xdb4   :  { %5721 = vmatpush1.bf16.msra.mxu0 %v8584_v24  ;;  %v4147_v24 = vld [vmem:[%s14163_s15 + $0x738] sm:$0xff] }
 0xdb5   :  { %5850 = vmatpush1.bf16.msra.mxu1 %v8590_v7  ;;  %5722 = vmatprep.subr.bf16.mxu0 %v8601_v15  ;;  %v4155_v7 = vld [vmem:[%s14163_s15 + $0x778] sm:$0xff]  ;;  %v8696_v15 = vcombine.low %v4128_v3, %v4136_v17  ;;  %v4034_v3 = vld [vmem:[%s14163_s15 + $0x3b0] sm:$0xff] }
 0xdb6   :  { %5851 = vmatprep.subr.bf16.mxu1 %v8607_v6  ;;  %v8702_v6 = vcombine.low %v4131_v1, %v4139_v42  ;;  %v8719_v2 = vcombine.high %v4147_v24, %v4155_v7  ;;  %v4042_v17 = vld [vmem:[%s14163_s15 + $0x3f0] sm:$0xff] }
 0xdb8   :  { %5723 = vmatpush1.bf16.msra.mxu0 %v8600_v28  ;;  %v4163_v28 = vld [vmem:[%s14163_s15 + $0x7b8] sm:$0xff] }
 0xdb9   :  { %5852 = vmatpush1.bf16.msra.mxu1 %v8606_v16  ;;  %5724 = vmatprep.subr.bf16.mxu0 %v8617_v19  ;;  %v4171_v16 = vld [vmem:[%s14163_s15 + $0x7f8] sm:$0xff]  ;;  %v8712_v19 = vcombine.low %v4144_v61, %v4152_v10 }
 0xdba   :  { %5853 = vmatprep.subr.bf16.mxu1 %v8623_v31  ;;  %v8718_v31 = vcombine.low %v4147_v24, %v4155_v7  ;;  %v8735_v37 = vcombine.high %v4163_v28, %v4171_v16  ;;  %v8605_v24 = vcombine.high %v4034_v3, %v4042_v17 }
 0xdbc   :  { %5725 = vmatpush1.bf16.msra.mxu0 %v8616_v33  ;;  %v8728_v33 = vcombine.low %v4160_v20, %v4168_v11  ;;  %v8604_v20 = vcombine.low %v4034_v3, %v4042_v17 }
 0xdbd   :  { %5854 = vmatpush1.bf16.msra.mxu1 %v8622_v36  ;;  %5726 = vmatprep.subr.bf16.mxu0 %v8633_v39  ;;  %v8734_v36 = vcombine.low %v4163_v28, %v4171_v16  ;;  %v8493_v39 = vcombine.high %v3922_v14, %v3930_v9  ;;  %v4066_v28 = vld [vmem:[%s14163_s15 + $0x4b0] sm:$0xff] }
 0xdbe   :  { %5855 = vmatprep.subr.bf16.mxu1 %v8639_v13  ;;  %v3938_v13 = vld [vmem:[%s14163_s15 + $0xb0] sm:$0xff] }
 0xdbf   :  { %v8509_v45 = vcombine.high %v3938_v13, %v3946_v23  ;;  %v4074_v16 = vld [vmem:[%s14163_s15 + $0x4f0] sm:$0xff] }
 0xdc0   :  { %5727 = vmatpush1.bf16.msra.mxu0 %v8632_v21  ;;  %v3962_v21 = vld [vmem:[%s14163_s15 + $0x170] sm:$0xff]  ;;  %v8636_v14 = vcombine.low %v4066_v28, %v4074_v16 }
 0xdc1   :  { %5856 = vmatpush1.bf16.msra.mxu1 %v8638_v60  ;;  %5728 = vmatprep.subr.bf16.mxu0 %v8649_v58  ;;  %v8508_v60 = vcombine.low %v3938_v13, %v3946_v23  ;;  %v8525_v58 = vcombine.high %v3954_v35, %v3962_v21  ;;  %v8524_v38 = vcombine.low %v3954_v35, %v3962_v21  ;;  %v4114_v23 = vld [vmem:[%s14163_s15 + $0x630] sm:$0xff] }
 0xdc2   :  { %5857 = vmatprep.subr.bf16.mxu1 %v8655_v49  ;;  %v3970_v49 = vld [vmem:[%s14163_s15 + $0x1b0] sm:$0xff] }
 0xdc3   :  { %v8541_v55 = vcombine.high %v3970_v49, %v3978_v51  ;;  %v4130_v21 = vld [vmem:[%s14163_s15 + $0x6b0] sm:$0xff] }
 0xdc4   :  { %5729 = vmatpush1.bf16.msra.mxu0 %v8648_v27  ;;  %v8540_v27 = vcombine.low %v3970_v49, %v3978_v51  ;;  %v4146_v51 = vld [vmem:[%s14163_s15 + $0x730] sm:$0xff] }
 0xdc5   :  { %5858 = vmatpush1.bf16.msra.mxu1 %v8654_v34  ;;  %5730 = vmatprep.subr.bf16.mxu0 %v8665_v57  ;;  %v4002_v57 = vld [vmem:[%s14163_s15 + $0x2b0] sm:$0xff] }
 0xdc6   :  { %5859 = vmatprep.subr.bf16.mxu1 %v8671_v59  ;;  %v4010_v59 = vld [vmem:[%s14163_s15 + $0x2f0] sm:$0xff] }
 0xdc7   :  { %v8573_v32 = vcombine.high %v4002_v57, %v4010_v59 }
 0xdc8   :  { %5731 = vmatpush1.bf16.msra.mxu0 %v8664_v43  ;;  %v8572_v43 = vcombine.low %v4002_v57, %v4010_v59 }
 0xdc9   :  { %5860 = vmatpush1.bf16.msra.mxu1 %v8670_v46  ;;  %5732 = vmatprep.subr.bf16.mxu0 %v8681_v62  ;;  %v8589_v46 = vcombine.high %v4018_v63, %v4026_v30 }
 0xdca   :  { %5861 = vmatprep.subr.bf16.mxu1 %v8687_v44 }
 0xdcc   :  { %5733 = vmatpush1.bf16.msra.mxu0 %v8680_v47 }
 0xdcd   :  { %5862 = vmatpush1.bf16.msra.mxu1 %v8686_v0  ;;  %5734 = vmatprep.subr.bf16.mxu0 %v8697_v5 }
 0xdce   :  { %5863 = vmatprep.subr.bf16.mxu1 %v8703_v8  ;;  %v8588_v8 = vcombine.low %v4018_v63, %v4026_v30 }
 0xdd0   :  { %5735 = vmatpush1.bf16.msra.mxu0 %v8696_v15 }
 0xdd1   :  { %5864 = vmatpush1.bf16.msra.mxu1 %v8702_v6  ;;  %5736 = vmatprep.subr.bf16.mxu0 %v8713_v22  ;;  %v4050_v6 = vld [vmem:[%s14163_s15 + $0x430] sm:$0xff] }
 0xdd2   :  { %5865 = vmatprep.subr.bf16.mxu1 %v8719_v2  ;;  %v4058_v22 = vld [vmem:[%s14163_s15 + $0x470] sm:$0xff] }
 0xdd3   :  { %v8621_v11 = vcombine.high %v4050_v6, %v4058_v22 }
 0xdd4   :  { %5737 = vmatpush1.bf16.msra.mxu0 %v8712_v19  ;;  %v8620_v19 = vcombine.low %v4050_v6, %v4058_v22 }
 0xdd5   :  { %5866 = vmatpush1.bf16.msra.mxu1 %v8718_v31  ;;  %5738 = vmatprep.subr.bf16.mxu0 %v8729_v25  ;;  %v8637_v31 = vcombine.high %v4066_v28, %v4074_v16  ;;  %v4082_v25 = vld [vmem:[%s14163_s15 + $0x530] sm:$0xff] }
 0xdd6   :  { %5867 = vmatprep.subr.bf16.mxu1 %v8735_v37  ;;  %v4090_v37 = vld [vmem:[%s14163_s15 + $0x570] sm:$0xff] }
 0xdd7   :  { %v8653_v9 = vcombine.high %v4082_v25, %v4090_v37 }
 0xdd8   :  { %5739 = vmatpush1.bf16.msra.mxu0 %v8728_v33  ;;  %v4098_v33 = vld [vmem:[%s14163_s15 + $0x5b0] sm:$0xff] }
 0xdd9   :  { %5868 = vmatpush1.bf16.msra.mxu1 %v8734_v36  ;;  %5794 = vmatprep.subr.bf16.mxu0 %v8493_v39  ;;  %v4106_v36 = vld [vmem:[%s14163_s15 + $0x5f0] sm:$0xff]  ;;  %v8652_v39 = vcombine.low %v4082_v25, %v4090_v37 }
 0xdda   :  { %v8669_v13 = vcombine.high %v4098_v33, %v4106_v36 }
 0xddb   :  { %5741 = vmatmul.mubr.bf16.vlgmr.msra.gmra.mrb[48].mxu0 %v12127_v40 }
 0xddc   :  { %5870 = vmatmul.mubr.bf16.vlgmr.msra.gmra.mrb[80].mxu1 %v12127_v40  ;;  %5795 = vmatpush1.bf16.msra.mxu0 %v8492_v26  ;;  %v4122_v26 = vld [vmem:[%s14163_s15 + $0x670] sm:$0xff] }
 0xddd   :  { %5826 = vmatprep.mubr.bf16.mxu0 %v12129_v41  ;;  %5796 = vmatprep.subr.bf16.mxu0 %v8509_v45  ;;  %v3994_v41 = vld [vmem:[%s14163_s15 + $0x270] sm:$0xff]  ;;  %v8668_v45 = vcombine.low %v4098_v33, %v4106_v36  ;;  %v8685_v35 = vcombine.high %v4114_v23, %v4122_v26 }
 0xdde   :  { %v8557_v34 = vcombine.high %v3986_v56, %v3994_v41  ;;  %v8556_v29 = vcombine.low %v3986_v56, %v3994_v41  ;;  %v4162_v41 = vld [vmem:[%s14163_s15 + $0x7b0] sm:$0xff] }
 0xde0   :  { %5797 = vmatpush1.bf16.msra.mxu0 %v8508_v60  ;;  %v4138_v60 = vld [vmem:[%s14163_s15 + $0x6f0] sm:$0xff] }
 0xde1   :  { %5798 = vmatprep.subr.bf16.mxu0 %v8525_v58  ;;  %v8684_v58 = vcombine.low %v4114_v23, %v4122_v26  ;;  %v8701_v49 = vcombine.high %v4130_v21, %v4138_v60 }
 0xde4   :  { %5799 = vmatpush1.bf16.msra.mxu0 %v8524_v38  ;;  %v4154_v38 = vld [vmem:[%s14163_s15 + $0x770] sm:$0xff] }
 0xde5   :  { %5800 = vmatprep.subr.bf16.mxu0 %v8541_v55  ;;  %v8700_v55 = vcombine.low %v4130_v21, %v4138_v60  ;;  %v8717_v56 = vcombine.high %v4146_v51, %v4154_v38 }
 0xde8   :  { %5801 = vmatpush1.bf16.msra.mxu0 %v8540_v27  ;;  %v4170_v27 = vld [vmem:[%s14163_s15 + $0x7f0] sm:$0xff] }
 0xde9   :  { %5802 = vmatprep.subr.bf16.mxu0 %v8557_v34  ;;  %v8716_v34 = vcombine.low %v4146_v51, %v4154_v38  ;;  %v8733_v57 = vcombine.high %v4162_v41, %v4170_v27  ;;  %v8732_v59 = vcombine.low %v4162_v41, %v4170_v27 }
 0xdec   :  { %5803 = vmatpush1.bf16.msra.mxu0 %v8556_v29 }
 0xded   :  { %5804 = vmatprep.subr.bf16.mxu0 %v8573_v32 }
 0xdee   :  { %v9058_v62 = vpop.f32.mrb[36].mxu0  ;;  %v12742_v44 = vpop.f32.mrb[68].mxu1 }
 0xdef   :  { %v9059_v1 = vpop.f32.mrb[37].mxu0  ;;  %v12750_v42 = vpop.f32.mrb[69].mxu1 }
 0xdf0   :  { %v12752_v47 = vadd.f32 %v9059_v1, %v9058_v62  ;;  %5805 = vmatpush1.bf16.msra.mxu0 %v8572_v43  ;;  %v9061_v0 = vpop.f32.mrb[38].mxu0  ;;  %v12754_v5 = vpop.f32.mrb[70].mxu1 }
 0xdf1   :  { %v9062_v61 = vpop.f32.mrb[39].mxu0  ;;  %v12756_v10 = vpop.f32.mrb[71].mxu1  ;;  %5806 = vmatprep.subr.bf16.mxu0 %v8589_v46 }
 0xdf2   :  { %v12758_v7 = vadd.f32 %v9062_v61, %v9061_v0  ;;  %v3849_v15 = vsel %vm3848_vm5, %v12752_v47, -inf }
 0xdf3   :  { %3850 = vmax.xlane.f32.xlu0 %v3849_v15 }
 0xdf4   :  { %5807 = vmatpush1.bf16.msra.mxu0 %v8588_v8  ;;  %v3852_v2 = vsel %vm3848_vm5, %v12758_v7, -inf }
 0xdf5   :  { %3853 = vmax.xlane.f32.xlu1 %v3852_v2  ;;  %5808 = vmatprep.subr.bf16.mxu0 %v8605_v24 }
 0xdf8   :  { %5809 = vmatpush1.bf16.msra.mxu0 %v8604_v20 }
 0xdf9   :  { %5810 = vmatprep.subr.bf16.mxu0 %v8621_v11 }
 0xdfc   :  { %5811 = vmatpush1.bf16.msra.mxu0 %v8620_v19 }
 0xdfd   :  { %5812 = vmatprep.subr.bf16.mxu0 %v8637_v31 }
 0xe00   :  { %5813 = vmatpush1.bf16.msra.mxu0 %v8636_v14 }
 0xe01   :  { %5814 = vmatprep.subr.bf16.mxu0 %v8653_v9 }
 0xe04   :  { %5815 = vmatpush1.bf16.msra.mxu0 %v8652_v39 }
 0xe05   :  { %5816 = vmatprep.subr.bf16.mxu0 %v8669_v13 }
 0xe08   :  { %5817 = vmatpush1.bf16.msra.mxu0 %v8668_v45 }
 0xe09   :  { %5818 = vmatprep.subr.bf16.mxu0 %v8685_v35  ;;  %v3862_v35 = vand.u32 127, %v91_v48 }
 0xe0b   :  { %v3863_v21 = vcvt.s32.f32 %v3862_v35 }
 0xe0c   :  { %5819 = vmatpush1.bf16.msra.mxu0 %v8684_v58 }
 0xe0d   :  { %5820 = vmatprep.subr.bf16.mxu0 %v8701_v49 }
 0xe10   :  { %5821 = vmatpush1.bf16.msra.mxu0 %v8700_v55 }
 0xe11   :  { %5822 = vmatprep.subr.bf16.mxu0 %v8717_v56 }
 0xe14   :  { %5823 = vmatpush1.bf16.msra.mxu0 %v8716_v34 }
 0xe15   :  { %5824 = vmatprep.subr.bf16.mxu0 %v8733_v57 }
 0xe18   :  { %5825 = vmatpush1.bf16.msra.mxu0 %v8732_v59 }
 0xe1b   :  { %5827 = vmatmul.mubr.bf16.vlgmr.msra.gmra.mrb[52].mxu0 %v12127_v40 }
 0xe2e   :  { %v12813_v29 = vpop.f32.mrb[40].mxu0  ;;  %v12815_v32 = vpop.f32.mrb[72].mxu1 }
 0xe2f   :  { %v12817_v63 = vpop.f32.mrb[41].mxu0  ;;  %v12819_v30 = vpop.f32.mrb[73].mxu1 }
 0xe30   :  { %v12821_v43 = vpop.f32.mrb[42].mxu0  ;;  %v12823_v46 = vpop.f32.mrb[74].mxu1 }
 0xe31   :  { %v12825_v62 = vpop.f32.mrb[43].mxu0  ;;  %v12827_v3 = vpop.f32.mrb[75].mxu1 }
 0xe6e   :  { %v12829_v17 = vpop.f32.mrb[44].mxu0 }
 0xe6f   :  { %v12831_v1 = vpop.f32.mrb[76].mxu1  ;;  %v12833_v40 = vpop.f32.mrb[45].mxu0 }
 0xe70   :  { %v12835_v0 = vpop.f32.mrb[77].mxu1  ;;  %v12837_v8 = vpop.f32.mrb[46].mxu0 }
 0xe71   :  { %v12839_v61 = vpop.f32.mrb[78].mxu1  ;;  %v12841_v24 = vpop.f32.mrb[47].mxu0 }
 0xe72   :  { %v12843_v15 = vpop.f32.mrb[79].mxu1 }
 0xe80   :  { %v3851_v6 = vpop.xlane.xlu0 %3850 }
 0xe81   :  { %v3855_v22 = vsub.f32 %v12752_v47, %v3851_v6 }
 0xe82   :  { %v3854_v2 = vpop.xlane.xlu1 %3853 }
 0xe83   :  { %v3856_v20 = vsub.f32 %v12758_v7, %v3854_v2  ;;  %v3857_v11 = vmul.f32 1.442695, %v3855_v22 }
 0xe85   :  { %v3859_v28 = vmul.f32 1.442695, %v3856_v20  ;;  %10227 = vpow2.f32 %v3857_v11 }
 0xe87   :  { %10229 = vpow2.f32 %v3859_v28 }
 0xe8f   :  { %v10228_v16 = vpop.eup %10227 }
 0xe90   :  { %v3864_v31 = vsel %vm3848_vm5, %v10228_v16, -inf }
 0xe91   :  { %v10230_v19 = vpop.eup %10229  ;;  %3865 = vmax.xlane.f32.xlu0 %v3864_v31 }
 0xe92   :  { %v3867_v25 = vsel %vm3848_vm5, %v10230_v19, -inf }
 0xe93   :  { %3868 = vmax.xlane.f32.xlu1 %v3867_v25 }
 0xeae   :  { %v12849_v37 = vpop.f32.mrb[48].mxu0 }
 0xeaf   :  { %v12851_v14 = vpop.f32.mrb[80].mxu1  ;;  %v12853_v47 = vpop.f32.mrb[49].mxu0 }
 0xeb0   :  { %v12855_v9 = vpop.f32.mrb[81].mxu1  ;;  %v12857_v7 = vpop.f32.mrb[50].mxu0 }
 0xeb1   :  { %v12859_v33 = vpop.f32.mrb[82].mxu1  ;;  %v12861_v36 = vpop.f32.mrb[51].mxu0 }
 0xeb2   :  { %v12863_v39 = vpop.f32.mrb[83].mxu1 }
 0xeee   :  { %v12865_v13 = vpop.f32.mrb[52].mxu0 }
 0xeef   :  { %v12867_v23 = vpop.f32.mrb[53].mxu0 }
 0xef0   :  { %v12869_v26 = vpop.f32.mrb[54].mxu0 }
 0xef1   :  { %v12871_v45 = vpop.f32.mrb[55].mxu0 }
 0xf1e   :  { %v3866_v60 = vpop.xlane.xlu0 %3865 }
 0xf1f   :  { %vm3870_vm6 = vcmp.eq.f32.partialorder %v10228_v16, %v3866_v60 }
 0xf20   :  { %v3869_v58 = vpop.xlane.xlu1 %3868  ;;  %v3872_v49 = vsel %vm3870_vm6, %v3863_v21, 4.0 }
 0xf21   :  { %vm3871_vm7 = vcmp.eq.f32.partialorder %v10230_v19, %v3869_v58  ;;  %v3874_v51 = vsel %vm3848_vm5, %v3872_v49, inf  ;;  %v10396_v49 = vmov 0  }
 0xf22   :  { %v3873_v38 = vsel %vm3871_vm7, %v3863_v21, 4.0  ;;  %3875 = vmin.xlane.f32.xlu0 %v3874_v51  ;;  %9418 = vset.pattern.permute.xlu1 %v10396_v49  ;;  %v9738_v51 = vld [vmem:[%s14165_s17 + $0x10] ss:$8 sps:$4 sm:$0xff]  }
 0xf23   :  { %v3877_v55 = vsel %vm3848_vm5, %v3873_v38, inf  ;;  %9417 = vset.pattern.permute.xlu0 %v10396_v49  ;;  %v9743_v38 = vld [vmem:[%s14165_s17 + $0x24] ss:$8 sps:$4 sm:$0xff]   ;;  %v9770_v49 = vld [vmem:[%s14165_s17 + $0xb4] ss:$8 sps:$4 sm:$0xff]  }
 0xf24   :  { %3878 = vmin.xlane.f32.xlu1 %v3877_v55  ;;  %v9741_v55 = vld [vmem:[%s14165_s17 + $0x20] ss:$8 sps:$4 sm:$0xff]  }
 0xfaf   :  { %v3876_v56 = vpop.xlane.xlu0 %3875 }
 0xfb0   :  { %vm3880_vm8 = vcmp.eq.f32.partialorder %v3863_v21, %v3876_v56  ;;  %v9746_v56 = vld [vmem:[%s14165_s17 + $0x34] ss:$8 sps:$4 sm:$0xff]  }
 0xfb1   :  { %v3879_v41 = vpop.xlane.xlu1 %3878  ;;  %v3882_v27 = vsel %vm3880_vm8, -1.0, %v10228_v16 }
 0xfb2   :  { %vm3881_vm9 = vcmp.eq.f32.partialorder %v3863_v21, %v3879_v41  ;;  %v3884_v48 = vsel %vm3848_vm5, %v3882_v27, -inf  ;;  %v9744_v41 = vld [vmem:[%s14165_s17 + $0x30] ss:$8 sps:$4 sm:$0xff]  }
 0xfb3   :  { %v3883_v34 = vsel %vm3881_vm9, -1.0, %v10230_v19  ;;  %3885 = vmax.xlane.f32.xlu0 %v3884_v48  ;;  %v9747_v48 = vld [vmem:[%s14165_s17 + $0x40] ss:$8 sps:$4 sm:$0xff]  }
 0xfb4   :  { %v3887_v57 = vsel %vm3848_vm5, %v3883_v34, -inf }
 0xfb5   :  { %3888 = vmax.xlane.f32.xlu1 %v3887_v57  ;;  %v9750_v57 = vld [vmem:[%s14165_s17 + $0x50] ss:$8 sps:$4 sm:$0xff]  }
0x1040   :  { %v3886_v59 = vpop.xlane.xlu0 %3885 }
0x1041   :  { %vm3890_vm10 = vcmp.eq.f32.partialorder %v3882_v27, %v3886_v59  ;;  %v9749_v27 = vld [vmem:[%s14165_s17 + $0x44] ss:$8 sps:$4 sm:$0xff]  }
0x1042   :  { %v3889_v6 = vpop.xlane.xlu1 %3888  ;;  %v3892_v22 = vsel %vm3890_vm10, %v3863_v21, 4.0  ;;  %v9755_v59 = vld [vmem:[%s14165_s17 + $0x64] ss:$8 sps:$4 sm:$0xff]  }
0x1043   :  { %vm3891_vm11 = vcmp.eq.f32.partialorder %v3883_v34, %v3889_v6  ;;  %v3894_v2 = vsel %vm3848_vm5, %v3892_v22, inf  ;;  %v9752_v34 = vld [vmem:[%s14165_s17 + $0x54] ss:$8 sps:$4 sm:$0xff]   ;;  %v9753_v6 = vld [vmem:[%s14165_s17 + $0x60] ss:$8 sps:$4 sm:$0xff]  }
0x1044   :  { %v3893_v20 = vsel %vm3891_vm11, %v3863_v21, 4.0  ;;  %3895 = vmin.xlane.f32.xlu0 %v3894_v2  ;;  %v9758_v22 = vld [vmem:[%s14165_s17 + $0x74] ss:$8 sps:$4 sm:$0xff]   ;;  %v9756_v2 = vld [vmem:[%s14165_s17 + $0x70] ss:$8 sps:$4 sm:$0xff]  }
0x1045   :  { %v3897_v11 = vsel %vm3848_vm5, %v3893_v20, inf  ;;  %v9761_v20 = vld [vmem:[%s14165_s17 + $0x84] ss:$8 sps:$4 sm:$0xff]  }
0x1046   :  { %3898 = vmin.xlane.f32.xlu1 %v3897_v11  ;;  %v9759_v11 = vld [vmem:[%s14165_s17 + $0x80] ss:$8 sps:$4 sm:$0xff]  }
0x10d1   :  { %v3896_v28 = vpop.xlane.xlu0 %3895 }
0x10d2   :  { %vm3900_vm12 = vcmp.eq.f32.partialorder %v3863_v21, %v3896_v28  ;;  %v9764_v28 = vld [vmem:[%s14165_s17 + $0x94] ss:$8 sps:$4 sm:$0xff]  }
0x10d3   :  { %v3899_v31 = vpop.xlane.xlu1 %3898  ;;  %vm3902_vm13 = vmor %vm3880_vm8, %vm3900_vm12 }
0x10d4   :  { %vm3901_vm14 = vcmp.eq.f32.partialorder %v3863_v21, %v3899_v31  ;;  %v12884_v25 = vsel %vm3902_vm13, %v10228_v16, 0.0  ;;  %v9735_v21 = vld [vmem:[%s14165_s17] ss:$8 sps:$4 sm:$0xff]   ;;  %v9737_v16 = vld [vmem:[%s14165_s17 + $0x4] ss:$8 sps:$4 sm:$0xff]  }
0x10d5   :  { %vm3903_vm15 = vmor %vm3881_vm9, %vm3901_vm14  ;;  %v3906_v35 = vsel %vm3848_vm5, %v12884_v25, 0.0  ;;  %7714 = vmatprep.subr.bf16.mxu0 %v9737_v16  ;;  %v9762_v31 = vld [vmem:[%s14165_s17 + $0x90] ss:$8 sps:$4 sm:$0xff]   ;;  %v9773_v16 = vld [vmem:[%s14165_s17 + $0xc4] ss:$8 sps:$4 sm:$0xff]  }
0x10d6   :  { %v12888_v60 = vsel %vm3903_vm15, %v10230_v19, 0.0  ;;  %3907 = vadd.xlane.f32.xlu0 %v3906_v35  ;;  %v9740_v19 = vld [vmem:[%s14165_s17 + $0x14] ss:$8 sps:$4 sm:$0xff]   ;;  %7715 = vmatpush1.bf16.msra.mxu0 %v9735_v21  ;;  %v9767_v35 = vld [vmem:[%s14165_s17 + $0xa4] ss:$8 sps:$4 sm:$0xff]  }
0x10d7   :  { %v3909_v58 = vsel %vm3848_vm5, %v12888_v60, 0.0  ;;  %7716 = vmatprep.subr.bf16.mxu0 %v9740_v19  ;;  %v9768_v21 = vld [vmem:[%s14165_s17 + $0xb0] ss:$8 sps:$4 sm:$0xff]   ;;  %v9771_v19 = vld [vmem:[%s14165_s17 + $0xc0] ss:$8 sps:$4 sm:$0xff]  }
0x10d8   :  { %3910 = vadd.xlane.f32.xlu1 %v3909_v58  ;;  %v9765_v58 = vld [vmem:[%s14165_s17 + $0xa0] ss:$8 sps:$4 sm:$0xff]  }
0x10da   :  { %7717 = vmatpush1.bf16.msra.mxu0 %v9738_v51  ;;  %v9776_v51 = vld [vmem:[%s14165_s17 + $0xd4] ss:$8 sps:$4 sm:$0xff]  }
0x10db   :  { %7718 = vmatprep.subr.bf16.mxu0 %v9743_v38  ;;  %v9774_v38 = vld [vmem:[%s14165_s17 + $0xd0] ss:$8 sps:$4 sm:$0xff]  }
0x10de   :  { %7719 = vmatpush1.bf16.msra.mxu0 %v9741_v55  ;;  %v9779_v55 = vld [vmem:[%s14165_s17 + $0xe4] ss:$8 sps:$4 sm:$0xff]  }
0x10df   :  { %7720 = vmatprep.subr.bf16.mxu0 %v9746_v56  ;;  %v9777_v56 = vld [vmem:[%s14165_s17 + $0xe0] ss:$8 sps:$4 sm:$0xff]  }
0x10e2   :  { %7721 = vmatpush1.bf16.msra.mxu0 %v9744_v41 }
0x10e3   :  { %7722 = vmatprep.subr.bf16.mxu0 %v9749_v27 }
0x10e6   :  { %7723 = vmatpush1.bf16.msra.mxu0 %v9747_v48 }
0x10e7   :  { %7724 = vmatprep.subr.bf16.mxu0 %v9752_v34 }
0x10ea   :  { %7725 = vmatpush1.bf16.msra.mxu0 %v9750_v57 }
0x10eb   :  { %7726 = vmatprep.subr.bf16.mxu0 %v9755_v59 }
0x10ee   :  { %7727 = vmatpush1.bf16.msra.mxu0 %v9753_v6  ;;  %v9780_v6 = vld [vmem:[%s14165_s17 + $0xf0] ss:$8 sps:$4 sm:$0xff]  }
0x10ef   :  { %7728 = vmatprep.subr.bf16.mxu0 %v9758_v22  ;;  %v9782_v22 = vld [vmem:[%s14165_s17 + $0xf4] ss:$8 sps:$4 sm:$0xff]  }
0x10f2   :  { %7729 = vmatpush1.bf16.msra.mxu0 %v9756_v2  ;;  %v9785_v2 = vld [vmem:[%s14165_s17 + $0x104] ss:$8 sps:$4 sm:$0xff]  }
0x10f3   :  { %7730 = vmatprep.subr.bf16.mxu0 %v9761_v20  ;;  %v10399_v20 = vmov 2  }
0x10f6   :  { %7731 = vmatpush1.bf16.msra.mxu0 %v9759_v11  ;;  %v12994_v11 = vsub.s32 2, %v10631_v50 }
0x10f7   :  { %7732 = vmatprep.subr.bf16.mxu0 %v9764_v28  ;;  %v4172_v28 = vld [vmem:[%s14164_s16] sm:$0xff] }
0x10f8   :  { %14202 = vst [vmem:[#allocation11_spill] sm:$0xff] %v12994_v11 }
0x10fa   :  { %7733 = vmatpush1.bf16.msra.mxu0 %v9762_v31  ;;  %v13000_v31 = vsub.s32 3, %v10631_v50 }
0x10fb   :  { %7734 = vmatprep.subr.bf16.mxu0 %v9767_v35  ;;  %v4187_v35 = vrot.slane %v4172_v28, %v12994_v11 }
0x10fc   :  { %14203 = vst [vmem:[#allocation12_spill] sm:$0xff] %v13000_v31 }
0x10fe   :  { %7735 = vmatpush1.bf16.msra.mxu0 %v9765_v58  ;;  %v4191_v58 = vrot.slane %v4172_v28, %v13000_v31 }
0x10ff   :  { %7736 = vmatprep.subr.bf16.mxu0 %v9770_v49  ;;  %v13005_v49 = vadd.f32 %v12742_v44, %v4187_v35 }
0x1102   :  { %7737 = vmatpush1.bf16.msra.mxu0 %v9768_v21  ;;  %v13008_v21 = vsub.s32 6, %v10631_v50 }
0x1103   :  { %7738 = vmatprep.subr.bf16.mxu0 %v9773_v16  ;;  %v13011_v16 = vadd.f32 %v12750_v42, %v4191_v58  ;;  %v4183_v42 = vrot.slane %v4172_v28, %v10640_v53 }
0x1104   :  { %14204 = vst [vmem:[#allocation13_spill] sm:$0xff] %v13008_v21 }
0x1105   :  { %v5883_v44 = vsub.f32 0.0, %v13011_v16 }
0x1106   :  { %7739 = vmatpush1.bf16.msra.mxu0 %v9771_v19  ;;  %v13014_v19 = vadd.f32 %v12754_v5, %v4187_v35 }
0x1107   :  { %7740 = vmatprep.subr.bf16.mxu0 %v9776_v51  ;;  %v5882_v51 = vsub.f32 0.0, %v13005_v49 }
0x1109   :  { %v5916_v5 = vmul.f32 1.442695, %v5882_v51 }
0x110a   :  { %7741 = vmatpush1.bf16.msra.mxu0 %v9774_v38  ;;  %v4179_v38 = vrot.slane %v4172_v28, %v10637_v52 }
0x110b   :  { %7742 = vmatprep.subr.bf16.mxu0 %v9779_v55  ;;  %v13019_v55 = vsub.s32 7, %v10631_v50 }
0x110d   :  { %14205 = vst [vmem:[#allocation14_spill] sm:$0xff] %v13019_v55 }
0x110e   :  { %7743 = vmatpush1.bf16.msra.mxu0 %v9777_v56  ;;  %v4203_v56 = vrot.slane %v4172_v28, %v13008_v21 }
0x110f   :  { %7744 = vmatprep.subr.bf16.mxu0 %v9782_v22 }
0x1112   :  { %7745 = vmatpush1.bf16.msra.mxu0 %v9780_v6 }
0x1113   :  { %7757 = vmatprep.subr.bf16.mxu0 %v9785_v2  ;;  %v13037_v2 = vadd.f32 %v12817_v63, %v4183_v42 }
0x1115   :  { %v5881_v35 = vsub.f32 0.0, %v13037_v2 }
0x1163   :  { %v3908_v41 = vpop.xlane.xlu0 %3907 }
0x1164   :  { %10231 = vrcp.f32 %v3908_v41  ;;  %v5898_v41 = vsub.f32 0.0, %v13014_v19 }
0x1165   :  { %v3911_v27 = vpop.xlane.xlu1 %3910 }
0x1166   :  { %10233 = vrcp.f32 %v3911_v27  ;;  %v13025_v27 = vadd.f32 %v12756_v10, %v4191_v58  ;;  %v5948_v6 = vmul.f32 1.442695, %v5898_v41  ;;  %v13055_v58 = vadd.f32 %v12823_v46, %v4203_v56 }
0x1167   :  { %10235 = vpow2.f32 %v5916_v5 }
0x1168   :  { %v5899_v22 = vsub.f32 0.0, %v13025_v27 }
0x116a   :  { %v5950_v63 = vmul.f32 1.442695, %v5899_v22 }
0x116e   :  { %v10232_v48 = vpop.eup %10231 }
0x116f   :  { %v3914_v57 = vmul.f32 %v10232_v48, %v12884_v25  ;;  %v10397_v25 = vmov 3   ;;  %v13029_v48 = vadd.f32 %v12813_v29, %v4179_v38 }
0x1170   :  { %v10234_v34 = vpop.eup %10233 }
0x1171   :  { %v3915_v59 = vmul.f32 %v10234_v34, %v12888_v60  ;;  %6074 = vperm.xlu0 %9417, %v3914_v57   ;;  %v10398_v60 = vmov 1   ;;  %v4207_v34 = vrot.slane %v4172_v28, %v13019_v55  ;;  %v5880_v10 = vsub.f32 0.0, %v13029_v48 }
0x1173   :  { %6079 = vperm.xlu1 %9418, %v3915_v59   ;;  %v13069_v5 = vadd.f32 %v12827_v3, %v4207_v34  ;;  %v10236_v3 = vpop.eup %10235 }
0x1175   :  { %9422 = vset.pattern.permute.xlu0 %v10397_v25 }
0x1177   :  { %9419 = vset.pattern.permute.xlu1 %v10398_v60  ;;  %v13045_v60 = vadd.f32 %v12821_v43, %v4179_v38  ;;  %v5912_v43 = vmul.f32 1.442695, %v5880_v10  ;;  %v13064_v38 = vadd.f32 %v12825_v62, %v4183_v42 }
0x1178   :  { %6091 = vperm.xlu1 %9419, %v3914_v57  }
0x1179   :  { %v5897_v42 = vsub.f32 0.0, %v13064_v38 }
0x117c   :  { %6095 = vperm.xlu1 %9419, %v3915_v59  }
0x1180   :  { %9420 = vset.pattern.permute.xlu1 %v10399_v20  ;;  %v13051_v20 = vsub.s32 5, %v10631_v50 }
0x1181   :  { %6107 = vperm.xlu1 %9420, %v3914_v57  }
0x1182   :  { %14207 = vst [vmem:[#allocation16_spill] sm:$0xff] %v13051_v20 }
0x1185   :  { %6111 = vperm.xlu1 %9420, %v3915_v59  }
0x1189   :  { %9421 = vset.pattern.permute.xlu1 %v10397_v25  ;;  %v13041_v25 = vadd.f32 %v12819_v30, %v4207_v34  ;;  %v13060_v30 = vld [vmem:[%s14164_s16 + $0x8] sm:$0xff]  ;;  %v5903_v34 = vsub.f32 0.0, %v13069_v5 }
0x118a   :  { %6123 = vperm.xlu1 %9421, %v3914_v57   ;;  %v13033_v57 = vadd.f32 %v12815_v32, %v4203_v56  ;;  %v13048_v32 = vsub.s32 4, %v10631_v50  ;;  %v4219_v46 = vrot.slane %v13060_v30, %v12994_v11  ;;  %v5914_v56 = vmul.f32 1.442695, %v5881_v35 }
0x118b   :  { %v5887_v51 = vsub.f32 0.0, %v13041_v25  ;;  %v5958_v4 = vmul.f32 1.442695, %v5903_v34 }
0x118c   :  { %v5886_v29 = vsub.f32 0.0, %v13033_v57  ;;  %14206 = vst [vmem:[#allocation15_spill] sm:$0xff] %v13048_v32  ;;  %v4195_v41 = vrot.slane %v4172_v28, %v13048_v32 }
0x118d   :  { %v5926_v62 = vmul.f32 1.442695, %v5887_v51  ;;  %v5946_v51 = vmul.f32 1.442695, %v5897_v42 }
0x118e   :  { %6127 = vperm.xlu1 %9421, %v3915_v59   ;;  %v5918_v59 = vmul.f32 1.442695, %v5883_v44  ;;  %v5924_v50 = vmul.f32 1.442695, %v5886_v29  ;;  %v5896_v44 = vsub.f32 0.0, %v13045_v60  ;;  %v13077_v10 = vadd.f32 %v12829_v17, %v4195_v41 }
0x118f   :  { %v13081_v29 = vadd.f32 %v12831_v1, %v4219_v46  ;;  %v5978_v17 = vadd.f32 1.0, %v10236_v3 }
0x1190   :  { %10237 = vpow2.f32 %v5918_v59  ;;  %v5902_v59 = vsub.f32 0.0, %v13055_v58  ;;  %v5944_v22 = vmul.f32 1.442695, %v5896_v44  ;;  %v5884_v44 = vsub.f32 0.0, %v13077_v10 }
0x1191   :  { %10239 = vpow2.f32 %v5948_v6  ;;  %v4199_v6 = vrot.slane %v4172_v28, %v13051_v20  ;;  %v4223_v28 = vrot.slane %v13060_v30, %v13000_v31  ;;  %v5890_v1 = vsub.f32 0.0, %v13081_v29 }
0x1192   :  { %10241 = vpow2.f32 %v5950_v63  ;;  %v5956_v63 = vmul.f32 1.442695, %v5902_v59 }
0x1193   :  { %10243 = vpow2.f32 %v5912_v43  ;;  %v13084_v35 = vadd.f32 %v12833_v40, %v4199_v6  ;;  %v13092_v40 = vadd.f32 %v12835_v0, %v4223_v28 }
0x1194   :  { %10245 = vpow2.f32 %v5924_v50 }
0x1195   :  { %10247 = vpow2.f32 %v5914_v56  ;;  %v5885_v56 = vsub.f32 0.0, %v13084_v35  ;;  %v5891_v54 = vsub.f32 0.0, %v13092_v40 }
0x1196   :  { %10249 = vpow2.f32 %v5926_v62  ;;  %v5920_v62 = vmul.f32 1.442695, %v5884_v44 }
0x1197   :  { %10251 = vpow2.f32 %v5944_v22  ;;  %v5932_v22 = vmul.f32 1.442695, %v5890_v1  ;;  %v5922_v34 = vmul.f32 1.442695, %v5885_v56  ;;  %v13106_v56 = vadd.f32 %v12843_v15, %v4223_v28 }
0x1198   :  { %10253 = vpow2.f32 %v5956_v63  ;;  %v13096_v63 = vadd.f32 %v12837_v8, %v4195_v41  ;;  %v13103_v8 = vadd.f32 %v12841_v24, %v4199_v6 }
0x1199   :  { %10255 = vpow2.f32 %v5946_v51 }
0x119a   :  { %v10238_v43 = vpop.eup %10237  ;;  %10257 = vrcp.f32 %v5978_v17  ;;  %v13099_v17 = vadd.f32 %v12839_v61, %v4219_v46  ;;  %v5900_v44 = vsub.f32 0.0, %v13096_v63  ;;  %v4211_v61 = vrot.slane %v13060_v30, %v10637_v52 }
0x119b   :  { %v10240_v50 = vpop.eup %10239  ;;  %v5979_v12 = vadd.f32 1.0, %v10238_v43  ;;  %10259 = vpow2.f32 %v5958_v4  ;;  %v5901_v28 = vsub.f32 0.0, %v13103_v8 }
0x119c   :  { %v5994_v59 = vadd.f32 1.0, %v10240_v50  ;;  %v10242_v18 = vpop.eup %10241  ;;  %v5952_v24 = vmul.f32 1.442695, %v5900_v44 }
0x119d   :  { %v10244_v42 = vpop.eup %10243  ;;  %10261 = vrcp.f32 %v5979_v12  ;;  %v5995_v43 = vadd.f32 1.0, %v10242_v18  ;;  %v5934_v12 = vmul.f32 1.442695, %v5891_v54  ;;  %v5906_v54 = vsub.f32 0.0, %v13099_v17 }
0x119e   :  { %v10246_v3 = vpop.eup %10245  ;;  %10263 = vrcp.f32 %v5994_v59  ;;  %v5976_v31 = vadd.f32 1.0, %v10244_v42 }
0x119f   :  { %v10248_v0 = vpop.eup %10247  ;;  %10265 = vpow2.f32 %v5920_v62  ;;  %v5982_v50 = vadd.f32 1.0, %v10246_v3  ;;  %v4235_v62 = vrot.slane %v13060_v30, %v13008_v21 }
0x11a0   :  { %v10250_v51 = vpop.eup %10249  ;;  %10267 = vpow2.f32 %v5932_v22  ;;  %v5977_v1 = vadd.f32 1.0, %v10248_v0  ;;  %v4239_v22 = vrot.slane %v13060_v30, %v13019_v55  ;;  %v13124_v0 = vadd.f32 %v12849_v37, %v4211_v61 }
0x11a1   :  { %v10252_v4 = vpop.eup %10251  ;;  %10269 = vpow2.f32 %v5922_v34  ;;  %v5983_v41 = vadd.f32 1.0, %v10250_v51 }
0x11a2   :  { %10271 = vrcp.f32 %v5995_v43  ;;  %v10254_v18 = vpop.eup %10253  ;;  %v5992_v59 = vadd.f32 1.0, %v10252_v4  ;;  %v5907_v43 = vsub.f32 0.0, %v13106_v56  ;;  %v13129_v4 = vadd.f32 %v12851_v14, %v4235_v62 }
0x11a3   :  { %10273 = vrcp.f32 %v5976_v31  ;;  %v10256_v46 = vpop.eup %10255  ;;  %v4215_v31 = vrot.slane %v13060_v30, %v10640_v53  ;;  %v5998_v6 = vadd.f32 1.0, %v10254_v18  ;;  %v5888_v55 = vsub.f32 0.0, %v13124_v0 }
0x11a4   :  { %10275 = vrcp.f32 %v5982_v50  ;;  %v13113_v42 = vpop.eup %10257  ;;  %v5993_v34 = vadd.f32 1.0, %v10256_v46  ;;  %v5964_v50 = vmul.f32 1.442695, %v5906_v54  ;;  %v5966_v37 = vmul.f32 1.442695, %v5907_v43 }
0x11a5   :  { %10277 = vpow2.f32 %v5934_v12  ;;  %v10260_v15 = vpop.eup %10259 }
0x11a6   :  { %10279 = vrcp.f32 %v5977_v1  ;;  %v5999_v44 = vadd.f32 1.0, %v10260_v15  ;;  %v13132_v1 = vadd.f32 %v12853_v47, %v4215_v31  ;;  %v13142_v47 = vadd.f32 %v12857_v7, %v4211_v61 }
0x11a7   :  { %v13120_v3 = vpop.eup %10261  ;;  %10281 = vrcp.f32 %v5983_v41  ;;  %v5954_v41 = vmul.f32 1.442695, %v5901_v28  ;;  %v4231_v7 = vrot.slane %v13060_v30, %v13051_v20 }
0x11a8   :  { %v13126_v51 = vpop.eup %10263  ;;  %10283 = vrcp.f32 %v5992_v59  ;;  %v13136_v59 = vadd.f32 %v12855_v9, %v4239_v22  ;;  %v5889_v28 = vsub.f32 0.0, %v13132_v1 }
0x11a9   :  { %v10266_v12 = vpop.eup %10265  ;;  %10285 = vpow2.f32 %v5952_v24  ;;  %v5894_v24 = vsub.f32 0.0, %v13129_v4 }
0x11aa   :  { %v10268_v18 = vpop.eup %10267  ;;  %10287 = vrcp.f32 %v5998_v6  ;;  %v5980_v14 = vadd.f32 1.0, %v10266_v12  ;;  %v5928_v12 = vmul.f32 1.442695, %v5888_v55 }
0x11ab   :  { %v10270_v46 = vpop.eup %10269  ;;  %10289 = vrcp.f32 %v5993_v34  ;;  %v5986_v6 = vadd.f32 1.0, %v10268_v18  ;;  %v13148_v34 = vadd.f32 %v12861_v36, %v4215_v31  ;;  %v13158_v18 = vadd.f32 %v12859_v33, %v4235_v62 }
0x11ac   :  { %v13138_v54 = vpop.eup %10271  ;;  %10291 = vpow2.f32 %v5964_v50  ;;  %v5981_v43 = vadd.f32 1.0, %v10270_v46  ;;  %v4227_v50 = vrot.slane %v13060_v30, %v13048_v32  ;;  %v5940_v31 = vmul.f32 1.442695, %v5894_v24 }
0x11ad   :  { %v13144_v15 = vpop.eup %10273  ;;  %10293 = vrcp.f32 %v5999_v44  ;;  %v5895_v44 = vsub.f32 0.0, %v13136_v59  ;;  %v13164_v46 = vadd.f32 %v12863_v39, %v4239_v22  ;;  %v5930_v30 = vmul.f32 1.442695, %v5889_v28 }
0x11ae   :  { %v13150_v9 = vpop.eup %10275  ;;  %10295 = vpow2.f32 %v5954_v41  ;;  %v5904_v41 = vsub.f32 0.0, %v13142_v47  ;;  %v5905_v55 = vsub.f32 0.0, %v13148_v34  ;;  %v13172_v62 = vadd.f32 %v12865_v13, %v4227_v50 }
0x11af   :  { %v10278_v61 = vpop.eup %10277  ;;  %10297 = vpow2.f32 %v5966_v37  ;;  %14208 = vst [vmem:[#allocation17_spill] sm:$0xff] %v13164_v46  ;;  %v5942_v24 = vmul.f32 1.442695, %v5895_v44  ;;  %v5910_v11 = vsub.f32 0.0, %v13158_v18  ;;  %v13176_v39 = vadd.f32 %v12867_v23, %v4231_v7 }
0x11b0   :  { %v13160_v36 = vpop.eup %10279  ;;  %10299 = vrcp.f32 %v5980_v14  ;;  %v5987_v33 = vadd.f32 1.0, %v10278_v61  ;;  %v5911_v28 = vsub.f32 0.0, %v13164_v46  ;;  %v13184_v13 = vadd.f32 %v12869_v26, %v4227_v50 }
0x11b1   :  { %v13166_v21 = vpop.eup %10281  ;;  %10301 = vrcp.f32 %v5986_v6  ;;  %v5960_v6 = vmul.f32 1.442695, %v5904_v41  ;;  %v5892_v44 = vsub.f32 0.0, %v13172_v62  ;;  %v5972_v53 = vmul.f32 1.442695, %v5910_v11 }
0x11b2   :  { %v13169_v37 = vpop.eup %10283  ;;  %10303 = vrcp.f32 %v5981_v43  ;;  %v5962_v43 = vmul.f32 1.442695, %v5905_v55  ;;  %14209 = vst [vmem:[#allocation18_spill] sm:$0xff] %v13184_v13  ;;  %v13191_v41 = vadd.f32 %v12871_v45, %v4231_v7  ;;  %v5908_v50 = vsub.f32 0.0, %v13184_v13 }
0x11b3   :  { %v10286_v14 = vpop.eup %10285  ;;  %10305 = vpow2.f32 %v5928_v12 }
0x11b4   :  { %v13178_v22 = vpop.eup %10287  ;;  %10307 = vpow2.f32 %v5940_v31  ;;  %v5996_v12 = vadd.f32 1.0, %v10286_v14  ;;  %v5893_v31 = vsub.f32 0.0, %v13176_v39  ;;  %14210 = vst [vmem:[#allocation19_spill] sm:$0xff] %v13191_v41  ;;  %v5936_v14 = vmul.f32 1.442695, %v5892_v44 }
0x11b5   :  { %v13181_v20 = vpop.eup %10289  ;;  %10309 = vpow2.f32 %v5930_v30  ;;  %v5974_v30 = vmul.f32 1.442695, %v5911_v28  ;;  %v5968_v28 = vmul.f32 1.442695, %v5908_v50 }
0x11b6   :  { %v10292_v61 = vpop.eup %10291  ;;  %10311 = vrcp.f32 %v5987_v33  ;;  %v5938_v11 = vmul.f32 1.442695, %v5893_v31 }
0x11b7   :  { %v13187_v23 = vpop.eup %10293  ;;  %10313 = vpow2.f32 %v5942_v24  ;;  %v6002_v26 = vadd.f32 1.0, %v10292_v61  ;;  %v5909_v24 = vsub.f32 0.0, %v13191_v41 }
0x11b8   :  { %v10296_v32 = vpop.eup %10295  ;;  %10315 = vpow2.f32 %v5960_v6 }
0x11b9   :  { %v10298_v55 = vpop.eup %10297  ;;  %10317 = vpow2.f32 %v5962_v43  ;;  %v5997_v7 = vadd.f32 1.0, %v10296_v32 }
0x11ba   :  { %v13194_v33 = vpop.eup %10299  ;;  %10319 = vrcp.f32 %v5996_v12  ;;  %v6003_v61 = vadd.f32 1.0, %v10298_v55  ;;  %v5970_v12 = vmul.f32 1.442695, %v5909_v24  ;;  %v6015_v55 = vmul.f32 %v13120_v3, %v13011_v16 }
0x11bb   :  { %v13196_v52 = vpop.eup %10301  ;;  %10321 = vpow2.f32 %v5972_v53  ;;  %v6009_v24 = vmul.f32 %v13144_v15, %v13029_v48  ;;  %v6041_v16 = vmul.f32 %v13169_v37, %v13045_v60 }
0x11bc   :  { %v13199_v45 = vpop.eup %10303  ;;  %10323 = vpow2.f32 %v5974_v30 }
0x11bd   :  { %v10306_v6 = vpop.eup %10305  ;;  %10325 = vrcp.f32 %v6002_v26  ;;  %v6013_v26 = vmul.f32 %v13113_v42, %v13005_v49  ;;  %v6011_v49 = vmul.f32 %v13160_v36, %v13037_v2 }
0x11be   :  { %v10308_v43 = vpop.eup %10307  ;;  %10327 = vpow2.f32 %v5936_v14  ;;  %v5984_v53 = vadd.f32 1.0, %v10306_v6  ;;  %v6045_v14 = vmul.f32 %v13126_v51, %v13014_v19  ;;  %v6043_v19 = vmul.f32 %v13181_v20, %v13064_v38 }
0x11bf   :  { %v10310_v13 = vpop.eup %10309  ;;  %10329 = vpow2.f32 %v5938_v11  ;;  %v5990_v46 = vadd.f32 1.0, %v10308_v43  ;;  %v6047_v11 = vmul.f32 %v13138_v54, %v13025_v27 }
0x11c0   :  { %v13201_v44 = vpop.eup %10311  ;;  %10331 = vrcp.f32 %v5997_v7  ;;  %v5985_v32 = vadd.f32 1.0, %v10310_v13 }
0x11c1   :  { %v10314_v31 = vpop.eup %10313  ;;  %10333 = vpow2.f32 %v5968_v28  ;;  %v6021_v28 = vmul.f32 %v13150_v9, %v13033_v57  ;;  %v6017_v57 = vmul.f32 %v13194_v33, %v13077_v10 }
0x11c2   :  { %v10316_v41 = vpop.eup %10315  ;;  %10335 = vrcp.f32 %v6003_v61  ;;  %v5991_v51 = vadd.f32 1.0, %v10314_v31 }
0x11c3   :  { %v10318_v30 = vpop.eup %10317  ;;  %10337 = vpow2.f32 %v5970_v12  ;;  %v6000_v42 = vadd.f32 1.0, %v10316_v41 }
0x11c4   :  { %v13207_v50 = vpop.eup %10319  ;;  %10339 = vrcp.f32 %v5984_v53  ;;  %v6001_v27 = vadd.f32 1.0, %v10318_v30  ;;  %v9783_v53 = vld [vmem:[%s14165_s17 + $0x100] ss:$8 sps:$4 sm:$0xff]  }
0x11c5   :  { %v10322_v13 = vpop.eup %10321  ;;  %10341 = vrcp.f32 %v5990_v46 }
0x11c6   :  { %v10324_v3 = vpop.eup %10323  ;;  %10343 = vrcp.f32 %v5985_v32  ;;  %v6006_v43 = vadd.f32 1.0, %v10322_v13 }
0x11c7   :  { %v13223_v48 = vpop.eup %10325  ;;  %10345 = vrcp.f32 %v6000_v42  ;;  %v6007_v61 = vadd.f32 1.0, %v10324_v3  ;;  %v6053_v42 = vmul.f32 %v13178_v22, %v13055_v58  ;;  %v6019_v3 = vmul.f32 %v13199_v45, %v13084_v35  ;;  %v9791_v35 = vld [vmem:[%s14165_s17 + $0x124] ss:$8 sps:$4 sm:$0xff]  }
0x11c8   :  { %v10328_v37 = vpop.eup %10327  ;;  %10347 = vrcp.f32 %v6001_v27 }
0x11c9   :  { %v10330_v6 = vpop.eup %10329  ;;  %v5988_v9 = vadd.f32 1.0, %v10328_v37  ;;  %10349 = vrcp.f32 %v5991_v51  ;;  %v9786_v51 = vld [vmem:[%s14165_s17 + $0x110] ss:$8 sps:$4 sm:$0xff]  }
0x11ca   :  { %v10332_v12 = vpop.eup %10331  ;;  %v5989_v13 = vadd.f32 1.0, %v10330_v6  ;;  %10351 = vrcp.f32 %v6006_v43 }
0x11cb   :  { %10353 = vrcp.f32 %v6007_v61  ;;  %v6051_v58 = vmul.f32 %v10332_v12, %v13103_v8  ;;  %v6029_v61 = vmul.f32 %v13196_v52, %v13081_v29  ;;  %v6031_v12 = vmul.f32 %v13201_v44, %v13092_v40  ;;  %v9797_v44 = vld [vmem:[%s14165_s17 + $0x144] ss:$8 sps:$4 sm:$0xff]  }
0x11cc   :  { %10355 = vrcp.f32 %v5988_v9  ;;  %v6061_v9 = vmul.f32 %v13223_v48, %v13099_v17  ;;  %v9800_v48 = vld [vmem:[%s14165_s17 + $0x154] ss:$8 sps:$4 sm:$0xff]  }
0x11cd   :  { %10357 = vrcp.f32 %v5989_v13 }
0x11f0   :  { %v13221_v54 = vpop.permute.xlu0 %6074 }
0x11f1   :  { %v6082_v15 = vmul.f32 %v13221_v54, %v6009_v24  ;;  %v13227_v2 = vmul.f32 %v13221_v54, %v6013_v26  ;;  %v6083_v60 = vmul.f32 %v13221_v54, %v6011_v49  ;;  %v6085_v46 = vmul.f32 %v13221_v54, %v6015_v55  ;;  %v10334_v55 = vpop.eup %10333 }
0x11f2   :  { %v13229_v36 = vpop.permute.xlu1 %6079  ;;  %v13253_v24 = vpop.eup %10335 }
0x11f3   :  { %v6087_v20 = vmul.f32 %v13229_v36, %v6043_v19  ;;  %v6086_v38 = vmul.f32 %v13229_v36, %v6041_v16  ;;  %v6089_v41 = vmul.f32 %v13229_v36, %v6047_v11  ;;  %v13237_v7 = vmul.f32 %v13229_v36, %v6045_v14  ;;  %v9788_v11 = vld [vmem:[%s14165_s17 + $0x114] ss:$8 sps:$4 sm:$0xff]   ;;  %v10338_v16 = vpop.eup %10337 }
0x11f4   :  { %v6023_v14 = vmul.f32 %v13166_v21, %v13041_v25  ;;  %v10340_v33 = vpop.eup %10339  ;;  %v6004_v19 = vadd.f32 1.0, %v10334_v55  ;;  %v6005_v45 = vadd.f32 1.0, %v10338_v16  ;;  %v9792_v55 = vld [vmem:[%s14165_s17 + $0x130] ss:$8 sps:$4 sm:$0xff]  }
0x11f5   :  { %v6395_v31 = vpack.c.bf16 %v6087_v20, %v6083_v60  ;;  %v6394_v32 = vpack.c.bf16 %v6086_v38, %v6082_v15  ;;  %v6397_v30 = vpack.c.bf16 %v6089_v41, %v6085_v46  ;;  %v6396_v26 = vpack.c.bf16 %v13237_v7, %v13227_v2  ;;  %v13273_v27 = vpop.eup %10341  ;;  %v9794_v38 = vld [vmem:[%s14165_s17 + $0x134] ss:$8 sps:$4 sm:$0xff]   ;;  %v9837_v2 = vld [vmem:[%s14165_s17 + $0x220] ss:$8 sps:$4 sm:$0xff]  }
0x11f6   :  { %v6055_v15 = vmul.f32 %v13187_v23, %v13069_v5  ;;  %v6049_v60 = vmul.f32 %v13207_v50, %v13096_v63  ;;  %v10344_v22 = vpop.eup %10343  ;;  %10359 = vrcp.f32 %v6004_v19  ;;  %v9789_v50 = vld [vmem:[%s14165_s17 + $0x120] ss:$8 sps:$4 sm:$0xff]   ;;  %v9842_v7 = vld [vmem:[%s14165_s17 + $0x234] ss:$8 sps:$4 sm:$0xff]  }
0x11f7   :  { %v13255_v49 = vpop.permute.xlu1 %6091  ;;  %7746 = vmatprep.mubr.bf16.mxu0 %v6395_v31  ;;  %v10346_v20 = vpop.eup %10345  ;;  %10361 = vrcp.f32 %v6005_v45  ;;  %v9795_v19 = vld [vmem:[%s14165_s17 + $0x140] ss:$8 sps:$4 sm:$0xff]  }
0x11f8   :  { %7747 = vmatmul.mubr.bf16.vlgmr.msra.gmra.mrb[56].mxu0 %v6394_v32  ;;  %v13258_v21 = vmul.f32 %v13255_v49, %v6017_v57  ;;  %v13261_v25 = vmul.f32 %v13255_v49, %v6023_v14  ;;  %v13264_v10 = vmul.f32 %v13255_v49, %v6021_v28  ;;  %v13286_v37 = vmul.f32 %v13255_v49, %v6019_v3  ;;  %v10348_v31 = vpop.eup %10347 }
0x11f9   :  { %7758 = vmatpush1.bf16.msra.mxu0 %v9783_v53  ;;  %7789 = vmatprep.mubr.bf16.mxu0 %v6397_v30  ;;  %v6025_v53 = vmul.f32 %v10340_v33, %v13124_v0  ;;  %v10350_v30 = vpop.eup %10349  ;;  %v6027_v0 = vmul.f32 %v10344_v22, %v13132_v1  ;;  %v6057_v13 = vmul.f32 %v10346_v20, %v13142_v47 }
0x11fa   :  { %7759 = vmatprep.subr.bf16.mxu0 %v9788_v11  ;;  %v10352_v40 = vpop.eup %10351  ;;  %v6063_v11 = vmul.f32 %v13253_v24, %v13106_v56  ;;  %v6059_v16 = vmul.f32 %v10348_v31, %v13148_v34  ;;  %v6039_v22 = vmul.f32 %v10350_v30, %v13136_v59  ;;  %v14212_v30 = vld [vmem:[#allocation18_spill] sm:$0xff] }
0x11fb   :  { %v13283_v46 = vpop.permute.xlu1 %6095  ;;  %v10354_v57 = vpop.eup %10353 }
0x11fc   :  { %v13289_v5 = vmul.f32 %v13283_v46, %v6051_v58  ;;  %v13292_v63 = vmul.f32 %v13283_v46, %v6049_v60  ;;  %v13295_v8 = vmul.f32 %v13283_v46, %v6055_v15  ;;  %v13298_v23 = vmul.f32 %v13283_v46, %v6053_v42  ;;  %v10356_v33 = vpop.eup %10355 }
0x11fd   :  { %7760 = vmatpush1.bf16.msra.mxu0 %v9786_v51  ;;  %v10358_v3 = vpop.eup %10357  ;;  %v6033_v45 = vmul.f32 %v10356_v33, %v13172_v62 }
0x11fe   :  { %7761 = vmatprep.subr.bf16.mxu0 %v9791_v35  ;;  %v6399_v41 = vpack.c.bf16 %v13289_v5, %v13286_v37  ;;  %v6398_v6 = vpack.c.bf16 %v13292_v63, %v13258_v21  ;;  %v6401_v28 = vpack.c.bf16 %v13295_v8, %v13261_v25  ;;  %v6400_v43 = vpack.c.bf16 %v13298_v23, %v13264_v10  ;;  %v9845_v37 = vld [vmem:[%s14165_s17 + $0x244] ss:$8 sps:$4 sm:$0xff]   ;;  %v9843_v5 = vld [vmem:[%s14165_s17 + $0x240] ss:$8 sps:$4 sm:$0xff]   ;;  %v9890_v25 = vld [vmem:[%s14165_s17 + $0x334] ss:$8 sps:$4 sm:$0xff]  }
0x11ff   :  { %v6037_v35 = vmul.f32 %v13273_v27, %v13129_v4  ;;  %v6035_v62 = vmul.f32 %v10358_v3, %v13176_v39  ;;  %v6069_v27 = vmul.f32 %v10352_v40, %v13158_v18  ;;  %v9806_v40 = vld [vmem:[%s14165_s17 + $0x174] ss:$8 sps:$4 sm:$0xff]   ;;  %v9885_v21 = vld [vmem:[%s14165_s17 + $0x320] ss:$8 sps:$4 sm:$0xff]   ;;  %v9888_v63 = vld [vmem:[%s14165_s17 + $0x330] ss:$8 sps:$4 sm:$0xff]  }
0x1200   :  { %v13319_v32 = vpop.permute.xlu1 %6107  ;;  %v10360_v24 = vpop.eup %10359  ;;  %v9893_v8 = vld [vmem:[%s14165_s17 + $0x344] ss:$8 sps:$4 sm:$0xff]   ;;  %v9933_v10 = vld [vmem:[%s14165_s17 + $0x420] ss:$8 sps:$4 sm:$0xff]   ;;  %v9938_v23 = vld [vmem:[%s14165_s17 + $0x434] ss:$8 sps:$4 sm:$0xff]  }
0x1201   :  { %7762 = vmatpush1.bf16.msra.mxu0 %v9789_v50  ;;  %v13325_v14 = vmul.f32 %v13319_v32, %v6025_v53  ;;  %v13328_v52 = vmul.f32 %v13319_v32, %v6031_v12  ;;  %v13331_v29 = vmul.f32 %v13319_v32, %v6029_v61  ;;  %v13346_v1 = vmul.f32 %v13319_v32, %v6027_v0  ;;  %v10362_v50 = vpop.eup %10361  ;;  %v9803_v61 = vld [vmem:[%s14165_s17 + $0x164] ss:$8 sps:$4 sm:$0xff]   ;;  %v14213_v0 = vld [vmem:[#allocation19_spill] sm:$0xff] }
0x1202   :  { %7763 = vmatprep.subr.bf16.mxu0 %v9794_v38  ;;  %v9798_v38 = vld [vmem:[%s14165_s17 + $0x150] ss:$8 sps:$4 sm:$0xff]   ;;  %v14211_v53 = vld [vmem:[#allocation17_spill] sm:$0xff] }
0x1203   :  { %v6071_v31 = vmul.f32 %v10354_v57, %v14211_v53  ;;  %v9821_v53 = vld [vmem:[%s14165_s17 + $0x1c4] ss:$8 sps:$4 sm:$0xff]  }
0x1204   :  { %v13343_v42 = vpop.permute.xlu1 %6111 }
0x1205   :  { %7764 = vmatpush1.bf16.msra.mxu0 %v9792_v55  ;;  %v13352_v17 = vmul.f32 %v13343_v42, %v6059_v16  ;;  %v13355_v56 = vmul.f32 %v13343_v42, %v6057_v13  ;;  %v13358_v47 = vmul.f32 %v13343_v42, %v6063_v11  ;;  %v13361_v34 = vmul.f32 %v13343_v42, %v6061_v9  ;;  %v9801_v11 = vld [vmem:[%s14165_s17 + $0x160] ss:$8 sps:$4 sm:$0xff]  }
0x1206   :  { %7765 = vmatprep.subr.bf16.mxu0 %v9797_v44  ;;  %v6065_v55 = vmul.f32 %v10360_v24, %v14212_v30  ;;  %v6067_v44 = vmul.f32 %v10362_v50, %v14213_v0  ;;  %v9804_v24 = vld [vmem:[%s14165_s17 + $0x170] ss:$8 sps:$4 sm:$0xff]   ;;  %v9824_v30 = vld [vmem:[%s14165_s17 + $0x1d4] ss:$8 sps:$4 sm:$0xff]   ;;  %v9827_v0 = vld [vmem:[%s14165_s17 + $0x1e4] ss:$8 sps:$4 sm:$0xff]  }
0x1207   :  { %v6403_v51 = vpack.c.bf16 %v13352_v17, %v13346_v1  ;;  %v6402_v15 = vpack.c.bf16 %v13355_v56, %v13325_v14  ;;  %v6405_v60 = vpack.c.bf16 %v13358_v47, %v13328_v52  ;;  %v6404_v58 = vpack.c.bf16 %v13361_v34, %v13331_v29  ;;  %v9810_v50 = vld [vmem:[%s14165_s17 + $0x190] ss:$8 sps:$4 sm:$0xff]   ;;  %v9941_v1 = vld [vmem:[%s14165_s17 + $0x444] ss:$8 sps:$4 sm:$0xff]   ;;  %v9939_v17 = vld [vmem:[%s14165_s17 + $0x440] ss:$8 sps:$4 sm:$0xff]  }
0x1208   :  { %v9981_v14 = vld [vmem:[%s14165_s17 + $0x520] ss:$8 sps:$4 sm:$0xff]   ;;  %v9986_v52 = vld [vmem:[%s14165_s17 + $0x534] ss:$8 sps:$4 sm:$0xff]   ;;  %v9984_v56 = vld [vmem:[%s14165_s17 + $0x530] ss:$8 sps:$4 sm:$0xff]  }
0x1209   :  { %7766 = vmatpush1.bf16.msra.mxu0 %v9795_v19  ;;  %v13378_v20 = vpop.permute.xlu1 %6123  ;;  %v9989_v47 = vld [vmem:[%s14165_s17 + $0x544] ss:$8 sps:$4 sm:$0xff]   ;;  %v10029_v29 = vld [vmem:[%s14165_s17 + $0x620] ss:$8 sps:$4 sm:$0xff]   ;;  %v10034_v34 = vld [vmem:[%s14165_s17 + $0x634] ss:$8 sps:$4 sm:$0xff]  }
0x120a   :  { %7767 = vmatprep.subr.bf16.mxu0 %v9800_v48  ;;  %v13387_v12 = vmul.f32 %v13378_v20, %v6033_v45  ;;  %v13390_v4 = vmul.f32 %v13378_v20, %v6039_v22  ;;  %v13393_v59 = vmul.f32 %v13378_v20, %v6037_v35  ;;  %v13406_v13 = vmul.f32 %v13378_v20, %v6035_v62  ;;  %v9809_v35 = vld [vmem:[%s14165_s17 + $0x184] ss:$8 sps:$4 sm:$0xff]   ;;  %v9807_v22 = vld [vmem:[%s14165_s17 + $0x180] ss:$8 sps:$4 sm:$0xff]   ;;  %v9812_v45 = vld [vmem:[%s14165_s17 + $0x194] ss:$8 sps:$4 sm:$0xff]  }
0x120b   :  { %v9818_v62 = vld [vmem:[%s14165_s17 + $0x1b4] ss:$8 sps:$4 sm:$0xff]  }
0x120d   :  { %7768 = vmatpush1.bf16.msra.mxu0 %v9798_v38  ;;  %v13400_v9 = vpop.permute.xlu1 %6127  ;;  %v9815_v38 = vld [vmem:[%s14165_s17 + $0x1a4] ss:$8 sps:$4 sm:$0xff]  }
0x120e   :  { %v13409_v39 = vmul.f32 %v13400_v9, %v6065_v55  ;;  %v13412_v18 = vmul.f32 %v13400_v9, %v6069_v27  ;;  %7769 = vmatprep.subr.bf16.mxu0 %v9803_v61  ;;  %v13418_v57 = vmul.f32 %v13400_v9, %v6067_v44  ;;  %v13421_v16 = vmul.f32 %v13400_v9, %v6071_v31  ;;  %v9813_v61 = vld [vmem:[%s14165_s17 + $0x1a0] ss:$8 sps:$4 sm:$0xff]   ;;  %v9816_v27 = vld [vmem:[%s14165_s17 + $0x1b0] ss:$8 sps:$4 sm:$0xff]  }
0x120f   :  { %v9819_v31 = vld [vmem:[%s14165_s17 + $0x1c0] ss:$8 sps:$4 sm:$0xff]   ;;  %v9822_v55 = vld [vmem:[%s14165_s17 + $0x1d0] ss:$8 sps:$4 sm:$0xff]  }
0x1210   :  { %v6407_v33 = vpack.c.bf16 %v13418_v57, %v13406_v13  ;;  %v6406_v3 = vpack.c.bf16 %v13409_v39, %v13387_v12  ;;  %v6409_v19 = vpack.c.bf16 %v13421_v16, %v13390_v4  ;;  %v6408_v48 = vpack.c.bf16 %v13412_v18, %v13393_v59  ;;  %v9825_v44 = vld [vmem:[%s14165_s17 + $0x1e0] ss:$8 sps:$4 sm:$0xff]   ;;  %v10037_v13 = vld [vmem:[%s14165_s17 + $0x644] ss:$8 sps:$4 sm:$0xff]   ;;  %v10082_v4 = vld [vmem:[%s14165_s17 + $0x734] ss:$8 sps:$4 sm:$0xff]  }
0x1211   :  { %7770 = vmatpush1.bf16.msra.mxu0 %v9801_v11  ;;  %v9830_v11 = vld [vmem:[%s14165_s17 + $0x1f4] ss:$8 sps:$4 sm:$0xff]   ;;  %v10035_v57 = vld [vmem:[%s14165_s17 + $0x640] ss:$8 sps:$4 sm:$0xff]   ;;  %v10080_v39 = vld [vmem:[%s14165_s17 + $0x730] ss:$8 sps:$4 sm:$0xff]  }
0x1212   :  { %7771 = vmatprep.subr.bf16.mxu0 %v9806_v40  ;;  %v9828_v40 = vld [vmem:[%s14165_s17 + $0x1f0] ss:$8 sps:$4 sm:$0xff]   ;;  %v10077_v12 = vld [vmem:[%s14165_s17 + $0x720] ss:$8 sps:$4 sm:$0xff]   ;;  %v10085_v16 = vld [vmem:[%s14165_s17 + $0x744] ss:$8 sps:$4 sm:$0xff]  }
0x1213   :  { %v14219_v59 = vld [vmem:[#allocation13_spill] sm:$0xff] }
0x1215   :  { %7772 = vmatpush1.bf16.msra.mxu0 %v9804_v24  ;;  %v9833_v24 = vld [vmem:[%s14165_s17 + $0x204] ss:$8 sps:$4 sm:$0xff]  }
0x1216   :  { %7773 = vmatprep.subr.bf16.mxu0 %v9809_v35  ;;  %v9831_v35 = vld [vmem:[%s14165_s17 + $0x200] ss:$8 sps:$4 sm:$0xff]  }
0x1219   :  { %7774 = vmatpush1.bf16.msra.mxu0 %v9807_v22  ;;  %v9836_v22 = vld [vmem:[%s14165_s17 + $0x214] ss:$8 sps:$4 sm:$0xff]  }
0x121a   :  { %7775 = vmatprep.subr.bf16.mxu0 %v9812_v45  ;;  %v9834_v45 = vld [vmem:[%s14165_s17 + $0x210] ss:$8 sps:$4 sm:$0xff]  }
0x121d   :  { %7776 = vmatpush1.bf16.msra.mxu0 %v9810_v50  ;;  %v9839_v50 = vld [vmem:[%s14165_s17 + $0x224] ss:$8 sps:$4 sm:$0xff]  }
0x121e   :  { %7777 = vmatprep.subr.bf16.mxu0 %v9815_v38  ;;  %v9846_v38 = vld [vmem:[%s14165_s17 + $0x250] ss:$8 sps:$4 sm:$0xff]  }
0x1221   :  { %7778 = vmatpush1.bf16.msra.mxu0 %v9813_v61  ;;  %v9851_v61 = vld [vmem:[%s14165_s17 + $0x264] ss:$8 sps:$4 sm:$0xff]  }
0x1222   :  { %7779 = vmatprep.subr.bf16.mxu0 %v9818_v62  ;;  %v9849_v62 = vld [vmem:[%s14165_s17 + $0x260] ss:$8 sps:$4 sm:$0xff]  }
0x1225   :  { %7780 = vmatpush1.bf16.msra.mxu0 %v9816_v27  ;;  %v9854_v27 = vld [vmem:[%s14165_s17 + $0x274] ss:$8 sps:$4 sm:$0xff]  }
0x1226   :  { %7781 = vmatprep.subr.bf16.mxu0 %v9821_v53  ;;  %v9852_v53 = vld [vmem:[%s14165_s17 + $0x270] ss:$8 sps:$4 sm:$0xff]  }
0x1229   :  { %7782 = vmatpush1.bf16.msra.mxu0 %v9819_v31  ;;  %v9857_v31 = vld [vmem:[%s14165_s17 + $0x284] ss:$8 sps:$4 sm:$0xff]  }
0x122a   :  { %7783 = vmatprep.subr.bf16.mxu0 %v9824_v30  ;;  %v9855_v30 = vld [vmem:[%s14165_s17 + $0x280] ss:$8 sps:$4 sm:$0xff]  }
0x122d   :  { %7784 = vmatpush1.bf16.msra.mxu0 %v9822_v55  ;;  %v9860_v55 = vld [vmem:[%s14165_s17 + $0x294] ss:$8 sps:$4 sm:$0xff]  }
0x122e   :  { %7785 = vmatprep.subr.bf16.mxu0 %v9827_v0  ;;  %v9858_v0 = vld [vmem:[%s14165_s17 + $0x290] ss:$8 sps:$4 sm:$0xff]  }
0x1231   :  { %7786 = vmatpush1.bf16.msra.mxu0 %v9825_v44  ;;  %v9863_v44 = vld [vmem:[%s14165_s17 + $0x2a4] ss:$8 sps:$4 sm:$0xff]  }
0x1232   :  { %7787 = vmatprep.subr.bf16.mxu0 %v9830_v11  ;;  %v9861_v11 = vld [vmem:[%s14165_s17 + $0x2a0] ss:$8 sps:$4 sm:$0xff]  }
0x1235   :  { %7788 = vmatpush1.bf16.msra.mxu0 %v9828_v40  ;;  %v9866_v40 = vld [vmem:[%s14165_s17 + $0x2b4] ss:$8 sps:$4 sm:$0xff]  }
0x1236   :  { %7800 = vmatprep.subr.bf16.mxu0 %v9833_v24  ;;  %v9864_v24 = vld [vmem:[%s14165_s17 + $0x2b0] ss:$8 sps:$4 sm:$0xff]  }
0x1238   :  { %7790 = vmatmul.mubr.bf16.vlgmr.msra.gmra.mrb[56].mxu0 %v6396_v26  ;;  %v9840_v26 = vld [vmem:[%s14165_s17 + $0x230] ss:$8 sps:$4 sm:$0xff]  }
0x1239   :  { %7801 = vmatpush1.bf16.msra.mxu0 %v9831_v35  ;;  %7832 = vmatprep.mubr.bf16.mxu0 %v6399_v41  ;;  %v9848_v41 = vld [vmem:[%s14165_s17 + $0x254] ss:$8 sps:$4 sm:$0xff]   ;;  %v9869_v35 = vld [vmem:[%s14165_s17 + $0x2c4] ss:$8 sps:$4 sm:$0xff]  }
0x123a   :  { %7802 = vmatprep.subr.bf16.mxu0 %v9836_v22  ;;  %v9867_v22 = vld [vmem:[%s14165_s17 + $0x2c0] ss:$8 sps:$4 sm:$0xff]  }
0x123d   :  { %7803 = vmatpush1.bf16.msra.mxu0 %v9834_v45  ;;  %v9872_v45 = vld [vmem:[%s14165_s17 + $0x2d4] ss:$8 sps:$4 sm:$0xff]  }
0x123e   :  { %7804 = vmatprep.subr.bf16.mxu0 %v9839_v50  ;;  %v9870_v50 = vld [vmem:[%s14165_s17 + $0x2d0] ss:$8 sps:$4 sm:$0xff]  }
0x1241   :  { %7805 = vmatpush1.bf16.msra.mxu0 %v9837_v2  ;;  %v9875_v2 = vld [vmem:[%s14165_s17 + $0x2e4] ss:$8 sps:$4 sm:$0xff]  }
0x1242   :  { %7806 = vmatprep.subr.bf16.mxu0 %v9842_v7  ;;  %v9873_v7 = vld [vmem:[%s14165_s17 + $0x2e0] ss:$8 sps:$4 sm:$0xff]  }
0x1245   :  { %7807 = vmatpush1.bf16.msra.mxu0 %v9840_v26  ;;  %v9878_v26 = vld [vmem:[%s14165_s17 + $0x2f4] ss:$8 sps:$4 sm:$0xff]  }
0x1246   :  { %7808 = vmatprep.subr.bf16.mxu0 %v9845_v37  ;;  %v9876_v37 = vld [vmem:[%s14165_s17 + $0x2f0] ss:$8 sps:$4 sm:$0xff]  }
0x1249   :  { %7809 = vmatpush1.bf16.msra.mxu0 %v9843_v5  ;;  %v9881_v5 = vld [vmem:[%s14165_s17 + $0x304] ss:$8 sps:$4 sm:$0xff]  }
0x124a   :  { %7810 = vmatprep.subr.bf16.mxu0 %v9848_v41  ;;  %v9879_v41 = vld [vmem:[%s14165_s17 + $0x300] ss:$8 sps:$4 sm:$0xff]  }
0x124d   :  { %7811 = vmatpush1.bf16.msra.mxu0 %v9846_v38  ;;  %v9884_v38 = vld [vmem:[%s14165_s17 + $0x314] ss:$8 sps:$4 sm:$0xff]  }
0x124e   :  { %7812 = vmatprep.subr.bf16.mxu0 %v9851_v61  ;;  %v9882_v61 = vld [vmem:[%s14165_s17 + $0x310] ss:$8 sps:$4 sm:$0xff]  }
0x1251   :  { %7813 = vmatpush1.bf16.msra.mxu0 %v9849_v62  ;;  %v9887_v62 = vld [vmem:[%s14165_s17 + $0x324] ss:$8 sps:$4 sm:$0xff]  }
0x1252   :  { %7814 = vmatprep.subr.bf16.mxu0 %v9854_v27  ;;  %v9894_v27 = vld [vmem:[%s14165_s17 + $0x350] ss:$8 sps:$4 sm:$0xff]  }
0x1255   :  { %7815 = vmatpush1.bf16.msra.mxu0 %v9852_v53  ;;  %v9899_v53 = vld [vmem:[%s14165_s17 + $0x364] ss:$8 sps:$4 sm:$0xff]  }
0x1256   :  { %7816 = vmatprep.subr.bf16.mxu0 %v9857_v31  ;;  %v9897_v31 = vld [vmem:[%s14165_s17 + $0x360] ss:$8 sps:$4 sm:$0xff]  }
0x1259   :  { %7817 = vmatpush1.bf16.msra.mxu0 %v9855_v30  ;;  %v9902_v30 = vld [vmem:[%s14165_s17 + $0x374] ss:$8 sps:$4 sm:$0xff]  }
0x125a   :  { %7818 = vmatprep.subr.bf16.mxu0 %v9860_v55  ;;  %v9900_v55 = vld [vmem:[%s14165_s17 + $0x370] ss:$8 sps:$4 sm:$0xff]  }
0x125d   :  { %7819 = vmatpush1.bf16.msra.mxu0 %v9858_v0  ;;  %v9905_v0 = vld [vmem:[%s14165_s17 + $0x384] ss:$8 sps:$4 sm:$0xff]  }
0x125e   :  { %7820 = vmatprep.subr.bf16.mxu0 %v9863_v44  ;;  %v9903_v44 = vld [vmem:[%s14165_s17 + $0x380] ss:$8 sps:$4 sm:$0xff]  }
0x1261   :  { %7821 = vmatpush1.bf16.msra.mxu0 %v9861_v11  ;;  %v9908_v11 = vld [vmem:[%s14165_s17 + $0x394] ss:$8 sps:$4 sm:$0xff]  }
0x1262   :  { %7822 = vmatprep.subr.bf16.mxu0 %v9866_v40  ;;  %v9906_v40 = vld [vmem:[%s14165_s17 + $0x390] ss:$8 sps:$4 sm:$0xff]  }
0x1265   :  { %7823 = vmatpush1.bf16.msra.mxu0 %v9864_v24  ;;  %v9911_v24 = vld [vmem:[%s14165_s17 + $0x3a4] ss:$8 sps:$4 sm:$0xff]  }
0x1266   :  { %7824 = vmatprep.subr.bf16.mxu0 %v9869_v35  ;;  %v9909_v35 = vld [vmem:[%s14165_s17 + $0x3a0] ss:$8 sps:$4 sm:$0xff]  }
0x1269   :  { %7825 = vmatpush1.bf16.msra.mxu0 %v9867_v22  ;;  %v9914_v22 = vld [vmem:[%s14165_s17 + $0x3b4] ss:$8 sps:$4 sm:$0xff]  }
0x126a   :  { %7826 = vmatprep.subr.bf16.mxu0 %v9872_v45  ;;  %v9912_v45 = vld [vmem:[%s14165_s17 + $0x3b0] ss:$8 sps:$4 sm:$0xff]  }
0x126d   :  { %7827 = vmatpush1.bf16.msra.mxu0 %v9870_v50  ;;  %v9917_v50 = vld [vmem:[%s14165_s17 + $0x3c4] ss:$8 sps:$4 sm:$0xff]  }
0x126e   :  { %7828 = vmatprep.subr.bf16.mxu0 %v9875_v2  ;;  %v9915_v2 = vld [vmem:[%s14165_s17 + $0x3c0] ss:$8 sps:$4 sm:$0xff]  }
0x1271   :  { %7829 = vmatpush1.bf16.msra.mxu0 %v9873_v7  ;;  %v9920_v7 = vld [vmem:[%s14165_s17 + $0x3d4] ss:$8 sps:$4 sm:$0xff]  }
0x1272   :  { %7830 = vmatprep.subr.bf16.mxu0 %v9878_v26  ;;  %v9918_v26 = vld [vmem:[%s14165_s17 + $0x3d0] ss:$8 sps:$4 sm:$0xff]  }
0x1275   :  { %7831 = vmatpush1.bf16.msra.mxu0 %v9876_v37  ;;  %v9923_v37 = vld [vmem:[%s14165_s17 + $0x3e4] ss:$8 sps:$4 sm:$0xff]  }
0x1276   :  { %7843 = vmatprep.subr.bf16.mxu0 %v9881_v5  ;;  %v9921_v5 = vld [vmem:[%s14165_s17 + $0x3e0] ss:$8 sps:$4 sm:$0xff]  }
0x1278   :  { %7833 = vmatmul.mubr.bf16.vlgmr.msra.gmra.mrb[56].mxu0 %v6398_v6  ;;  %v9891_v6 = vld [vmem:[%s14165_s17 + $0x340] ss:$8 sps:$4 sm:$0xff]  }
0x1279   :  { %7844 = vmatpush1.bf16.msra.mxu0 %v9879_v41  ;;  %7875 = vmatprep.mubr.bf16.mxu0 %v6401_v28  ;;  %v9896_v28 = vld [vmem:[%s14165_s17 + $0x354] ss:$8 sps:$4 sm:$0xff]  }
0x127a   :  { %7845 = vmatprep.subr.bf16.mxu0 %v9884_v38  ;;  %v9926_v41 = vld [vmem:[%s14165_s17 + $0x3f4] ss:$8 sps:$4 sm:$0xff]   ;;  %v9924_v38 = vld [vmem:[%s14165_s17 + $0x3f0] ss:$8 sps:$4 sm:$0xff]  }
0x127d   :  { %7846 = vmatpush1.bf16.msra.mxu0 %v9882_v61  ;;  %v9929_v61 = vld [vmem:[%s14165_s17 + $0x404] ss:$8 sps:$4 sm:$0xff]  }
0x127e   :  { %7847 = vmatprep.subr.bf16.mxu0 %v9887_v62  ;;  %v9927_v62 = vld [vmem:[%s14165_s17 + $0x400] ss:$8 sps:$4 sm:$0xff]  }
0x1281   :  { %7848 = vmatpush1.bf16.msra.mxu0 %v9885_v21  ;;  %v9932_v21 = vld [vmem:[%s14165_s17 + $0x414] ss:$8 sps:$4 sm:$0xff]  }
0x1282   :  { %7849 = vmatprep.subr.bf16.mxu0 %v9890_v25  ;;  %v9930_v25 = vld [vmem:[%s14165_s17 + $0x410] ss:$8 sps:$4 sm:$0xff]  }
0x1285   :  { %7850 = vmatpush1.bf16.msra.mxu0 %v9888_v63  ;;  %v9935_v63 = vld [vmem:[%s14165_s17 + $0x424] ss:$8 sps:$4 sm:$0xff]  }
0x1286   :  { %7851 = vmatprep.subr.bf16.mxu0 %v9893_v8  ;;  %v9942_v8 = vld [vmem:[%s14165_s17 + $0x450] ss:$8 sps:$4 sm:$0xff]  }
0x1289   :  { %7852 = vmatpush1.bf16.msra.mxu0 %v9891_v6  ;;  %v9947_v6 = vld [vmem:[%s14165_s17 + $0x464] ss:$8 sps:$4 sm:$0xff]  }
0x128a   :  { %7853 = vmatprep.subr.bf16.mxu0 %v9896_v28  ;;  %v9945_v28 = vld [vmem:[%s14165_s17 + $0x460] ss:$8 sps:$4 sm:$0xff]  }
0x128d   :  { %7854 = vmatpush1.bf16.msra.mxu0 %v9894_v27  ;;  %v9950_v27 = vld [vmem:[%s14165_s17 + $0x474] ss:$8 sps:$4 sm:$0xff]  }
0x128e   :  { %7855 = vmatprep.subr.bf16.mxu0 %v9899_v53  ;;  %v9948_v53 = vld [vmem:[%s14165_s17 + $0x470] ss:$8 sps:$4 sm:$0xff]  }
0x1291   :  { %7856 = vmatpush1.bf16.msra.mxu0 %v9897_v31  ;;  %v9953_v31 = vld [vmem:[%s14165_s17 + $0x484] ss:$8 sps:$4 sm:$0xff]  }
0x1292   :  { %7857 = vmatprep.subr.bf16.mxu0 %v9902_v30  ;;  %v9951_v30 = vld [vmem:[%s14165_s17 + $0x480] ss:$8 sps:$4 sm:$0xff]  }
0x1295   :  { %7858 = vmatpush1.bf16.msra.mxu0 %v9900_v55  ;;  %v9956_v55 = vld [vmem:[%s14165_s17 + $0x494] ss:$8 sps:$4 sm:$0xff]  }
0x1296   :  { %7859 = vmatprep.subr.bf16.mxu0 %v9905_v0  ;;  %v9954_v0 = vld [vmem:[%s14165_s17 + $0x490] ss:$8 sps:$4 sm:$0xff]  }
0x1299   :  { %7860 = vmatpush1.bf16.msra.mxu0 %v9903_v44  ;;  %v9959_v44 = vld [vmem:[%s14165_s17 + $0x4a4] ss:$8 sps:$4 sm:$0xff]  }
0x129a   :  { %7861 = vmatprep.subr.bf16.mxu0 %v9908_v11  ;;  %v9957_v11 = vld [vmem:[%s14165_s17 + $0x4a0] ss:$8 sps:$4 sm:$0xff]  }
0x129d   :  { %7862 = vmatpush1.bf16.msra.mxu0 %v9906_v40  ;;  %v9962_v40 = vld [vmem:[%s14165_s17 + $0x4b4] ss:$8 sps:$4 sm:$0xff]  }
0x129e   :  { %7863 = vmatprep.subr.bf16.mxu0 %v9911_v24  ;;  %v9960_v24 = vld [vmem:[%s14165_s17 + $0x4b0] ss:$8 sps:$4 sm:$0xff]  }
0x12a1   :  { %7864 = vmatpush1.bf16.msra.mxu0 %v9909_v35  ;;  %v9965_v35 = vld [vmem:[%s14165_s17 + $0x4c4] ss:$8 sps:$4 sm:$0xff]  }
0x12a2   :  { %7865 = vmatprep.subr.bf16.mxu0 %v9914_v22  ;;  %v9963_v22 = vld [vmem:[%s14165_s17 + $0x4c0] ss:$8 sps:$4 sm:$0xff]  }
0x12a5   :  { %7866 = vmatpush1.bf16.msra.mxu0 %v9912_v45  ;;  %v9968_v45 = vld [vmem:[%s14165_s17 + $0x4d4] ss:$8 sps:$4 sm:$0xff]  }
0x12a6   :  { %7867 = vmatprep.subr.bf16.mxu0 %v9917_v50  ;;  %v9966_v50 = vld [vmem:[%s14165_s17 + $0x4d0] ss:$8 sps:$4 sm:$0xff]  }
0x12a9   :  { %7868 = vmatpush1.bf16.msra.mxu0 %v9915_v2  ;;  %v9971_v2 = vld [vmem:[%s14165_s17 + $0x4e4] ss:$8 sps:$4 sm:$0xff]  }
0x12aa   :  { %7869 = vmatprep.subr.bf16.mxu0 %v9920_v7  ;;  %v9969_v7 = vld [vmem:[%s14165_s17 + $0x4e0] ss:$8 sps:$4 sm:$0xff]  }
0x12ad   :  { %7870 = vmatpush1.bf16.msra.mxu0 %v9918_v26  ;;  %v9974_v26 = vld [vmem:[%s14165_s17 + $0x4f4] ss:$8 sps:$4 sm:$0xff]  }
0x12ae   :  { %7871 = vmatprep.subr.bf16.mxu0 %v9923_v37  ;;  %v9972_v37 = vld [vmem:[%s14165_s17 + $0x4f0] ss:$8 sps:$4 sm:$0xff]  }
0x12b1   :  { %7872 = vmatpush1.bf16.msra.mxu0 %v9921_v5  ;;  %v9977_v5 = vld [vmem:[%s14165_s17 + $0x504] ss:$8 sps:$4 sm:$0xff]  }
0x12b2   :  { %7873 = vmatprep.subr.bf16.mxu0 %v9926_v41  ;;  %v9975_v41 = vld [vmem:[%s14165_s17 + $0x500] ss:$8 sps:$4 sm:$0xff]  }
0x12b5   :  { %7874 = vmatpush1.bf16.msra.mxu0 %v9924_v38  ;;  %v9980_v38 = vld [vmem:[%s14165_s17 + $0x514] ss:$8 sps:$4 sm:$0xff]  }
0x12b6   :  { %7886 = vmatprep.subr.bf16.mxu0 %v9929_v61  ;;  %v9978_v61 = vld [vmem:[%s14165_s17 + $0x510] ss:$8 sps:$4 sm:$0xff]  }
0x12b8   :  { %7876 = vmatmul.mubr.bf16.vlgmr.msra.gmra.mrb[56].mxu0 %v6400_v43  ;;  %v9936_v43 = vld [vmem:[%s14165_s17 + $0x430] ss:$8 sps:$4 sm:$0xff]  }
0x12b9   :  { %7887 = vmatpush1.bf16.msra.mxu0 %v9927_v62  ;;  %7918 = vmatprep.mubr.bf16.mxu0 %v6403_v51  ;;  %v9944_v51 = vld [vmem:[%s14165_s17 + $0x454] ss:$8 sps:$4 sm:$0xff]   ;;  %v9983_v62 = vld [vmem:[%s14165_s17 + $0x524] ss:$8 sps:$4 sm:$0xff]  }
0x12ba   :  { %7888 = vmatprep.subr.bf16.mxu0 %v9932_v21  ;;  %v9990_v21 = vld [vmem:[%s14165_s17 + $0x550] ss:$8 sps:$4 sm:$0xff]  }
0x12bd   :  { %7889 = vmatpush1.bf16.msra.mxu0 %v9930_v25  ;;  %v9995_v25 = vld [vmem:[%s14165_s17 + $0x564] ss:$8 sps:$4 sm:$0xff]  }
0x12be   :  { %7890 = vmatprep.subr.bf16.mxu0 %v9935_v63  ;;  %v9993_v63 = vld [vmem:[%s14165_s17 + $0x560] ss:$8 sps:$4 sm:$0xff]  }
0x12c1   :  { %7891 = vmatpush1.bf16.msra.mxu0 %v9933_v10  ;;  %v9998_v10 = vld [vmem:[%s14165_s17 + $0x574] ss:$8 sps:$4 sm:$0xff]  }
0x12c2   :  { %7892 = vmatprep.subr.bf16.mxu0 %v9938_v23  ;;  %v9996_v23 = vld [vmem:[%s14165_s17 + $0x570] ss:$8 sps:$4 sm:$0xff]  }
0x12c5   :  { %7893 = vmatpush1.bf16.msra.mxu0 %v9936_v43  ;;  %v10001_v43 = vld [vmem:[%s14165_s17 + $0x584] ss:$8 sps:$4 sm:$0xff]  }
0x12c6   :  { %7894 = vmatprep.subr.bf16.mxu0 %v9941_v1  ;;  %v9999_v1 = vld [vmem:[%s14165_s17 + $0x580] ss:$8 sps:$4 sm:$0xff]  }
0x12c9   :  { %7895 = vmatpush1.bf16.msra.mxu0 %v9939_v17  ;;  %v10004_v17 = vld [vmem:[%s14165_s17 + $0x594] ss:$8 sps:$4 sm:$0xff]  }
0x12ca   :  { %7896 = vmatprep.subr.bf16.mxu0 %v9944_v51  ;;  %v10002_v51 = vld [vmem:[%s14165_s17 + $0x590] ss:$8 sps:$4 sm:$0xff]  }
0x12cd   :  { %7897 = vmatpush1.bf16.msra.mxu0 %v9942_v8  ;;  %v10007_v8 = vld [vmem:[%s14165_s17 + $0x5a4] ss:$8 sps:$4 sm:$0xff]  }
0x12ce   :  { %7898 = vmatprep.subr.bf16.mxu0 %v9947_v6  ;;  %v10005_v6 = vld [vmem:[%s14165_s17 + $0x5a0] ss:$8 sps:$4 sm:$0xff]  }
0x12d1   :  { %7899 = vmatpush1.bf16.msra.mxu0 %v9945_v28  ;;  %v10010_v28 = vld [vmem:[%s14165_s17 + $0x5b4] ss:$8 sps:$4 sm:$0xff]  }
0x12d2   :  { %7900 = vmatprep.subr.bf16.mxu0 %v9950_v27  ;;  %v10008_v27 = vld [vmem:[%s14165_s17 + $0x5b0] ss:$8 sps:$4 sm:$0xff]  }
0x12d5   :  { %7901 = vmatpush1.bf16.msra.mxu0 %v9948_v53  ;;  %v10013_v53 = vld [vmem:[%s14165_s17 + $0x5c4] ss:$8 sps:$4 sm:$0xff]  }
0x12d6   :  { %7902 = vmatprep.subr.bf16.mxu0 %v9953_v31  ;;  %v10011_v31 = vld [vmem:[%s14165_s17 + $0x5c0] ss:$8 sps:$4 sm:$0xff]  }
0x12d9   :  { %7903 = vmatpush1.bf16.msra.mxu0 %v9951_v30  ;;  %v10016_v30 = vld [vmem:[%s14165_s17 + $0x5d4] ss:$8 sps:$4 sm:$0xff]  }
0x12da   :  { %7904 = vmatprep.subr.bf16.mxu0 %v9956_v55  ;;  %v10014_v55 = vld [vmem:[%s14165_s17 + $0x5d0] ss:$8 sps:$4 sm:$0xff]  }
0x12dd   :  { %7905 = vmatpush1.bf16.msra.mxu0 %v9954_v0  ;;  %v10019_v0 = vld [vmem:[%s14165_s17 + $0x5e4] ss:$8 sps:$4 sm:$0xff]  }
0x12de   :  { %7906 = vmatprep.subr.bf16.mxu0 %v9959_v44  ;;  %v10017_v44 = vld [vmem:[%s14165_s17 + $0x5e0] ss:$8 sps:$4 sm:$0xff]  }
0x12e1   :  { %7907 = vmatpush1.bf16.msra.mxu0 %v9957_v11  ;;  %v10022_v11 = vld [vmem:[%s14165_s17 + $0x5f4] ss:$8 sps:$4 sm:$0xff]  }
0x12e2   :  { %7908 = vmatprep.subr.bf16.mxu0 %v9962_v40  ;;  %v10020_v40 = vld [vmem:[%s14165_s17 + $0x5f0] ss:$8 sps:$4 sm:$0xff]  }
0x12e5   :  { %7909 = vmatpush1.bf16.msra.mxu0 %v9960_v24  ;;  %v10025_v24 = vld [vmem:[%s14165_s17 + $0x604] ss:$8 sps:$4 sm:$0xff]  }
0x12e6   :  { %7910 = vmatprep.subr.bf16.mxu0 %v9965_v35  ;;  %v10023_v35 = vld [vmem:[%s14165_s17 + $0x600] ss:$8 sps:$4 sm:$0xff]  }
0x12e9   :  { %7911 = vmatpush1.bf16.msra.mxu0 %v9963_v22  ;;  %v10028_v22 = vld [vmem:[%s14165_s17 + $0x614] ss:$8 sps:$4 sm:$0xff]  }
0x12ea   :  { %7912 = vmatprep.subr.bf16.mxu0 %v9968_v45  ;;  %v10026_v45 = vld [vmem:[%s14165_s17 + $0x610] ss:$8 sps:$4 sm:$0xff]  }
0x12ed   :  { %7913 = vmatpush1.bf16.msra.mxu0 %v9966_v50  ;;  %v10031_v50 = vld [vmem:[%s14165_s17 + $0x624] ss:$8 sps:$4 sm:$0xff]  }
0x12ee   :  { %7914 = vmatprep.subr.bf16.mxu0 %v9971_v2  ;;  %v10038_v2 = vld [vmem:[%s14165_s17 + $0x650] ss:$8 sps:$4 sm:$0xff]  }
0x12f1   :  { %7915 = vmatpush1.bf16.msra.mxu0 %v9969_v7  ;;  %v10043_v7 = vld [vmem:[%s14165_s17 + $0x664] ss:$8 sps:$4 sm:$0xff]  }
0x12f2   :  { %7916 = vmatprep.subr.bf16.mxu0 %v9974_v26  ;;  %v10041_v26 = vld [vmem:[%s14165_s17 + $0x660] ss:$8 sps:$4 sm:$0xff]  }
0x12f5   :  { %7917 = vmatpush1.bf16.msra.mxu0 %v9972_v37  ;;  %v10046_v37 = vld [vmem:[%s14165_s17 + $0x674] ss:$8 sps:$4 sm:$0xff]  }
0x12f6   :  { %7929 = vmatprep.subr.bf16.mxu0 %v9977_v5  ;;  %v10044_v5 = vld [vmem:[%s14165_s17 + $0x670] ss:$8 sps:$4 sm:$0xff]  }
0x12f8   :  { %7919 = vmatmul.mubr.bf16.vlgmr.msra.gmra.mrb[56].mxu0 %v6402_v15  ;;  %v9987_v15 = vld [vmem:[%s14165_s17 + $0x540] ss:$8 sps:$4 sm:$0xff]  }
0x12f9   :  { %7930 = vmatpush1.bf16.msra.mxu0 %v9975_v41  ;;  %7961 = vmatprep.mubr.bf16.mxu0 %v6405_v60  ;;  %v9992_v60 = vld [vmem:[%s14165_s17 + $0x554] ss:$8 sps:$4 sm:$0xff]   ;;  %v10049_v41 = vld [vmem:[%s14165_s17 + $0x684] ss:$8 sps:$4 sm:$0xff]  }
0x12fa   :  { %7931 = vmatprep.subr.bf16.mxu0 %v9980_v38  ;;  %v10047_v38 = vld [vmem:[%s14165_s17 + $0x680] ss:$8 sps:$4 sm:$0xff]  }
0x12fd   :  { %7932 = vmatpush1.bf16.msra.mxu0 %v9978_v61  ;;  %v10052_v61 = vld [vmem:[%s14165_s17 + $0x694] ss:$8 sps:$4 sm:$0xff]  }
0x12fe   :  { %7933 = vmatprep.subr.bf16.mxu0 %v9983_v62  ;;  %v10050_v62 = vld [vmem:[%s14165_s17 + $0x690] ss:$8 sps:$4 sm:$0xff]  }
0x1301   :  { %7934 = vmatpush1.bf16.msra.mxu0 %v9981_v14  ;;  %v10055_v14 = vld [vmem:[%s14165_s17 + $0x6a4] ss:$8 sps:$4 sm:$0xff]  }
0x1302   :  { %7935 = vmatprep.subr.bf16.mxu0 %v9986_v52  ;;  %v10053_v52 = vld [vmem:[%s14165_s17 + $0x6a0] ss:$8 sps:$4 sm:$0xff]  }
0x1305   :  { %7936 = vmatpush1.bf16.msra.mxu0 %v9984_v56  ;;  %v10058_v56 = vld [vmem:[%s14165_s17 + $0x6b4] ss:$8 sps:$4 sm:$0xff]  }
0x1306   :  { %7937 = vmatprep.subr.bf16.mxu0 %v9989_v47  ;;  %v10056_v47 = vld [vmem:[%s14165_s17 + $0x6b0] ss:$8 sps:$4 sm:$0xff]  }
0x1309   :  { %7938 = vmatpush1.bf16.msra.mxu0 %v9987_v15  ;;  %v10061_v15 = vld [vmem:[%s14165_s17 + $0x6c4] ss:$8 sps:$4 sm:$0xff]  }
0x130a   :  { %7939 = vmatprep.subr.bf16.mxu0 %v9992_v60  ;;  %v10059_v60 = vld [vmem:[%s14165_s17 + $0x6c0] ss:$8 sps:$4 sm:$0xff]  }
0x130d   :  { %7940 = vmatpush1.bf16.msra.mxu0 %v9990_v21  ;;  %v10064_v21 = vld [vmem:[%s14165_s17 + $0x6d4] ss:$8 sps:$4 sm:$0xff]  }
0x130e   :  { %7941 = vmatprep.subr.bf16.mxu0 %v9995_v25  ;;  %v10062_v25 = vld [vmem:[%s14165_s17 + $0x6d0] ss:$8 sps:$4 sm:$0xff]  }
0x1311   :  { %7942 = vmatpush1.bf16.msra.mxu0 %v9993_v63  ;;  %v10067_v63 = vld [vmem:[%s14165_s17 + $0x6e4] ss:$8 sps:$4 sm:$0xff]  }
0x1312   :  { %7943 = vmatprep.subr.bf16.mxu0 %v9998_v10  ;;  %v10065_v10 = vld [vmem:[%s14165_s17 + $0x6e0] ss:$8 sps:$4 sm:$0xff]  }
0x1315   :  { %7944 = vmatpush1.bf16.msra.mxu0 %v9996_v23  ;;  %v10070_v23 = vld [vmem:[%s14165_s17 + $0x6f4] ss:$8 sps:$4 sm:$0xff]  }
0x1316   :  { %7945 = vmatprep.subr.bf16.mxu0 %v10001_v43  ;;  %v10068_v43 = vld [vmem:[%s14165_s17 + $0x6f0] ss:$8 sps:$4 sm:$0xff]  }
0x1319   :  { %7946 = vmatpush1.bf16.msra.mxu0 %v9999_v1  ;;  %v10073_v1 = vld [vmem:[%s14165_s17 + $0x704] ss:$8 sps:$4 sm:$0xff]  }
0x131a   :  { %7947 = vmatprep.subr.bf16.mxu0 %v10004_v17  ;;  %v10071_v17 = vld [vmem:[%s14165_s17 + $0x700] ss:$8 sps:$4 sm:$0xff]  }
0x131d   :  { %7948 = vmatpush1.bf16.msra.mxu0 %v10002_v51  ;;  %v10076_v51 = vld [vmem:[%s14165_s17 + $0x714] ss:$8 sps:$4 sm:$0xff]  }
0x131e   :  { %7949 = vmatprep.subr.bf16.mxu0 %v10007_v8  ;;  %v10074_v8 = vld [vmem:[%s14165_s17 + $0x710] ss:$8 sps:$4 sm:$0xff]  }
0x1321   :  { %7950 = vmatpush1.bf16.msra.mxu0 %v10005_v6  ;;  %v10079_v6 = vld [vmem:[%s14165_s17 + $0x724] ss:$8 sps:$4 sm:$0xff]  }
0x1322   :  { %7951 = vmatprep.subr.bf16.mxu0 %v10010_v28  ;;  %v10086_v28 = vld [vmem:[%s14165_s17 + $0x750] ss:$8 sps:$4 sm:$0xff]  }
0x1325   :  { %7952 = vmatpush1.bf16.msra.mxu0 %v10008_v27  ;;  %v10091_v27 = vld [vmem:[%s14165_s17 + $0x764] ss:$8 sps:$4 sm:$0xff]  }
0x1326   :  { %7953 = vmatprep.subr.bf16.mxu0 %v10013_v53  ;;  %v10089_v53 = vld [vmem:[%s14165_s17 + $0x760] ss:$8 sps:$4 sm:$0xff]  }
0x1329   :  { %7954 = vmatpush1.bf16.msra.mxu0 %v10011_v31  ;;  %v10094_v31 = vld [vmem:[%s14165_s17 + $0x774] ss:$8 sps:$4 sm:$0xff]  }
0x132a   :  { %7955 = vmatprep.subr.bf16.mxu0 %v10016_v30  ;;  %v10092_v30 = vld [vmem:[%s14165_s17 + $0x770] ss:$8 sps:$4 sm:$0xff]  }
0x132d   :  { %7956 = vmatpush1.bf16.msra.mxu0 %v10014_v55  ;;  %v10097_v55 = vld [vmem:[%s14165_s17 + $0x784] ss:$8 sps:$4 sm:$0xff]  }
0x132e   :  { %7957 = vmatprep.subr.bf16.mxu0 %v10019_v0  ;;  %v10095_v0 = vld [vmem:[%s14165_s17 + $0x780] ss:$8 sps:$4 sm:$0xff]  }
0x1331   :  { %7958 = vmatpush1.bf16.msra.mxu0 %v10017_v44  ;;  %v10100_v44 = vld [vmem:[%s14165_s17 + $0x794] ss:$8 sps:$4 sm:$0xff]  }
0x1332   :  { %7959 = vmatprep.subr.bf16.mxu0 %v10022_v11  ;;  %v10098_v11 = vld [vmem:[%s14165_s17 + $0x790] ss:$8 sps:$4 sm:$0xff]  }
0x1335   :  { %7960 = vmatpush1.bf16.msra.mxu0 %v10020_v40  ;;  %v10103_v40 = vld [vmem:[%s14165_s17 + $0x7a4] ss:$8 sps:$4 sm:$0xff]  }
0x1336   :  { %7972 = vmatprep.subr.bf16.mxu0 %v10025_v24  ;;  %v10101_v24 = vld [vmem:[%s14165_s17 + $0x7a0] ss:$8 sps:$4 sm:$0xff]  }
0x1338   :  { %7962 = vmatmul.mubr.bf16.vlgmr.msra.gmra.mrb[56].mxu0 %v6404_v58  ;;  %v10032_v58 = vld [vmem:[%s14165_s17 + $0x630] ss:$8 sps:$4 sm:$0xff]  }
0x1339   :  { %7973 = vmatpush1.bf16.msra.mxu0 %v10023_v35  ;;  %8004 = vmatprep.mubr.bf16.mxu0 %v6407_v33  ;;  %v10040_v33 = vld [vmem:[%s14165_s17 + $0x654] ss:$8 sps:$4 sm:$0xff]  }
0x133a   :  { %7974 = vmatprep.subr.bf16.mxu0 %v10028_v22  ;;  %v10106_v35 = vld [vmem:[%s14165_s17 + $0x7b4] ss:$8 sps:$4 sm:$0xff]   ;;  %v10104_v22 = vld [vmem:[%s14165_s17 + $0x7b0] ss:$8 sps:$4 sm:$0xff]  }
0x133d   :  { %7975 = vmatpush1.bf16.msra.mxu0 %v10026_v45  ;;  %v10109_v45 = vld [vmem:[%s14165_s17 + $0x7c4] ss:$8 sps:$4 sm:$0xff]  }
0x133e   :  { %7976 = vmatprep.subr.bf16.mxu0 %v10031_v50  ;;  %v10107_v50 = vld [vmem:[%s14165_s17 + $0x7c0] ss:$8 sps:$4 sm:$0xff]  }
0x1341   :  { %7977 = vmatpush1.bf16.msra.mxu0 %v10029_v29  ;;  %v10112_v29 = vld [vmem:[%s14165_s17 + $0x7d4] ss:$8 sps:$4 sm:$0xff]  }
0x1342   :  { %7978 = vmatprep.subr.bf16.mxu0 %v10034_v34  ;;  %v10110_v34 = vld [vmem:[%s14165_s17 + $0x7d0] ss:$8 sps:$4 sm:$0xff]  }
0x1345   :  { %7979 = vmatpush1.bf16.msra.mxu0 %v10032_v58  ;;  %v10115_v58 = vld [vmem:[%s14165_s17 + $0x7e4] ss:$8 sps:$4 sm:$0xff]  }
0x1346   :  { %7980 = vmatprep.subr.bf16.mxu0 %v10037_v13  ;;  %v10113_v13 = vld [vmem:[%s14165_s17 + $0x7e0] ss:$8 sps:$4 sm:$0xff]  }
0x1349   :  { %7981 = vmatpush1.bf16.msra.mxu0 %v10035_v57  ;;  %v10118_v57 = vld [vmem:[%s14165_s17 + $0x7f4] ss:$8 sps:$4 sm:$0xff]  }
0x134a   :  { %7982 = vmatprep.subr.bf16.mxu0 %v10040_v33  ;;  %v10116_v33 = vld [vmem:[%s14165_s17 + $0x7f0] ss:$8 sps:$4 sm:$0xff]  }
0x134d   :  { %7983 = vmatpush1.bf16.msra.mxu0 %v10038_v2  ;;  %v6410_v2 = vld [vmem:[%s14166_s18] sm:$0xff] }
0x134e   :  { %7984 = vmatprep.subr.bf16.mxu0 %v10043_v7  ;;  %v14214_v7 = vld [vmem:[#allocation5_spill] sm:$0xff]  ;;  %v8091_v18 = vrot.slane %v6410_v2, %v14219_v59 }
0x1351   :  { %7985 = vmatpush1.bf16.msra.mxu0 %v10041_v26  ;;  %v6415_v26 = vrot.slane %v6410_v2, %v14214_v7 }
0x1352   :  { %7986 = vmatprep.subr.bf16.mxu0 %v10046_v37  ;;  %v14215_v37 = vld [vmem:[#allocation15_spill] sm:$0xff] }
0x1355   :  { %7987 = vmatpush1.bf16.msra.mxu0 %v10044_v5  ;;  %v6419_v5 = vrot.slane %v6410_v2, %v14215_v37 }
0x1356   :  { %7988 = vmatprep.subr.bf16.mxu0 %v10049_v41  ;;  %v14216_v41 = vld [vmem:[#allocation6_spill] sm:$0xff] }
0x1359   :  { %7989 = vmatpush1.bf16.msra.mxu0 %v10047_v38  ;;  %v8061_v38 = vrot.slane %v6410_v2, %v14216_v41 }
0x135a   :  { %7990 = vmatprep.subr.bf16.mxu0 %v10052_v61  ;;  %v14217_v61 = vld [vmem:[#allocation16_spill] sm:$0xff] }
0x135d   :  { %7991 = vmatpush1.bf16.msra.mxu0 %v10050_v62  ;;  %v8065_v62 = vrot.slane %v6410_v2, %v14217_v61 }
0x135e   :  { %7992 = vmatprep.subr.bf16.mxu0 %v10055_v14  ;;  %v6425_v14 = vrot.slane %v6415_v26, %v14214_v7 }
0x1361   :  { %7993 = vmatpush1.bf16.msra.mxu0 %v10053_v52  ;;  %v14218_v52 = vld [vmem:[#allocation11_spill] sm:$0xff] }
0x1362   :  { %7994 = vmatprep.subr.bf16.mxu0 %v10058_v56  ;;  %v8087_v56 = vrot.slane %v6410_v2, %v14218_v52 }
0x1365   :  { %7995 = vmatpush1.bf16.msra.mxu0 %v10056_v47  ;;  %v6429_v47 = vrot.slane %v6419_v5, %v14214_v7  ;;  %v14223_v7 = vld [vmem:[#allocation8_spill] sm:$0xff] }
0x1366   :  { %7996 = vmatprep.subr.bf16.mxu0 %v10061_v15  ;;  %v14220_v15 = vld [vmem:[#allocation12_spill] sm:$0xff] }
0x1369   :  { %7997 = vmatpush1.bf16.msra.mxu0 %v10059_v60  ;;  %v8113_v60 = vrot.slane %v6410_v2, %v14220_v15 }
0x136a   :  { %7998 = vmatprep.subr.bf16.mxu0 %v10064_v21  ;;  %v14221_v21 = vld [vmem:[#allocation14_spill] sm:$0xff] }
0x136d   :  { %7999 = vmatpush1.bf16.msra.mxu0 %v10062_v25  ;;  %v8117_v25 = vrot.slane %v6410_v2, %v14221_v21 }
0x136e   :  { %8000 = vmatprep.subr.bf16.mxu0 %v10067_v63  ;;  %v8075_v63 = vrot.slane %v8065_v62, %v14216_v41 }
0x1371   :  { %8001 = vmatpush1.bf16.msra.mxu0 %v10065_v10  ;;  %v6430_v10 = vmul.f32 %v6425_v14, %v13221_v54 }
0x1372   :  { %8002 = vmatprep.subr.bf16.mxu0 %v10070_v23  ;;  %v8097_v23 = vrot.slane %v8087_v56, %v14218_v52 }
0x1375   :  { %8003 = vmatpush1.bf16.msra.mxu0 %v10068_v43 }
0x1376   :  { %8015 = vmatprep.subr.bf16.mxu0 %v10073_v1  ;;  %v6431_v1 = vmul.f32 %v6429_v47, %v13221_v54  ;;  %v8102_v54 = vmul.f32 %v8097_v23, %v13319_v32 }
0x1378   :  { %8005 = vmatmul.mubr.bf16.vlgmr.msra.gmra.mrb[56].mxu0 %v6406_v3  ;;  %v10083_v3 = vld [vmem:[%s14165_s17 + $0x740] ss:$8 sps:$4 sm:$0xff]  }
0x1379   :  { %8016 = vmatpush1.bf16.msra.mxu0 %v10071_v17  ;;  %8047 = vmatprep.mubr.bf16.mxu0 %v6409_v19  ;;  %v10088_v19 = vld [vmem:[%s14165_s17 + $0x754] ss:$8 sps:$4 sm:$0xff]   ;;  %v8101_v17 = vrot.slane %v8091_v18, %v14218_v52  ;;  %s10400_s17 = smov [#allocation2]  }
0x137a   :  { %8017 = vmatprep.subr.bf16.mxu0 %v10076_v51  ;;  %s8149_s18 = sshll.u32 %s10400_s17, 4  ;;  %s8150_s18 = int_to_ptr.vmem [resolvable:$true] %s8149_s18 }
0x137b   :  { %s10367_s16 = scalar_lea.vmem %s8150_s18, 512  ;;  %p10372_p1 = scmp.lt.s32.totalorder %s8150_s18, %s8150_s18 }
0x137c   :  { %p10368_p0 = scmp.ne.s32.totalorder %s8150_s18, %s10367_s16  ;;  %p10373_p2 = scmp.lt.s32.totalorder %s10367_s16, %s10367_s16 }
0x137d   :  { %8018 = vmatpush1.bf16.msra.mxu0 %v10074_v8 }
0x137e   :  { %8019 = vmatprep.subr.bf16.mxu0 %v10079_v6  ;;  %v8123_v6 = vrot.slane %v8113_v60, %v14220_v15  ;;  %p10374_p3 = por %p10373_p2, %p10372_p1 }
0x1380   :  { %p10375_p4 = pnand %p10374_p3, %p10368_p0 }
0x1381   :  { %8020 = vmatpush1.bf16.msra.mxu0 %v10077_v12 }
0x1382   :  { %8021 = vmatprep.subr.bf16.mxu0 %v10082_v4  ;;  %v6432_v4 = vmul.f32 %v6425_v14, %v13229_v36 }
0x1385   :  { %8022 = vmatpush1.bf16.msra.mxu0 %v10080_v39 }
0x1386   :  { %8023 = vmatprep.subr.bf16.mxu0 %v10085_v16  ;;  %v8077_v16 = vmul.f32 %v8075_v63, %v13255_v49 }
0x1389   :  { %8024 = vmatpush1.bf16.msra.mxu0 %v10083_v3  ;;  %v8127_v3 = vrot.slane %v8117_v25, %v14220_v15 }
0x138a   :  { %8025 = vmatprep.subr.bf16.mxu0 %v10088_v19 }
0x138d   :  { %8026 = vmatpush1.bf16.msra.mxu0 %v10086_v28  ;;  %v6433_v28 = vmul.f32 %v6429_v47, %v13229_v36 }
0x138e   :  { %8027 = vmatprep.subr.bf16.mxu0 %v10091_v27 }
0x1391   :  { %8028 = vmatpush1.bf16.msra.mxu0 %v10089_v53 }
0x1392   :  { %8029 = vmatprep.subr.bf16.mxu0 %v10094_v31 }
0x1395   :  { %8030 = vmatpush1.bf16.msra.mxu0 %v10092_v30 }
0x1396   :  { %8031 = vmatprep.subr.bf16.mxu0 %v10097_v55 }
0x1399   :  { %8032 = vmatpush1.bf16.msra.mxu0 %v10095_v0  ;;  %v8103_v0 = vmul.f32 %v8101_v17, %v13319_v32 }
0x139a   :  { %8033 = vmatprep.subr.bf16.mxu0 %v10100_v44 }
0x139d   :  { %8034 = vmatpush1.bf16.msra.mxu0 %v10098_v11  ;;  %v8079_v11 = vmul.f32 %v8075_v63, %v13283_v46 }
0x139e   :  { %8035 = vmatprep.subr.bf16.mxu0 %v10103_v40 }
0x13a1   :  { %8036 = vmatpush1.bf16.msra.mxu0 %v10101_v24 }
0x13a2   :  { %8037 = vmatprep.subr.bf16.mxu0 %v10106_v35  ;;  %v8104_v35 = vmul.f32 %v8097_v23, %v13343_v42 }
0x13a5   :  { %8038 = vmatpush1.bf16.msra.mxu0 %v10104_v22  ;;  %v8129_v22 = vmul.f32 %v8127_v3, %v13378_v20 }
0x13a6   :  { %8039 = vmatprep.subr.bf16.mxu0 %v10109_v45 }
0x13a9   :  { %8040 = vmatpush1.bf16.msra.mxu0 %v10107_v50  ;;  %v8105_v50 = vmul.f32 %v8101_v17, %v13343_v42  ;;  %v14225_v42 = vld [vmem:[#allocation10_spill] sm:$0xff] }
0x13aa   :  { %8041 = vmatprep.subr.bf16.mxu0 %v10112_v29 }
0x13ad   :  { %8042 = vmatpush1.bf16.msra.mxu0 %v10110_v34 }
0x13ae   :  { %8043 = vmatprep.subr.bf16.mxu0 %v10115_v58  ;;  %v8130_v58 = vmul.f32 %v8123_v6, %v13400_v9 }
0x13b1   :  { %8044 = vmatpush1.bf16.msra.mxu0 %v10113_v13 }
0x13b2   :  { %8045 = vmatprep.subr.bf16.mxu0 %v10118_v57  ;;  %v14222_v57 = vld [vmem:[#allocation7_spill] sm:$0xff] }
0x13b5   :  { %8046 = vmatpush1.bf16.msra.mxu0 %v10116_v33 }
0x13b8   :  { %8048 = vmatmul.mubr.bf16.vlgmr.msra.gmra.mrb[56].mxu0 %v6408_v48  ;;  %v8071_v48 = vrot.slane %v8061_v38, %v14216_v41 }
0x13ba   :  { %v8076_v8 = vmul.f32 %v8071_v48, %v13255_v49  ;;  %v8078_v31 = vmul.f32 %v8071_v48, %v13283_v46  ;;  %v8128_v49 = vmul.f32 %v8123_v6, %v13378_v20  ;;  %v8131_v46 = vmul.f32 %v8127_v3, %v13400_v9  ;;  %v14224_v20 = vld [vmem:[#allocation9_spill] sm:$0xff] }
0x148b   :  { %v8049_v43 = vpop.f32.mrb[56].mxu0 }
0x148c   :  { %v9291_v51 = vadd.f32 %v8049_v43, %v6430_v10  ;;  %v8051_v12 = vpop.f32.mrb[57].mxu0 }
0x148d   :  { %v9292_v39 = vadd.f32 %v8051_v12, %v6431_v1  ;;  %v8053_v19 = vpop.f32.mrb[58].mxu0 }
0x148e   :  { %v8080_v27 = vadd.f32 %v9291_v51, %v8076_v8  ;;  %v9293_v53 = vadd.f32 %v8053_v19, %v6432_v4  ;;  %v8055_v30 = vpop.f32.mrb[59].mxu0 }
0x148f   :  { %v8081_v55 = vadd.f32 %v9292_v39, %v8077_v16  ;;  %v9294_v44 = vadd.f32 %v8055_v30, %v6433_v28 }
0x1490   :  { %v8106_v40 = vadd.f32 %v8102_v54, %v8080_v27  ;;  %v8082_v24 = vadd.f32 %v9293_v53, %v8078_v31 }
0x1491   :  { %v8107_v36 = vadd.f32 %v8103_v0, %v8081_v55  ;;  %v8083_v45 = vadd.f32 %v9294_v44, %v8079_v11 }
0x1492   :  { %v8132_v29 = vadd.f32 %v8128_v49, %v8106_v40  ;;  %v8108_v34 = vadd.f32 %v8104_v35, %v8082_v24 }
0x1493   :  { %v8133_v32 = vadd.f32 %v8129_v22, %v8107_v36  ;;  %v8109_v13 = vadd.f32 %v8105_v50, %v8083_v45 }
0x1494   :  { %v8136_v33 = vadd.f32 %v8132_v29, %v14222_v57  ;;  %v8134_v2 = vadd.f32 %v8130_v58, %v8108_v34 }
0x1495   :  { %v8137_v26 = vadd.f32 %v8133_v32, %v14223_v7  ;;  %v8135_v37 = vadd.f32 %v8131_v46, %v8109_v13 }
0x1496   :  { %8140 = vst [vmem:[#allocation2] sm:$0xff] %v8136_v33  ;;  %v8138_v5 = vadd.f32 %v8134_v2, %v14224_v20 }
0x1497   :  { %8141 = vst [vmem:[#allocation2 + $0x8] sm:$0xff] %v8137_v26  ;;  %v8139_v41 = vadd.f32 %v8135_v37, %v14225_v42 }
0x1498   :  { %8142 = vst [vmem:[#allocation2 + $0x10] sm:$0xff] %v8138_v5 }
0x1499   :  { %8143 = vst [vmem:[#allocation2 + $0x18] sm:$0xff] %v8139_v41 }
0x149a   :  { %10378 = shalt.err (!%p10375_p4)
}
0x149b   :  { %s10379_s12 = scalar_lea.hbm %s14167_s19, 512 }
0x149c   :  { %p10380_p5 = scmp.ne.s32.totalorder %s14167_s19, %s10379_s12  ;;  %p10383_p6 = scmp.lt.u32.totalorder %s10379_s12, %s14167_s19 }
0x149e   :  { %p10385_p7 = pnand %p10383_p6, %p10380_p5 }
0x14a0   :  { %10388 = shalt.err (!%p10385_p7)
}
0x14a1   :  { %s10401_s2 = smov 256   ;;  %s10402_s8 = smov 16  }
0x14a2   :  { %8155 = dma.vmem_to_hbm [thread:$0]  %s8150_s18, 512, %s14167_s19, [#allocation3], %s10401_s2, %s10401_s2, %s10402_s8  }
0x14a3   :  { %10389 = dma.done.wait [#allocation3], 512  }
0x14a4   :  { %10390 = vsyncadd [#allocation3], 4294966784 }
0x14a5   :  { %8159 = vsyncpa [#allocation3], 1 }

</bundles_post_ra>
